<compile_context>
chip_gen: v6e
topology: v6e:2x2x1
jax: 0.10.0
libtpu: 0.0.40
codegen_flags: <defaults>
</compile_context>

<pallas_src>
import functools

import jax
import jax.numpy as jnp
import numpy as np
from jax.experimental import pallas as pl
from jax.experimental.pallas import tpu as pltpu

# ----------------------------- equal earth projection (glue, plain JAX) -----
_A1, _A2, _A3, _A4 = 1.340264, -0.081106, 0.000893, 0.003796
_SF = 66.50336


def equal_earth_projection(L):
    lat = L[:, 0] * (jnp.pi / 180.0)
    lon = L[:, 1] * (jnp.pi / 180.0)
    theta = jnp.arcsin((jnp.sqrt(3.0) / 2.0) * jnp.sin(lat))
    denom = 3.0 * (9.0 * _A4 * theta ** 8 + 7.0 * _A3 * theta ** 6
                   + 3.0 * _A2 * theta ** 2 + _A1)
    x = (2.0 * jnp.sqrt(3.0) * lon * jnp.cos(theta)) / denom
    y = theta * (_A4 * theta ** 8 + _A3 * theta ** 6 + _A2 * theta ** 2 + _A1)
    return (jnp.stack((x, y), axis=1) * _SF) / 180.0


# ----------------------------- Pallas kernel --------------------------------
def _loc_enc_kernel(x_ref, bt_ref,
                    w1_ref, s1_ref, b1_ref,
                    w2_ref, s2_ref, b2_ref,
                    w3_ref, s3_ref, b3_ref,
                    w4_ref, s4_ref, b4_ref,
                    out_ref, *, num_scales, multi_slab):
    if multi_slab:
        s = pl.program_id(1)                         # scale within this slab
        l = pl.program_id(0) * pl.num_programs(1) + s  # global fourier-scale idx
    else:
        s = pl.program_id(0)
        l = s

    @pl.when(s == 0)
    def _():
        out_ref[...] = jnp.zeros_like(out_ref)

    def compute():
        v = x_ref[...]                        # (N, 2)  projected coords, f32
        bt = bt_ref[...]                      # (2, 256) fourier matrix b.T, f32

        # Gaussian random fourier features: gamma(v) = [cos(2*pi*v@b.T), sin(...)]
        # K=2 contraction done element-wise on the VPU (exact f32, avoids MXU
        # rounding of the large phase arguments before the trig).
        vp = (2.0 * jnp.pi) * (v[:, 0:1] * bt[0:1, :] + v[:, 1:2] * bt[1:2, :])
        cos_e = jnp.cos(vp).astype(jnp.bfloat16)          # (N, 256)
        sin_e = jnp.sin(vp).astype(jnp.bfloat16)          # (N, 256)

        # Weights arrive as int8 with per-output-channel f32 scales.  The
        # int8 -> bf16 cast is exact and sits on the VPU (huge slack, hidden
        # under the weight DMA); the scale commutes with the matmul, so it is
        # applied after the f32 accumulation, right before the bias.
        # Layer 1: split matmul instead of a lane-axis concat [cos, sin];
        # static slices of the weight ref are free.
        h = (jnp.dot(cos_e, w1_ref[0:256, :].astype(jnp.bfloat16),
                     preferred_element_type=jnp.float32)
             + jnp.dot(sin_e, w1_ref[256:512, :].astype(jnp.bfloat16),
                       preferred_element_type=jnp.float32))
        h = jnp.maximum(h * s1_ref[...] + b1_ref[...], 0.0).astype(jnp.bfloat16)

        h = jnp.dot(h, w2_ref[...].astype(jnp.bfloat16),
                    preferred_element_type=jnp.float32)
        h = jnp.maximum(h * s2_ref[...] + b2_ref[...], 0.0).astype(jnp.bfloat16)

        h = jnp.dot(h, w3_ref[...].astype(jnp.bfloat16),
                    preferred_element_type=jnp.float32)
        h = jnp.maximum(h * s3_ref[...] + b3_ref[...], 0.0).astype(jnp.bfloat16)

        y = jnp.dot(h, w4_ref[...].astype(jnp.bfloat16),
                    preferred_element_type=jnp.float32)
        out_ref[...] += y * s4_ref[...] + b4_ref[...]   # partial sum over scales

    if multi_slab:
        # Padded tail step (l >= num_scales): the clamped index_map repeats the
        # previous block (pipeline dedupes the DMA) and compute is skipped.
        pl.when(l < num_scales)(compute)
    else:
        compute()


def _num_partial_slabs():
    """2 partial-sum slabs on dual-TensorCore chips (v7x) so the leading
    'parallel' grid axis shards fourier scales across cores; 1 on single-TC
    v5e/v6e (no padded tail step, no epilogue sum, one fewer XLA dispatch).
    With L=3 the v7x split is 2-vs-1 scales, capping the megacore win at ~1.5x;
    not worth chasing further at this L."""
    try:
        kind = jax.devices()[0].device_kind.lower()
    except Exception:
        return 1
    return 2 if "v7" in kind else 1


def location_encoder_forward(location, params):
    """location: (N, 2) lat/lon in degrees. Returns (N, 512) float32."""
    (bt, w1, s1, b1, w2, s2, b2, w3, s3, b3, w4, s4, b4) = params
    proj = equal_earth_projection(location).astype(jnp.float32)   # (N, 2)
    N = proj.shape[0]
    L = bt.shape[0]

    num_slabs = _num_partial_slabs()
    multi_slab = num_slabs > 1

    if multi_slab:
        NS = pl.cdiv(L, num_slabs)           # scales handled per slab
        grid = (num_slabs, NS)
        # Clamp so the padded tail step re-uses the previous block index
        # (pipeline dedupes the DMA) instead of reading out of bounds.
        idx_scale = lambda c, s: (jnp.minimum(c * NS + s, L - 1), 0, 0)
        idx_x = lambda c, s: (0, 0)
        out_spec = pl.BlockSpec((None, N, 512), lambda c, s: (c, 0, 0))
        out_shape = jax.ShapeDtypeStruct((num_slabs, N, 512), jnp.float32)
        dim_sem = ("parallel", "arbitrary")
    else:
        grid = (L,)
        idx_scale = lambda s: (s, 0, 0)
        idx_x = lambda s: (0, 0)
        out_spec = pl.BlockSpec((N, 512), lambda s: (0, 0))
        out_shape = jax.ShapeDtypeStruct((N, 512), jnp.float32)
        dim_sem = ("arbitrary",)

    def per_scale(block_shape):
        return pl.BlockSpec(block_shape, idx_scale)

    params_per_scale = 512 * 1024 + 1024 * 1024 + 1024 * 1024 + 1024 * 512
    cost = pl.CostEstimate(
        flops=2 * N * params_per_scale * L,
        transcendentals=N * 512 * L,
        bytes_accessed=(params_per_scale * L                        # int8 weights
                        + L * (2 * 256 + 2 * (3 * 1024 + 512)) * 4  # bt + biases + scales (f32)
                        + N * 2 * 4 + num_slabs * N * 512 * 4),     # in / out
    )

    grid_spec = pltpu.PrefetchScalarGridSpec(
        num_scalar_prefetch=0,
        grid=grid,
        in_specs=[
            pl.BlockSpec((N, 2), idx_x),          # projected locations (f32)
            per_scale((None, 2, 256)),            # fourier b.T          (f32)
            per_scale((None, 512, 1024)),         # W1                   (int8)
            per_scale((None, 1, 1024)),           # s1 per-col scale     (f32)
            per_scale((None, 1, 1024)),           # b1                   (f32)
            per_scale((None, 1024, 1024)),        # W2                   (int8)
            per_scale((None, 1, 1024)),           # s2
            per_scale((None, 1, 1024)),           # b2
            per_scale((None, 1024, 1024)),        # W3                   (int8)
            per_scale((None, 1, 1024)),           # s3
            per_scale((None, 1, 1024)),           # b3
            per_scale((None, 1024, 512)),         # W4 head              (int8)
            per_scale((None, 1, 512)),            # s4
            per_scale((None, 1, 512)),            # b4
        ],
        out_specs=out_spec,
    )

    out = pl.pallas_call(
        functools.partial(_loc_enc_kernel, num_scales=L, multi_slab=multi_slab),
        out_shape=out_shape,
        grid_spec=grid_spec,
        compiler_params=pltpu.CompilerParams(
            dimension_semantics=dim_sem,
            vmem_limit_bytes=28 * 1024 * 1024,
        ),
        cost_estimate=cost,
    )(proj, bt, w1, s1, b1, w2, s2, b2, w3, s3, b3, w4, s4, b4)

    return out.sum(axis=0) if multi_slab else out


# ----------------------------- deterministic synthetic params ---------------
def init_params(key, sigmas):
    """Synthetic parameters, stored in the streaming format the kernel consumes:
    per-scale int8 weights + per-output-channel f32 scales + f32 biases."""
    L = len(sigmas)
    ks = jax.random.split(key, 9)
    sig = jnp.asarray(sigmas, jnp.float32)[:, None, None]
    # GaussianEncoding: b ~ N(0, sigma^2), shape (256, 2); we store b.T = (2, 256).
    bt = jax.random.normal(ks[0], (L, 2, 256), jnp.float32) * sig

    def lin_w(k, fin, fout):
        w = jax.random.normal(k, (L, fin, fout), jnp.float32) / jnp.sqrt(float(fin))
        # Symmetric per-output-channel int8 quantization.
        amax = jnp.max(jnp.abs(w), axis=1, keepdims=True)            # (L, 1, fout)
        scale = jnp.maximum(amax, 1e-12) / 127.0
        q = jnp.clip(jnp.round(w / scale), -127.0, 127.0).astype(jnp.int8)
        return q, scale

    def lin_b(k, fout):
        return jax.random.normal(k, (L, 1, fout), jnp.float32) * 0.01

    w1, s1 = lin_w(ks[1], 512, 1024); b1 = lin_b(ks[2], 1024)
    w2, s2 = lin_w(ks[3], 1024, 1024); b2 = lin_b(ks[4], 1024)
    w3, s3 = lin_w(ks[5], 1024, 1024); b3 = lin_b(ks[6], 1024)
    w4, s4 = lin_w(ks[7], 1024, 512); b4 = lin_b(ks[8], 512)
    return (bt, w1, s1, b1, w2, s2, b2, w3, s3, b3, w4, s4, b4)


# ----------------------------- pure-JAX reference ---------------------------
def reference_forward(location, params):
    """f32 reference of the module forward using the same (dequantized) params
    the kernel streams."""
    (bt, w1, s1, b1, w2, s2, b2, w3, s3, b3, w4, s4, b4) = params
    deq = lambda q, s: q.astype(jnp.float32) * s
    w1f, w2f, w3f, w4f = deq(w1, s1), deq(w2, s2), deq(w3, s3), deq(w4, s4)
    proj = equal_earth_projection(location).astype(jnp.float32)
    out = jnp.zeros((proj.shape[0], 512), jnp.float32)
    for l in range(bt.shape[0]):
        vp = (2.0 * jnp.pi) * (proj[:, 0:1] * bt[l, 0:1, :]
                               + proj[:, 1:2] * bt[l, 1:2, :])
        enc = jnp.concatenate([jnp.cos(vp), jnp.sin(vp)], axis=-1)
        h = jax.nn.relu(enc @ w1f[l] + b1[l])
        h = jax.nn.relu(h @ w2f[l] + b2[l])
        h = jax.nn.relu(h @ w3f[l] + b3[l])
        out = out + (h @ w4f[l] + b4[l])
    return out


# ----------------------------- main ------------------------------------------
if __name__ == "__main__":
    key = jax.random.PRNGKey(0)
    k_loc, k_par = jax.random.split(key)

    N = 8                                    # multiple of 8 (f32 sublane)
    sigmas = [2 ** 0, 2 ** 4, 2 ** 8]
    lat = jax.random.uniform(k_loc, (N, 1), jnp.float32, -80.0, 80.0)
    lon = jax.random.uniform(jax.random.fold_in(k_loc, 1), (N, 1), jnp.float32,
                             -170.0, 170.0)
    location = jnp.concatenate([lat, lon], axis=1)          # (N, 2) degrees

    params = init_params(k_par, sigmas)

    out = location_encoder_forward(location, params)
    out = jax.block_until_ready(out)

    ref = jax.block_until_ready(reference_forward(location, params))
    np.testing.assert_allclose(np.asarray(out), np.asarray(ref),
                               rtol=3e-2, atol=3e-2)
    assert out.shape == (N, 512) and out.dtype == jnp.float32

    print("KERNEL_OK")
</pallas_src>

<mosaic_0001>
module attributes {stable_mosaic.version = 11 : i64} {
  func.func @_loc_enc_kernel(%arg0: i32, %arg1: memref<8x2xf32, #tpu.memory_space<vmem>>, %arg2: memref<1x2x256xf32, #tpu.memory_space<vmem>>, %arg3: memref<1x512x1024xi8, #tpu.memory_space<vmem>>, %arg4: memref<1x1x1024xf32, #tpu.memory_space<vmem>>, %arg5: memref<1x1x1024xf32, #tpu.memory_space<vmem>>, %arg6: memref<1x1024x1024xi8, #tpu.memory_space<vmem>>, %arg7: memref<1x1x1024xf32, #tpu.memory_space<vmem>>, %arg8: memref<1x1x1024xf32, #tpu.memory_space<vmem>>, %arg9: memref<1x1024x1024xi8, #tpu.memory_space<vmem>>, %arg10: memref<1x1x1024xf32, #tpu.memory_space<vmem>>, %arg11: memref<1x1x1024xf32, #tpu.memory_space<vmem>>, %arg12: memref<1x1024x512xi8, #tpu.memory_space<vmem>>, %arg13: memref<1x1x512xf32, #tpu.memory_space<vmem>>, %arg14: memref<1x1x512xf32, #tpu.memory_space<vmem>>, %arg15: memref<8x512xf32, #tpu.memory_space<vmem>>) attributes {dimension_semantics = [#tpu.dimension_semantics<arbitrary>], iteration_bounds = array<i64: 3>, scalar_prefetch = 0 : i64, scratch_operands = 0 : i64, tpu.core_type = #tpu.core_type<tc>, window_params = [{pipeline_mode = #tpu.pipeline_mode<synchronous>, transform_indices = @transform_0, window_bounds = array<i64: 8, 2>}, {transform_indices = @transform_1, window_bounds = array<i64: 1, 2, 256>}, {transform_indices = @transform_2, window_bounds = array<i64: 1, 512, 1024>}, {transform_indices = @transform_3, window_bounds = array<i64: 1, 1, 1024>}, {transform_indices = @transform_4, window_bounds = array<i64: 1, 1, 1024>}, {transform_indices = @transform_5, window_bounds = array<i64: 1, 1024, 1024>}, {transform_indices = @transform_6, window_bounds = array<i64: 1, 1, 1024>}, {transform_indices = @transform_7, window_bounds = array<i64: 1, 1, 1024>}, {transform_indices = @transform_8, window_bounds = array<i64: 1, 1024, 1024>}, {transform_indices = @transform_9, window_bounds = array<i64: 1, 1, 1024>}, {transform_indices = @transform_10, window_bounds = array<i64: 1, 1, 1024>}, {transform_indices = @transform_11, window_bounds = array<i64: 1, 1024, 512>}, {transform_indices = @transform_12, window_bounds = array<i64: 1, 1, 512>}, {transform_indices = @transform_13, window_bounds = array<i64: 1, 1, 512>}, {pipeline_mode = #tpu.pipeline_mode<synchronous>, transform_indices = @transform_14, window_bounds = array<i64: 8, 512>}]} {
    %c0_i32 = arith.constant 0 : i32
    %0 = arith.cmpi eq, %arg0, %c0_i32 : i32
    %1 = arith.extui %0 : i1 to i32
    %c0_i32_0 = arith.constant 0 : i32
    %2 = arith.cmpi ne, %1, %c0_i32_0 : i32
    scf.if %2 {
      %cst_55 = arith.constant 0.000000e+00 : f32
      %88 = vector.broadcast %cst_55 : f32 to vector<8x512xf32>
      %c0_56 = arith.constant 0 : index
      %c0_57 = arith.constant 0 : index
      %89 = vector.load %arg15[%c0_56, %c0_57] : memref<8x512xf32, #tpu.memory_space<vmem>>, vector<8x512xf32>
      tpu.vector_store %arg15[%c0_56, %c0_57], %88 {strides = array<i32>} : memref<8x512xf32, #tpu.memory_space<vmem>>, vector<8x512xf32>,
    } else {
    }
    %c0 = arith.constant 0 : index
    %c0_1 = arith.constant 0 : index
    %3 = vector.load %arg1[%c0, %c0_1] : memref<8x2xf32, #tpu.memory_space<vmem>>, vector<8x2xf32>
    %c0_2 = arith.constant 0 : index
    %c0_3 = arith.constant 0 : index
    %c0_4 = arith.constant 0 : index
    %4 = vector.load %arg2[%c0_2, %c0_3, %c0_4] : memref<1x2x256xf32, #tpu.memory_space<vmem>>, vector<1x2x256xf32>
    %5 = vector.shape_cast %4 : vector<1x2x256xf32> to vector<2x256xf32>
    %6 = vector.extract_strided_slice %3 {offsets = [0, 0], sizes = [8, 1], strides = [1, 1]} : vector<8x2xf32> to vector<8x1xf32>
    %7 = vector.extract_strided_slice %5 {offsets = [0, 0], sizes = [1, 256], strides = [1, 1]} : vector<2x256xf32> to vector<1x256xf32>
    %8 = vector.broadcast %6 : vector<8x1xf32> to vector<8x256xf32>
    %9 = vector.broadcast %7 : vector<1x256xf32> to vector<8x256xf32>
    %10 = arith.mulf %8, %9 : vector<8x256xf32>
    %11 = vector.extract_strided_slice %3 {offsets = [0, 1], sizes = [8, 1], strides = [1, 1]} : vector<8x2xf32> to vector<8x1xf32>
    %12 = vector.extract_strided_slice %5 {offsets = [1, 0], sizes = [1, 256], strides = [1, 1]} : vector<2x256xf32> to vector<1x256xf32>
    %13 = vector.broadcast %11 : vector<8x1xf32> to vector<8x256xf32>
    %14 = vector.broadcast %12 : vector<1x256xf32> to vector<8x256xf32>
    %15 = arith.mulf %13, %14 : vector<8x256xf32>
    %16 = arith.addf %10, %15 : vector<8x256xf32>
    %cst = arith.constant 6.28318548 : f32
    %17 = vector.broadcast %cst : f32 to vector<8x256xf32>
    %18 = arith.mulf %17, %16 : vector<8x256xf32>
    %19 = math.cos %18 : vector<8x256xf32>
    %20 = arith.truncf %19 : vector<8x256xf32> to vector<8x256xbf16>
    %21 = math.sin %18 : vector<8x256xf32>
    %22 = arith.truncf %21 : vector<8x256xf32> to vector<8x256xbf16>
    %c0_5 = arith.constant 0 : index
    %c0_6 = arith.constant 0 : index
    %c0_7 = arith.constant 0 : index
    %23 = vector.load %arg3[%c0_5, %c0_6, %c0_7] : memref<1x512x1024xi8, #tpu.memory_space<vmem>>, vector<1x256x1024xi8>
    %24 = vector.shape_cast %23 : vector<1x256x1024xi8> to vector<256x1024xi8>
    %25 = arith.sitofp %24 : vector<256x1024xi8> to vector<256x1024xbf16>
    %cst_8 = arith.constant dense<0.000000e+00> : vector<8x1024xf32>
    %26 = tpu.matmul %20, %25, %cst_8 {dimension_numbers = #tpu.dot_dimension_numbers<[1], [0], [0], [1], [0, 0, 1, 1], [], []>} : vector<8x256xbf16>, vector<256x1024xbf16>, vector<8x1024xf32> -> vector<8x1024xf32>
    %c0_9 = arith.constant 0 : index
    %c256 = arith.constant 256 : index
    %c0_10 = arith.constant 0 : index
    %27 = vector.load %arg3[%c0_9, %c256, %c0_10] : memref<1x512x1024xi8, #tpu.memory_space<vmem>>, vector<1x256x1024xi8>
    %28 = vector.shape_cast %27 : vector<1x256x1024xi8> to vector<256x1024xi8>
    %29 = arith.sitofp %28 : vector<256x1024xi8> to vector<256x1024xbf16>
    %cst_11 = arith.constant dense<0.000000e+00> : vector<8x1024xf32>
    %30 = tpu.matmul %22, %29, %cst_11 {dimension_numbers = #tpu.dot_dimension_numbers<[1], [0], [0], [1], [0, 0, 1, 1], [], []>} : vector<8x256xbf16>, vector<256x1024xbf16>, vector<8x1024xf32> -> vector<8x1024xf32>
    %31 = arith.addf %26, %30 : vector<8x1024xf32>
    %c0_12 = arith.constant 0 : index
    %c0_13 = arith.constant 0 : index
    %c0_14 = arith.constant 0 : index
    %32 = vector.load %arg4[%c0_12, %c0_13, %c0_14] : memref<1x1x1024xf32, #tpu.memory_space<vmem>>, vector<1x1x1024xf32>
    %33 = vector.shape_cast %32 : vector<1x1x1024xf32> to vector<1x1024xf32>
    %34 = vector.broadcast %33 : vector<1x1024xf32> to vector<8x1024xf32>
    %35 = arith.mulf %31, %34 : vector<8x1024xf32>
    %c0_15 = arith.constant 0 : index
    %c0_16 = arith.constant 0 : index
    %c0_17 = arith.constant 0 : index
    %36 = vector.load %arg5[%c0_15, %c0_16, %c0_17] : memref<1x1x1024xf32, #tpu.memory_space<vmem>>, vector<1x1x1024xf32>
    %37 = vector.shape_cast %36 : vector<1x1x1024xf32> to vector<1x1024xf32>
    %38 = vector.broadcast %37 : vector<1x1024xf32> to vector<8x1024xf32>
    %39 = arith.addf %35, %38 : vector<8x1024xf32>
    %cst_18 = arith.constant 0.000000e+00 : f32
    %40 = vector.broadcast %cst_18 : f32 to vector<8x1024xf32>
    %41 = arith.maximumf %39, %40 : vector<8x1024xf32>
    %42 = arith.truncf %41 : vector<8x1024xf32> to vector<8x1024xbf16>
    %c0_19 = arith.constant 0 : index
    %c0_20 = arith.constant 0 : index
    %c0_21 = arith.constant 0 : index
    %43 = vector.load %arg6[%c0_19, %c0_20, %c0_21] : memref<1x1024x1024xi8, #tpu.memory_space<vmem>>, vector<1x1024x1024xi8>
    %44 = vector.shape_cast %43 : vector<1x1024x1024xi8> to vector<1024x1024xi8>
    %45 = arith.sitofp %44 : vector<1024x1024xi8> to vector<1024x1024xbf16>
    %cst_22 = arith.constant dense<0.000000e+00> : vector<8x1024xf32>
    %46 = tpu.matmul %42, %45, %cst_22 {dimension_numbers = #tpu.dot_dimension_numbers<[1], [0], [0], [1], [0, 0, 1, 1], [], []>} : vector<8x1024xbf16>, vector<1024x1024xbf16>, vector<8x1024xf32> -> vector<8x1024xf32>
    %c0_23 = arith.constant 0 : index
    %c0_24 = arith.constant 0 : index
    %c0_25 = arith.constant 0 : index
    %47 = vector.load %arg7[%c0_23, %c0_24, %c0_25] : memref<1x1x1024xf32, #tpu.memory_space<vmem>>, vector<1x1x1024xf32>
    %48 = vector.shape_cast %47 : vector<1x1x1024xf32> to vector<1x1024xf32>
    %49 = vector.broadcast %48 : vector<1x1024xf32> to vector<8x1024xf32>
    %50 = arith.mulf %46, %49 : vector<8x1024xf32>
    %c0_26 = arith.constant 0 : index
    %c0_27 = arith.constant 0 : index
    %c0_28 = arith.constant 0 : index
    %51 = vector.load %arg8[%c0_26, %c0_27, %c0_28] : memref<1x1x1024xf32, #tpu.memory_space<vmem>>, vector<1x1x1024xf32>
    %52 = vector.shape_cast %51 : vector<1x1x1024xf32> to vector<1x1024xf32>
    %53 = vector.broadcast %52 : vector<1x1024xf32> to vector<8x1024xf32>
    %54 = arith.addf %50, %53 : vector<8x1024xf32>
    %cst_29 = arith.constant 0.000000e+00 : f32
    %55 = vector.broadcast %cst_29 : f32 to vector<8x1024xf32>
    %56 = arith.maximumf %54, %55 : vector<8x1024xf32>
    %57 = arith.truncf %56 : vector<8x1024xf32> to vector<8x1024xbf16>
    %c0_30 = arith.constant 0 : index
    %c0_31 = arith.constant 0 : index
    %c0_32 = arith.constant 0 : index
    %58 = vector.load %arg9[%c0_30, %c0_31, %c0_32] : memref<1x1024x1024xi8, #tpu.memory_space<vmem>>, vector<1x1024x1024xi8>
    %59 = vector.shape_cast %58 : vector<1x1024x1024xi8> to vector<1024x1024xi8>
    %60 = arith.sitofp %59 : vector<1024x1024xi8> to vector<1024x1024xbf16>
    %cst_33 = arith.constant dense<0.000000e+00> : vector<8x1024xf32>
    %61 = tpu.matmul %57, %60, %cst_33 {dimension_numbers = #tpu.dot_dimension_numbers<[1], [0], [0], [1], [0, 0, 1, 1], [], []>} : vector<8x1024xbf16>, vector<1024x1024xbf16>, vector<8x1024xf32> -> vector<8x1024xf32>
    %c0_34 = arith.constant 0 : index
    %c0_35 = arith.constant 0 : index
    %c0_36 = arith.constant 0 : index
    %62 = vector.load %arg10[%c0_34, %c0_35, %c0_36] : memref<1x1x1024xf32, #tpu.memory_space<vmem>>, vector<1x1x1024xf32>
    %63 = vector.shape_cast %62 : vector<1x1x1024xf32> to vector<1x1024xf32>
    %64 = vector.broadcast %63 : vector<1x1024xf32> to vector<8x1024xf32>
    %65 = arith.mulf %61, %64 : vector<8x1024xf32>
    %c0_37 = arith.constant 0 : index
    %c0_38 = arith.constant 0 : index
    %c0_39 = arith.constant 0 : index
    %66 = vector.load %arg11[%c0_37, %c0_38, %c0_39] : memref<1x1x1024xf32, #tpu.memory_space<vmem>>, vector<1x1x1024xf32>
    %67 = vector.shape_cast %66 : vector<1x1x1024xf32> to vector<1x1024xf32>
    %68 = vector.broadcast %67 : vector<1x1024xf32> to vector<8x1024xf32>
    %69 = arith.addf %65, %68 : vector<8x1024xf32>
    %cst_40 = arith.constant 0.000000e+00 : f32
    %70 = vector.broadcast %cst_40 : f32 to vector<8x1024xf32>
    %71 = arith.maximumf %69, %70 : vector<8x1024xf32>
    %72 = arith.truncf %71 : vector<8x1024xf32> to vector<8x1024xbf16>
    %c0_41 = arith.constant 0 : index
    %c0_42 = arith.constant 0 : index
    %c0_43 = arith.constant 0 : index
    %73 = vector.load %arg12[%c0_41, %c0_42, %c0_43] : memref<1x1024x512xi8, #tpu.memory_space<vmem>>, vector<1x1024x512xi8>
    %74 = vector.shape_cast %73 : vector<1x1024x512xi8> to vector<1024x512xi8>
    %75 = arith.sitofp %74 : vector<1024x512xi8> to vector<1024x512xbf16>
    %cst_44 = arith.constant dense<0.000000e+00> : vector<8x512xf32>
    %76 = tpu.matmul %72, %75, %cst_44 {dimension_numbers = #tpu.dot_dimension_numbers<[1], [0], [0], [1], [0, 0, 1, 1], [], []>} : vector<8x1024xbf16>, vector<1024x512xbf16>, vector<8x512xf32> -> vector<8x512xf32>
    %c0_45 = arith.constant 0 : index
    %c0_46 = arith.constant 0 : index
    %77 = vector.load %arg15[%c0_45, %c0_46] : memref<8x512xf32, #tpu.memory_space<vmem>>, vector<8x512xf32>
    %c0_47 = arith.constant 0 : index
    %c0_48 = arith.constant 0 : index
    %c0_49 = arith.constant 0 : index
    %78 = vector.load %arg13[%c0_47, %c0_48, %c0_49] : memref<1x1x512xf32, #tpu.memory_space<vmem>>, vector<1x1x512xf32>
    %79 = vector.shape_cast %78 : vector<1x1x512xf32> to vector<1x512xf32>
    %80 = vector.broadcast %79 : vector<1x512xf32> to vector<8x512xf32>
    %81 = arith.mulf %76, %80 : vector<8x512xf32>
    %c0_50 = arith.constant 0 : index
    %c0_51 = arith.constant 0 : index
    %c0_52 = arith.constant 0 : index
    %82 = vector.load %arg14[%c0_50, %c0_51, %c0_52] : memref<1x1x512xf32, #tpu.memory_space<vmem>>, vector<1x1x512xf32>
    %83 = vector.shape_cast %82 : vector<1x1x512xf32> to vector<1x512xf32>
    %84 = vector.broadcast %83 : vector<1x512xf32> to vector<8x512xf32>
    %85 = arith.addf %81, %84 : vector<8x512xf32>
    %86 = arith.addf %77, %85 : vector<8x512xf32>
    %c0_53 = arith.constant 0 : index
    %c0_54 = arith.constant 0 : index
    %87 = vector.load %arg15[%c0_53, %c0_54] : memref<8x512xf32, #tpu.memory_space<vmem>>, vector<8x512xf32>
    tpu.vector_store %arg15[%c0_53, %c0_54], %86 {strides = array<i32>} : memref<8x512xf32, #tpu.memory_space<vmem>>, vector<8x512xf32>,
    return
  }
  func.func @transform_0(%arg0: i32) -> (i32, i32) {
    %c0_i32 = arith.constant 0 : i32
    %c0_i32_0 = arith.constant 0 : i32
    %c0_i32_1 = arith.constant 0 : i32
    return %c0_i32, %c0_i32_0 : i32, i32
  }
  func.func @transform_1(%arg0: i32) -> (i32, i32, i32) {
    %c0_i32 = arith.constant 0 : i32
    %c0_i32_0 = arith.constant 0 : i32
    %c0_i32_1 = arith.constant 0 : i32
    return %arg0, %c0_i32, %c0_i32_0 : i32, i32, i32
  }
  func.func @transform_2(%arg0: i32) -> (i32, i32, i32) {
    %c0_i32 = arith.constant 0 : i32
    %c0_i32_0 = arith.constant 0 : i32
    %c0_i32_1 = arith.constant 0 : i32
    return %arg0, %c0_i32, %c0_i32_0 : i32, i32, i32
  }
  func.func @transform_3(%arg0: i32) -> (i32, i32, i32) {
    %c0_i32 = arith.constant 0 : i32
    %c0_i32_0 = arith.constant 0 : i32
    %c0_i32_1 = arith.constant 0 : i32
    return %arg0, %c0_i32, %c0_i32_0 : i32, i32, i32
  }
  func.func @transform_4(%arg0: i32) -> (i32, i32, i32) {
    %c0_i32 = arith.constant 0 : i32
    %c0_i32_0 = arith.constant 0 : i32
    %c0_i32_1 = arith.constant 0 : i32
    return %arg0, %c0_i32, %c0_i32_0 : i32, i32, i32
  }
  func.func @transform_5(%arg0: i32) -> (i32, i32, i32) {
    %c0_i32 = arith.constant 0 : i32
    %c0_i32_0 = arith.constant 0 : i32
    %c0_i32_1 = arith.constant 0 : i32
    return %arg0, %c0_i32, %c0_i32_0 : i32, i32, i32
  }
  func.func @transform_6(%arg0: i32) -> (i32, i32, i32) {
    %c0_i32 = arith.constant 0 : i32
    %c0_i32_0 = arith.constant 0 : i32
    %c0_i32_1 = arith.constant 0 : i32
    return %arg0, %c0_i32, %c0_i32_0 : i32, i32, i32
  }
  func.func @transform_7(%arg0: i32) -> (i32, i32, i32) {
    %c0_i32 = arith.constant 0 : i32
    %c0_i32_0 = arith.constant 0 : i32
    %c0_i32_1 = arith.constant 0 : i32
    return %arg0, %c0_i32, %c0_i32_0 : i32, i32, i32
  }
  func.func @transform_8(%arg0: i32) -> (i32, i32, i32) {
    %c0_i32 = arith.constant 0 : i32
    %c0_i32_0 = arith.constant 0 : i32
    %c0_i32_1 = arith.constant 0 : i32
    return %arg0, %c0_i32, %c0_i32_0 : i32, i32, i32
  }
  func.func @transform_9(%arg0: i32) -> (i32, i32, i32) {
    %c0_i32 = arith.constant 0 : i32
    %c0_i32_0 = arith.constant 0 : i32
    %c0_i32_1 = arith.constant 0 : i32
    return %arg0, %c0_i32, %c0_i32_0 : i32, i32, i32
  }
  func.func @transform_10(%arg0: i32) -> (i32, i32, i32) {
    %c0_i32 = arith.constant 0 : i32
    %c0_i32_0 = arith.constant 0 : i32
    %c0_i32_1 = arith.constant 0 : i32
    return %arg0, %c0_i32, %c0_i32_0 : i32, i32, i32
  }
  func.func @transform_11(%arg0: i32) -> (i32, i32, i32) {
    %c0_i32 = arith.constant 0 : i32
    %c0_i32_0 = arith.constant 0 : i32
    %c0_i32_1 = arith.constant 0 : i32
    return %arg0, %c0_i32, %c0_i32_0 : i32, i32, i32
  }
  func.func @transform_12(%arg0: i32) -> (i32, i32, i32) {
    %c0_i32 = arith.constant 0 : i32
    %c0_i32_0 = arith.constant 0 : i32
    %c0_i32_1 = arith.constant 0 : i32
    return %arg0, %c0_i32, %c0_i32_0 : i32, i32, i32
  }
  func.func @transform_13(%arg0: i32) -> (i32, i32, i32) {
    %c0_i32 = arith.constant 0 : i32
    %c0_i32_0 = arith.constant 0 : i32
    %c0_i32_1 = arith.constant 0 : i32
    return %arg0, %c0_i32, %c0_i32_0 : i32, i32, i32
  }
  func.func @transform_14(%arg0: i32) -> (i32, i32) {
    %c0_i32 = arith.constant 0 : i32
    %c0_i32_0 = arith.constant 0 : i32
    %c0_i32_1 = arith.constant 0 : i32
    return %c0_i32, %c0_i32_0 : i32, i32
  }
}

</mosaic_0001>

<bundles_post_ra>
// kernel: tpu_custom_call.1
= control target key start
LH: loop header
LB: loop body
LE: loop exit
PB: predicated region body
PF: predicated region fallthrough
CT: control target
= control target key end

     0   :  { %s9002_s0 = inlined_call_operand.vmem [shape: f32[8,2], index: 0, kind: input, shape index: {}]   ;;  %s9003_s1 = inlined_call_operand.hbm [shape: f32[3,2,256], index: 1, kind: input, shape index: {}]   ;;  %s9004_s2 = inlined_call_operand.hbm [shape: s8[3,512,1024], index: 2, kind: input, shape index: {}]   ;;  %s9005_s3 = inlined_call_operand.hbm [shape: f32[3,1,1024], index: 3, kind: input, shape index: {}]   ;;  %s9006_s4 = inlined_call_operand.hbm [shape: f32[3,1,1024], index: 4, kind: input, shape index: {}]   ;;  %s9007_s5 = inlined_call_operand.hbm [shape: s8[3,1024,1024], index: 5, kind: input, shape index: {}]   ;;  %s9008_s6 = inlined_call_operand.hbm [shape: f32[3,1,1024], index: 6, kind: input, shape index: {}]   ;;  %s9009_s7 = inlined_call_operand.hbm [shape: f32[3,1,1024], index: 7, kind: input, shape index: {}]   ;;  %s9010_s8 = inlined_call_operand.hbm [shape: s8[3,1024,1024], index: 8, kind: input, shape index: {}]   ;;  %s9011_s9 = inlined_call_operand.hbm [shape: f32[3,1,1024], index: 9, kind: input, shape index: {}]   ;;  %s9012_s10 = inlined_call_operand.hbm [shape: f32[3,1,1024], index: 10, kind: input, shape index: {}]   ;;  %s9013_s11 = inlined_call_operand.hbm [shape: s8[3,1024,512], index: 11, kind: input, shape index: {}]   ;;  %s9014_s12 = inlined_call_operand.hbm [shape: f32[3,1,512], index: 12, kind: input, shape index: {}]   ;;  %s9015_s13 = inlined_call_operand.hbm [shape: f32[3,1,512], index: 13, kind: input, shape index: {}]   ;;  %s9016_s14 = inlined_call_operand.hbm [shape: f32[8,512], index: 14, kind: output, shape index: {}]  }
   0x1   :  { %9037 = sst [smem:[#allocation39_spill]] %s9002_s0 }
   0x2   :  { %9038 = sst [smem:[#allocation40_spill]] %s9004_s2 }
   0x3   :  { %9039 = sst [smem:[#allocation41_spill]] %s9006_s4 }
   0x4   :  { %9040 = sst [smem:[#allocation42_spill]] %s9008_s6 }
   0x5   :  { %9041 = sst [smem:[#allocation43_spill]] %s9010_s8 }
   0x6   :  { %9042 = sst [smem:[#allocation44_spill]] %s9012_s10 }
   0x7   :  { %9043 = sst [smem:[#allocation45_spill]] %s9013_s11 }
   0x8   :  { %9044 = sst [smem:[#allocation46_spill]] %s9015_s13 }
   0x9   :  { %9045 = sst [smem:[#allocation47_spill]] %s9016_s14 }
   0xa   :  { %19 = vsyncpa [#allocation3], 0 }
   0xb   :  { %21 = vsyncpa [#allocation3 + $0x1], 0 }
   0xc   :  { %22 = vsyncpa [#allocation6], 0 }
   0xd   :  { %24 = vsyncpa [#allocation6 + $0x1], 0 }
   0xe   :  { %25 = vsyncpa [#allocation9], 0 }
   0xf   :  { %27 = vsyncpa [#allocation9 + $0x1], 0 }
  0x10   :  { %28 = vsyncpa [#allocation12], 0 }
  0x11   :  { %30 = vsyncpa [#allocation12 + $0x1], 0 }
  0x12   :  { %31 = vsyncpa [#allocation15], 0 }
  0x13   :  { %33 = vsyncpa [#allocation15 + $0x1], 0 }
  0x14   :  { %34 = vsyncpa [#allocation18], 0 }
  0x15   :  { %36 = vsyncpa [#allocation18 + $0x1], 0 }
  0x16   :  { %37 = vsyncpa [#allocation21], 0 }
  0x17   :  { %39 = vsyncpa [#allocation21 + $0x1], 0 }
  0x18   :  { %40 = vsyncpa [#allocation4], 0  ;;  %s7117_s29 = smov 0   ;;  %s7119_s30 = smov 0  }
  0x19   :  { %s7121_s15 = smov 0   ;;  %s7123_s16 = smov 0  }
  0x1a LB: > { %9046 = sst [smem:[#allocation32_spill]] %s7005_s30  ;;  %s7136_s17 = sadd.s32 4294967295, %s7013_s16   ;;  %s7013_s16 = sphi %s7123_s16, %s9090_s16   ;;  %s7009_s15 = sphi %s7121_s15, %s9093_s15   ;;  %s7005_s30 = sphi %s7119_s30, %s9092_s30   ;;  %s7001_s29 = sphi %s7117_s29, %s9091_s29  }
  0x1b   : > { %9047 = sst [smem:[#allocation33_spill]] %s7009_s15  ;;  %s7139_s18 = sadd.s32 1, %s7013_s16  }
  0x1c   : > { %9048 = sst [smem:[#allocation34_spill]] %s7136_s17  ;;  %s71_s19 = ssub.s32 %s7013_s16, %s7139_s18 }
  0x1d   : > { %9049 = sst [smem:[#allocation35_spill]] %s7139_s18  ;;  %s74_s20 = sadd.s32 1, %s7009_s15 }
  0x1e   : > { %p72_p0 = scmp.eq.s32.totalorder %s71_s19, 0  ;;  %p81_p1 = scmp.ne.s32.totalorder %s7009_s15, %s7005_s30 }
  0x1f   : > { %p82_p2 = scmp.eq.s32.totalorder %s7013_s16, 0  ;;  %p87_p3 = scmp.ne.s32.totalorder %s7005_s30, %s7001_s29 }
  0x20   : > { %s7149_s21 = scalar_select %p72_p0, %s7009_s15, %s74_s20  }
  0x21   : > { %p7151_p4 = por %p82_p2, %p81_p1  ;;  %p88_p5 = scmp.eq.s32.totalorder %s7136_s17, 0 }
  0x22   : > { %9050 = sst [smem:[#allocation36_spill]] %s7149_s21  ;;  %p6401_p7 = scmp.ge.s32.totalorder %s7013_s16, 3 }
  0x23   : > { %p7156_p6 = por %p88_p5, %p87_p3 }
  0x24   : > { %443 = sbr.rel (%p6401_p7) target bundleno = 380 (0x17c), region = 20 }
  0x25   : > { %s9052_s23 = scalar_select %p7156_p6, 1, 0 }
  0x27   : > { %9053 = sst [smem:[#allocation37_spill]] %s9052_s23 }
  0x29   : > { %s7162_s24 = sand.u32 1, %s7009_s15   ;;  %s7165_s25 = sand.u32 1, %s7013_s16  }
  0x2a   : > { %s9021_s26 = sshll.u32 %s7162_s24, 10  ;;  %s9020_s27 = sshll.u32 %s7013_s16, 14 }
  0x2b   : > { %s9054_s2 = sld [smem:[#allocation40_spill]]  ;;  %s470_s20 = scalar_lea.vmem [#allocation5], %s9021_s26 }
  0x2c   : > { %s477_s21 = sshll.u32 %s470_s20, 4  ;;  %s9029_s15 = scalar_lea.sflag [#allocation6], %s7165_s25  ;;  %s7178_s21 = int_to_ptr.vmem [resolvable:$true] %s477_s21 }
  0x31   : > { %s7174_s19 = scalar_lea.hbm %s9054_s2, %s9020_s27  ;;  %s6593_s28 = scalar_lea.hbm %s9054_s2, 49152 }
  0x32   : > { %s6589_s18 = scalar_lea.hbm %s7174_s19, 16384  ;;  %p6594_p11 = scmp.lt.s32.totalorder %s7174_s19, %s9054_s2 }
  0x33   : > { %p6590_p8 = scmp.ne.s32.totalorder %s7174_s19, %s6589_s18  ;;  %p6595_p12 = scmp.lt.s32.totalorder %s6593_s28, %s6589_s18 }
  0x35   : > { %p6591_p9 = pnand %p6590_p8, %p7151_p4  ;;  %p6596_p13 = por %p6595_p12, %p6594_p11 }
  0x37   : > { %p6592_p10 = pneg %p6591_p9 }
  0x39   : > { %p6597_p0 = pnand %p6596_p13, %p6592_p10 }
  0x3b   : > { %6600 = shalt.err (!%p6597_p0)
}
  0x3c   : > { %s6601_s20 = scalar_lea.vmem %s7178_s21, 16384  ;;  %s7015_s26 = smov [#allocation5]  }
  0x3d   : > { %p6602_p1 = scmp.ne.s32.totalorder %s7178_s21, %s6601_s20  ;;  %s6605_s0 = sshll.u32 %s7015_s26, 4  ;;  %s6606_s0 = int_to_ptr.vmem [resolvable:$false] %s6605_s0 }
  0x3e   : > { %s6607_s14 = scalar_lea.vmem %s6606_s0, 32768  ;;  %p6608_p5 = scmp.lt.s32.totalorder %s7178_s21, %s6606_s0 }
  0x3f   : > { %p6603_p2 = pnand %p6602_p1, %p7151_p4  ;;  %p6609_p7 = scmp.lt.s32.totalorder %s6607_s14, %s6601_s20 }
  0x41   : > { %p6604_p3 = pneg %p6603_p2  ;;  %p6610_p8 = por %p6609_p7, %p6608_p5 }
  0x43   : > { %p6611_p9 = pnand %p6610_p8, %p6604_p3 }
  0x45   : > { %6614 = shalt.err (!%p6611_p9)
}
  0x46   : > { %s9030_s18 = smov 1024   ;;  %s9032_s27 = smov 64  }
  0x47   : > { %6498 = dma.hbm_to_vmem [thread:$0]  (%p7151_p4), %s7174_s19, 16384, %s7178_s21, %s9029_s15, %s9030_s18, %s9030_s18, %s9032_s27  }
  0x48   : > { %s9055_s26 = sshll.u32 %s7013_s16, 14  ;;  %s9056_s11 = sld [smem:[#allocation45_spill]] }
  0x49   : > { %s9058_s0 = sshll.u32 %s7162_s24, 10  ;;  %s7219_s17 = sshll.u32 %s7162_s24, 3 }
  0x4a   : > { %s7215_s14 = scalar_lea.vmem [#allocation19], %s9058_s0  ;;  %s7222_s23 = sshll.u32 %s7013_s16, 7 }
  0x4b   : > { %s9059_s4 = sld [smem:[#allocation41_spill]]  ;;  %s510_s19 = scalar_lea.vmem [#allocation8], %s7219_s17 }
  0x4e   : > { %s7211_s20 = scalar_lea.hbm %s9056_s11, %s9055_s26  ;;  %s518_s26 = sshll.u32 %s510_s19, 4  ;;  %s519_s26 = int_to_ptr.vmem [resolvable:$true] %s518_s26 }
  0x4f   : > { %9057 = sst [smem:[#allocation38_spill]] %s7211_s20 }
  0x51   : > { %s7228_s21 = scalar_lea.hbm %s9059_s4, %s7222_s23  ;;  %s6619_s15 = scalar_lea.hbm %s9059_s4, 384 }
  0x52   : > { %s6615_s29 = scalar_lea.hbm %s7228_s21, 128  ;;  %p6620_p13 = scmp.lt.s32.totalorder %s7228_s21, %s9059_s4 }
  0x53   : > { %p6616_p10 = scmp.ne.s32.totalorder %s7228_s21, %s6615_s29  ;;  %p6621_p0 = scmp.lt.s32.totalorder %s6619_s15, %s6615_s29 }
  0x55   : > { %p6617_p11 = pnand %p6616_p10, %p7151_p4  ;;  %p6622_p1 = por %p6621_p0, %p6620_p13 }
  0x57   : > { %p6618_p12 = pneg %p6617_p11 }
  0x59   : > { %p6623_p2 = pnand %p6622_p1, %p6618_p12 }
  0x5b   : > { %6626 = shalt.err (!%p6623_p2)
}
  0x5c   : > { %s6627_s30 = scalar_lea.vmem %s519_s26, 128  ;;  %s7018_s19 = smov [#allocation8]  }
  0x5d   : > { %p6628_p3 = scmp.ne.s32.totalorder %s519_s26, %s6627_s30  ;;  %s6631_s27 = sshll.u32 %s7018_s19, 4  ;;  %s6632_s27 = int_to_ptr.vmem [resolvable:$false] %s6631_s27 }
  0x5e   : > { %s6633_s28 = scalar_lea.vmem %s6632_s27, 256  ;;  %p6634_p8 = scmp.lt.s32.totalorder %s519_s26, %s6632_s27 }
  0x5f   : > { %p6629_p5 = pnand %p6628_p3, %p7151_p4  ;;  %p6635_p9 = scmp.lt.s32.totalorder %s6633_s28, %s6627_s30 }
  0x61   : > { %p6630_p7 = pneg %p6629_p5  ;;  %p6636_p10 = por %p6635_p9, %p6634_p8 }
  0x63   : > { %p6637_p11 = pnand %p6636_p10, %p6630_p7 }
  0x65   : > { %6640 = shalt.err (!%p6637_p11)
}
  0x66   : > { %s9060_s2 = scalar_lea.sflag [#allocation9], %s7165_s25  ;;  %s9061_s6 = sld [smem:[#allocation42_spill]] }
  0x67   : > { %6500 = dma.hbm_to_vmem [thread:$0]  (%p7151_p4), %s7228_s21, 128, %s519_s26, %s9060_s2  }
  0x68   : > { %s550_s27 = scalar_lea.vmem [#allocation11], %s7219_s17 }
  0x69   : > { %s558_s28 = sshll.u32 %s550_s27, 4  ;;  %s559_s28 = int_to_ptr.vmem [resolvable:$true] %s558_s28 }
  0x6c   : > { %s7254_s29 = scalar_lea.hbm %s9061_s6, %s7222_s23  ;;  %s6645_s26 = scalar_lea.hbm %s9061_s6, 384 }
  0x6d   : > { %s6641_s30 = scalar_lea.hbm %s7254_s29, 128  ;;  %p6646_p1 = scmp.lt.s32.totalorder %s7254_s29, %s9061_s6 }
  0x6e   : > { %p6642_p12 = scmp.ne.s32.totalorder %s7254_s29, %s6641_s30  ;;  %p6647_p2 = scmp.lt.s32.totalorder %s6645_s26, %s6641_s30 }
  0x70   : > { %p6643_p13 = pnand %p6642_p12, %p7151_p4  ;;  %p6648_p3 = por %p6647_p2, %p6646_p1 }
  0x72   : > { %p6644_p0 = pneg %p6643_p13 }
  0x74   : > { %p6649_p5 = pnand %p6648_p3, %p6644_p0 }
  0x76   : > { %6652 = shalt.err (!%p6649_p5)
}
  0x77   : > { %s6653_s18 = scalar_lea.vmem %s559_s28, 128  ;;  %s7019_s27 = smov [#allocation11]  }
  0x78   : > { %p6654_p7 = scmp.ne.s32.totalorder %s559_s28, %s6653_s18  ;;  %s6657_s0 = sshll.u32 %s7019_s27, 4  ;;  %s6658_s0 = int_to_ptr.vmem [resolvable:$false] %s6657_s0 }
  0x79   : > { %s6659_s13 = scalar_lea.vmem %s6658_s0, 256  ;;  %p6660_p10 = scmp.lt.s32.totalorder %s559_s28, %s6658_s0 }
  0x7a   : > { %p6655_p8 = pnand %p6654_p7, %p7151_p4  ;;  %p6661_p11 = scmp.lt.s32.totalorder %s6659_s13, %s6653_s18 }
  0x7c   : > { %p6656_p9 = pneg %p6655_p8  ;;  %p6662_p12 = por %p6661_p11, %p6660_p10 }
  0x7e   : > { %p6663_p13 = pnand %p6662_p12, %p6656_p9 }
  0x80   : > { %6666 = shalt.err (!%p6663_p13)
}
  0x81   : > { %s9062_s30 = scalar_lea.sflag [#allocation12], %s7165_s25  ;;  %s6480_s19 = sshll.u32 %s7013_s16, 15 }
  0x82   : > { %6502 = dma.hbm_to_vmem [thread:$0]  (%p7151_p4), %s7254_s29, 128, %s559_s28, %s9062_s30  }
  0x83   : > { %s9063_s21 = sshll.u32 %s7162_s24, 11  ;;  %s7286_s15 = scalar_lea.hbm %s9007_s5, %s6480_s19 }
  0x84   : > { %s7280_s26 = scalar_lea.vmem [#allocation10], %s9063_s21  ;;  %s9064_s8 = sld [smem:[#allocation43_spill]] }
  0x85   : > { %s9065_s6 = smov %s9063_s21  ;;  %s9034_s30 = scalar_lea.sflag [#allocation15], %s7165_s25 }
  0x86   : > { %s588_s29 = scalar_lea.vmem [#allocation14], %s9065_s6 }
  0x87   : > { %s595_s28 = sshll.u32 %s588_s29, 4  ;;  %s7295_s28 = int_to_ptr.vmem [resolvable:$true] %s595_s28 }
  0x8a   : > { %s7291_s4 = scalar_lea.hbm %s9064_s8, %s6480_s19  ;;  %s6671_s18 = scalar_lea.hbm %s9064_s8, 98304 }
  0x8b   : > { %s6667_s21 = scalar_lea.hbm %s7291_s4, 32768  ;;  %p6672_p3 = scmp.lt.s32.totalorder %s7291_s4, %s9064_s8 }
  0x8c   : > { %p6668_p0 = scmp.ne.s32.totalorder %s7291_s4, %s6667_s21  ;;  %p6673_p5 = scmp.lt.s32.totalorder %s6671_s18, %s6667_s21 }
  0x8e   : > { %p6669_p1 = pnand %p6668_p0, %p7151_p4  ;;  %p6674_p7 = por %p6673_p5, %p6672_p3 }
  0x90   : > { %p6670_p2 = pneg %p6669_p1 }
  0x92   : > { %p6675_p8 = pnand %p6674_p7, %p6670_p2 }
  0x94   : > { %6678 = shalt.err (!%p6675_p8)
}
  0x95   : > { %s6679_s6 = scalar_lea.vmem %s7295_s28, 32768  ;;  %s7020_s29 = smov [#allocation14]  }
  0x96   : > { %p6680_p9 = scmp.ne.s32.totalorder %s7295_s28, %s6679_s6  ;;  %s6683_s13 = sshll.u32 %s7020_s29, 4  ;;  %s6684_s13 = int_to_ptr.vmem [resolvable:$false] %s6683_s13 }
  0x97   : > { %s6685_s2 = scalar_lea.vmem %s6684_s13, 65536  ;;  %p6686_p12 = scmp.lt.s32.totalorder %s7295_s28, %s6684_s13 }
  0x98   : > { %p6681_p10 = pnand %p6680_p9, %p7151_p4  ;;  %p6687_p13 = scmp.lt.s32.totalorder %s6685_s2, %s6679_s6 }
  0x9a   : > { %p6682_p11 = pneg %p6681_p10  ;;  %p6688_p0 = por %p6687_p13, %p6686_p12 }
  0x9c   : > { %p6689_p1 = pnand %p6688_p0, %p6682_p11 }
  0x9e   : > { %6692 = shalt.err (!%p6689_p1)
}
  0x9f   : > { %s9066_s21 = smov 64   ;;  %s9067_s18 = smov 1024  }
  0xa0   : > { %6504 = dma.hbm_to_vmem [thread:$0]  (%p7151_p4), %s7291_s4, 32768, %s7295_s28, %s9034_s30, %s9067_s18, %s9067_s18, %s9066_s21  }
  0xa1   : > { %s9068_s10 = sld [smem:[#allocation44_spill]]  ;;  %s628_s29 = scalar_lea.vmem [#allocation17], %s7219_s17 }
  0xa2   : > { %s636_s13 = sshll.u32 %s628_s29, 4  ;;  %s7331_s2 = sshll.u32 %s7162_s24, 2  ;;  %s637_s13 = int_to_ptr.vmem [resolvable:$true] %s636_s13 }
  0xa7   : > { %s7327_s6 = scalar_lea.hbm %s9068_s10, %s7222_s23  ;;  %s6697_s19 = scalar_lea.hbm %s9068_s10, 384 }
  0xa8   : > { %s6693_s8 = scalar_lea.hbm %s7327_s6, 128  ;;  %p6698_p7 = scmp.lt.s32.totalorder %s7327_s6, %s9068_s10 }
  0xa9   : > { %p6694_p2 = scmp.ne.s32.totalorder %s7327_s6, %s6693_s8  ;;  %p6699_p8 = scmp.lt.s32.totalorder %s6697_s19, %s6693_s8 }
  0xab   : > { %p6695_p3 = pnand %p6694_p2, %p7151_p4  ;;  %p6700_p9 = por %p6699_p8, %p6698_p7 }
  0xad   : > { %p6696_p5 = pneg %p6695_p3 }
  0xaf   : > { %p6701_p10 = pnand %p6700_p9, %p6696_p5 }
  0xb1   : > { %6704 = shalt.err (!%p6701_p10)
}
  0xb2   : > { %s6705_s29 = scalar_lea.vmem %s637_s13, 128  ;;  %s7021_s0 = smov [#allocation17]  }
  0xb3   : > { %p6706_p11 = scmp.ne.s32.totalorder %s637_s13, %s6705_s29  ;;  %s6709_s11 = sshll.u32 %s7021_s0, 4  ;;  %s6710_s11 = int_to_ptr.vmem [resolvable:$false] %s6709_s11 }
  0xb4   : > { %s6711_s20 = scalar_lea.vmem %s6710_s11, 256  ;;  %p6712_p0 = scmp.lt.s32.totalorder %s637_s13, %s6710_s11 }
  0xb5   : > { %p6707_p12 = pnand %p6706_p11, %p7151_p4  ;;  %p6713_p1 = scmp.lt.s32.totalorder %s6711_s20, %s6705_s29 }
  0xb7   : > { %p6708_p13 = pneg %p6707_p12  ;;  %p6714_p2 = por %p6713_p1, %p6712_p0 }
  0xb9   : > { %p6715_p3 = pnand %p6714_p2, %p6708_p13 }
  0xbb   : > { %6718 = shalt.err (!%p6715_p3)
}
  0xbc   : > { %s9069_s8 = scalar_lea.sflag [#allocation18], %s7165_s25  ;;  %s7353_s30 = sshll.u32 %s7013_s16, 6 }
  0xbd   : > { %6506 = dma.hbm_to_vmem [thread:$0]  (%p7151_p4), %s7327_s6, 128, %s637_s13, %s9069_s8  }
  0xbe   : > { %s7359_s11 = scalar_lea.hbm %s9014_s12, %s7353_s30  ;;  %s668_s20 = scalar_lea.vmem [#allocation20], %s7331_s2 }
  0xbf   : > { %s676_s28 = sshll.u32 %s668_s20, 4  ;;  %s6719_s27 = scalar_lea.hbm %s7359_s11, 64  ;;  %s677_s28 = int_to_ptr.vmem [resolvable:$true] %s676_s28 }
  0xc0   : > { %p6720_p5 = scmp.ne.s32.totalorder %s7359_s11, %s6719_s27  ;;  %s6723_s29 = scalar_lea.hbm %s9014_s12, 192 }
  0xc1   : > { %p6724_p9 = scmp.lt.s32.totalorder %s7359_s11, %s9014_s12  ;;  %p6725_p10 = scmp.lt.s32.totalorder %s6723_s29, %s6719_s27 }
  0xc2   : > { %p6721_p7 = pnand %p6720_p5, %p7151_p4 }
  0xc3   : > { %p6726_p11 = por %p6725_p10, %p6724_p9 }
  0xc4   : > { %p6722_p8 = pneg %p6721_p7 }
  0xc6   : > { %p6727_p12 = pnand %p6726_p11, %p6722_p8 }
  0xc8   : > { %6730 = shalt.err (!%p6727_p12)
}
  0xc9   : > { %s6731_s4 = scalar_lea.vmem %s677_s28, 64  ;;  %s7022_s20 = smov [#allocation20]  }
  0xca   : > { %p6732_p13 = scmp.ne.s32.totalorder %s677_s28, %s6731_s4  ;;  %s6735_s19 = sshll.u32 %s7022_s20, 4  ;;  %s6736_s19 = int_to_ptr.vmem [resolvable:$false] %s6735_s19 }
  0xcb   : > { %s6737_s10 = scalar_lea.vmem %s6736_s19, 128  ;;  %p6738_p2 = scmp.lt.s32.totalorder %s677_s28, %s6736_s19 }
  0xcc   : > { %p6733_p0 = pnand %p6732_p13, %p7151_p4  ;;  %p6739_p3 = scmp.lt.s32.totalorder %s6737_s10, %s6731_s4 }
  0xce   : > { %p6734_p1 = pneg %p6733_p0  ;;  %p6740_p5 = por %p6739_p3, %p6738_p2 }
  0xd0   : > { %p6741_p7 = pnand %p6740_p5, %p6734_p1 }
  0xd2   : > { %6744 = shalt.err (!%p6741_p7)
}
  0xd3   : > { %s9070_s27 = scalar_lea.sflag [#allocation21], %s7165_s25  ;;  %s7385_s29 = scalar_lea.hbm %s9003_s1, %s7353_s30 }
  0xd4   : > { %6508 = dma.hbm_to_vmem [thread:$0]  (%p7151_p4), %s7359_s11, 64, %s677_s28, %s9070_s27  }
  0xd5   : > { %s451_s10 = scalar_lea.vmem [#allocation2], %s7331_s2  ;;  %s448_s8 = scalar_lea.sflag [#allocation3], %s7162_s24 }
  0xd6   : > { %s459_s19 = sshll.u32 %s451_s10, 4  ;;  %s6745_s0 = scalar_lea.hbm %s7385_s29, 64  ;;  %s460_s19 = int_to_ptr.vmem [resolvable:$true] %s459_s19 }
  0xd7   : > { %p6746_p8 = scmp.ne.s32.totalorder %s7385_s29, %s6745_s0  ;;  %s6749_s11 = scalar_lea.hbm %s9003_s1, 192 }
  0xd8   : > { %p6750_p11 = scmp.lt.s32.totalorder %s7385_s29, %s9003_s1  ;;  %p6751_p12 = scmp.lt.s32.totalorder %s6749_s11, %s6745_s0 }
  0xd9   : > { %p6747_p9 = pnand %p6746_p8, %p7151_p4 }
  0xda   : > { %p6752_p13 = por %p6751_p12, %p6750_p11 }
  0xdb   : > { %p6748_p10 = pneg %p6747_p9 }
  0xdd   : > { %p6753_p0 = pnand %p6752_p13, %p6748_p10 }
  0xdf   : > { %6756 = shalt.err (!%p6753_p0)
}
  0xe0   : > { %s6757_s6 = scalar_lea.vmem %s460_s19, 64  ;;  %s7023_s24 = smov [#allocation2]  }
  0xe1   : > { %p6758_p1 = scmp.ne.s32.totalorder %s460_s19, %s6757_s6  ;;  %s6761_s13 = sshll.u32 %s7023_s24, 4  ;;  %s6762_s13 = int_to_ptr.vmem [resolvable:$false] %s6761_s13 }
  0xe2   : > { %s6763_s10 = scalar_lea.vmem %s6762_s13, 128  ;;  %p6764_p5 = scmp.lt.s32.totalorder %s460_s19, %s6762_s13 }
  0xe3   : > { %p6759_p2 = pnand %p6758_p1, %p7151_p4  ;;  %p6765_p7 = scmp.lt.s32.totalorder %s6763_s10, %s6757_s6 }
  0xe5   : > { %p6760_p3 = pneg %p6759_p2  ;;  %p6766_p8 = por %p6765_p7, %p6764_p5 }
  0xe7   : > { %p6767_p9 = pnand %p6766_p8, %p6760_p3 }
  0xe9   : > { %6770 = shalt.err (!%p6767_p9)
}
  0xea   : > { %6497 = dma.hbm_to_vmem [thread:$0]  (%p7151_p4), %s7385_s29, 64, %s460_s19, %s448_s8  }
  0xeb   : > { %s7409_s20 = scalar_lea.hbm %s9005_s3, %s7222_s23  ;;  %s491_s11 = scalar_lea.vmem [#allocation7], %s7219_s17 }
  0xec   : > { %s499_s28 = sshll.u32 %s491_s11, 4  ;;  %s9071_s27 = sshll.u32 %s7280_s26, 4  ;;  %s500_s28 = int_to_ptr.vmem [resolvable:$true] %s499_s28  ;;  %s7414_s27 = int_to_ptr.vmem [resolvable:$true] %s9071_s27 }
  0xed   : > { %s6771_s6 = scalar_lea.hbm %s7409_s20, 128  ;;  %s6775_s8 = scalar_lea.hbm %s9005_s3, 384 }
  0xee   : > { %p6772_p10 = scmp.ne.s32.totalorder %s7409_s20, %s6771_s6  ;;  %p6776_p13 = scmp.lt.s32.totalorder %s7409_s20, %s9005_s3 }
  0xef   : > { %p6777_p0 = scmp.lt.s32.totalorder %s6775_s8, %s6771_s6 }
  0xf0   : > { %p6773_p11 = pnand %p6772_p10, %p7151_p4 }
  0xf1   : > { %p6778_p1 = por %p6777_p0, %p6776_p13 }
  0xf2   : > { %p6774_p12 = pneg %p6773_p11 }
  0xf4   : > { %p6779_p2 = pnand %p6778_p1, %p6774_p12 }
  0xf6   : > { %6782 = shalt.err (!%p6779_p2)
}
  0xf7   : > { %s6783_s26 = scalar_lea.vmem %s500_s28, 128  ;;  %s7024_s10 = smov [#allocation7]  }
  0xf8   : > { %p6784_p3 = scmp.ne.s32.totalorder %s500_s28, %s6783_s26  ;;  %s6787_s0 = sshll.u32 %s7024_s10, 4  ;;  %s6788_s0 = int_to_ptr.vmem [resolvable:$false] %s6787_s0 }
  0xf9   : > { %s6789_s4 = scalar_lea.vmem %s6788_s0, 256  ;;  %p6790_p8 = scmp.lt.s32.totalorder %s500_s28, %s6788_s0 }
  0xfa   : > { %p6785_p5 = pnand %p6784_p3, %p7151_p4  ;;  %p6791_p9 = scmp.lt.s32.totalorder %s6789_s4, %s6783_s26 }
  0xfc   : > { %p6786_p7 = pneg %p6785_p5  ;;  %p6792_p10 = por %p6791_p9, %p6790_p8 }
  0xfe   : > { %p6793_p11 = pnand %p6792_p10, %p6786_p7 }
 0x100   : > { %6796 = shalt.err (!%p6793_p11)
}
 0x101   : > { %s9072_s11 = scalar_lea.sflag [#allocation6], %s7165_s25  ;;  %s6797_s6 = scalar_lea.hbm %s7286_s15, 32768 }
 0x102   : > { %6499 = dma.hbm_to_vmem [thread:$0]  (%p7151_p4), %s7409_s20, 128, %s500_s28, %s9072_s11  }
 0x103   : > { %p6798_p12 = scmp.ne.s32.totalorder %s7286_s15, %s6797_s6  ;;  %s6801_s8 = scalar_lea.hbm %s9007_s5, 98304 }
 0x104   : > { %p6802_p1 = scmp.lt.s32.totalorder %s7286_s15, %s9007_s5  ;;  %p6803_p2 = scmp.lt.s32.totalorder %s6801_s8, %s6797_s6 }
 0x105   : > { %p6799_p13 = pnand %p6798_p12, %p7151_p4 }
 0x106   : > { %p6804_p3 = por %p6803_p2, %p6802_p1 }
 0x107   : > { %p6800_p0 = pneg %p6799_p13 }
 0x109   : > { %p6805_p5 = pnand %p6804_p3, %p6800_p0 }
 0x10b   : > { %6808 = shalt.err (!%p6805_p5)
}
 0x10c   : > { %s6809_s20 = scalar_lea.vmem %s7414_s27, 32768  ;;  %s7025_s28 = smov [#allocation10]  }
 0x10d   : > { %p6810_p7 = scmp.ne.s32.totalorder %s7414_s27, %s6809_s20  ;;  %s6813_s26 = sshll.u32 %s7025_s28, 4  ;;  %s6814_s26 = int_to_ptr.vmem [resolvable:$false] %s6813_s26 }
 0x10e   : > { %s6815_s10 = scalar_lea.vmem %s6814_s26, 65536  ;;  %p6816_p10 = scmp.lt.s32.totalorder %s7414_s27, %s6814_s26 }
 0x10f   : > { %p6811_p8 = pnand %p6810_p7, %p7151_p4  ;;  %p6817_p11 = scmp.lt.s32.totalorder %s6815_s10, %s6809_s20 }
 0x111   : > { %p6812_p9 = pneg %p6811_p8  ;;  %p6818_p12 = por %p6817_p11, %p6816_p10 }
 0x113   : > { %p6819_p13 = pnand %p6818_p12, %p6812_p9 }
 0x115   : > { %6822 = shalt.err (!%p6819_p13)
}
 0x116   : > { %s9073_s0 = scalar_lea.sflag [#allocation9], %s7165_s25  ;;  %s7463_s6 = scalar_lea.hbm %s9009_s7, %s7222_s23 }
 0x117   : > { %6501 = dma.hbm_to_vmem [thread:$0]  (%p7151_p4), %s7286_s15, 32768, %s7414_s27, %s9073_s0, %s9067_s18, %s9067_s18, %s9066_s21  }
 0x118   : > { %s569_s29 = scalar_lea.vmem [#allocation13], %s7219_s17  ;;  %s7470_s13 = scalar_lea.hbm %s9011_s9, %s7222_s23 }
 0x119   : > { %s577_s19 = sshll.u32 %s569_s29, 4  ;;  %s6823_s20 = scalar_lea.hbm %s7463_s6, 128  ;;  %s578_s19 = int_to_ptr.vmem [resolvable:$true] %s577_s19 }
 0x11a   : > { %p6824_p0 = scmp.ne.s32.totalorder %s7463_s6, %s6823_s20  ;;  %s6827_s18 = scalar_lea.hbm %s9009_s7, 384 }
 0x11b   : > { %p6828_p3 = scmp.lt.s32.totalorder %s7463_s6, %s9009_s7  ;;  %p6829_p5 = scmp.lt.s32.totalorder %s6827_s18, %s6823_s20 }
 0x11c   : > { %p6825_p1 = pnand %p6824_p0, %p7151_p4 }
 0x11d   : > { %p6830_p7 = por %p6829_p5, %p6828_p3 }
 0x11e   : > { %p6826_p2 = pneg %p6825_p1 }
 0x120   : > { %p6831_p8 = pnand %p6830_p7, %p6826_p2 }
 0x122   : > { %6834 = shalt.err (!%p6831_p8)
}
 0x123   : > { %s6835_s26 = scalar_lea.vmem %s578_s19, 128  ;;  %s7026_s23 = smov [#allocation13]  }
 0x124   : > { %p6836_p9 = scmp.ne.s32.totalorder %s578_s19, %s6835_s26  ;;  %s6839_s10 = sshll.u32 %s7026_s23, 4  ;;  %s6840_s10 = int_to_ptr.vmem [resolvable:$false] %s6839_s10 }
 0x125   : > { %s6841_s0 = scalar_lea.vmem %s6840_s10, 256  ;;  %p6842_p12 = scmp.lt.s32.totalorder %s578_s19, %s6840_s10 }
 0x126   : > { %p6837_p10 = pnand %p6836_p9, %p7151_p4  ;;  %p6843_p13 = scmp.lt.s32.totalorder %s6841_s0, %s6835_s26 }
 0x128   : > { %p6838_p11 = pneg %p6837_p10  ;;  %p6844_p0 = por %p6843_p13, %p6842_p12 }
 0x12a   : > { %p6845_p1 = pnand %p6844_p0, %p6838_p11 }
 0x12c   : > { %6848 = shalt.err (!%p6845_p1)
}
 0x12d   : > { %s9074_s4 = scalar_lea.sflag [#allocation12], %s7165_s25  ;;  %s609_s11 = scalar_lea.vmem [#allocation16], %s7219_s17 }
 0x12e   : > { %6503 = dma.hbm_to_vmem [thread:$0]  (%p7151_p4), %s7463_s6, 128, %s578_s19, %s9074_s4  }
 0x12f   : > { %s617_s29 = sshll.u32 %s609_s11, 4  ;;  %s9075_s8 = sshll.u32 %s7215_s14, 4  ;;  %s7493_s8 = int_to_ptr.vmem [resolvable:$true] %s9075_s8  ;;  %s618_s29 = int_to_ptr.vmem [resolvable:$true] %s617_s29 }
 0x130   : > { %s6849_s24 = scalar_lea.hbm %s7470_s13, 128  ;;  %s6853_s21 = scalar_lea.hbm %s9011_s9, 384 }
 0x131   : > { %p6850_p2 = scmp.ne.s32.totalorder %s7470_s13, %s6849_s24  ;;  %p6854_p7 = scmp.lt.s32.totalorder %s7470_s13, %s9011_s9 }
 0x132   : > { %p6855_p8 = scmp.lt.s32.totalorder %s6853_s21, %s6849_s24 }
 0x133   : > { %p6851_p3 = pnand %p6850_p2, %p7151_p4 }
 0x134   : > { %p6856_p9 = por %p6855_p8, %p6854_p7 }
 0x135   : > { %p6852_p5 = pneg %p6851_p3 }
 0x137   : > { %p6857_p10 = pnand %p6856_p9, %p6852_p5 }
 0x139   : > { %6860 = shalt.err (!%p6857_p10)
}
 0x13a   : > { %s6861_s17 = scalar_lea.vmem %s618_s29, 128  ;;  %s7027_s14 = smov [#allocation16]  }
 0x13b   : > { %p6862_p11 = scmp.ne.s32.totalorder %s618_s29, %s6861_s17  ;;  %s6865_s6 = sshll.u32 %s7027_s14, 4  ;;  %s6866_s6 = int_to_ptr.vmem [resolvable:$false] %s6865_s6 }
 0x13c   : > { %s6867_s19 = scalar_lea.vmem %s6866_s6, 256  ;;  %p6868_p0 = scmp.lt.s32.totalorder %s618_s29, %s6866_s6 }
 0x13d   : > { %p6863_p12 = pnand %p6862_p11, %p7151_p4  ;;  %p6869_p1 = scmp.lt.s32.totalorder %s6867_s19, %s6861_s17 }
 0x13f   : > { %p6864_p13 = pneg %p6863_p12  ;;  %p6870_p2 = por %p6869_p1, %p6868_p0 }
 0x141   : > { %p6871_p3 = pnand %p6870_p2, %p6864_p13 }
 0x143   : > { %6874 = shalt.err (!%p6871_p3)
}
 0x144   : > { %s9076_s28 = scalar_lea.sflag [#allocation15], %s7165_s25  ;;  %s9077_s26 = sld [smem:[#allocation38_spill]] }
 0x145   : > { %6505 = dma.hbm_to_vmem [thread:$0]  (%p7151_p4), %s7470_s13, 128, %s618_s29, %s9076_s28  }
 0x146   : > { %s9078_s4 = sld [smem:[#allocation45_spill]] }
 0x14a   : > { %s6875_s23 = scalar_lea.hbm %s9077_s26, 16384 }
 0x14b   : > { %p6876_p5 = scmp.ne.s32.totalorder %s9077_s26, %s6875_s23 }
 0x14c   : > { %s6879_s11 = scalar_lea.hbm %s9078_s4, 49152  ;;  %p6880_p9 = scmp.lt.s32.totalorder %s9077_s26, %s9078_s4 }
 0x14d   : > { %p6877_p7 = pnand %p6876_p5, %p7151_p4  ;;  %p6881_p10 = scmp.lt.s32.totalorder %s6879_s11, %s6875_s23 }
 0x14f   : > { %p6878_p8 = pneg %p6877_p7  ;;  %p6882_p11 = por %p6881_p10, %p6880_p9 }
 0x151   : > { %p6883_p12 = pnand %p6882_p11, %p6878_p8 }
 0x153   : > { %6886 = shalt.err (!%p6883_p12)
}
 0x154   : > { %s6887_s13 = scalar_lea.vmem %s7493_s8, 16384  ;;  %s7028_s29 = smov [#allocation19]  }
 0x155   : > { %p6888_p13 = scmp.ne.s32.totalorder %s7493_s8, %s6887_s13  ;;  %s6891_s15 = sshll.u32 %s7028_s29, 4  ;;  %s6892_s15 = int_to_ptr.vmem [resolvable:$false] %s6891_s15 }
 0x156   : > { %s6893_s21 = scalar_lea.vmem %s6892_s15, 32768  ;;  %p6894_p2 = scmp.lt.s32.totalorder %s7493_s8, %s6892_s15 }
 0x157   : > { %p6889_p0 = pnand %p6888_p13, %p7151_p4  ;;  %p6895_p3 = scmp.lt.s32.totalorder %s6893_s21, %s6887_s13 }
 0x159   : > { %p6890_p1 = pneg %p6889_p0  ;;  %p6896_p5 = por %p6895_p3, %p6894_p2 }
 0x15b   : > { %p6897_p7 = pnand %p6896_p5, %p6890_p1 }
 0x15d   : > { %6900 = shalt.err (!%p6897_p7)
}
 0x15e   : > { %s7029_s18 = smov 512   ;;  %s7030_s27 = smov 32  }
 0x15f   : > { %s9079_s17 = scalar_lea.sflag [#allocation18], %s7165_s25  ;;  %s9080_s19 = sld [smem:[#allocation46_spill]] }
 0x160   : > { %6507 = dma.hbm_to_vmem [thread:$0]  (%p7151_p4), %s9077_s26, 16384, %s7493_s8, %s9079_s17, %s7029_s18, %s7029_s18, %s7030_s27  }
 0x161   : > { %s687_s23 = scalar_lea.vmem [#allocation22], %s7331_s2 }
 0x162   : > { %s695_s10 = sshll.u32 %s687_s23, 4  ;;  %s696_s10 = int_to_ptr.vmem [resolvable:$true] %s695_s10 }
 0x165   : > { %s693_s28 = scalar_lea.hbm %s9080_s19, %s7353_s30  ;;  %s6905_s24 = scalar_lea.hbm %s9080_s19, 192 }
 0x166   : > { %s6901_s0 = scalar_lea.hbm %s693_s28, 64  ;;  %p6906_p11 = scmp.lt.s32.totalorder %s693_s28, %s9080_s19 }
 0x167   : > { %p6902_p8 = scmp.ne.s32.totalorder %s693_s28, %s6901_s0  ;;  %p6907_p12 = scmp.lt.s32.totalorder %s6905_s24, %s6901_s0 }
 0x169   : > { %p6903_p9 = pnand %p6902_p8, %p7151_p4  ;;  %p6908_p13 = por %p6907_p12, %p6906_p11 }
 0x16b   : > { %p6904_p10 = pneg %p6903_p9 }
 0x16d   : > { %p6909_p0 = pnand %p6908_p13, %p6904_p10 }
 0x16f   : > { %6912 = shalt.err (!%p6909_p0)
}
 0x170   : > { %s6913_s2 = scalar_lea.vmem %s696_s10, 64  ;;  %s7031_s30 = smov [#allocation22]  }
 0x171   : > { %p6914_p1 = scmp.ne.s32.totalorder %s696_s10, %s6913_s2  ;;  %s6917_s8 = sshll.u32 %s7031_s30, 4  ;;  %s6918_s8 = int_to_ptr.vmem [resolvable:$false] %s6917_s8 }
 0x172   : > { %s6919_s26 = scalar_lea.vmem %s6918_s8, 128  ;;  %p6920_p5 = scmp.lt.s32.totalorder %s696_s10, %s6918_s8 }
 0x173   : > { %p6915_p2 = pnand %p6914_p1, %p7151_p4  ;;  %p6921_p7 = scmp.lt.s32.totalorder %s6919_s26, %s6913_s2 }
 0x175   : > { %p6916_p3 = pneg %p6915_p2  ;;  %p6922_p8 = por %p6921_p7, %p6920_p5 }
 0x177   : > { %p6923_p9 = pnand %p6922_p8, %p6916_p3 }
 0x179   : > { %6926 = shalt.err (!%p6923_p9)
}
 0x17a   : > { %s9081_s29 = scalar_lea.sflag [#allocation21], %s7165_s25 }
 0x17b   : > { %6509 = dma.hbm_to_vmem [thread:$0]  (%p7151_p4), %s693_s28, 64, %s696_s10, %s9081_s29  }
 0x17c PF: > { %p6441_p10 = scmp.ge.s32.totalorder %s7013_s16, 1  ;;  %p700_p11 = scmp.lt.s32.totalorder %s7013_s16, 4 }
 0x17e   : > { %p701_p12 = pnand %p6441_p10, %p700_p11 }
 0x17f   : > { %s9082_s15 = sld [smem:[#allocation32_spill]] (!%p701_p12) }
 0x180   : > { %704 = sbr.rel (%p701_p12) target bundleno = 2586 (0xa1a), region = 76 }
 0x185   : > { %s7557_s18 = sand.u32 1, %s9082_s15  }
 0x186   : > { %s7560_s27 = sshll.u32 %s7557_s18, 2  ;;  %s707_s22 = scalar_lea.sflag [#allocation3], %s7557_s18 }
 0x187   : > { %s710_s17 = scalar_lea.vmem [#allocation2], %s7560_s27 }
 0x188   : > { %6968 = dma.done.wait (%p7156_p6), %s707_s22, 64  }
 0x189   : > { %6970 = vsyncadd (%p7156_p6), %s707_s22, 4294967232  ;;  %s9084_s25 = sld [smem:[#allocation34_spill]]  ;;  %s6443_s14 = sshll.u32 %s7557_s18, 10 }
 0x18a   : > { %s7573_s28 = scalar_lea.vmem [#allocation5], %s6443_s14 }
 0x18f   : > { %s7569_s16 = sand.u32 1, %s9084_s25  }
 0x190   : > { %s716_s6 = scalar_lea.sflag [#allocation6], %s7569_s16 }
 0x191   : > { %6972 = dma.done.wait (%p7156_p6), %s716_s6, 16512  }
 0x192   : > { %6974 = vsyncadd (%p7156_p6), %s716_s6, 4294950784  ;;  %s7580_s23 = sshll.u32 %s7557_s18, 3  ;;  %s734_s0 = scalar_lea.sflag [#allocation9], %s7569_s16 }
 0x193   : > { %s728_s10 = scalar_lea.vmem [#allocation7], %s7580_s23  ;;  %s737_s4 = scalar_lea.vmem [#allocation8], %s7580_s23 }
 0x194   : > { %6976 = dma.done.wait (%p7156_p6), %s734_s0, 32896  }
 0x195   : > { %6978 = vsyncadd (%p7156_p6), %s734_s0, 4294934400  ;;  %s6446_s11 = sshll.u32 %s7557_s18, 11  ;;  %s752_s20 = scalar_lea.sflag [#allocation12], %s7569_s16 }
 0x196   : > { %s7590_s24 = scalar_lea.vmem [#allocation10], %s6446_s11  ;;  %s755_s13 = scalar_lea.vmem [#allocation11], %s7580_s23 }
 0x197   : > { %6980 = dma.done.wait (%p7156_p6), %s752_s20, 256  }
 0x198   : > { %6982 = vsyncadd (%p7156_p6), %s752_s20, 4294967040  ;;  %s764_s2 = scalar_lea.vmem [#allocation13], %s7580_s23  ;;  %s770_s30 = scalar_lea.sflag [#allocation15], %s7569_s16 }
 0x199   : > { %s7600_s8 = scalar_lea.vmem [#allocation14], %s6446_s11 }
 0x19a   : > { %6984 = dma.done.wait (%p7156_p6), %s770_s30, 32896  }
 0x19b   : > { %6986 = vsyncadd (%p7156_p6), %s770_s30, 4294934400  ;;  %s782_s26 = scalar_lea.vmem [#allocation16], %s7580_s23  ;;  %s788_s29 = scalar_lea.sflag [#allocation18], %s7569_s16 }
 0x19c   : > { %s791_s15 = scalar_lea.vmem [#allocation17], %s7580_s23 }
 0x19d   : > { %6988 = dma.done.wait (%p7156_p6), %s788_s29, 16512  }
 0x19e   : > { %6990 = vsyncadd (%p7156_p6), %s788_s29, 4294950784  ;;  %s7613_s18 = scalar_lea.vmem [#allocation19], %s6443_s14  ;;  %s806_s22 = scalar_lea.sflag [#allocation21], %s7569_s16 }
 0x19f   : > { %s809_s6 = scalar_lea.vmem [#allocation20], %s7560_s27 }
 0x1a0   : > { %6992 = dma.done.wait (%p7156_p6), %s806_s22, 128  }
 0x1a1   : > { %6994 = vsyncadd (%p7156_p6), %s806_s22, 4294967168  ;;  %s818_s0 = scalar_lea.vmem [#allocation22], %s7560_s27  ;;  %p6455_p4 = scmp.ne.s32.totalorder %s9084_s25, 0 }
 0x1a3   : > { %921 = sbr.rel (%p6455_p4) target bundleno = 427 (0x1ab), region = 132 }
 0x1a8   : > { %v7032_v0 = vmov 0.0  }
 0x1a9   : > { %922 = vst [vmem:[#allocation23] sm:$0xff] %v7032_v0  ;;  %923 = vst [vmem:[#allocation23 + $0x8] sm:$0xff] %v7032_v0 }
 0x1aa   : > { %924 = vst [vmem:[#allocation23 + $0x10] sm:$0xff] %v7032_v0  ;;  %925 = vst [vmem:[#allocation23 + $0x18] sm:$0xff] %v7032_v0 }
 0x1ab PF: > { %s9085_s16 = sld [smem:[#allocation39_spill]]  ;;  %v7033_v2 = vmov 0   ;;  %v7034_v3 = vmov 1   ;;  %v1617_v4 = vld [vmem:[%s7573_s28 + $0x2c8] sm:$0xff]  ;;  %v1619_v5 = vld [vmem:[%s7573_s28 + $0x2d8] sm:$0xff]  ;;  %v1616_v8 = vld [vmem:[%s7573_s28 + $0x2c0] sm:$0xff] }
 0x1ac   : > { %6575 = vset.pattern.permute.xlu0 %v7033_v2  ;;  %v1713_v6 = vunpack.c.h.s8.bf16 %v1617_v4  ;;  %v1715_v7 = vunpack.c.h.s8.bf16 %v1619_v5  ;;  %v1618_v9 = vld [vmem:[%s7573_s28 + $0x2d0] sm:$0xff]  ;;  %v1712_v10 = vunpack.c.h.s8.bf16 %v1616_v8  ;;  %v1705_v12 = vunpack.c.l.s8.bf16 %v1617_v4  ;;  %v1609_v16 = vld [vmem:[%s7573_s28 + $0x288] sm:$0xff]  ;;  %v1611_v17 = vld [vmem:[%s7573_s28 + $0x298] sm:$0xff]  ;;  %s9088_s21 = sld [smem:[#allocation34_spill]]  ;;  %s7041_s27 = smov [#allocation23]  }
 0x1ad   : > { %v1714_v11 = vunpack.c.h.s8.bf16 %v1618_v9  ;;  %v1707_v13 = vunpack.c.l.s8.bf16 %v1619_v5  ;;  %v1704_v14 = vunpack.c.l.s8.bf16 %v1616_v8  ;;  %v1706_v15 = vunpack.c.l.s8.bf16 %v1618_v9  ;;  %v1608_v20 = vld [vmem:[%s7573_s28 + $0x280] sm:$0xff]  ;;  %v1610_v21 = vld [vmem:[%s7573_s28 + $0x290] sm:$0xff]  ;;  %v1601_v28 = vld [vmem:[%s7573_s28 + $0x248] sm:$0xff] }
 0x1ae   : > { %1784 = vmatprep.subr.bf16.mxu0 %v1713_v6  ;;  %1825 = vmatprep.subr.bf16.mxu1 %v1715_v7  ;;  %v1697_v18 = vunpack.c.h.s8.bf16 %v1609_v16  ;;  %v1699_v19 = vunpack.c.h.s8.bf16 %v1611_v17  ;;  %v1696_v22 = vunpack.c.h.s8.bf16 %v1608_v20  ;;  %v1698_v23 = vunpack.c.h.s8.bf16 %v1610_v21  ;;  %v1603_v29 = vld [vmem:[%s7573_s28 + $0x258] sm:$0xff]  ;;  %v1600_v32 = vld [vmem:[%s7573_s28 + $0x240] sm:$0xff]  ;;  %v1602_v33 = vld [vmem:[%s7573_s28 + $0x250] sm:$0xff] }
 0x1af   : > { %1785 = vmatpush1.bf16.msra.mxu0 %v1712_v10  ;;  %1826 = vmatpush1.bf16.msra.mxu1 %v1714_v11  ;;  %v1689_v24 = vunpack.c.l.s8.bf16 %v1609_v16  ;;  %v1691_v25 = vunpack.c.l.s8.bf16 %v1611_v17  ;;  %v1688_v26 = vunpack.c.l.s8.bf16 %v1608_v20  ;;  %v1690_v27 = vunpack.c.l.s8.bf16 %v1610_v21  ;;  %v1593_v40 = vld [vmem:[%s7573_s28 + $0x208] sm:$0xff]  ;;  %v1595_v41 = vld [vmem:[%s7573_s28 + $0x218] sm:$0xff]  ;;  %v1592_v44 = vld [vmem:[%s7573_s28 + $0x200] sm:$0xff] }
 0x1b0   : > { %1786 = vmatprep.subr.bf16.mxu0 %v1705_v12  ;;  %1827 = vmatprep.subr.bf16.mxu1 %v1707_v13  ;;  %v1681_v30 = vunpack.c.h.s8.bf16 %v1601_v28  ;;  %v1683_v31 = vunpack.c.h.s8.bf16 %v1603_v29  ;;  %v1680_v34 = vunpack.c.h.s8.bf16 %v1600_v32  ;;  %v1682_v35 = vunpack.c.h.s8.bf16 %v1602_v33  ;;  %v1594_v45 = vld [vmem:[%s7573_s28 + $0x210] sm:$0xff]  ;;  %v1649_v52 = vld [vmem:[%s7573_s28 + $0x3c8] sm:$0xff]  ;;  %v1651_v53 = vld [vmem:[%s7573_s28 + $0x3d8] sm:$0xff] }
 0x1b1   : > { %v926_v1 = vld [vmem:[%s9085_s16] sm:$0xff]  ;;  %v1673_v36 = vunpack.c.l.s8.bf16 %v1601_v28  ;;  %v1675_v37 = vunpack.c.l.s8.bf16 %v1603_v29  ;;  %v1672_v38 = vunpack.c.l.s8.bf16 %v1600_v32  ;;  %v1674_v39 = vunpack.c.l.s8.bf16 %v1602_v33  ;;  %v1648_v56 = vld [vmem:[%s7573_s28 + $0x3c0] sm:$0xff]  ;;  %v1650_v57 = vld [vmem:[%s7573_s28 + $0x3d0] sm:$0xff] }
 0x1b2   : > { %930 = vperm.xlu0 %6575, %v926_v1   ;;  %v1665_v42 = vunpack.c.h.s8.bf16 %v1593_v40  ;;  %v1667_v43 = vunpack.c.h.s8.bf16 %v1595_v41  ;;  %v1664_v46 = vunpack.c.h.s8.bf16 %v1592_v44  ;;  %v1666_v47 = vunpack.c.h.s8.bf16 %v1594_v45  ;;  %v1641_v0 = vld [vmem:[%s7573_s28 + $0x388] sm:$0xff]  ;;  %v1640_v4 = vld [vmem:[%s7573_s28 + $0x380] sm:$0xff]  ;;  %v1642_v5 = vld [vmem:[%s7573_s28 + $0x390] sm:$0xff]  ;;  %p6527_p6 = scmp.eq.s32.totalorder %s9088_s21, 2 }
 0x1b3   : > { %1787 = vmatpush1.bf16.msra.mxu0 %v1704_v14  ;;  %1828 = vmatpush1.bf16.msra.mxu1 %v1706_v15  ;;  %v1657_v48 = vunpack.c.l.s8.bf16 %v1593_v40  ;;  %v1659_v49 = vunpack.c.l.s8.bf16 %v1595_v41  ;;  %v1656_v50 = vunpack.c.l.s8.bf16 %v1592_v44  ;;  %v1658_v51 = vunpack.c.l.s8.bf16 %v1594_v45  ;;  %v1633_v10 = vld [vmem:[%s7573_s28 + $0x348] sm:$0xff]  ;;  %v1635_v11 = vld [vmem:[%s7573_s28 + $0x358] sm:$0xff]  ;;  %v1632_v16 = vld [vmem:[%s7573_s28 + $0x340] sm:$0xff] }
 0x1b4   : > { %1788 = vmatprep.subr.bf16.mxu0 %v1697_v18  ;;  %1829 = vmatprep.subr.bf16.mxu1 %v1699_v19  ;;  %v1777_v54 = vunpack.c.h.s8.bf16 %v1649_v52  ;;  %v1779_v55 = vunpack.c.h.s8.bf16 %v1651_v53  ;;  %v1776_v58 = vunpack.c.h.s8.bf16 %v1648_v56  ;;  %v1778_v59 = vunpack.c.h.s8.bf16 %v1650_v57  ;;  %v1634_v17 = vld [vmem:[%s7573_s28 + $0x350] sm:$0xff]  ;;  %v1624_v28 = vld [vmem:[%s7573_s28 + $0x300] sm:$0xff] }
 0x1b5   : > { %v1769_v60 = vunpack.c.l.s8.bf16 %v1649_v52  ;;  %v1771_v61 = vunpack.c.l.s8.bf16 %v1651_v53  ;;  %v1768_v62 = vunpack.c.l.s8.bf16 %v1648_v56  ;;  %v1770_v63 = vunpack.c.l.s8.bf16 %v1650_v57  ;;  %v1626_v29 = vld [vmem:[%s7573_s28 + $0x310] sm:$0xff] }
 0x1b6   : > { %6576 = vset.pattern.permute.xlu0 %v7034_v3  ;;  %v1761_v2 = vunpack.c.h.s8.bf16 %v1641_v0  ;;  %v1760_v6 = vunpack.c.h.s8.bf16 %v1640_v4  ;;  %v1762_v7 = vunpack.c.h.s8.bf16 %v1642_v5  ;;  %v1753_v8 = vunpack.c.l.s8.bf16 %v1641_v0 }
 0x1b7   : > { %955 = vperm.xlu0 %6576, %v926_v1   ;;  %1789 = vmatpush1.bf16.msra.mxu0 %v1696_v22  ;;  %v1643_v1 = vld [vmem:[%s7573_s28 + $0x398] sm:$0xff]  ;;  %v1752_v12 = vunpack.c.l.s8.bf16 %v1640_v4  ;;  %v1754_v13 = vunpack.c.l.s8.bf16 %v1642_v5  ;;  %v1745_v14 = vunpack.c.h.s8.bf16 %v1633_v10  ;;  %v1747_v15 = vunpack.c.h.s8.bf16 %v1635_v11  ;;  %v1625_v22 = vld [vmem:[%s7573_s28 + $0x308] sm:$0xff] }
 0x1b8   : > { %1830 = vmatpush1.bf16.msra.mxu1 %v1698_v23  ;;  %1790 = vmatprep.subr.bf16.mxu0 %v1689_v24  ;;  %v1763_v3 = vunpack.c.h.s8.bf16 %v1643_v1  ;;  %v1755_v9 = vunpack.c.l.s8.bf16 %v1643_v1  ;;  %v1744_v18 = vunpack.c.h.s8.bf16 %v1632_v16  ;;  %v1746_v19 = vunpack.c.h.s8.bf16 %v1634_v17  ;;  %v1627_v23 = vld [vmem:[%s7573_s28 + $0x318] sm:$0xff] }
 0x1b9   : > { %1831 = vmatprep.subr.bf16.mxu1 %v1691_v25  ;;  %v1737_v20 = vunpack.c.l.s8.bf16 %v1633_v10  ;;  %v1739_v21 = vunpack.c.l.s8.bf16 %v1635_v11  ;;  %v1736_v24 = vunpack.c.l.s8.bf16 %v1632_v16  ;;  %v1738_v25 = vunpack.c.l.s8.bf16 %v1634_v17 }
 0x1ba   : > { %v1721_v32 = vunpack.c.l.s8.bf16 %v1625_v22  ;;  %v1723_v33 = vunpack.c.l.s8.bf16 %v1627_v23  ;;  %v934_v40 = vlaneseq }
 0x1bb   : > { %1791 = vmatpush1.bf16.msra.mxu0 %v1688_v26  ;;  %v1729_v26 = vunpack.c.h.s8.bf16 %v1625_v22 }
 0x1bc   : > { %1832 = vmatpush1.bf16.msra.mxu1 %v1690_v27  ;;  %1792 = vmatprep.subr.bf16.mxu0 %v1681_v30  ;;  %v1731_v27 = vunpack.c.h.s8.bf16 %v1627_v23  ;;  %v1728_v30 = vunpack.c.h.s8.bf16 %v1624_v28  ;;  %v7666_v41 = vshrl.u32 %v934_v40, 7  ;;  %v7040_v40 = vmov 1326507024  }
 0x1bd   : > { %1833 = vmatprep.subr.bf16.mxu1 %v1683_v31  ;;  %v1730_v31 = vunpack.c.h.s8.bf16 %v1626_v29 }
 0x1be   : > { %v7675_v44 = vsub.s32 1, %v7666_v41  ;;  %v7678_v45 = vsub.s32 3, %v7666_v41 }
 0x1bf   : > { %1793 = vmatpush1.bf16.msra.mxu0 %v1680_v34  ;;  %v1720_v34 = vunpack.c.l.s8.bf16 %v1624_v28 }
 0x1c0   : > { %1834 = vmatpush1.bf16.msra.mxu1 %v1682_v35  ;;  %1794 = vmatprep.subr.bf16.mxu0 %v1673_v36  ;;  %v1722_v35 = vunpack.c.l.s8.bf16 %v1626_v29  ;;  %v7659_v36 = vld [vmem:[%s7573_s28 + $0x2e8] sm:$0xff]  ;;  %v7038_v29 = vmov 2102212464  }
 0x1c1   : > { %1835 = vmatprep.subr.bf16.mxu1 %v1675_v37  ;;  %v7662_v37 = vld [vmem:[%s7573_s28 + $0x2f8] sm:$0xff] }
 0x1c3   : > { %1795 = vmatpush1.bf16.msra.mxu0 %v1672_v38  ;;  %v1717_v38 = vunpack.c.h.s8.bf16 %v7659_v36 }
 0x1c4   : > { %1836 = vmatpush1.bf16.msra.mxu1 %v1674_v39  ;;  %1796 = vmatprep.subr.bf16.mxu0 %v1665_v42  ;;  %v1719_v39 = vunpack.c.h.s8.bf16 %v7662_v37  ;;  %v7669_v42 = vsub.s32 0, %v7666_v41 }
 0x1c5   : > { %1837 = vmatprep.subr.bf16.mxu1 %v1667_v43  ;;  %v7672_v43 = vsub.s32 2, %v7666_v41 }
 0x1c7   : > { %1797 = vmatpush1.bf16.msra.mxu0 %v1664_v46  ;;  %v927_v46 = vld [vmem:[%s710_s17] sm:$0xf]  ;;  %s6091_s17 = sshll.u32 %s7041_s27, 4  ;;  %s6092_s17 = int_to_ptr.vmem [resolvable:$true] %s6091_s17 }
 0x1c8   : > { %1838 = vmatpush1.bf16.msra.mxu1 %v1666_v47  ;;  %1798 = vmatprep.subr.bf16.mxu0 %v1657_v48  ;;  %v937_v47 = vrot.slane %v927_v46, %v7669_v42  ;;  %v941_v48 = vrot.slane %v927_v46, %v7672_v43  ;;  %s6927_s25 = scalar_lea.vmem %s6092_s17, 512  ;;  %p6934_p2 = scmp.lt.s32.totalorder %s6092_s17, %s6092_s17 }
 0x1c9   : > { %1839 = vmatprep.subr.bf16.mxu1 %v1659_v49  ;;  %v961_v49 = vrot.slane %v927_v46, %v7675_v44  ;;  %p6928_p13 = scmp.ne.s32.totalorder %s6092_s17, %s6927_s25  ;;  %p6935_p3 = scmp.lt.s32.totalorder %s6927_s25, %s6927_s25 }
 0x1ca   : > { %v947_v52 = vrot.slane %v937_v47, %v7669_v42  ;;  %v951_v53 = vrot.slane %v941_v48, %v7669_v42 }
 0x1cb   : > { %1799 = vmatpush1.bf16.msra.mxu0 %v1656_v50  ;;  %v965_v50 = vrot.slane %v927_v46, %v7678_v45  ;;  %p6929_p0 = pnand %p6928_p13, %p6527_p6  ;;  %p6936_p5 = por %p6935_p3, %p6934_p2 }
 0x1cc   : > { %1840 = vmatpush1.bf16.msra.mxu1 %v1658_v51  ;;  %1800 = vmatprep.subr.bf16.mxu0 %v1777_v54  ;;  %v971_v54 = vrot.slane %v961_v49, %v7675_v44 }
 0x1cd   : > { %1841 = vmatprep.subr.bf16.mxu1 %v1779_v55  ;;  %v975_v55 = vrot.slane %v965_v50, %v7675_v44  ;;  %p6930_p1 = pneg %p6929_p0 }
 0x1cf   : > { %1801 = vmatpush2.bf16.msra.mxu0 %v1776_v58  ;;  %p6937_p7 = pnand %p6936_p5, %p6930_p1 }
 0x1d0   : > { %1842 = vmatpush2.bf16.msra.mxu1 %v1778_v59  ;;  %1802 = vmatprep.subr.bf16.mxu0 %v1769_v60 }
 0x1d1   : > { %1843 = vmatprep.subr.bf16.mxu1 %v1771_v61 }
 0x1d3   : > { %1803 = vmatpush2.bf16.msra.mxu0 %v1768_v62 }
 0x1d4   : > { %1844 = vmatpush2.bf16.msra.mxu1 %v1770_v63  ;;  %1804 = vmatprep.subr.bf16.mxu0 %v1761_v2 }
 0x1d5   : > { %1845 = vmatprep.subr.bf16.mxu1 %v1763_v3 }
 0x1d7   : > { %1805 = vmatpush2.bf16.msra.mxu0 %v1760_v6 }
 0x1d8   : > { %1846 = vmatpush2.bf16.msra.mxu1 %v1762_v7  ;;  %1806 = vmatprep.subr.bf16.mxu0 %v1753_v8 }
 0x1d9   : > { %1847 = vmatprep.subr.bf16.mxu1 %v1755_v9 }
 0x1db   : > { %1807 = vmatpush2.bf16.msra.mxu0 %v1752_v12 }
 0x1dc   : > { %1848 = vmatpush2.bf16.msra.mxu1 %v1754_v13  ;;  %1808 = vmatprep.subr.bf16.mxu0 %v1745_v14 }
 0x1dd   : > { %1849 = vmatprep.subr.bf16.mxu1 %v1747_v15 }
 0x1df   : > { %1809 = vmatpush2.bf16.msra.mxu0 %v1744_v18 }
 0x1e0   : > { %1850 = vmatpush2.bf16.msra.mxu1 %v1746_v19  ;;  %1810 = vmatprep.subr.bf16.mxu0 %v1737_v20 }
 0x1e1   : > { %1851 = vmatprep.subr.bf16.mxu1 %v1739_v21  ;;  %v7035_v21 = vmov 683565275  }
 0x1e3   : > { %1811 = vmatpush2.bf16.msra.mxu0 %v1736_v24 }
 0x1e4   : > { %1852 = vmatpush2.bf16.msra.mxu1 %v1738_v25  ;;  %1812 = vmatprep.subr.bf16.mxu0 %v1729_v26  ;;  %v7036_v25 = vmov 2475754826  }
 0x1e5   : > { %1853 = vmatprep.subr.bf16.mxu1 %v1731_v27  ;;  %v7037_v27 = vmov 2131351028  }
 0x1e7   : > { %1813 = vmatpush2.bf16.msra.mxu0 %v1728_v30 }
 0x1e8   : > { %1854 = vmatpush2.bf16.msra.mxu1 %v1730_v31  ;;  %1814 = vmatprep.subr.bf16.mxu0 %v1721_v32  ;;  %v7039_v31 = vmov 920167782  }
 0x1e9   : > { %1855 = vmatprep.subr.bf16.mxu1 %v1723_v33 }
 0x1eb   : > { %1815 = vmatpush2.bf16.msra.mxu0 %v1720_v34 }
 0x1ec   : > { %1856 = vmatpush2.bf16.msra.mxu1 %v1722_v35  ;;  %1866 = vmatprep.subr.bf16.mxu0 %v1717_v38 }
 0x1ed   : > { %1907 = vmatprep.subr.bf16.mxu1 %v1719_v39 }
 0x22d   : > { %v931_v51 = vpop.permute.xlu0 %930 }
 0x22e   : > { %v952_v57 = vmul.f32 %v947_v52, %v931_v51  ;;  %v953_v58 = vmul.f32 %v951_v53, %v931_v51 }
 0x232   : > { %v956_v56 = vpop.permute.xlu0 %955 }
 0x233   : > { %v976_v59 = vmul.f32 %v971_v54, %v956_v56  ;;  %v977_v60 = vmul.f32 %v975_v55, %v956_v56 }
 0x235   : > { %v978_v61 = vadd.f32 %v976_v59, %v952_v57  ;;  %v979_v62 = vadd.f32 %v977_v60, %v953_v58 }
 0x237   : > { %v7690_v63 = vmul.f32 6.2831855, %v978_v61  ;;  %v7692_v0 = vmul.f32 6.2831855, %v979_v62 }
 0x239   : > { %v982_v1 = vand.u32 2147483647, %v7690_v63  ;;  %v985_v2 = vand.u32 2139095040, %v7690_v63  ;;  %v1088_v3 = vand.u32 2139095040, %v7692_v0  ;;  %v1085_v6 = vand.u32 2147483647, %v7692_v0 }
 0x23a   : > { %vm984_vm14 = vcmp.lt.s32.totalorder %v7690_v63, 0 }
 0x23b   : > { %v986_v4 = vshrl.u32 %v985_v2, 23  ;;  %v989_v5 = vand.u32 8388607, %v982_v1  ;;  %v1089_v7 = vshrl.u32 %v1088_v3, 23  ;;  %v7702_v12 = vand.u32 8388607, %v1085_v6 }
 0x23c   : > { %vm7745_vm15 = vcmp.le.f32.partialorder %v982_v1, 0.7853982 }
 0x23d   : > { %v6456_v8 = vadd.s32 4294967169, %v986_v4  ;;  %v6460_v9 = vadd.s32 4294967169, %v1089_v7  ;;  %v990_v11 = vor.u32 8388608, %v989_v5  ;;  %v1093_v19 = vor.u32 8388608, %v7702_v12 }
 0x23f   : > { %v992_v10 = vadd.s32 1, %v6456_v8  ;;  %v1095_v13 = vadd.s32 1, %v6460_v9  ;;  %v7704_v18 = vshll.u32 %v990_v11, 8 }
 0x241   : > { %vm993_vm0 = vcmp.gt.s32.totalorder %v992_v10, 0  ;;  %vm1096_vm1 = vcmp.gt.s32.totalorder %v1095_v13, 0 }
 0x242   : > { %v994_v14 = vsel %vm993_vm0, %v992_v10, 0  ;;  %v1097_v17 = vsel %vm1096_vm1, %v1095_v13, 0  ;;  %vm1087_vm0 = vcmp.lt.s32.totalorder %v7692_v0, 0  ;;  %vm1086_vm1 = vcmp.le.f32.partialorder %v1085_v6, 0.7853982 }
 0x243   : > { %v995_v15 = vshrl.u32 %v994_v14, 5  ;;  %v996_v16 = vand.u32 31, %v994_v14  ;;  %v7707_v23 = vshrl.u32 %v1097_v17, 5  ;;  %v1099_v24 = vand.u32 31, %v1097_v17 }
 0x245   : > { %v997_v20 = vsub.s32 32, %v996_v16  ;;  %v999_v22 = vshll.u32 %v7035_v21, %v996_v16  ;;  %v1002_v26 = vshll.u32 %v7036_v25, %v996_v16  ;;  %v1005_v28 = vshll.u32 %v7037_v27, %v996_v16 }
 0x246   : > { %v1008_v30 = vshll.u32 %v7038_v29, %v996_v16  ;;  %v1011_v32 = vshll.u32 %v7039_v31, %v996_v16  ;;  %vm1014_vm2 = vcmp.lt.s32.totalorder %v995_v15, 1  ;;  %vm1015_vm3 = vcmp.lt.s32.totalorder %v995_v15, 2 }
 0x247   : > { %v1000_v33 = vshrl.u32 %v7036_v25, %v997_v20  ;;  %v1003_v34 = vshrl.u32 %v7037_v27, %v997_v20  ;;  %v1006_v35 = vshrl.u32 %v7038_v29, %v997_v20  ;;  %v998_v38 = vshrl.u32 %v7035_v21, %v997_v20 }
 0x248   : > { %v1009_v39 = vshrl.u32 %v7039_v31, %v997_v20  ;;  %v1012_v46 = vshrl.u32 %v7040_v40, %v997_v20  ;;  %v1100_v50 = vsub.s32 32, %v1099_v24  ;;  %vm1016_vm4 = vcmp.lt.s32.totalorder %v995_v15, 3 }
 0x249   : > { %v1001_v47 = vor.u32 %v1000_v33, %v999_v22  ;;  %v1004_v48 = vor.u32 %v1003_v34, %v1002_v26  ;;  %v1007_v49 = vor.u32 %v1006_v35, %v1005_v28  ;;  %vm1017_vm5 = vcmp.lt.s32.totalorder %v995_v15, 4 }
 0x24a   : > { %v1010_v51 = vor.u32 %v1009_v39, %v1008_v30  ;;  %v1013_v52 = vor.u32 %v1012_v46, %v1011_v32  ;;  %v1102_v60 = vshll.u32 %v7035_v21, %v1099_v24  ;;  %v1103_v2 = vshrl.u32 %v7036_v25, %v1100_v50 }
 0x24b   : > { %v1018_v53 = vsel %vm1014_vm2, %v998_v38, %v1001_v47  ;;  %v1019_v54 = vsel %vm1017_vm5, %v1007_v49, 2102212464  ;;  %v1022_v55 = vsel %vm1014_vm2, %v1001_v47, %v1004_v48  ;;  %v1026_v56 = vsel %vm1014_vm2, %v1004_v48, %v1007_v49 }
 0x24c   : > { %v1020_v57 = vsel %vm1016_vm4, %v1004_v48, %v1019_v54  ;;  %v1023_v58 = vsel %vm1017_vm5, %v1010_v51, 920167782  ;;  %v1027_v59 = vsel %vm1017_vm5, %v1013_v52, 1326507024  ;;  %v1105_v3 = vshll.u32 %v7036_v25, %v1099_v24 }
 0x24d   : > { %v1024_v61 = vsel %vm1016_vm4, %v1007_v49, %v1023_v58  ;;  %v1028_v62 = vsel %vm1016_vm4, %v1010_v51, %v1027_v59  ;;  %v1021_v4 = vsel %vm1015_vm3, %v1018_v53, %v1020_v57  ;;  %v1106_v8 = vshrl.u32 %v7037_v27, %v1100_v50 }
 0x24e   : > { %v1025_v5 = vsel %vm1015_vm3, %v1022_v55, %v1024_v61  ;;  %v1029_v7 = vsel %vm1015_vm3, %v1026_v56, %v1028_v62  ;;  %v1104_v13 = vor.u32 %v1103_v2, %v1102_v60  ;;  %v1108_v16 = vshll.u32 %v7037_v27, %v1099_v24 }
 0x24f   : > { %v7716_v9 = vmul.u32.u64.low %v7704_v18, %v1029_v7  ;;  %v7717_v10 = vmul.u32.u64.high %v7704_v18, %v1029_v7, %v7716_v9  ;;  %v7720_v11 = vmul.u32.u64.low %v7704_v18, %v1025_v5  ;;  %v7721_v12 = vmul.u32.u64.high %v7704_v18, %v1025_v5, %v7720_v11 }
 0x250   : > { %v1107_v14 = vor.u32 %v1106_v8, %v1105_v3  ;;  %v1109_v17 = vshrl.u32 %v7038_v29, %v1100_v50  ;;  %v1111_v20 = vshll.u32 %v7038_v29, %v1099_v24  ;;  %v1112_v22 = vshrl.u32 %v7039_v31, %v1100_v50 }
 0x251   : > { %v1115_v25 = vshrl.u32 %v7040_v40, %v1100_v50  ;;  %v1133_v26 = vshll.u32 %v1093_v19, 8  ;;  %v1037_v15 = vmul.u32 %v7704_v18, %v1021_v4  ;;  %v1101_v28 = vshrl.u32 %v7035_v21, %v1100_v50 }
 0x252   : > { %v1110_v30 = vor.u32 %v1109_v17, %v1108_v16  ;;  %v1114_v32 = vshll.u32 %v7039_v31, %v1099_v24  ;;  %vm1039_vm6 = vc.u32 %v7717_v10, %v7720_v11  ;;  %v1040_v33 = vadd.s32 1, %v7721_v12 }
 0x253   : > { %v1113_v34 = vor.u32 %v1112_v22, %v1111_v20  ;;  %vm1117_vm7 = vcmp.lt.s32.totalorder %v7707_v23, 1  ;;  %vm1119_vm8 = vcmp.lt.s32.totalorder %v7707_v23, 3  ;;  %vm1120_vm9 = vcmp.lt.s32.totalorder %v7707_v23, 4 }
 0x254   : > { %v1116_v35 = vor.u32 %v1115_v25, %v1114_v32  ;;  %v1125_v27 = vsel %vm1117_vm7, %v1104_v13, %v1107_v14  ;;  %v1041_v19 = vsel %vm1039_vm6, %v1040_v33, %v7721_v12  ;;  %v1122_v29 = vsel %vm1120_vm9, %v1110_v30, 2102212464 }
 0x255   : > { %v1126_v18 = vsel %vm1120_vm9, %v1113_v34, 920167782  ;;  %v1129_v21 = vsel %vm1117_vm7, %v1107_v14, %v1110_v30  ;;  %v1042_v38 = vadd.s32 %v1041_v19, %v1037_v15  ;;  %vm1118_vm10 = vcmp.lt.s32.totalorder %v7707_v23, 2 }
 0x256   : > { %v1127_v24 = vsel %vm1119_vm8, %v1110_v30, %v1126_v18  ;;  %v1130_v31 = vsel %vm1120_vm9, %v1116_v35, 1326507024  ;;  %v1121_v39 = vsel %vm1117_vm7, %v1101_v28, %v1104_v13  ;;  %v1123_v40 = vsel %vm1119_vm8, %v1107_v14, %v1122_v29 }
 0x257   : > { %v1128_v46 = vsel %vm1118_vm10, %v1125_v27, %v1127_v24  ;;  %v1131_v47 = vsel %vm1119_vm8, %v1113_v34, %v1130_v31  ;;  %v1043_v48 = vadd.s32 536870912, %v1042_v38  ;;  %v1124_v55 = vsel %vm1118_vm10, %v1121_v39, %v1123_v40 }
 0x258   : > { %v1132_v49 = vsel %vm1118_vm10, %v1129_v21, %v1131_v47  ;;  %v7731_v50 = vmul.u32.u64.low %v1133_v26, %v1128_v46  ;;  %v7732_v51 = vmul.u32.u64.high %v1133_v26, %v1128_v46, %v7731_v50  ;;  %v1140_v23 = vmul.u32 %v1133_v26, %v1124_v55 }
 0x259   : > { %v7734_v52 = vmul.u32.u64.low %v1133_v26, %v1132_v49  ;;  %v7735_v53 = vmul.u32.u64.high %v1133_v26, %v1132_v49, %v7734_v52  ;;  %v1044_v54 = vshrl.u32 %v1043_v48, 30  ;;  %v1038_v13 = vadd.s32 %v7720_v11, %v7717_v10 }
 0x25a   : > { %v1143_v57 = vadd.s32 1, %v7732_v51  ;;  %vm1074_vm7 = vweird.f32 %v7690_v63 }
 0x25b   : > { %v1045_v56 = vshll.u32 %v1044_v54, 30  ;;  %vm1142_vm11 = vc.u32 %v7735_v53, %v7731_v50  ;;  %v1141_v27 = vadd.s32 %v7731_v50, %v7735_v53  ;;  %v1068_v48 = vsub.s32 4, %v1044_v54 }
 0x25c   : > { %v1144_v59 = vsel %vm1142_vm11, %v1143_v57, %v7732_v51 }
 0x25d   : > { %v1046_v58 = vsub.s32 %v1042_v38, %v1045_v56  ;;  %v1145_v60 = vadd.s32 %v1144_v59, %v1140_v23  ;;  %v1069_v52 = vsel %vm984_vm14, %v1068_v48, %v1044_v54 }
 0x25e   : > { %v1071_v56 = vsel %vm7745_vm15, 0, %v1069_v52  ;;  %v1607_v52 = vld [vmem:[%s7573_s28 + $0x278] sm:$0xff] }
 0x25f   : > { %v1048_v61 = vsub.s32 0, %v1046_v58  ;;  %v1146_v62 = vadd.s32 536870912, %v1145_v60  ;;  %v1075_v59 = vand.u32 3, %v1071_v56 }
 0x261   : > { %v6457_v2 = vmin.u32 %v1048_v61, %v1046_v58  ;;  %v1147_v3 = vshrl.u32 %v1146_v62, 30  ;;  %vm1080_vm2 = vcmp.eq.s32.totalorder %v1075_v59, 2  ;;  %vm1077_vm3 = vcmp.eq.s32.totalorder %v1075_v59, 0 }
 0x262   : > { %vm1076_vm6 = vcmp.lt.s32.totalorder %v1075_v59, 2 }
 0x263   : > { %v1050_v4 = vclz %v6457_v2  ;;  %v1148_v5 = vshll.u32 %v1147_v3, 30  ;;  %v1171_v1 = vsub.s32 4, %v1147_v3 }
 0x265   : > { %v6458_v7 = vadd.s32 4294967294, %v1050_v4  ;;  %v1149_v8 = vsub.s32 %v1145_v60, %v1148_v5  ;;  %v1172_v23 = vsel %vm1087_vm0, %v1171_v1, %v1147_v3 }
 0x266   : > { %v1174_v54 = vsel %vm1086_vm1, 0, %v1172_v23  ;;  %v1606_v23 = vld [vmem:[%s7573_s28 + $0x270] sm:$0xff] }
 0x267   : > { %vm6459_vm12 = vcmp.lt.s32.totalorder %v6458_v7, 0  ;;  %v1151_v12 = vsub.s32 0, %v1149_v8  ;;  %v1387_v5 = vadd.s32 3, %v1174_v54  ;;  %v1686_v59 = vunpack.c.h.s8.bf16 %v1606_v23 }
 0x268   : > { %v1053_v9 = vsel %vm6459_vm12, 0, %v6458_v7 }
 0x269   : > { %v1054_v14 = vsub.s32 32, %v1053_v9  ;;  %v1058_v16 = vsub.s32 4294967266, %v1053_v9  ;;  %v6461_v17 = vmin.u32 %v1151_v12, %v1149_v8  ;;  %v1055_v20 = vshll.u32 %v1046_v58, %v1053_v9 }
 0x26a   : > { %v1283_v58 = vadd.s32 3, %v1071_v56  ;;  %v1388_v12 = vand.u32 3, %v1387_v5  ;;  %v1687_v56 = vunpack.c.h.s8.bf16 %v1607_v52 }
 0x26b   : > { %v1056_v22 = vshrl.u32 %v1038_v13, %v1054_v14  ;;  %v1059_v25 = vadd.s32 127, %v1058_v16  ;;  %v1153_v26 = vclz %v6461_v17  ;;  %v1178_v13 = vand.u32 3, %v1174_v54 }
 0x26c   : > { %v1284_v2 = vand.u32 3, %v1283_v58  ;;  %vm1393_vm9 = vcmp.eq.s32.totalorder %v1388_v12, 2  ;;  %vm1390_vm12 = vcmp.eq.s32.totalorder %v1388_v12, 0  ;;  %v1679_v54 = vunpack.c.l.s8.bf16 %v1607_v52 }
 0x26d   : > { %v1057_v15 = vor.u32 %v1056_v22, %v1055_v20  ;;  %v1060_v28 = vshll.u32 %v1059_v25, 23  ;;  %v6462_v30 = vadd.s32 4294967294, %v1153_v26  ;;  %vm1180_vm10 = vcmp.eq.s32.totalorder %v1178_v13, 0 }
 0x26e   : > { %vm1286_vm4 = vcmp.eq.s32.totalorder %v1284_v2, 0  ;;  %vm1289_vm5 = vcmp.eq.s32.totalorder %v1284_v2, 2  ;;  %vm1285_vm8 = vcmp.lt.s32.totalorder %v1284_v2, 2  ;;  %vm1183_vm11 = vcmp.eq.s32.totalorder %v1178_v13, 2 }
 0x26f   : > { %v1061_v32 = vor.u32 4788187, %v1060_v28  ;;  %vm6463_vm13 = vcmp.lt.s32.totalorder %v6462_v30, 0  ;;  %v1064_v34 = vcvt.s32.f32 %v1057_v15 }
 0x270   : > { %v1156_v35 = vsel %vm6463_vm13, 0, %v6462_v30  ;;  %vm1389_vm13 = vcmp.lt.s32.totalorder %v1388_v12, 2 }
 0x271   : > { %v1062_v33 = vand.u32 2147483647, %v1061_v32  ;;  %v1157_v19 = vsub.s32 32, %v1156_v35  ;;  %v1161_v29 = vsub.s32 4294967266, %v1156_v35  ;;  %v1158_v11 = vshll.u32 %v1149_v8, %v1156_v35  ;;  %v1620_v32 = vld [vmem:[%s7573_s28 + $0x2e0] sm:$0xff] }
 0x273   : > { %v1065_v10 = vmul.f32 %v1064_v34, %v1062_v33  ;;  %v1159_v18 = vshrl.u32 %v1141_v27, %v1157_v19  ;;  %v1162_v21 = vadd.s32 127, %v1161_v29  ;;  %v1622_v33 = vld [vmem:[%s7573_s28 + $0x2f0] sm:$0xff] }
 0x274   : > { %v1710_v39 = vunpack.c.l.s8.bf16 %v1622_v33 }
 0x275   : > { %v1066_v38 = vxor.u32 2147483648, %v1065_v10  ;;  %v1160_v24 = vor.u32 %v1159_v18, %v1158_v11  ;;  %v1163_v31 = vshll.u32 %v1162_v21, 23  ;;  %v1716_v11 = vunpack.c.h.s8.bf16 %v1620_v32 }
 0x276   : > { %v1718_v18 = vunpack.c.h.s8.bf16 %v1622_v33  ;;  %v1709_v21 = vunpack.c.l.s8.bf16 %v7659_v36  ;;  %v1614_v36 = vld [vmem:[%s7573_s28 + $0x2b0] sm:$0xff] }
 0x277   : > { %v1067_v40 = vsel %vm984_vm14, %v1066_v38, %v1065_v10  ;;  %v1164_v47 = vor.u32 4788187, %v1163_v31  ;;  %v1167_v50 = vcvt.s32.f32 %v1160_v24  ;;  %vm1179_vm14 = vcmp.lt.s32.totalorder %v1178_v13, 2  ;;  %v1613_v24 = vld [vmem:[%s7573_s28 + $0x2a8] sm:$0xff] }
 0x278   : > { %v1070_v46 = vsel %vm7745_vm15, %v7690_v63, %v1067_v40  ;;  %vm1177_vm15 = vweird.f32 %v7692_v0  ;;  %v1711_v38 = vunpack.c.l.s8.bf16 %v7662_v37  ;;  %v1708_v31 = vunpack.c.l.s8.bf16 %v1620_v32 }
 0x279   : > { %6577 = vcosq.f32 %v1070_v46  ;;  %v1165_v49 = vand.u32 2147483647, %v1164_v47  ;;  %v1701_v40 = vunpack.c.h.s8.bf16 %v1613_v24  ;;  %v1612_v47 = vld [vmem:[%s7573_s28 + $0x2a0] sm:$0xff]  ;;  %v1702_v48 = vunpack.c.h.s8.bf16 %v1614_v36 }
 0x27a   : > { %6579 = vsinq.f32 %v1070_v46  ;;  %v1700_v37 = vunpack.c.h.s8.bf16 %v1612_v47  ;;  %v1694_v1 = vunpack.c.l.s8.bf16 %v1614_v36 }
 0x27b   : > { %v1168_v51 = vmul.f32 %v1167_v50, %v1165_v49  ;;  %v1693_v49 = vunpack.c.l.s8.bf16 %v1613_v24 }
 0x27d   : > { %v1169_v53 = vxor.u32 2147483648, %v1168_v51 }
 0x27f   : > { %v1170_v55 = vsel %vm1087_vm0, %v1169_v53, %v1168_v51  ;;  %v1605_v51 = vld [vmem:[%s7573_s28 + $0x268] sm:$0xff]  ;;  %v1692_v53 = vunpack.c.l.s8.bf16 %v1612_v47 }
 0x280   : > { %v1173_v57 = vsel %vm1086_vm1, %v7692_v0, %v1170_v55  ;;  %v1615_v0 = vld [vmem:[%s7573_s28 + $0x2b8] sm:$0xff]  ;;  %v1685_v55 = vunpack.c.h.s8.bf16 %v1605_v51 }
 0x281   : > { %6581 = vcosq.f32 %v1173_v57  ;;  %v1703_v46 = vunpack.c.h.s8.bf16 %v1615_v0  ;;  %v1695_v50 = vunpack.c.l.s8.bf16 %v1615_v0 }
 0x282   : > { %6583 = vsinq.f32 %v1173_v57  ;;  %v1604_v57 = vld [vmem:[%s7573_s28 + $0x260] sm:$0xff] }
 0x283   : > { %v1684_v58 = vunpack.c.h.s8.bf16 %v1604_v57  ;;  %v1676_v2 = vunpack.c.l.s8.bf16 %v1604_v57 }
 0x286   : > { %v6578_v60 = vpop.eup %6577 }
 0x287   : > { %v6580_v61 = vpop.eup %6579  ;;  %v1081_v62 = vxor.u32 2147483648, %v6578_v60 }
 0x288   : > { %v1078_v4 = vxor.u32 2147483648, %v6580_v61 }
 0x289   : > { %v1082_v6 = vsel %vm1080_vm2, %v1081_v62, %v6580_v61  ;;  %v1291_v8 = vsel %vm1289_vm5, %v1081_v62, %v6580_v61  ;;  %v1597_v61 = vld [vmem:[%s7573_s28 + $0x228] sm:$0xff]  ;;  %v1599_v62 = vld [vmem:[%s7573_s28 + $0x238] sm:$0xff] }
 0x28a   : > { %v1079_v7 = vsel %vm1077_vm3, %v6578_v60, %v1078_v4  ;;  %v1288_v3 = vsel %vm1286_vm4, %v6578_v60, %v1078_v4  ;;  %v1677_v60 = vunpack.c.l.s8.bf16 %v1605_v51  ;;  %v1678_v4 = vunpack.c.l.s8.bf16 %v1606_v23 }
 0x28b   : > { %v1083_v9 = vsel %vm1076_vm6, %v1079_v7, %v1082_v6  ;;  %v1292_v17 = vsel %vm1285_vm8, %v1288_v3, %v1291_v8  ;;  %v1669_v5 = vunpack.c.h.s8.bf16 %v1597_v61  ;;  %v1671_v6 = vunpack.c.h.s8.bf16 %v1599_v62  ;;  %v1596_v7 = vld [vmem:[%s7573_s28 + $0x220] sm:$0xff]  ;;  %v1598_v3 = vld [vmem:[%s7573_s28 + $0x230] sm:$0xff] }
 0x28c   : > { %v7761_v14 = vsel %vm1074_vm7, nan, %v1083_v9  ;;  %v1293_v15 = vsel %vm1074_vm7, nan, %v1292_v17  ;;  %v1668_v8 = vunpack.c.h.s8.bf16 %v1596_v7  ;;  %v1670_v9 = vunpack.c.h.s8.bf16 %v1598_v3  ;;  %v1655_v17 = vld [vmem:[%s7573_s28 + $0x3f8] sm:$0xff] }
 0x28d   : > { %v7768_v29 = vpack.c.bf16 %v1293_v15, %v1293_v15  ;;  %v1661_v12 = vunpack.c.l.s8.bf16 %v1597_v61  ;;  %v1663_v13 = vunpack.c.l.s8.bf16 %v1599_v62  ;;  %v1652_v15 = vld [vmem:[%s7573_s28 + $0x3e0] sm:$0xff] }
 0x28e   : > { %v6582_v16 = vpop.eup %6581 }
 0x28f   : > { %v6584_v20 = vpop.eup %6583  ;;  %v1184_v22 = vxor.u32 2147483648, %v6582_v16 }
 0x290   : > { %v1181_v25 = vxor.u32 2147483648, %v6584_v20 }
 0x291   : > { %v1395_v26 = vsel %vm1393_vm9, %v1184_v22, %v6584_v20  ;;  %v1185_v28 = vsel %vm1183_vm11, %v1184_v22, %v6584_v20  ;;  %v1660_v20 = vunpack.c.l.s8.bf16 %v1596_v7  ;;  %v1662_v22 = vunpack.c.l.s8.bf16 %v1598_v3 }
 0x292   : > { %v1392_v30 = vsel %vm1390_vm12, %v6582_v16, %v1181_v25  ;;  %v1182_v34 = vsel %vm1180_vm10, %v6582_v16, %v1181_v25  ;;  %v1653_v16 = vld [vmem:[%s7573_s28 + $0x3e8] sm:$0xff] }
 0x293   : > { %v1396_v35 = vsel %vm1389_vm13, %v1392_v30, %v1395_v26  ;;  %v1186_v27 = vsel %vm1179_vm14, %v1182_v34, %v1185_v28  ;;  %v1781_v25 = vunpack.c.h.s8.bf16 %v1653_v16  ;;  %v1783_v26 = vunpack.c.h.s8.bf16 %v1655_v17  ;;  %v1654_v28 = vld [vmem:[%s7573_s28 + $0x3f0] sm:$0xff] }
 0x294   : > { %v1397_v19 = vsel %vm1177_vm15, nan, %v1396_v35  ;;  %v7770_v10 = vsel %vm1177_vm15, nan, %v1186_v27  ;;  %v1780_v30 = vunpack.c.h.s8.bf16 %v1652_v15  ;;  %v1782_v32 = vunpack.c.h.s8.bf16 %v1654_v28  ;;  %v1645_v35 = vld [vmem:[%s7573_s28 + $0x3a8] sm:$0xff]  ;;  %v1647_v27 = vld [vmem:[%s7573_s28 + $0x3b8] sm:$0xff] }
 0x295   : > { %v1399_v63 = vpack.c.bf16 %v1397_v19, %v1397_v19  ;;  %v1773_v33 = vunpack.c.l.s8.bf16 %v1653_v16  ;;  %v1775_v34 = vunpack.c.l.s8.bf16 %v1655_v17  ;;  %v1772_v19 = vunpack.c.l.s8.bf16 %v1652_v15  ;;  %v1419_v15 = vld [vmem:[%s7573_s28 + $0x98] sm:$0xff] }
 0x297   : > { %1816 = vmatprep.mubr.bf16.mxu0 %v1399_v63  ;;  %1857 = vmatprep.mubr.bf16.mxu1 %v1399_v63 }
 0x298   : > { %1817 = vmatmul.mubr.bf16.vlgmr.msra.gmra.mxu0 %v7768_v29  ;;  %1858 = vmatmul.mubr.bf16.vlgmr.msra.gmra.mxu1 %v7768_v29 }
 0x299   : > { %1867 = vmatpush1.bf16.msra.mxu0 %v1716_v11  ;;  %1908 = vmatpush1.bf16.msra.mxu1 %v1718_v18  ;;  %v1765_v11 = vunpack.c.h.s8.bf16 %v1645_v35  ;;  %v1767_v18 = vunpack.c.h.s8.bf16 %v1647_v27 }
 0x29a   : > { %1898 = vmatprep.mubr.bf16.mxu0 %v1399_v63  ;;  %1939 = vmatprep.mubr.bf16.mxu1 %v1399_v63  ;;  %v1774_v63 = vunpack.c.l.s8.bf16 %v1654_v28 }
 0x29b   : > { %1868 = vmatprep.subr.bf16.mxu0 %v1709_v21  ;;  %1909 = vmatprep.subr.bf16.mxu1 %v1711_v38  ;;  %v1644_v21 = vld [vmem:[%s7573_s28 + $0x3a0] sm:$0xff]  ;;  %v1646_v38 = vld [vmem:[%s7573_s28 + $0x3b0] sm:$0xff] }
 0x29c   : > { %v1764_v24 = vunpack.c.h.s8.bf16 %v1644_v21  ;;  %v1766_v0 = vunpack.c.h.s8.bf16 %v1646_v38  ;;  %v1756_v47 = vunpack.c.l.s8.bf16 %v1644_v21  ;;  %v1758_v36 = vunpack.c.l.s8.bf16 %v1646_v38 }
 0x29d   : > { %1869 = vmatpush1.bf16.msra.mxu0 %v1708_v31  ;;  %1910 = vmatpush1.bf16.msra.mxu1 %v1710_v39  ;;  %v1757_v31 = vunpack.c.l.s8.bf16 %v1645_v35  ;;  %v1759_v39 = vunpack.c.l.s8.bf16 %v1647_v27 }
 0x29e   : > { %1870 = vmatprep.subr.bf16.mxu0 %v1701_v40  ;;  %1911 = vmatprep.subr.bf16.mxu1 %v1703_v46  ;;  %v1637_v40 = vld [vmem:[%s7573_s28 + $0x368] sm:$0xff]  ;;  %v1639_v46 = vld [vmem:[%s7573_s28 + $0x378] sm:$0xff] }
 0x2a1   : > { %1871 = vmatpush1.bf16.msra.mxu0 %v1700_v37  ;;  %1912 = vmatpush1.bf16.msra.mxu1 %v1702_v48  ;;  %v1749_v37 = vunpack.c.h.s8.bf16 %v1637_v40  ;;  %v1751_v48 = vunpack.c.h.s8.bf16 %v1639_v46 }
 0x2a2   : > { %1872 = vmatprep.subr.bf16.mxu0 %v1693_v49  ;;  %1913 = vmatprep.subr.bf16.mxu1 %v1695_v50  ;;  %v1636_v49 = vld [vmem:[%s7573_s28 + $0x360] sm:$0xff]  ;;  %v1638_v50 = vld [vmem:[%s7573_s28 + $0x370] sm:$0xff] }
 0x2a3   : > { %v1748_v51 = vunpack.c.h.s8.bf16 %v1636_v49  ;;  %v1750_v52 = vunpack.c.h.s8.bf16 %v1638_v50  ;;  %v1740_v57 = vunpack.c.l.s8.bf16 %v1636_v49  ;;  %v1742_v23 = vunpack.c.l.s8.bf16 %v1638_v50 }
 0x2a5   : > { %1873 = vmatpush1.bf16.msra.mxu0 %v1692_v53  ;;  %1914 = vmatpush1.bf16.msra.mxu1 %v1694_v1  ;;  %v1741_v53 = vunpack.c.l.s8.bf16 %v1637_v40  ;;  %v1743_v1 = vunpack.c.l.s8.bf16 %v1639_v46 }
 0x2a6   : > { %1874 = vmatprep.subr.bf16.mxu0 %v1685_v55  ;;  %1915 = vmatprep.subr.bf16.mxu1 %v1687_v56  ;;  %v1629_v55 = vld [vmem:[%s7573_s28 + $0x328] sm:$0xff]  ;;  %v1631_v56 = vld [vmem:[%s7573_s28 + $0x338] sm:$0xff] }
 0x2a9   : > { %1875 = vmatpush1.bf16.msra.mxu0 %v1684_v58  ;;  %1916 = vmatpush1.bf16.msra.mxu1 %v1686_v59  ;;  %v1733_v58 = vunpack.c.h.s8.bf16 %v1629_v55  ;;  %v1735_v59 = vunpack.c.h.s8.bf16 %v1631_v56 }
 0x2aa   : > { %1876 = vmatprep.subr.bf16.mxu0 %v1677_v60  ;;  %1917 = vmatprep.subr.bf16.mxu1 %v1679_v54  ;;  %v1628_v60 = vld [vmem:[%s7573_s28 + $0x320] sm:$0xff]  ;;  %v1630_v54 = vld [vmem:[%s7573_s28 + $0x330] sm:$0xff] }
 0x2ab   : > { %v1732_v61 = vunpack.c.h.s8.bf16 %v1628_v60  ;;  %v1734_v62 = vunpack.c.h.s8.bf16 %v1630_v54  ;;  %v1724_v7 = vunpack.c.l.s8.bf16 %v1628_v60  ;;  %v1726_v3 = vunpack.c.l.s8.bf16 %v1630_v54 }
 0x2ad   : > { %1877 = vmatpush1.bf16.msra.mxu0 %v1676_v2  ;;  %1918 = vmatpush1.bf16.msra.mxu1 %v1678_v4  ;;  %v1725_v2 = vunpack.c.l.s8.bf16 %v1629_v55  ;;  %v1727_v4 = vunpack.c.l.s8.bf16 %v1631_v56 }
 0x2ae   : > { %1878 = vmatprep.subr.bf16.mxu0 %v1669_v5  ;;  %1919 = vmatprep.subr.bf16.mxu1 %v1671_v6  ;;  %v1425_v5 = vld [vmem:[%s7573_s28 + $0xc8] sm:$0xff]  ;;  %v1427_v6 = vld [vmem:[%s7573_s28 + $0xd8] sm:$0xff] }
 0x2b1   : > { %1879 = vmatpush1.bf16.msra.mxu0 %v1668_v8  ;;  %1920 = vmatpush1.bf16.msra.mxu1 %v1670_v9  ;;  %v1521_v8 = vunpack.c.h.s8.bf16 %v1425_v5  ;;  %v1523_v9 = vunpack.c.h.s8.bf16 %v1427_v6 }
 0x2b2   : > { %1880 = vmatprep.subr.bf16.mxu0 %v1661_v12  ;;  %1921 = vmatprep.subr.bf16.mxu1 %v1663_v13  ;;  %v1424_v12 = vld [vmem:[%s7573_s28 + $0xc0] sm:$0xff]  ;;  %v1426_v13 = vld [vmem:[%s7573_s28 + $0xd0] sm:$0xff] }
 0x2b3   : > { %v1520_v16 = vunpack.c.h.s8.bf16 %v1424_v12  ;;  %v1522_v17 = vunpack.c.h.s8.bf16 %v1426_v13  ;;  %v1512_v28 = vunpack.c.l.s8.bf16 %v1424_v12 }
 0x2b5   : > { %1881 = vmatpush1.bf16.msra.mxu0 %v1660_v20  ;;  %1922 = vmatpush1.bf16.msra.mxu1 %v1662_v22  ;;  %v7810_v20 = vpack.c.bf16 %v7770_v10, %v7770_v10  ;;  %v1513_v22 = vunpack.c.l.s8.bf16 %v1425_v5 }
 0x2b6   : > { %1882 = vmatprep.subr.bf16.mxu0 %v1781_v25  ;;  %1923 = vmatprep.subr.bf16.mxu1 %v1783_v26  ;;  %v1515_v25 = vunpack.c.l.s8.bf16 %v1427_v6  ;;  %v1417_v26 = vld [vmem:[%s7573_s28 + $0x88] sm:$0xff] }
 0x2b7   : > { %v1505_v10 = vunpack.c.h.s8.bf16 %v1417_v26  ;;  %v1497_v27 = vunpack.c.l.s8.bf16 %v1417_v26 }
 0x2b9   : > { %1883 = vmatpush2.bf16.msra.mxu0 %v1780_v30  ;;  %1924 = vmatpush2.bf16.msra.mxu1 %v1782_v32  ;;  %v1514_v30 = vunpack.c.l.s8.bf16 %v1426_v13  ;;  %v1416_v32 = vld [vmem:[%s7573_s28 + $0x80] sm:$0xff] }
 0x2ba   : > { %1884 = vmatprep.subr.bf16.mxu0 %v1773_v33  ;;  %1925 = vmatprep.subr.bf16.mxu1 %v1775_v34  ;;  %v1507_v33 = vunpack.c.h.s8.bf16 %v1419_v15  ;;  %v1418_v34 = vld [vmem:[%s7573_s28 + $0x90] sm:$0xff] }
 0x2bb   : > { %v1506_v35 = vunpack.c.h.s8.bf16 %v1418_v34  ;;  %v1498_v21 = vunpack.c.l.s8.bf16 %v1418_v34 }
 0x2bd   : > { %1885 = vmatpush2.bf16.msra.mxu0 %v1772_v19  ;;  %1926 = vmatpush2.bf16.msra.mxu1 %v1774_v63  ;;  %v1499_v19 = vunpack.c.l.s8.bf16 %v1419_v15  ;;  %v1409_v63 = vld [vmem:[%s7573_s28 + $0x48] sm:$0xff] }
 0x2be   : > { %1886 = vmatprep.subr.bf16.mxu0 %v1765_v11  ;;  %1927 = vmatprep.subr.bf16.mxu1 %v1767_v18  ;;  %v1411_v11 = vld [vmem:[%s7573_s28 + $0x58] sm:$0xff]  ;;  %v1496_v18 = vunpack.c.l.s8.bf16 %v1416_v32  ;;  %v1489_v38 = vunpack.c.h.s8.bf16 %v1409_v63  ;;  %v1481_v46 = vunpack.c.l.s8.bf16 %v1409_v63 }
 0x2c1   : > { %1887 = vmatpush2.bf16.msra.mxu0 %v1764_v24  ;;  %1928 = vmatpush2.bf16.msra.mxu1 %v1766_v0  ;;  %v1408_v24 = vld [vmem:[%s7573_s28 + $0x40] sm:$0xff]  ;;  %v1491_v0 = vunpack.c.h.s8.bf16 %v1411_v11 }
 0x2c2   : > { %1888 = vmatprep.subr.bf16.mxu0 %v1757_v31  ;;  %1929 = vmatprep.subr.bf16.mxu1 %v1759_v39  ;;  %v1410_v31 = vld [vmem:[%s7573_s28 + $0x50] sm:$0xff]  ;;  %v1488_v39 = vunpack.c.h.s8.bf16 %v1408_v24 }
 0x2c3   : > { %v1490_v40 = vunpack.c.h.s8.bf16 %v1410_v31  ;;  %v1482_v49 = vunpack.c.l.s8.bf16 %v1410_v31 }
 0x2c5   : > { %1889 = vmatpush2.bf16.msra.mxu0 %v1756_v47  ;;  %1930 = vmatpush2.bf16.msra.mxu1 %v1758_v36  ;;  %v1483_v47 = vunpack.c.l.s8.bf16 %v1411_v11  ;;  %v1401_v36 = vld [vmem:[%s7573_s28 + $0x8] sm:$0xff] }
 0x2c6   : > { %1890 = vmatprep.subr.bf16.mxu0 %v1749_v37  ;;  %1931 = vmatprep.subr.bf16.mxu1 %v1751_v48  ;;  %v1403_v37 = vld [vmem:[%s7573_s28 + $0x18] sm:$0xff]  ;;  %v1480_v48 = vunpack.c.l.s8.bf16 %v1408_v24  ;;  %v1473_v50 = vunpack.c.h.s8.bf16 %v1401_v36  ;;  %v1465_v56 = vunpack.c.l.s8.bf16 %v1401_v36 }
 0x2c9   : > { %1891 = vmatpush2.bf16.msra.mxu0 %v1748_v51  ;;  %1932 = vmatpush2.bf16.msra.mxu1 %v1750_v52  ;;  %v1400_v51 = vld [vmem:[%s7573_s28] sm:$0xff]  ;;  %v1475_v52 = vunpack.c.h.s8.bf16 %v1403_v37 }
 0x2ca   : > { %1892 = vmatprep.subr.bf16.mxu0 %v1741_v53  ;;  %1933 = vmatprep.subr.bf16.mxu1 %v1743_v1  ;;  %v1402_v53 = vld [vmem:[%s7573_s28 + $0x10] sm:$0xff]  ;;  %v1472_v1 = vunpack.c.h.s8.bf16 %v1400_v51 }
 0x2cb   : > { %v1474_v55 = vunpack.c.h.s8.bf16 %v1402_v53  ;;  %v1466_v60 = vunpack.c.l.s8.bf16 %v1402_v53 }
 0x2cd   : > { %1893 = vmatpush2.bf16.msra.mxu0 %v1740_v57  ;;  %1934 = vmatpush2.bf16.msra.mxu1 %v1742_v23  ;;  %v1467_v57 = vunpack.c.l.s8.bf16 %v1403_v37  ;;  %v1457_v23 = vld [vmem:[%s7573_s28 + $0x1c8] sm:$0xff] }
 0x2ce   : > { %1894 = vmatprep.subr.bf16.mxu0 %v1733_v58  ;;  %1935 = vmatprep.subr.bf16.mxu1 %v1735_v59  ;;  %v1459_v58 = vld [vmem:[%s7573_s28 + $0x1d8] sm:$0xff]  ;;  %v1464_v59 = vunpack.c.l.s8.bf16 %v1400_v51  ;;  %v1585_v54 = vunpack.c.h.s8.bf16 %v1457_v23  ;;  %v1577_v6 = vunpack.c.l.s8.bf16 %v1457_v23  ;;  %v7850_v23 = vpack.c.bf16 %v7761_v14, %v7761_v14 }
 0x2d1   : > { %1895 = vmatpush2.bf16.msra.mxu0 %v1732_v61  ;;  %1936 = vmatpush2.bf16.msra.mxu1 %v1734_v62  ;;  %v1456_v61 = vld [vmem:[%s7573_s28 + $0x1c0] sm:$0xff]  ;;  %v1587_v62 = vunpack.c.h.s8.bf16 %v1459_v58 }
 0x2d2   : > { %1896 = vmatprep.subr.bf16.mxu0 %v1725_v2  ;;  %1937 = vmatprep.subr.bf16.mxu1 %v1727_v4  ;;  %v1458_v2 = vld [vmem:[%s7573_s28 + $0x1d0] sm:$0xff]  ;;  %v1584_v4 = vunpack.c.h.s8.bf16 %v1456_v61 }
 0x2d3   : > { %v1586_v5 = vunpack.c.h.s8.bf16 %v1458_v2  ;;  %v1578_v12 = vunpack.c.l.s8.bf16 %v1458_v2 }
 0x2d5   : > { %1897 = vmatpush2.bf16.msra.mxu0 %v1724_v7  ;;  %1938 = vmatpush2.bf16.msra.mxu1 %v1726_v3  ;;  %v1579_v7 = vunpack.c.l.s8.bf16 %v1459_v58  ;;  %v1449_v3 = vld [vmem:[%s7573_s28 + $0x188] sm:$0xff] }
 0x2d6   : > { %1948 = vmatprep.subr.bf16.mxu0 %v1521_v8  ;;  %1989 = vmatprep.subr.bf16.mxu1 %v1523_v9  ;;  %v1451_v8 = vld [vmem:[%s7573_s28 + $0x198] sm:$0xff]  ;;  %v1576_v9 = vunpack.c.l.s8.bf16 %v1456_v61  ;;  %v1569_v13 = vunpack.c.h.s8.bf16 %v1449_v3  ;;  %v1561_v15 = vunpack.c.l.s8.bf16 %v1449_v3 }
 0x2d7   : > { %v1423_v61 = vld [vmem:[%s7573_s28 + $0xb8] sm:$0xff] }
 0x2d8   : > { %1899 = vmatmul.mubr.bf16.vlgmr.msra.gmra.mxu0 %v7768_v29  ;;  %1940 = vmatmul.mubr.bf16.vlgmr.msra.gmra.mxu1 %v7768_v29  ;;  %v1504_v29 = vunpack.c.h.s8.bf16 %v1416_v32 }
 0x2d9   : > { %1949 = vmatpush1.bf16.msra.mxu0 %v1520_v16  ;;  %1980 = vmatprep.mubr.bf16.mxu0 %v7810_v20  ;;  %v1448_v16 = vld [vmem:[%s7573_s28 + $0x180] sm:$0xff] }
 0x2da   : > { %1990 = vmatpush1.bf16.msra.mxu1 %v1522_v17  ;;  %2021 = vmatprep.mubr.bf16.mxu1 %v7810_v20  ;;  %v1571_v17 = vunpack.c.h.s8.bf16 %v1451_v8  ;;  %v1560_v32 = vunpack.c.l.s8.bf16 %v1448_v16 }
 0x2db   : > { %1950 = vmatprep.subr.bf16.mxu0 %v1513_v22  ;;  %1991 = vmatprep.subr.bf16.mxu1 %v1515_v25  ;;  %v1450_v22 = vld [vmem:[%s7573_s28 + $0x190] sm:$0xff]  ;;  %v1568_v25 = vunpack.c.h.s8.bf16 %v1448_v16 }
 0x2dc   : > { %v1570_v26 = vunpack.c.h.s8.bf16 %v1450_v22 }
 0x2dd   : > { %1951 = vmatpush1.bf16.msra.mxu0 %v1512_v28  ;;  %v1563_v28 = vunpack.c.l.s8.bf16 %v1451_v8 }
 0x2de   : > { %1992 = vmatpush1.bf16.msra.mxu1 %v1514_v30  ;;  %1952 = vmatprep.subr.bf16.mxu0 %v1505_v10  ;;  %v1441_v30 = vld [vmem:[%s7573_s28 + $0x148] sm:$0xff]  ;;  %v1443_v10 = vld [vmem:[%s7573_s28 + $0x158] sm:$0xff] }
 0x2df   : > { %1993 = vmatprep.subr.bf16.mxu1 %v1507_v33  ;;  %v1562_v33 = vunpack.c.l.s8.bf16 %v1450_v22  ;;  %v1553_v34 = vunpack.c.h.s8.bf16 %v1441_v30  ;;  %v1545_v11 = vunpack.c.l.s8.bf16 %v1441_v30  ;;  %v1412_v22 = vld [vmem:[%s7573_s28 + $0x60] sm:$0xff] }
 0x2e1   : > { %1953 = vmatpush1.bf16.msra.mxu0 %v1504_v29  ;;  %v1440_v29 = vld [vmem:[%s7573_s28 + $0x140] sm:$0xff] }
 0x2e2   : > { %1994 = vmatpush1.bf16.msra.mxu1 %v1506_v35  ;;  %1954 = vmatprep.subr.bf16.mxu0 %v1497_v27  ;;  %v1555_v35 = vunpack.c.h.s8.bf16 %v1443_v10  ;;  %v1442_v27 = vld [vmem:[%s7573_s28 + $0x150] sm:$0xff]  ;;  %v1544_v24 = vunpack.c.l.s8.bf16 %v1440_v29 }
 0x2e3   : > { %1995 = vmatprep.subr.bf16.mxu1 %v1499_v19  ;;  %v1552_v19 = vunpack.c.h.s8.bf16 %v1440_v29  ;;  %v1554_v63 = vunpack.c.h.s8.bf16 %v1442_v27 }
 0x2e5   : > { %1955 = vmatpush1.bf16.msra.mxu0 %v1496_v18  ;;  %v1547_v18 = vunpack.c.l.s8.bf16 %v1443_v10 }
 0x2e6   : > { %1996 = vmatpush1.bf16.msra.mxu1 %v1498_v21  ;;  %1956 = vmatprep.subr.bf16.mxu0 %v1489_v38  ;;  %v1433_v21 = vld [vmem:[%s7573_s28 + $0x108] sm:$0xff]  ;;  %v1435_v38 = vld [vmem:[%s7573_s28 + $0x118] sm:$0xff] }
 0x2e7   : > { %1997 = vmatprep.subr.bf16.mxu1 %v1491_v0  ;;  %v1546_v0 = vunpack.c.l.s8.bf16 %v1442_v27  ;;  %v1537_v31 = vunpack.c.h.s8.bf16 %v1433_v21  ;;  %v1529_v37 = vunpack.c.l.s8.bf16 %v1433_v21  ;;  %v1404_v27 = vld [vmem:[%s7573_s28 + $0x20] sm:$0xff] }
 0x2e9   : > { %1957 = vmatpush1.bf16.msra.mxu0 %v1488_v39  ;;  %v1432_v39 = vld [vmem:[%s7573_s28 + $0x100] sm:$0xff] }
 0x2ea   : > { %1998 = vmatpush1.bf16.msra.mxu1 %v1490_v40  ;;  %1958 = vmatprep.subr.bf16.mxu0 %v1481_v46  ;;  %v1539_v40 = vunpack.c.h.s8.bf16 %v1435_v38  ;;  %v1434_v46 = vld [vmem:[%s7573_s28 + $0x110] sm:$0xff]  ;;  %v1528_v51 = vunpack.c.l.s8.bf16 %v1432_v39 }
 0x2eb   : > { %1999 = vmatprep.subr.bf16.mxu1 %v1483_v47  ;;  %v1536_v47 = vunpack.c.h.s8.bf16 %v1432_v39  ;;  %v1538_v36 = vunpack.c.h.s8.bf16 %v1434_v46 }
 0x2ed   : > { %1959 = vmatpush1.bf16.msra.mxu0 %v1480_v48  ;;  %v1531_v48 = vunpack.c.l.s8.bf16 %v1435_v38 }
 0x2ee   : > { %2000 = vmatpush1.bf16.msra.mxu1 %v1482_v49  ;;  %1960 = vmatprep.subr.bf16.mxu0 %v1473_v50  ;;  %v1429_v49 = vld [vmem:[%s7573_s28 + $0xe8] sm:$0xff]  ;;  %v1431_v50 = vld [vmem:[%s7573_s28 + $0xf8] sm:$0xff] }
 0x2ef   : > { %2001 = vmatprep.subr.bf16.mxu1 %v1475_v52  ;;  %v1530_v52 = vunpack.c.l.s8.bf16 %v1434_v46  ;;  %v1525_v53 = vunpack.c.h.s8.bf16 %v1429_v49  ;;  %v1460_v46 = vld [vmem:[%s7573_s28 + $0x1e0] sm:$0xff] }
 0x2f1   : > { %1961 = vmatpush1.bf16.msra.mxu0 %v1472_v1  ;;  %v1428_v1 = vld [vmem:[%s7573_s28 + $0xe0] sm:$0xff] }
 0x2f2   : > { %2002 = vmatpush1.bf16.msra.mxu1 %v1474_v55  ;;  %1962 = vmatprep.subr.bf16.mxu0 %v1465_v56  ;;  %v1527_v55 = vunpack.c.h.s8.bf16 %v1431_v50  ;;  %v1430_v56 = vld [vmem:[%s7573_s28 + $0xf0] sm:$0xff] }
 0x2f3   : > { %2003 = vmatprep.subr.bf16.mxu1 %v1467_v57  ;;  %v1524_v57 = vunpack.c.h.s8.bf16 %v1428_v1  ;;  %v1526_v58 = vunpack.c.h.s8.bf16 %v1430_v56  ;;  %v1518_v14 = vunpack.c.l.s8.bf16 %v1430_v56  ;;  %v1452_v56 = vld [vmem:[%s7573_s28 + $0x1a0] sm:$0xff] }
 0x2f5   : > { %1963 = vmatpush1.bf16.msra.mxu0 %v1464_v59  ;;  %v1517_v59 = vunpack.c.l.s8.bf16 %v1429_v49 }
 0x2f6   : > { %2004 = vmatpush1.bf16.msra.mxu1 %v1466_v60  ;;  %1964 = vmatprep.subr.bf16.mxu0 %v1585_v54  ;;  %v1421_v60 = vld [vmem:[%s7573_s28 + $0xa8] sm:$0xff]  ;;  %v1519_v54 = vunpack.c.l.s8.bf16 %v1431_v50 }
 0x2f7   : > { %2005 = vmatprep.subr.bf16.mxu1 %v1587_v62  ;;  %v1516_v62 = vunpack.c.l.s8.bf16 %v1428_v1  ;;  %v1509_v2 = vunpack.c.h.s8.bf16 %v1421_v60  ;;  %v1501_v8 = vunpack.c.l.s8.bf16 %v1421_v60 }
 0x2f9   : > { %1965 = vmatpush2.bf16.msra.mxu0 %v1584_v4  ;;  %v1420_v4 = vld [vmem:[%s7573_s28 + $0xa0] sm:$0xff] }
 0x2fa   : > { %2006 = vmatpush2.bf16.msra.mxu1 %v1586_v5  ;;  %1966 = vmatprep.subr.bf16.mxu0 %v1577_v6  ;;  %v1511_v5 = vunpack.c.h.s8.bf16 %v1423_v61  ;;  %v1422_v6 = vld [vmem:[%s7573_s28 + $0xb0] sm:$0xff]  ;;  %v1500_v16 = vunpack.c.l.s8.bf16 %v1420_v4 }
 0x2fb   : > { %2007 = vmatprep.subr.bf16.mxu1 %v1579_v7  ;;  %v1508_v7 = vunpack.c.h.s8.bf16 %v1420_v4  ;;  %v1510_v3 = vunpack.c.h.s8.bf16 %v1422_v6 }
 0x2fd   : > { %1967 = vmatpush2.bf16.msra.mxu0 %v1576_v9  ;;  %v1503_v9 = vunpack.c.l.s8.bf16 %v1423_v61 }
 0x2fe   : > { %2008 = vmatpush2.bf16.msra.mxu1 %v1578_v12  ;;  %1968 = vmatprep.subr.bf16.mxu0 %v1569_v13  ;;  %v1413_v12 = vld [vmem:[%s7573_s28 + $0x68] sm:$0xff]  ;;  %v1415_v13 = vld [vmem:[%s7573_s28 + $0x78] sm:$0xff] }
 0x2ff   : > { %2009 = vmatprep.subr.bf16.mxu1 %v1571_v17  ;;  %v1493_v17 = vunpack.c.h.s8.bf16 %v1413_v12  ;;  %v1485_v30 = vunpack.c.l.s8.bf16 %v1413_v12  ;;  %v1487_v10 = vunpack.c.l.s8.bf16 %v1415_v13 }
 0x301   : > { %1969 = vmatpush2.bf16.msra.mxu0 %v1568_v25  ;;  %v1495_v25 = vunpack.c.h.s8.bf16 %v1415_v13 }
 0x302   : > { %2010 = vmatpush2.bf16.msra.mxu1 %v1570_v26  ;;  %1970 = vmatprep.subr.bf16.mxu0 %v1561_v15  ;;  %v1414_v26 = vld [vmem:[%s7573_s28 + $0x70] sm:$0xff]  ;;  %v1492_v15 = vunpack.c.h.s8.bf16 %v1412_v22 }
 0x303   : > { %2011 = vmatprep.subr.bf16.mxu1 %v1563_v28  ;;  %v1494_v28 = vunpack.c.h.s8.bf16 %v1414_v26  ;;  %v1486_v29 = vunpack.c.l.s8.bf16 %v1414_v26  ;;  %v1436_v26 = vld [vmem:[%s7573_s28 + $0x120] sm:$0xff] }
 0x305   : > { %1971 = vmatpush2.bf16.msra.mxu0 %v1560_v32  ;;  %v1405_v32 = vld [vmem:[%s7573_s28 + $0x28] sm:$0xff] }
 0x306   : > { %2012 = vmatpush2.bf16.msra.mxu1 %v1562_v33  ;;  %1972 = vmatprep.subr.bf16.mxu0 %v1553_v34  ;;  %v1407_v33 = vld [vmem:[%s7573_s28 + $0x38] sm:$0xff]  ;;  %v1484_v34 = vunpack.c.l.s8.bf16 %v1412_v22  ;;  %v1469_v21 = vunpack.c.l.s8.bf16 %v1405_v32 }
 0x307   : > { %2013 = vmatprep.subr.bf16.mxu1 %v1555_v35  ;;  %v1477_v35 = vunpack.c.h.s8.bf16 %v1405_v32  ;;  %v1471_v38 = vunpack.c.l.s8.bf16 %v1407_v33 }
 0x309   : > { %1973 = vmatpush2.bf16.msra.mxu0 %v1552_v19  ;;  %v1479_v19 = vunpack.c.h.s8.bf16 %v1407_v33 }
 0x30a   : > { %2014 = vmatpush2.bf16.msra.mxu1 %v1554_v63  ;;  %1974 = vmatprep.subr.bf16.mxu0 %v1545_v11  ;;  %v1406_v63 = vld [vmem:[%s7573_s28 + $0x30] sm:$0xff]  ;;  %v1476_v11 = vunpack.c.h.s8.bf16 %v1404_v27 }
 0x30b   : > { %2015 = vmatprep.subr.bf16.mxu1 %v1547_v18  ;;  %v1478_v18 = vunpack.c.h.s8.bf16 %v1406_v63  ;;  %v1470_v39 = vunpack.c.l.s8.bf16 %v1406_v63  ;;  %v2252_v63 = vld [vmem:[%s7590_s24 + $0xc0] sm:$0xff] }
 0x30d   : > { %1975 = vmatpush2.bf16.msra.mxu0 %v1544_v24  ;;  %v1461_v24 = vld [vmem:[%s7573_s28 + $0x1e8] sm:$0xff] }
 0x30e   : > { %2016 = vmatpush2.bf16.msra.mxu1 %v1546_v0  ;;  %1976 = vmatprep.subr.bf16.mxu0 %v1537_v31  ;;  %v1463_v0 = vld [vmem:[%s7573_s28 + $0x1f8] sm:$0xff]  ;;  %v1468_v31 = vunpack.c.l.s8.bf16 %v1404_v27  ;;  %v1581_v49 = vunpack.c.l.s8.bf16 %v1461_v24 }
 0x30f   : > { %2017 = vmatprep.subr.bf16.mxu1 %v1539_v40  ;;  %v1589_v40 = vunpack.c.h.s8.bf16 %v1461_v24  ;;  %v1583_v50 = vunpack.c.l.s8.bf16 %v1463_v0 }
 0x311   : > { %1977 = vmatpush2.bf16.msra.mxu0 %v1536_v47  ;;  %v1591_v47 = vunpack.c.h.s8.bf16 %v1463_v0 }
 0x312   : > { %2018 = vmatpush2.bf16.msra.mxu1 %v1538_v36  ;;  %1978 = vmatprep.subr.bf16.mxu0 %v1529_v37  ;;  %v1462_v36 = vld [vmem:[%s7573_s28 + $0x1f0] sm:$0xff]  ;;  %v1588_v37 = vunpack.c.h.s8.bf16 %v1460_v46 }
 0x313   : > { %2019 = vmatprep.subr.bf16.mxu1 %v1531_v48  ;;  %v1590_v48 = vunpack.c.h.s8.bf16 %v1462_v36  ;;  %v1582_v1 = vunpack.c.l.s8.bf16 %v1462_v36 }
 0x315   : > { %1979 = vmatpush2.bf16.msra.mxu0 %v1528_v51  ;;  %v1453_v51 = vld [vmem:[%s7573_s28 + $0x1a8] sm:$0xff] }
 0x316   : > { %2020 = vmatpush2.bf16.msra.mxu1 %v1530_v52  ;;  %2030 = vmatprep.subr.bf16.mxu0 %v1525_v53  ;;  %v1455_v52 = vld [vmem:[%s7573_s28 + $0x1b8] sm:$0xff]  ;;  %v1580_v53 = vunpack.c.l.s8.bf16 %v1460_v46  ;;  %v2309_v46 = vld [vmem:[%s7590_s24 + $0x288] sm:$0xff] }
 0x317   : > { %2071 = vmatprep.subr.bf16.mxu1 %v1527_v55  ;;  %v1573_v55 = vunpack.c.h.s8.bf16 %v1453_v51  ;;  %v1567_v61 = vunpack.c.l.s8.bf16 %v1455_v52 }
 0x318   : > { %1981 = vmatmul.mubr.bf16.vlgmr.msra.gmra.mxu0 %v7850_v23 }
 0x319   : > { %2022 = vmatmul.mubr.bf16.vlgmr.msra.gmra.mxu1 %v7850_v23  ;;  %2031 = vmatpush1.bf16.msra.mxu0 %v1524_v57  ;;  %v1575_v57 = vunpack.c.h.s8.bf16 %v1455_v52  ;;  %v2308_v52 = vld [vmem:[%s7590_s24 + $0x280] sm:$0xff] }
 0x31a   : > { %2062 = vmatprep.mubr.bf16.mxu0 %v7810_v20  ;;  %2072 = vmatpush1.bf16.msra.mxu1 %v1526_v58  ;;  %v1454_v58 = vld [vmem:[%s7573_s28 + $0x1b0] sm:$0xff] }
 0x31b   : > { %2103 = vmatprep.mubr.bf16.mxu1 %v7810_v20  ;;  %2032 = vmatprep.subr.bf16.mxu0 %v1517_v59  ;;  %v1502_v20 = vunpack.c.l.s8.bf16 %v1422_v6  ;;  %v1572_v59 = vunpack.c.h.s8.bf16 %v1452_v56  ;;  %v1574_v60 = vunpack.c.h.s8.bf16 %v1454_v58  ;;  %v1566_v4 = vunpack.c.l.s8.bf16 %v1454_v58  ;;  %v1444_v6 = vld [vmem:[%s7573_s28 + $0x160] sm:$0xff] }
 0x31c   : > { %2073 = vmatprep.subr.bf16.mxu1 %v1519_v54  ;;  %v1565_v54 = vunpack.c.l.s8.bf16 %v1453_v51  ;;  %v2653_v51 = vunpack.c.h.s8.bf16 %v2309_v46 }
 0x31d   : > { %2033 = vmatpush1.bf16.msra.mxu0 %v1516_v62  ;;  %v1445_v62 = vld [vmem:[%s7573_s28 + $0x168] sm:$0xff] }
 0x31e   : > { %2074 = vmatpush1.bf16.msra.mxu1 %v1518_v14  ;;  %2034 = vmatprep.subr.bf16.mxu0 %v1509_v2  ;;  %v1447_v14 = vld [vmem:[%s7573_s28 + $0x178] sm:$0xff]  ;;  %v1564_v2 = vunpack.c.l.s8.bf16 %v1452_v56  ;;  %v1549_v12 = vunpack.c.l.s8.bf16 %v1445_v62 }
 0x31f   : > { %2075 = vmatprep.subr.bf16.mxu1 %v1511_v5  ;;  %v1557_v5 = vunpack.c.h.s8.bf16 %v1445_v62  ;;  %v1551_v13 = vunpack.c.l.s8.bf16 %v1447_v14  ;;  %v2644_v62 = vunpack.c.l.s8.bf16 %v2308_v52 }
 0x321   : > { %2035 = vmatpush1.bf16.msra.mxu0 %v1508_v7  ;;  %v1559_v7 = vunpack.c.h.s8.bf16 %v1447_v14 }
 0x322   : > { %2076 = vmatpush1.bf16.msra.mxu1 %v1510_v3  ;;  %2036 = vmatprep.subr.bf16.mxu0 %v1501_v8  ;;  %v1446_v3 = vld [vmem:[%s7573_s28 + $0x170] sm:$0xff]  ;;  %v1556_v8 = vunpack.c.h.s8.bf16 %v1444_v6 }
 0x323   : > { %2077 = vmatprep.subr.bf16.mxu1 %v1503_v9  ;;  %v1558_v9 = vunpack.c.h.s8.bf16 %v1446_v3  ;;  %v1550_v22 = vunpack.c.l.s8.bf16 %v1446_v3 }
 0x325   : > { %2037 = vmatpush1.bf16.msra.mxu0 %v1500_v16  ;;  %v1437_v16 = vld [vmem:[%s7573_s28 + $0x128] sm:$0xff] }
 0x326   : > { %2078 = vmatpush1.bf16.msra.mxu1 %v1502_v20  ;;  %2038 = vmatprep.subr.bf16.mxu0 %v1493_v17  ;;  %v1439_v20 = vld [vmem:[%s7573_s28 + $0x138] sm:$0xff]  ;;  %v1548_v17 = vunpack.c.l.s8.bf16 %v1444_v6  ;;  %v1533_v32 = vunpack.c.l.s8.bf16 %v1437_v16 }
 0x327   : > { %2079 = vmatprep.subr.bf16.mxu1 %v1495_v25  ;;  %v1541_v25 = vunpack.c.h.s8.bf16 %v1437_v16  ;;  %v1535_v33 = vunpack.c.l.s8.bf16 %v1439_v20 }
 0x329   : > { %2039 = vmatpush1.bf16.msra.mxu0 %v1492_v15  ;;  %v1543_v15 = vunpack.c.h.s8.bf16 %v1439_v20 }
 0x32a   : > { %2080 = vmatpush1.bf16.msra.mxu1 %v1494_v28  ;;  %2040 = vmatprep.subr.bf16.mxu0 %v1485_v30  ;;  %v1438_v28 = vld [vmem:[%s7573_s28 + $0x130] sm:$0xff]  ;;  %v1540_v30 = vunpack.c.h.s8.bf16 %v1436_v26 }
 0x32b   : > { %2081 = vmatprep.subr.bf16.mxu1 %v1487_v10  ;;  %v1542_v10 = vunpack.c.h.s8.bf16 %v1438_v28  ;;  %v1534_v27 = vunpack.c.l.s8.bf16 %v1438_v28 }
 0x32d   : > { %2041 = vmatpush1.bf16.msra.mxu0 %v1484_v34  ;;  %v2253_v34 = vld [vmem:[%s7590_s24 + $0xc8] sm:$0xff] }
 0x32e   : > { %2082 = vmatpush1.bf16.msra.mxu1 %v1486_v29  ;;  %2042 = vmatprep.subr.bf16.mxu0 %v1477_v35  ;;  %v2317_v29 = vld [vmem:[%s7590_s24 + $0x2c8] sm:$0xff]  ;;  %v1532_v35 = vunpack.c.l.s8.bf16 %v1436_v26  ;;  %v2533_v24 = vunpack.c.l.s8.bf16 %v2253_v34 }
 0x32f   : > { %2083 = vmatprep.subr.bf16.mxu1 %v1479_v19  ;;  %v2541_v19 = vunpack.c.h.s8.bf16 %v2253_v34  ;;  %v2661_v0 = vunpack.c.l.s8.bf16 %v2317_v29 }
 0x331   : > { %2043 = vmatpush1.bf16.msra.mxu0 %v1476_v11  ;;  %v2669_v11 = vunpack.c.h.s8.bf16 %v2317_v29 }
 0x332   : > { %2084 = vmatpush1.bf16.msra.mxu1 %v1478_v18  ;;  %2044 = vmatprep.subr.bf16.mxu0 %v1469_v21  ;;  %v2316_v18 = vld [vmem:[%s7590_s24 + $0x2c0] sm:$0xff]  ;;  %v2540_v21 = vunpack.c.h.s8.bf16 %v2252_v63 }
 0x333   : > { %2085 = vmatprep.subr.bf16.mxu1 %v1471_v38  ;;  %v2668_v38 = vunpack.c.h.s8.bf16 %v2316_v18 }
 0x335   : > { %2045 = vmatpush1.bf16.msra.mxu0 %v1468_v31  ;;  %v2245_v31 = vld [vmem:[%s7590_s24 + $0x88] sm:$0xff] }
 0x336   : > { %2086 = vmatpush1.bf16.msra.mxu1 %v1470_v39  ;;  %2046 = vmatprep.subr.bf16.mxu0 %v1589_v40  ;;  %v2517_v58 = vunpack.c.l.s8.bf16 %v2245_v31 }
 0x337   : > { %2087 = vmatprep.subr.bf16.mxu1 %v1591_v47  ;;  %v2532_v47 = vunpack.c.l.s8.bf16 %v2252_v63 }
 0x339   : > { %2047 = vmatpush2.bf16.msra.mxu0 %v1588_v37 }
 0x33a   : > { %2088 = vmatpush2.bf16.msra.mxu1 %v1590_v48  ;;  %2048 = vmatprep.subr.bf16.mxu0 %v1581_v49  ;;  %v2660_v48 = vunpack.c.l.s8.bf16 %v2316_v18  ;;  %v2525_v49 = vunpack.c.h.s8.bf16 %v2245_v31 }
 0x33b   : > { %2089 = vmatprep.subr.bf16.mxu1 %v1583_v50  ;;  %v2244_v50 = vld [vmem:[%s7590_s24 + $0x80] sm:$0xff] }
 0x33d   : > { %2049 = vmatpush2.bf16.msra.mxu0 %v1580_v53 }
 0x33e   : > { %2090 = vmatpush2.bf16.msra.mxu1 %v1582_v1  ;;  %2050 = vmatprep.subr.bf16.mxu0 %v1573_v55 }
 0x33f   : > { %2091 = vmatprep.subr.bf16.mxu1 %v1575_v57  ;;  %v2652_v57 = vunpack.c.h.s8.bf16 %v2308_v52 }
 0x341   : > { %2051 = vmatpush2.bf16.msra.mxu0 %v1572_v59  ;;  %v2645_v59 = vunpack.c.l.s8.bf16 %v2309_v46 }
 0x342   : > { %2092 = vmatpush2.bf16.msra.mxu1 %v1574_v60  ;;  %2052 = vmatprep.subr.bf16.mxu0 %v1565_v54  ;;  %v2237_v60 = vld [vmem:[%s7590_s24 + $0x48] sm:$0xff] }
 0x343   : > { %2093 = vmatprep.subr.bf16.mxu1 %v1567_v61  ;;  %v2301_v54 = vld [vmem:[%s7590_s24 + $0x248] sm:$0xff]  ;;  %v2516_v61 = vunpack.c.l.s8.bf16 %v2244_v50  ;;  %v2509_v14 = vunpack.c.h.s8.bf16 %v2237_v60  ;;  %v2501_v3 = vunpack.c.l.s8.bf16 %v2237_v60  ;;  %v2332_v60 = vld [vmem:[%s7590_s24 + $0x340] sm:$0xff] }
 0x345   : > { %2053 = vmatpush2.bf16.msra.mxu0 %v1564_v2  ;;  %v2236_v2 = vld [vmem:[%s7590_s24 + $0x40] sm:$0xff] }
 0x346   : > { %2094 = vmatpush2.bf16.msra.mxu1 %v1566_v4  ;;  %2054 = vmatprep.subr.bf16.mxu0 %v1557_v5  ;;  %v2637_v4 = vunpack.c.h.s8.bf16 %v2301_v54  ;;  %v2300_v5 = vld [vmem:[%s7590_s24 + $0x240] sm:$0xff]  ;;  %v2508_v6 = vunpack.c.h.s8.bf16 %v2236_v2 }
 0x347   : > { %2095 = vmatprep.subr.bf16.mxu1 %v1559_v7  ;;  %v2636_v7 = vunpack.c.h.s8.bf16 %v2300_v5  ;;  %v2628_v16 = vunpack.c.l.s8.bf16 %v2300_v5 }
 0x349   : > { %2055 = vmatpush2.bf16.msra.mxu0 %v1556_v8  ;;  %v2629_v8 = vunpack.c.l.s8.bf16 %v2301_v54 }
 0x34a   : > { %2096 = vmatpush2.bf16.msra.mxu1 %v1558_v9  ;;  %2056 = vmatprep.subr.bf16.mxu0 %v1549_v12  ;;  %v2229_v9 = vld [vmem:[%s7590_s24 + $0x8] sm:$0xff] }
 0x34b   : > { %2097 = vmatprep.subr.bf16.mxu1 %v1551_v13  ;;  %v2293_v12 = vld [vmem:[%s7590_s24 + $0x208] sm:$0xff]  ;;  %v2500_v13 = vunpack.c.l.s8.bf16 %v2236_v2  ;;  %v2493_v20 = vunpack.c.h.s8.bf16 %v2229_v9  ;;  %v2485_v28 = vunpack.c.l.s8.bf16 %v2229_v9  ;;  %v2324_v9 = vld [vmem:[%s7590_s24 + $0x300] sm:$0xff] }
 0x34c   : > { %v2261_v2 = vld [vmem:[%s7590_s24 + $0x108] sm:$0xff] }
 0x34d   : > { %2057 = vmatpush2.bf16.msra.mxu0 %v1548_v17  ;;  %v2228_v17 = vld [vmem:[%s7590_s24] sm:$0xff] }
 0x34e   : > { %2098 = vmatpush2.bf16.msra.mxu1 %v1550_v22  ;;  %2058 = vmatprep.subr.bf16.mxu0 %v1541_v25  ;;  %v2621_v22 = vunpack.c.h.s8.bf16 %v2293_v12  ;;  %v2292_v25 = vld [vmem:[%s7590_s24 + $0x200] sm:$0xff]  ;;  %v2492_v26 = vunpack.c.h.s8.bf16 %v2228_v17 }
 0x34f   : > { %2099 = vmatprep.subr.bf16.mxu1 %v1543_v15  ;;  %v2620_v15 = vunpack.c.h.s8.bf16 %v2292_v25  ;;  %v2612_v34 = vunpack.c.l.s8.bf16 %v2292_v25 }
 0x351   : > { %2059 = vmatpush2.bf16.msra.mxu0 %v1540_v30  ;;  %v2613_v30 = vunpack.c.l.s8.bf16 %v2293_v12 }
 0x352   : > { %2100 = vmatpush2.bf16.msra.mxu1 %v1542_v10  ;;  %2060 = vmatprep.subr.bf16.mxu0 %v1533_v32  ;;  %v2285_v10 = vld [vmem:[%s7590_s24 + $0x1c8] sm:$0xff] }
 0x353   : > { %2101 = vmatprep.subr.bf16.mxu1 %v1535_v33  ;;  %v2349_v32 = vld [vmem:[%s7590_s24 + $0x3c8] sm:$0xff]  ;;  %v2484_v33 = vunpack.c.l.s8.bf16 %v2228_v17  ;;  %v2605_v29 = vunpack.c.h.s8.bf16 %v2285_v10  ;;  %v2597_v18 = vunpack.c.l.s8.bf16 %v2285_v10 }
 0x354   : > { %v7927_v17 = vld [vmem:[%s7590_s24 + $0x4c8] sm:$0xff] }
 0x355   : > { %2061 = vmatpush2.bf16.msra.mxu0 %v1532_v35  ;;  %v2284_v35 = vld [vmem:[%s7590_s24 + $0x1c0] sm:$0xff] }
 0x356   : > { %2102 = vmatpush2.bf16.msra.mxu1 %v1534_v27  ;;  %2996 = vmatprep.subr.bf16.mxu0 %v2541_v19  ;;  %v2733_v27 = vunpack.c.h.s8.bf16 %v2349_v32  ;;  %v2348_v19 = vld [vmem:[%s7590_s24 + $0x3c0] sm:$0xff]  ;;  %v2604_v63 = vunpack.c.h.s8.bf16 %v2284_v35 }
 0x357   : > { %3037 = vmatprep.subr.bf16.mxu1 %v2669_v11  ;;  %v2732_v11 = vunpack.c.h.s8.bf16 %v2348_v19  ;;  %v2724_v31 = vunpack.c.l.s8.bf16 %v2348_v19  ;;  %v7944_v19 = vld [vmem:[%s728_s10] sm:$0xff] }
 0x358   : > { %2063 = vmatmul.mubr.bf16.vlgmr.msra.gmra.mxu0 %v7850_v23  ;;  %v7890_v39 = vpop.f32.mrf.mxu0  ;;  %v7892_v40 = vpop.f32.mrf.mxu1 }
 0x359   : > { %2104 = vmatmul.mubr.bf16.vlgmr.msra.gmra.mxu1 %v7850_v23  ;;  %2997 = vmatpush1.bf16.msra.mxu0 %v2540_v21  ;;  %v2524_v23 = vunpack.c.h.s8.bf16 %v2244_v50  ;;  %v2725_v21 = vunpack.c.l.s8.bf16 %v2349_v32 }
 0x35a   : > { %v7896_v36 = vpop.f32.mrf.mxu0  ;;  %v7898_v37 = vpop.f32.mrf.mxu1  ;;  %3038 = vmatpush1.bf16.msra.mxu1 %v2668_v38  ;;  %2998 = vmatprep.subr.bf16.mxu0 %v2533_v24  ;;  %v2277_v38 = vld [vmem:[%s7590_s24 + $0x188] sm:$0xff] }
 0x35b   : > { %3039 = vmatprep.subr.bf16.mxu1 %v2661_v0  ;;  %v2341_v24 = vld [vmem:[%s7590_s24 + $0x388] sm:$0xff]  ;;  %v2596_v0 = vunpack.c.l.s8.bf16 %v2284_v35  ;;  %v2589_v46 = vunpack.c.h.s8.bf16 %v2277_v38  ;;  %v2581_v52 = vunpack.c.l.s8.bf16 %v2277_v38 }
 0x35c   : > { %v1822_v53 = vpop.f32.mrf.mxu0  ;;  %v1863_v1 = vpop.f32.mrf.mxu1 }
 0x35d   : > { %2999 = vmatpush1.bf16.msra.mxu0 %v2532_v47  ;;  %v2276_v47 = vld [vmem:[%s7590_s24 + $0x180] sm:$0xff]  ;;  %v2709_v53 = vunpack.c.l.s8.bf16 %v2341_v24  ;;  %v2269_v1 = vld [vmem:[%s7590_s24 + $0x148] sm:$0xff] }
 0x35e   : > { %v1823_v55 = vpop.f32.mrf.mxu0  ;;  %v1864_v56 = vpop.f32.mrf.mxu1  ;;  %3040 = vmatpush1.bf16.msra.mxu1 %v2660_v48  ;;  %3000 = vmatprep.subr.bf16.mxu0 %v2525_v49  ;;  %v2717_v48 = vunpack.c.h.s8.bf16 %v2341_v24  ;;  %v2340_v49 = vld [vmem:[%s7590_s24 + $0x380] sm:$0xff]  ;;  %v2588_v50 = vunpack.c.h.s8.bf16 %v2276_v47 }
 0x35f   : > { %3041 = vmatprep.subr.bf16.mxu1 %v2653_v51  ;;  %v2716_v51 = vunpack.c.h.s8.bf16 %v2340_v49  ;;  %v2580_v55 = vunpack.c.l.s8.bf16 %v2276_v47  ;;  %v2708_v56 = vunpack.c.l.s8.bf16 %v2340_v49  ;;  %v2129_v49 = vrot.slane %v7944_v19, %v7678_v45 }
 0x361   : > { %3001 = vmatpush1.bf16.msra.mxu0 %v2524_v23  ;;  %v2333_v23 = vld [vmem:[%s7590_s24 + $0x348] sm:$0xff] }
 0x362   : > { %3042 = vmatpush1.bf16.msra.mxu1 %v2652_v57  ;;  %3002 = vmatprep.subr.bf16.mxu0 %v2517_v58  ;;  %v2573_v57 = vunpack.c.h.s8.bf16 %v2269_v1  ;;  %v2268_v58 = vld [vmem:[%s7590_s24 + $0x140] sm:$0xff] }
 0x363   : > { %3043 = vmatprep.subr.bf16.mxu1 %v2645_v59  ;;  %v2701_v59 = vunpack.c.h.s8.bf16 %v2333_v23  ;;  %v2572_v54 = vunpack.c.h.s8.bf16 %v2268_v58  ;;  %v2564_v5 = vunpack.c.l.s8.bf16 %v2268_v58 }
 0x365   : > { %3003 = vmatpush1.bf16.msra.mxu0 %v2516_v61  ;;  %v2700_v61 = vunpack.c.h.s8.bf16 %v2332_v60 }
 0x366   : > { %3044 = vmatpush1.bf16.msra.mxu1 %v2644_v62  ;;  %3004 = vmatprep.subr.bf16.mxu0 %v2509_v14  ;;  %v2565_v62 = vunpack.c.l.s8.bf16 %v2269_v1  ;;  %v2693_v14 = vunpack.c.l.s8.bf16 %v2333_v23 }
 0x367   : > { %3045 = vmatprep.subr.bf16.mxu1 %v2637_v4  ;;  %v2325_v4 = vld [vmem:[%s7590_s24 + $0x308] sm:$0xff] }
 0x369   : > { %3005 = vmatpush1.bf16.msra.mxu0 %v2508_v6  ;;  %v2692_v6 = vunpack.c.l.s8.bf16 %v2332_v60 }
 0x36a   : > { %3046 = vmatpush1.bf16.msra.mxu1 %v2636_v7  ;;  %3006 = vmatprep.subr.bf16.mxu0 %v2501_v3  ;;  %v2557_v7 = vunpack.c.h.s8.bf16 %v2261_v2  ;;  %v2260_v3 = vld [vmem:[%s7590_s24 + $0x100] sm:$0xff] }
 0x36b   : > { %3047 = vmatprep.subr.bf16.mxu1 %v2629_v8  ;;  %v2685_v8 = vunpack.c.h.s8.bf16 %v2325_v4  ;;  %v2556_v12 = vunpack.c.h.s8.bf16 %v2260_v3  ;;  %v2548_v25 = vunpack.c.l.s8.bf16 %v2260_v3 }
 0x36d   : > { %3007 = vmatpush1.bf16.msra.mxu0 %v2500_v13  ;;  %v2684_v13 = vunpack.c.h.s8.bf16 %v2324_v9 }
 0x36e   : > { %3048 = vmatpush1.bf16.msra.mxu1 %v2628_v16  ;;  %3008 = vmatprep.subr.bf16.mxu0 %v2493_v20  ;;  %v2549_v16 = vunpack.c.l.s8.bf16 %v2261_v2  ;;  %v2677_v20 = vunpack.c.l.s8.bf16 %v2325_v4  ;;  %v2444_v4 = vld [vmem:[%s7590_s24 + $0x6c0] sm:$0xff] }
 0x36f   : > { %3049 = vmatprep.subr.bf16.mxu1 %v2621_v22  ;;  %v7930_v22 = vld [vmem:[%s7590_s24 + $0x6c8] sm:$0xff] }
 0x371   : > { %3009 = vmatpush1.bf16.msra.mxu0 %v2492_v26  ;;  %v2676_v26 = vunpack.c.l.s8.bf16 %v2324_v9  ;;  %v2924_v9 = vunpack.c.h.s8.bf16 %v2444_v4 }
 0x372   : > { %3050 = vmatpush1.bf16.msra.mxu1 %v2620_v15  ;;  %3010 = vmatprep.subr.bf16.mxu0 %v2485_v28  ;;  %v2797_v15 = vunpack.c.h.s8.bf16 %v7927_v17  ;;  %v2925_v28 = vunpack.c.h.s8.bf16 %v7930_v22 }
 0x373   : > { %3051 = vmatprep.subr.bf16.mxu1 %v2613_v30 }
 0x375   : > { %3011 = vmatpush1.bf16.msra.mxu0 %v2484_v33 }
 0x376   : > { %3052 = vmatpush1.bf16.msra.mxu1 %v2612_v34  ;;  %3012 = vmatprep.subr.bf16.mxu0 %v2605_v29 }
 0x377   : > { %3053 = vmatprep.subr.bf16.mxu1 %v2733_v27 }
 0x379   : > { %3013 = vmatpush2.bf16.msra.mxu0 %v2604_v63  ;;  %v7948_v63 = vld [vmem:[%s737_s4] sm:$0xff] }
 0x37a   : > { %3054 = vmatpush2.bf16.msra.mxu1 %v2732_v11  ;;  %3014 = vmatprep.subr.bf16.mxu0 %v2597_v18  ;;  %v2117_v11 = vrot.slane %v7944_v19, %v7669_v42  ;;  %v2167_v24 = vrot.slane %v7948_v63, %v7669_v42  ;;  %v2175_v47 = vrot.slane %v7948_v63, %v7672_v43 }
 0x37b   : > { %3055 = vmatprep.subr.bf16.mxu1 %v2725_v21  ;;  %v2125_v21 = vrot.slane %v7944_v19, %v7672_v43 }
 0x37d   : > { %3015 = vmatpush2.bf16.msra.mxu0 %v2596_v0 }
 0x37e   : > { %3056 = vmatpush2.bf16.msra.mxu1 %v2724_v31  ;;  %3016 = vmatprep.subr.bf16.mxu0 %v2589_v46  ;;  %v2121_v31 = vrot.slane %v7944_v19, %v7675_v44 }
 0x37f   : > { %3057 = vmatprep.subr.bf16.mxu1 %v2717_v48 }
 0x381   : > { %3017 = vmatpush2.bf16.msra.mxu0 %v2588_v50 }
 0x382   : > { %3058 = vmatpush2.bf16.msra.mxu1 %v2716_v51  ;;  %3018 = vmatprep.subr.bf16.mxu0 %v2581_v52 }
 0x383   : > { %3059 = vmatprep.subr.bf16.mxu1 %v2709_v53 }
 0x385   : > { %3019 = vmatpush2.bf16.msra.mxu0 %v2580_v55 }
 0x386   : > { %3060 = vmatpush2.bf16.msra.mxu1 %v2708_v56  ;;  %3020 = vmatprep.subr.bf16.mxu0 %v2573_v57 }
 0x387   : > { %3061 = vmatprep.subr.bf16.mxu1 %v2701_v59 }
 0x389   : > { %3021 = vmatpush2.bf16.msra.mxu0 %v2572_v54 }
 0x38a   : > { %3062 = vmatpush2.bf16.msra.mxu1 %v2700_v61  ;;  %3022 = vmatprep.subr.bf16.mxu0 %v2565_v62 }
 0x38b   : > { %3063 = vmatprep.subr.bf16.mxu1 %v2693_v14  ;;  %v2380_v14 = vld [vmem:[%s7590_s24 + $0x4c0] sm:$0xff] }
 0x38d   : > { %3023 = vmatpush2.bf16.msra.mxu0 %v2564_v5 }
 0x38e   : > { %3064 = vmatpush2.bf16.msra.mxu1 %v2692_v6  ;;  %3024 = vmatprep.subr.bf16.mxu0 %v2557_v7  ;;  %v2796_v7 = vunpack.c.h.s8.bf16 %v2380_v14 }
 0x38f   : > { %3065 = vmatprep.subr.bf16.mxu1 %v2685_v8 }
 0x391   : > { %3025 = vmatpush2.bf16.msra.mxu0 %v2556_v12  ;;  %v2789_v12 = vunpack.c.l.s8.bf16 %v7927_v17  ;;  %v2916_v17 = vunpack.c.l.s8.bf16 %v2444_v4  ;;  %v2476_v4 = vld [vmem:[%s7590_s24 + $0x7c0] sm:$0xff] }
 0x392   : > { %3066 = vmatpush2.bf16.msra.mxu1 %v2684_v13  ;;  %3026 = vmatprep.subr.bf16.mxu0 %v2549_v16  ;;  %v2917_v16 = vunpack.c.l.s8.bf16 %v7930_v22  ;;  %v2436_v22 = vld [vmem:[%s7590_s24 + $0x680] sm:$0xff] }
 0x393   : > { %3067 = vmatprep.subr.bf16.mxu1 %v2677_v20  ;;  %v2373_v20 = vld [vmem:[%s7590_s24 + $0x488] sm:$0xff] }
 0x395   : > { %3027 = vmatpush2.bf16.msra.mxu0 %v2548_v25  ;;  %v2437_v25 = vld [vmem:[%s7590_s24 + $0x688] sm:$0xff] }
 0x396   : > { %3068 = vmatpush2.bf16.msra.mxu1 %v2676_v26  ;;  %3078 = vmatprep.subr.bf16.mxu0 %v2797_v15  ;;  %v2788_v26 = vunpack.c.l.s8.bf16 %v2380_v14  ;;  %v2781_v15 = vunpack.c.h.s8.bf16 %v2373_v20 }
 0x397   : > { %3119 = vmatprep.subr.bf16.mxu1 %v2925_v28  ;;  %v2372_v28 = vld [vmem:[%s7590_s24 + $0x480] sm:$0xff] }
 0x398   : > { %v7934_v30 = vpop.f32.mrf.mxu0  ;;  %v7936_v10 = vpop.f32.mrf.mxu1 }
 0x39a   : > { %v7938_v32 = vpop.f32.mrf.mxu0  ;;  %v7940_v33 = vpop.f32.mrf.mxu1 }
 0x39c   : > { %v1904_v34 = vpop.f32.mrf.mxu0  ;;  %v1945_v29 = vpop.f32.mrf.mxu1 }
 0x39d   : > { %v2909_v34 = vunpack.c.h.s8.bf16 %v2437_v25  ;;  %v2780_v29 = vunpack.c.h.s8.bf16 %v2372_v28 }
 0x39e   : > { %v1905_v35 = vpop.f32.mrf.mxu0  ;;  %v1946_v27 = vpop.f32.mrf.mxu1 }
 0x39f   : > { %v2908_v35 = vunpack.c.h.s8.bf16 %v2436_v22  ;;  %v2773_v27 = vunpack.c.l.s8.bf16 %v2373_v20  ;;  %v2469_v20 = vld [vmem:[%s7590_s24 + $0x788] sm:$0xff] }
 0x3d8   : > { %v1982_v18 = vpop.f32.mrf.mxu0 }
 0x3d9   : > { %v1983_v38 = vadd.f32 %v1982_v18, %v7890_v39  ;;  %v2023_v0 = vpop.f32.mrf.mxu1  ;;  %v2171_v39 = vrot.slane %v7948_v63, %v7675_v44  ;;  %v2365_v18 = vld [vmem:[%s7590_s24 + $0x448] sm:$0xff] }
 0x3da   : > { %v2024_v46 = vadd.f32 %v2023_v0, %v7892_v40  ;;  %v1984_v48 = vpop.f32.mrf.mxu0  ;;  %v2179_v40 = vrot.slane %v7948_v63, %v7678_v45  ;;  %v2765_v0 = vunpack.c.h.s8.bf16 %v2365_v18 }
 0x3db   : > { %v2154_v50 = vmul.f32 %v2117_v11, %v1983_v38  ;;  %v1985_v51 = vadd.f32 %v1984_v48, %v7896_v36  ;;  %v2025_v52 = vpop.f32.mrf.mxu1  ;;  %v2901_v11 = vunpack.c.l.s8.bf16 %v2437_v25  ;;  %v2772_v38 = vunpack.c.l.s8.bf16 %v2372_v28 }
 0x3dc   : > { %v2156_v53 = vmul.f32 %v2125_v21, %v2024_v46  ;;  %v2026_v1 = vadd.f32 %v2025_v52, %v7898_v37  ;;  %v1986_v23 = vpop.f32.mrf.mxu0  ;;  %v2429_v21 = vld [vmem:[%s7590_s24 + $0x648] sm:$0xff]  ;;  %v2973_v28 = vunpack.c.h.s8.bf16 %v2469_v20 }
 0x3dd   : > { %v2204_v55 = vadd.f32 %v2167_v24, %v2154_v50  ;;  %v2155_v56 = vmul.f32 %v2121_v31, %v1985_v51  ;;  %v2027_v57 = vpop.f32.mrf.mxu1  ;;  %v2900_v24 = vunpack.c.l.s8.bf16 %v2436_v22  ;;  %v2364_v31 = vld [vmem:[%s7590_s24 + $0x440] sm:$0xff]  ;;  %v2893_v46 = vunpack.c.h.s8.bf16 %v2429_v21  ;;  %v2421_v52 = vld [vmem:[%s7590_s24 + $0x608] sm:$0xff] }
 0x3de   : > { %v2206_v58 = vadd.f32 %v2175_v47, %v2156_v53  ;;  %v2157_v59 = vmul.f32 %v2129_v49, %v2026_v1  ;;  %v1987_v60 = vpop.f32.mrf.mxu0  ;;  %v2428_v47 = vld [vmem:[%s7590_s24 + $0x640] sm:$0xff]  ;;  %v2764_v48 = vunpack.c.h.s8.bf16 %v2364_v31  ;;  %v2757_v50 = vunpack.c.l.s8.bf16 %v2365_v18  ;;  %v2461_v18 = vld [vmem:[%s7590_s24 + $0x748] sm:$0xff] }
 0x3df   : > { %v2205_v36 = vadd.f32 %v2171_v39, %v2155_v56  ;;  %v2028_v54 = vpop.f32.mrf.mxu1  ;;  %v2212_v61 = vmax.f32 %v2204_v55, 0.0  ;;  %v2892_v49 = vunpack.c.h.s8.bf16 %v2428_v47  ;;  %v2885_v51 = vunpack.c.l.s8.bf16 %v2429_v21  ;;  %v2357_v39 = vld [vmem:[%s7590_s24 + $0x408] sm:$0xff]  ;;  %v2356_v23 = vld [vmem:[%s7590_s24 + $0x400] sm:$0xff] }
 0x3e0   : > { %v2207_v62 = vadd.f32 %v2179_v40, %v2157_v59  ;;  %v2214_v2 = vmax.f32 %v2206_v58, 0.0  ;;  %v2756_v53 = vunpack.c.l.s8.bf16 %v2364_v31  ;;  %v2884_v1 = vunpack.c.l.s8.bf16 %v2428_v47  ;;  %v2420_v56 = vld [vmem:[%s7590_s24 + $0x600] sm:$0xff]  ;;  %v2477_v54 = vld [vmem:[%s7590_s24 + $0x7c8] sm:$0xff] }
 0x3e1   : > { %v2213_v37 = vmax.f32 %v2205_v36, 0.0  ;;  %v7974_v3 = vpack.c.bf16 %v2212_v61, %v2212_v61  ;;  %v2749_v40 = vunpack.c.h.s8.bf16 %v2357_v39  ;;  %v2877_v55 = vunpack.c.h.s8.bf16 %v2421_v52  ;;  %v2413_v36 = vld [vmem:[%s7590_s24 + $0x5c8] sm:$0xff] }
 0x3e2   : > { %v2215_v5 = vmax.f32 %v2207_v62, 0.0  ;;  %v7979_v13 = vpack.c.bf16 %v2214_v2, %v2214_v2  ;;  %v2748_v57 = vunpack.c.h.s8.bf16 %v2356_v23  ;;  %v2876_v58 = vunpack.c.h.s8.bf16 %v2420_v56  ;;  %v2412_v2 = vld [vmem:[%s7590_s24 + $0x5c0] sm:$0xff] }
 0x3e3   : > { %v7972_v6 = vpack.c.bf16 %v2213_v37, %v2213_v37  ;;  %v2741_v59 = vunpack.c.l.s8.bf16 %v2357_v39  ;;  %v2869_v60 = vunpack.c.l.s8.bf16 %v2421_v52  ;;  %v2740_v61 = vunpack.c.l.s8.bf16 %v2356_v23 }
 0x3e4   : > { %v7976_v8 = vpack.c.bf16 %v2215_v5, %v2215_v5  ;;  %v2868_v62 = vunpack.c.l.s8.bf16 %v2420_v56  ;;  %v2861_v14 = vunpack.c.h.s8.bf16 %v2413_v36  ;;  %v2989_v37 = vunpack.c.h.s8.bf16 %v2477_v54 }
 0x3e5   : > { %3028 = vmatprep.mubr.bf16.mxu0 %v7972_v6  ;;  %v2860_v5 = vunpack.c.h.s8.bf16 %v2412_v2  ;;  %v2852_v25 = vunpack.c.l.s8.bf16 %v2412_v2  ;;  %v2957_v31 = vunpack.c.h.s8.bf16 %v2461_v18  ;;  %v2949_v39 = vunpack.c.l.s8.bf16 %v2461_v18 }
 0x3e6   : > { %3069 = vmatprep.mubr.bf16.mxu1 %v7976_v8  ;;  %3029 = vmatmul.mubr.bf16.vlgmr.msra.gmra.mxu0 %v7974_v3  ;;  %v8017_v52 = vsub.s32 5, %v7666_v41 }
 0x3e7   : > { %3070 = vmatmul.mubr.bf16.vlgmr.msra.gmra.mxu1 %v7979_v13  ;;  %3079 = vmatpush1.bf16.msra.mxu0 %v2796_v7  ;;  %v2988_v7 = vunpack.c.h.s8.bf16 %v2476_v4 }
 0x3e8   : > { %3120 = vmatpush1.bf16.msra.mxu1 %v2924_v9  ;;  %3080 = vmatprep.subr.bf16.mxu0 %v2789_v12  ;;  %v2853_v9 = vunpack.c.l.s8.bf16 %v2413_v36  ;;  %v2981_v12 = vunpack.c.l.s8.bf16 %v2477_v54 }
 0x3e9   : > { %3121 = vmatprep.subr.bf16.mxu1 %v2917_v16  ;;  %v2405_v16 = vld [vmem:[%s7590_s24 + $0x588] sm:$0xff] }
 0x3eb   : > { %3081 = vmatpush1.bf16.msra.mxu0 %v2788_v26  ;;  %v2980_v26 = vunpack.c.l.s8.bf16 %v2476_v4 }
 0x3ec   : > { %3122 = vmatpush1.bf16.msra.mxu1 %v2916_v17  ;;  %3082 = vmatprep.subr.bf16.mxu0 %v2781_v15  ;;  %v2845_v17 = vunpack.c.h.s8.bf16 %v2405_v16  ;;  %v2404_v15 = vld [vmem:[%s7590_s24 + $0x580] sm:$0xff] }
 0x3ed   : > { %3123 = vmatprep.subr.bf16.mxu1 %v2909_v34  ;;  %v2468_v34 = vld [vmem:[%s7590_s24 + $0x780] sm:$0xff]  ;;  %v2844_v22 = vunpack.c.h.s8.bf16 %v2404_v15  ;;  %v2836_v21 = vunpack.c.l.s8.bf16 %v2404_v15 }
 0x3ef   : > { %3083 = vmatpush1.bf16.msra.mxu0 %v2780_v29  ;;  %v2972_v29 = vunpack.c.h.s8.bf16 %v2468_v34 }
 0x3f0   : > { %3124 = vmatpush1.bf16.msra.mxu1 %v2908_v35  ;;  %3084 = vmatprep.subr.bf16.mxu0 %v2773_v27  ;;  %v2837_v35 = vunpack.c.l.s8.bf16 %v2405_v16  ;;  %v2965_v27 = vunpack.c.l.s8.bf16 %v2469_v20 }
 0x3f1   : > { %3125 = vmatprep.subr.bf16.mxu1 %v2901_v11  ;;  %v2397_v11 = vld [vmem:[%s7590_s24 + $0x548] sm:$0xff] }
 0x3f3   : > { %3085 = vmatpush1.bf16.msra.mxu0 %v2772_v38  ;;  %v2964_v38 = vunpack.c.l.s8.bf16 %v2468_v34 }
 0x3f4   : > { %3126 = vmatpush1.bf16.msra.mxu1 %v2900_v24  ;;  %3086 = vmatprep.subr.bf16.mxu0 %v2765_v0  ;;  %v2829_v24 = vunpack.c.h.s8.bf16 %v2397_v11  ;;  %v2396_v0 = vld [vmem:[%s7590_s24 + $0x540] sm:$0xff] }
 0x3f5   : > { %3127 = vmatprep.subr.bf16.mxu1 %v2893_v46  ;;  %v2460_v46 = vld [vmem:[%s7590_s24 + $0x740] sm:$0xff]  ;;  %v2828_v47 = vunpack.c.h.s8.bf16 %v2396_v0 }
 0x3f7   : > { %3087 = vmatpush1.bf16.msra.mxu0 %v2764_v48  ;;  %v8011_v48 = vsub.s32 4, %v7666_v41 }
 0x3f8   : > { %3128 = vmatpush1.bf16.msra.mxu1 %v2892_v49  ;;  %3088 = vmatprep.subr.bf16.mxu0 %v2757_v50  ;;  %v2956_v49 = vunpack.c.h.s8.bf16 %v2460_v46  ;;  %v8014_v50 = vsub.s32 6, %v7666_v41 }
 0x3f9   : > { %3129 = vmatprep.subr.bf16.mxu1 %v2885_v51  ;;  %v2821_v51 = vunpack.c.l.s8.bf16 %v2397_v11  ;;  %v2133_v23 = vrot.slane %v7944_v19, %v8011_v48 }
 0x3fb   : > { %3089 = vmatpush1.bf16.msra.mxu0 %v2756_v53  ;;  %v2389_v53 = vld [vmem:[%s7590_s24 + $0x508] sm:$0xff] }
 0x3fc   : > { %3130 = vmatpush1.bf16.msra.mxu1 %v2884_v1  ;;  %3090 = vmatprep.subr.bf16.mxu0 %v2749_v40  ;;  %v8021_v1 = vsub.s32 7, %v7666_v41  ;;  %v2453_v40 = vld [vmem:[%s7590_s24 + $0x708] sm:$0xff]  ;;  %v2183_v41 = vrot.slane %v7948_v63, %v8011_v48  ;;  %v2805_v15 = vunpack.c.l.s8.bf16 %v2389_v53 }
 0x3fd   : > { %3131 = vmatprep.subr.bf16.mxu1 %v2877_v55  ;;  %v2820_v55 = vunpack.c.l.s8.bf16 %v2396_v0 }
 0x3fe   : > { %v2195_v16 = vrot.slane %v7948_v63, %v8021_v1 }
 0x3ff   : > { %3091 = vmatpush1.bf16.msra.mxu0 %v2748_v57  ;;  %v2141_v57 = vrot.slane %v7944_v19, %v8014_v50 }
 0x400   : > { %3132 = vmatpush1.bf16.msra.mxu1 %v2876_v58  ;;  %3092 = vmatprep.subr.bf16.mxu0 %v2741_v59  ;;  %v2948_v58 = vunpack.c.l.s8.bf16 %v2460_v46  ;;  %v2813_v59 = vunpack.c.h.s8.bf16 %v2389_v53 }
 0x401   : > { %3133 = vmatprep.subr.bf16.mxu1 %v2869_v60  ;;  %v2388_v60 = vld [vmem:[%s7590_s24 + $0x500] sm:$0xff] }
 0x403   : > { %3093 = vmatpush1.bf16.msra.mxu0 %v2740_v61  ;;  %v2137_v61 = vrot.slane %v7944_v19, %v8017_v52 }
 0x404   : > { %3134 = vmatpush1.bf16.msra.mxu1 %v2868_v62  ;;  %3094 = vmatprep.subr.bf16.mxu0 %v2861_v14  ;;  %v2941_v62 = vunpack.c.h.s8.bf16 %v2453_v40  ;;  %v2452_v14 = vld [vmem:[%s7590_s24 + $0x700] sm:$0xff] }
 0x405   : > { %3135 = vmatprep.subr.bf16.mxu1 %v2989_v37  ;;  %v2191_v37 = vrot.slane %v7948_v63, %v8014_v50 }
 0x407   : > { %3095 = vmatpush2.bf16.msra.mxu0 %v2860_v5  ;;  %v2187_v5 = vrot.slane %v7948_v63, %v8017_v52 }
 0x408   : > { %3136 = vmatpush2.bf16.msra.mxu1 %v2988_v7  ;;  %3096 = vmatprep.subr.bf16.mxu0 %v2853_v9 }
 0x409   : > { %3137 = vmatprep.subr.bf16.mxu1 %v2981_v12 }
 0x40b   : > { %3097 = vmatpush2.bf16.msra.mxu0 %v2852_v25 }
 0x40c   : > { %3138 = vmatpush2.bf16.msra.mxu1 %v2980_v26  ;;  %3098 = vmatprep.subr.bf16.mxu0 %v2845_v17  ;;  %v2940_v17 = vunpack.c.h.s8.bf16 %v2452_v14 }
 0x40d   : > { %3139 = vmatprep.subr.bf16.mxu1 %v2973_v28 }
 0x40f   : > { %3099 = vmatpush2.bf16.msra.mxu0 %v2844_v22  ;;  %v2255_v22 = vld [vmem:[%s7590_s24 + $0xd8] sm:$0xff] }
 0x410   : > { %3140 = vmatpush2.bf16.msra.mxu1 %v2972_v29  ;;  %3100 = vmatprep.subr.bf16.mxu0 %v2837_v35  ;;  %v2543_v0 = vunpack.c.h.s8.bf16 %v2255_v22 }
 0x411   : > { %3141 = vmatprep.subr.bf16.mxu1 %v2965_v27  ;;  %v2319_v27 = vld [vmem:[%s7590_s24 + $0x2d8] sm:$0xff] }
 0x413   : > { %3101 = vmatpush2.bf16.msra.mxu0 %v2836_v21 }
 0x414   : > { %3142 = vmatpush2.bf16.msra.mxu1 %v2964_v38  ;;  %3102 = vmatprep.subr.bf16.mxu0 %v2829_v24  ;;  %v2932_v24 = vunpack.c.l.s8.bf16 %v2452_v14 }
 0x415   : > { %3143 = vmatprep.subr.bf16.mxu1 %v2957_v31  ;;  %v2254_v31 = vld [vmem:[%s7590_s24 + $0xd0] sm:$0xff] }
 0x417   : > { %3103 = vmatpush2.bf16.msra.mxu0 %v2828_v47 }
 0x418   : > { %3144 = vmatpush2.bf16.msra.mxu1 %v2956_v49  ;;  %v2064_v56 = vpop.f32.mrf.mxu0  ;;  %3104 = vmatprep.subr.bf16.mxu0 %v2821_v51  ;;  %v2671_v49 = vunpack.c.h.s8.bf16 %v2319_v27  ;;  %v2318_v51 = vld [vmem:[%s7590_s24 + $0x2d0] sm:$0xff] }
 0x419   : > { %v2065_v36 = vadd.f32 %v2064_v56, %v7934_v30  ;;  %v2105_v54 = vpop.f32.mrf.mxu1  ;;  %3145 = vmatprep.subr.bf16.mxu1 %v2949_v39  ;;  %v2145_v30 = vrot.slane %v7944_v19, %v8021_v1  ;;  %v2670_v56 = vunpack.c.h.s8.bf16 %v2318_v51 }
 0x41a   : > { %v2106_v2 = vadd.f32 %v2105_v54, %v7936_v10  ;;  %v2066_v4 = vpop.f32.mrf.mxu0  ;;  %v2812_v10 = vunpack.c.h.s8.bf16 %v2388_v60  ;;  %v2662_v54 = vunpack.c.l.s8.bf16 %v2318_v51 }
 0x41b   : > { %v2158_v7 = vmul.f32 %v2133_v23, %v2065_v36  ;;  %v2067_v9 = vadd.f32 %v2066_v4, %v7938_v32  ;;  %v2107_v12 = vpop.f32.mrf.mxu1  ;;  %3105 = vmatpush2.bf16.msra.mxu0 %v2820_v55  ;;  %v2933_v32 = vunpack.c.l.s8.bf16 %v2453_v40  ;;  %v2542_v40 = vunpack.c.h.s8.bf16 %v2254_v31  ;;  %v2311_v36 = vld [vmem:[%s7590_s24 + $0x298] sm:$0xff] }
 0x41c   : > { %v2160_v20 = vmul.f32 %v2141_v57, %v2106_v2  ;;  %v2108_v25 = vadd.f32 %v2107_v12, %v7940_v33  ;;  %3146 = vmatpush2.bf16.msra.mxu1 %v2948_v58  ;;  %v2068_v26 = vpop.f32.mrf.mxu0  ;;  %3106 = vmatprep.subr.bf16.mxu0 %v2813_v59  ;;  %v2804_v33 = vunpack.c.l.s8.bf16 %v2388_v60  ;;  %v2535_v58 = vunpack.c.l.s8.bf16 %v2255_v22  ;;  %v2247_v59 = vld [vmem:[%s7590_s24 + $0x98] sm:$0xff]  ;;  %v2310_v2 = vld [vmem:[%s7590_s24 + $0x290] sm:$0xff] }
 0x41d   : > { %v2208_v19 = vadd.f32 %v2183_v41, %v2158_v7  ;;  %v2159_v28 = vmul.f32 %v2137_v61, %v2067_v9  ;;  %v2109_v34 = vpop.f32.mrf.mxu1  ;;  %3147 = vmatprep.subr.bf16.mxu1 %v2941_v62  ;;  %v2663_v60 = vunpack.c.l.s8.bf16 %v2319_v27  ;;  %v2534_v41 = vunpack.c.l.s8.bf16 %v2254_v31  ;;  %v2246_v62 = vld [vmem:[%s7590_s24 + $0x90] sm:$0xff]  ;;  %v2239_v7 = vld [vmem:[%s7590_s24 + $0x58] sm:$0xff] }
 0x41e   : > { %v2210_v29 = vadd.f32 %v2191_v37, %v2160_v20  ;;  %v2161_v63 = vmul.f32 %v2145_v30, %v2108_v25  ;;  %v2069_v35 = vpop.f32.mrf.mxu0  ;;  %v2527_v61 = vunpack.c.h.s8.bf16 %v2247_v59  ;;  %v2655_v14 = vunpack.c.h.s8.bf16 %v2311_v36  ;;  %v2303_v9 = vld [vmem:[%s7590_s24 + $0x258] sm:$0xff]  ;;  %v2238_v20 = vld [vmem:[%s7590_s24 + $0x50] sm:$0xff] }
 0x41f   : > { %v2209_v11 = vadd.f32 %v2187_v5, %v2159_v28  ;;  %v2110_v18 = vpop.f32.mrf.mxu1  ;;  %3107 = vmatpush2.bf16.msra.mxu0 %v2812_v10  ;;  %v2216_v21 = vmax.f32 %v2208_v19, 0.0  ;;  %v2526_v37 = vunpack.c.h.s8.bf16 %v2246_v62  ;;  %v2654_v4 = vunpack.c.h.s8.bf16 %v2310_v2  ;;  %v2302_v26 = vld [vmem:[%s7590_s24 + $0x250] sm:$0xff]  ;;  %v2231_v34 = vld [vmem:[%s7590_s24 + $0x18] sm:$0xff] }
 0x420   : > { %v2211_v38 = vadd.f32 %v2195_v16, %v2161_v63  ;;  %3148 = vmatpush2.bf16.msra.mxu1 %v2940_v17  ;;  %3108 = vmatprep.subr.bf16.mxu0 %v2805_v15  ;;  %v2218_v46 = vmax.f32 %v2210_v29, 0.0  ;;  %v2519_v5 = vunpack.c.l.s8.bf16 %v2247_v59  ;;  %v2647_v30 = vunpack.c.l.s8.bf16 %v2311_v36  ;;  %v2230_v35 = vld [vmem:[%s7590_s24 + $0x10] sm:$0xff]  ;;  %v2343_v36 = vld [vmem:[%s7590_s24 + $0x398] sm:$0xff] }
 0x421   : > { %v2217_v47 = vmax.f32 %v2209_v11, 0.0  ;;  %3149 = vmatprep.subr.bf16.mxu1 %v2933_v32  ;;  %v8052_v23 = vpack.c.bf16 %v2216_v21, %v2216_v21  ;;  %v2518_v12 = vunpack.c.l.s8.bf16 %v2246_v62  ;;  %v2646_v16 = vunpack.c.l.s8.bf16 %v2310_v2  ;;  %v2295_v32 = vld [vmem:[%s7590_s24 + $0x218] sm:$0xff]  ;;  %v2294_v11 = vld [vmem:[%s7590_s24 + $0x210] sm:$0xff] }
 0x422   : > { %v2219_v39 = vmax.f32 %v2211_v38, 0.0  ;;  %v8056_v57 = vpack.c.bf16 %v2218_v46, %v2218_v46  ;;  %v2511_v10 = vunpack.c.h.s8.bf16 %v2239_v7  ;;  %v2639_v25 = vunpack.c.h.s8.bf16 %v2303_v9  ;;  %v2278_v62 = vld [vmem:[%s7590_s24 + $0x190] sm:$0xff] }
 0x423   : > { %v8050_v53 = vpack.c.bf16 %v2217_v47, %v2217_v47  ;;  %3109 = vmatpush2.bf16.msra.mxu0 %v2804_v33  ;;  %v2510_v17 = vunpack.c.h.s8.bf16 %v2238_v20  ;;  %v2638_v15 = vunpack.c.h.s8.bf16 %v2302_v26  ;;  %v2503_v19 = vunpack.c.l.s8.bf16 %v2239_v7  ;;  %v2342_v2 = vld [vmem:[%s7590_s24 + $0x390] sm:$0xff]  ;;  %v2271_v7 = vld [vmem:[%s7590_s24 + $0x158] sm:$0xff] }
 0x424   : > { %v8054_v55 = vpack.c.bf16 %v2219_v39, %v2219_v39  ;;  %3150 = vmatpush2.bf16.msra.mxu1 %v2932_v24  ;;  %3160 = vmatprep.subr.bf16.mxu0 %v2543_v0  ;;  %v2631_v28 = vunpack.c.l.s8.bf16 %v2303_v9  ;;  %v2502_v22 = vunpack.c.l.s8.bf16 %v2238_v20  ;;  %v2630_v29 = vunpack.c.l.s8.bf16 %v2302_v26  ;;  %v2287_v24 = vld [vmem:[%s7590_s24 + $0x1d8] sm:$0xff]  ;;  %v2350_v39 = vld [vmem:[%s7590_s24 + $0x3d0] sm:$0xff] }
 0x425   : > { %3110 = vmatprep.mubr.bf16.mxu0 %v8050_v53  ;;  %3201 = vmatprep.subr.bf16.mxu1 %v2671_v49  ;;  %v2495_v63 = vunpack.c.h.s8.bf16 %v2231_v34  ;;  %v2623_v27 = vunpack.c.h.s8.bf16 %v2295_v32  ;;  %v2494_v18 = vunpack.c.h.s8.bf16 %v2230_v35  ;;  %v2622_v33 = vunpack.c.h.s8.bf16 %v2294_v11  ;;  %v2351_v0 = vld [vmem:[%s7590_s24 + $0x3d8] sm:$0xff]  ;;  %v2286_v49 = vld [vmem:[%s7590_s24 + $0x1d0] sm:$0xff] }
 0x426   : > { %3151 = vmatprep.mubr.bf16.mxu1 %v8054_v55  ;;  %3111 = vmatmul.mubr.bf16.vlgmr.msra.gmra.mxu0 %v8052_v23  ;;  %v2487_v21 = vunpack.c.l.s8.bf16 %v2231_v34  ;;  %v2615_v38 = vunpack.c.l.s8.bf16 %v2295_v32  ;;  %v2486_v31 = vunpack.c.l.s8.bf16 %v2230_v35  ;;  %v2614_v46 = vunpack.c.l.s8.bf16 %v2294_v11  ;;  %v2335_v9 = vld [vmem:[%s7590_s24 + $0x358] sm:$0xff]  ;;  %v2270_v20 = vld [vmem:[%s7590_s24 + $0x150] sm:$0xff] }
 0x427   : > { %3152 = vmatmul.mubr.bf16.vlgmr.msra.gmra.mxu1 %v8056_v57  ;;  %3161 = vmatpush1.bf16.msra.mxu0 %v2542_v40  ;;  %v2607_v47 = vunpack.c.h.s8.bf16 %v2287_v24  ;;  %v2735_v51 = vunpack.c.h.s8.bf16 %v2351_v0  ;;  %v2606_v40 = vunpack.c.h.s8.bf16 %v2286_v49  ;;  %v2727_v59 = vunpack.c.l.s8.bf16 %v2351_v0  ;;  %v2334_v26 = vld [vmem:[%s7590_s24 + $0x350] sm:$0xff]  ;;  %v2263_v34 = vld [vmem:[%s7590_s24 + $0x118] sm:$0xff] }
 0x428   : > { %3202 = vmatpush1.bf16.msra.mxu1 %v2670_v56  ;;  %3192 = vmatprep.mubr.bf16.mxu0 %v7972_v6  ;;  %v2734_v56 = vunpack.c.h.s8.bf16 %v2350_v39  ;;  %v2327_v32 = vld [vmem:[%s7590_s24 + $0x318] sm:$0xff]  ;;  %v2262_v35 = vld [vmem:[%s7590_s24 + $0x110] sm:$0xff] }
 0x429   : > { %3233 = vmatprep.mubr.bf16.mxu1 %v7976_v8  ;;  %3162 = vmatprep.subr.bf16.mxu0 %v2535_v58  ;;  %v2599_v58 = vunpack.c.l.s8.bf16 %v2287_v24  ;;  %v2326_v11 = vld [vmem:[%s7590_s24 + $0x310] sm:$0xff]  ;;  %v2383_v24 = vld [vmem:[%s7590_s24 + $0x4d8] sm:$0xff] }
 0x42a   : > { %3203 = vmatprep.subr.bf16.mxu1 %v2663_v60  ;;  %v2279_v60 = vld [vmem:[%s7590_s24 + $0x198] sm:$0xff] }
 0x42b   : > { %3163 = vmatpush1.bf16.msra.mxu0 %v2534_v41  ;;  %v2598_v41 = vunpack.c.l.s8.bf16 %v2286_v49  ;;  %v2447_v0 = vld [vmem:[%s7590_s24 + $0x6d8] sm:$0xff]  ;;  %v2382_v49 = vld [vmem:[%s7590_s24 + $0x4d0] sm:$0xff] }
 0x42c   : > { %3204 = vmatpush1.bf16.msra.mxu1 %v2662_v54  ;;  %3164 = vmatprep.subr.bf16.mxu0 %v2527_v61  ;;  %v2726_v54 = vunpack.c.l.s8.bf16 %v2350_v39  ;;  %v2591_v61 = vunpack.c.h.s8.bf16 %v2279_v60  ;;  %v2446_v39 = vld [vmem:[%s7590_s24 + $0x6d0] sm:$0xff] }
 0x42d   : > { %3205 = vmatprep.subr.bf16.mxu1 %v2655_v14  ;;  %v2719_v14 = vunpack.c.h.s8.bf16 %v2343_v36 }
 0x42f   : > { %3165 = vmatpush1.bf16.msra.mxu0 %v2526_v37  ;;  %v2590_v37 = vunpack.c.h.s8.bf16 %v2278_v62 }
 0x430   : > { %3206 = vmatpush1.bf16.msra.mxu1 %v2654_v4  ;;  %3166 = vmatprep.subr.bf16.mxu0 %v2519_v5  ;;  %v2718_v4 = vunpack.c.h.s8.bf16 %v2342_v2  ;;  %v2583_v5 = vunpack.c.l.s8.bf16 %v2279_v60  ;;  %v2919_v60 = vunpack.c.l.s8.bf16 %v2447_v0 }
 0x431   : > { %3207 = vmatprep.subr.bf16.mxu1 %v2647_v30  ;;  %v2711_v30 = vunpack.c.l.s8.bf16 %v2343_v36  ;;  %v2439_v36 = vld [vmem:[%s7590_s24 + $0x698] sm:$0xff] }
 0x433   : > { %3167 = vmatpush1.bf16.msra.mxu0 %v2518_v12  ;;  %v2582_v12 = vunpack.c.l.s8.bf16 %v2278_v62  ;;  %v2374_v62 = vld [vmem:[%s7590_s24 + $0x490] sm:$0xff] }
 0x434   : > { %3208 = vmatpush1.bf16.msra.mxu1 %v2646_v16  ;;  %3168 = vmatprep.subr.bf16.mxu0 %v2511_v10  ;;  %v2710_v16 = vunpack.c.l.s8.bf16 %v2342_v2  ;;  %v2575_v10 = vunpack.c.h.s8.bf16 %v2271_v7  ;;  %v2438_v2 = vld [vmem:[%s7590_s24 + $0x690] sm:$0xff] }
 0x435   : > { %3209 = vmatprep.subr.bf16.mxu1 %v2639_v25  ;;  %v2703_v25 = vunpack.c.h.s8.bf16 %v2335_v9 }
 0x437   : > { %3169 = vmatpush1.bf16.msra.mxu0 %v2510_v17  ;;  %v2574_v17 = vunpack.c.h.s8.bf16 %v2270_v20 }
 0x438   : > { %3210 = vmatpush1.bf16.msra.mxu1 %v2638_v15  ;;  %3170 = vmatprep.subr.bf16.mxu0 %v2503_v19  ;;  %v2702_v15 = vunpack.c.h.s8.bf16 %v2334_v26  ;;  %v2567_v19 = vunpack.c.l.s8.bf16 %v2271_v7  ;;  %v2367_v7 = vld [vmem:[%s7590_s24 + $0x458] sm:$0xff] }
 0x439   : > { %3211 = vmatprep.subr.bf16.mxu1 %v2631_v28  ;;  %v2695_v28 = vunpack.c.l.s8.bf16 %v2335_v9  ;;  %v2431_v9 = vld [vmem:[%s7590_s24 + $0x658] sm:$0xff] }
 0x43b   : > { %3171 = vmatpush1.bf16.msra.mxu0 %v2502_v22  ;;  %v2566_v22 = vunpack.c.l.s8.bf16 %v2270_v20  ;;  %v2366_v20 = vld [vmem:[%s7590_s24 + $0x450] sm:$0xff] }
 0x43c   : > { %3212 = vmatpush1.bf16.msra.mxu1 %v2630_v29  ;;  %3172 = vmatprep.subr.bf16.mxu0 %v2495_v63  ;;  %v2694_v29 = vunpack.c.l.s8.bf16 %v2334_v26  ;;  %v2559_v63 = vunpack.c.h.s8.bf16 %v2263_v34  ;;  %v2430_v26 = vld [vmem:[%s7590_s24 + $0x650] sm:$0xff] }
 0x43d   : > { %3213 = vmatprep.subr.bf16.mxu1 %v2623_v27  ;;  %v2687_v27 = vunpack.c.h.s8.bf16 %v2327_v32 }
 0x43f   : > { %3173 = vmatpush1.bf16.msra.mxu0 %v2494_v18  ;;  %v2558_v18 = vunpack.c.h.s8.bf16 %v2262_v35 }
 0x440   : > { %3214 = vmatpush1.bf16.msra.mxu1 %v2622_v33  ;;  %3174 = vmatprep.subr.bf16.mxu0 %v2487_v21  ;;  %v2686_v33 = vunpack.c.h.s8.bf16 %v2326_v11  ;;  %v2551_v21 = vunpack.c.l.s8.bf16 %v2263_v34  ;;  %v2359_v34 = vld [vmem:[%s7590_s24 + $0x418] sm:$0xff] }
 0x441   : > { %3215 = vmatprep.subr.bf16.mxu1 %v2615_v38  ;;  %v2679_v38 = vunpack.c.l.s8.bf16 %v2327_v32  ;;  %v2423_v32 = vld [vmem:[%s7590_s24 + $0x618] sm:$0xff] }
 0x443   : > { %3175 = vmatpush1.bf16.msra.mxu0 %v2486_v31  ;;  %v2550_v31 = vunpack.c.l.s8.bf16 %v2262_v35  ;;  %v2358_v35 = vld [vmem:[%s7590_s24 + $0x410] sm:$0xff] }
 0x444   : > { %3216 = vmatpush1.bf16.msra.mxu1 %v2614_v46  ;;  %3176 = vmatprep.subr.bf16.mxu0 %v2607_v47  ;;  %v2678_v46 = vunpack.c.l.s8.bf16 %v2326_v11  ;;  %v2799_v47 = vunpack.c.h.s8.bf16 %v2383_v24  ;;  %v2422_v11 = vld [vmem:[%s7590_s24 + $0x610] sm:$0xff] }
 0x445   : > { %3217 = vmatprep.subr.bf16.mxu1 %v2735_v51  ;;  %v2927_v51 = vunpack.c.h.s8.bf16 %v2447_v0  ;;  %v2479_v0 = vld [vmem:[%s7590_s24 + $0x7d8] sm:$0xff] }
 0x447   : > { %3177 = vmatpush2.bf16.msra.mxu0 %v2606_v40  ;;  %v2798_v40 = vunpack.c.h.s8.bf16 %v2382_v49 }
 0x448   : > { %3218 = vmatpush2.bf16.msra.mxu1 %v2734_v56  ;;  %3178 = vmatprep.subr.bf16.mxu0 %v2599_v58  ;;  %v2926_v56 = vunpack.c.h.s8.bf16 %v2446_v39  ;;  %v2791_v58 = vunpack.c.l.s8.bf16 %v2383_v24  ;;  %v2415_v24 = vld [vmem:[%s7590_s24 + $0x5d8] sm:$0xff] }
 0x449   : > { %3219 = vmatprep.subr.bf16.mxu1 %v2727_v59  ;;  %v2375_v59 = vld [vmem:[%s7590_s24 + $0x498] sm:$0xff] }
 0x44b   : > { %3179 = vmatpush2.bf16.msra.mxu0 %v2598_v41  ;;  %v2790_v41 = vunpack.c.l.s8.bf16 %v2382_v49  ;;  %v2414_v49 = vld [vmem:[%s7590_s24 + $0x5d0] sm:$0xff] }
 0x44c   : > { %3220 = vmatpush2.bf16.msra.mxu1 %v2726_v54  ;;  %3180 = vmatprep.subr.bf16.mxu0 %v2591_v61  ;;  %v2918_v54 = vunpack.c.l.s8.bf16 %v2446_v39  ;;  %v2783_v61 = vunpack.c.h.s8.bf16 %v2375_v59  ;;  %v2478_v39 = vld [vmem:[%s7590_s24 + $0x7d0] sm:$0xff] }
 0x44d   : > { %3221 = vmatprep.subr.bf16.mxu1 %v2719_v14  ;;  %v2911_v14 = vunpack.c.h.s8.bf16 %v2439_v36 }
 0x44f   : > { %3181 = vmatpush2.bf16.msra.mxu0 %v2590_v37  ;;  %v2782_v37 = vunpack.c.h.s8.bf16 %v2374_v62 }
 0x450   : > { %3222 = vmatpush2.bf16.msra.mxu1 %v2718_v4  ;;  %3182 = vmatprep.subr.bf16.mxu0 %v2583_v5  ;;  %v2910_v4 = vunpack.c.h.s8.bf16 %v2438_v2  ;;  %v2775_v5 = vunpack.c.l.s8.bf16 %v2375_v59  ;;  %v2983_v59 = vunpack.c.l.s8.bf16 %v2479_v0 }
 0x451   : > { %3223 = vmatprep.subr.bf16.mxu1 %v2711_v30  ;;  %v2903_v30 = vunpack.c.l.s8.bf16 %v2439_v36  ;;  %v2471_v36 = vld [vmem:[%s7590_s24 + $0x798] sm:$0xff] }
 0x453   : > { %3183 = vmatpush2.bf16.msra.mxu0 %v2582_v12  ;;  %v2774_v12 = vunpack.c.l.s8.bf16 %v2374_v62  ;;  %v2406_v62 = vld [vmem:[%s7590_s24 + $0x590] sm:$0xff] }
 0x454   : > { %3224 = vmatpush2.bf16.msra.mxu1 %v2710_v16  ;;  %3184 = vmatprep.subr.bf16.mxu0 %v2575_v10  ;;  %v2902_v16 = vunpack.c.l.s8.bf16 %v2438_v2  ;;  %v2767_v10 = vunpack.c.h.s8.bf16 %v2367_v7  ;;  %v2470_v2 = vld [vmem:[%s7590_s24 + $0x790] sm:$0xff] }
 0x455   : > { %3225 = vmatprep.subr.bf16.mxu1 %v2703_v25  ;;  %v2895_v25 = vunpack.c.h.s8.bf16 %v2431_v9 }
 0x457   : > { %3185 = vmatpush2.bf16.msra.mxu0 %v2574_v17  ;;  %v2766_v17 = vunpack.c.h.s8.bf16 %v2366_v20 }
 0x458   : > { %3226 = vmatpush2.bf16.msra.mxu1 %v2702_v15  ;;  %3186 = vmatprep.subr.bf16.mxu0 %v2567_v19  ;;  %v2894_v15 = vunpack.c.h.s8.bf16 %v2430_v26  ;;  %v2759_v19 = vunpack.c.l.s8.bf16 %v2367_v7  ;;  %v2399_v7 = vld [vmem:[%s7590_s24 + $0x558] sm:$0xff] }
 0x459   : > { %3227 = vmatprep.subr.bf16.mxu1 %v2695_v28  ;;  %v2887_v28 = vunpack.c.l.s8.bf16 %v2431_v9  ;;  %v2463_v9 = vld [vmem:[%s7590_s24 + $0x758] sm:$0xff] }
 0x45b   : > { %3187 = vmatpush2.bf16.msra.mxu0 %v2566_v22  ;;  %v2758_v22 = vunpack.c.l.s8.bf16 %v2366_v20  ;;  %v2398_v20 = vld [vmem:[%s7590_s24 + $0x550] sm:$0xff] }
 0x45c   : > { %3228 = vmatpush2.bf16.msra.mxu1 %v2694_v29  ;;  %3188 = vmatprep.subr.bf16.mxu0 %v2559_v63  ;;  %v2886_v29 = vunpack.c.l.s8.bf16 %v2430_v26  ;;  %v2751_v63 = vunpack.c.h.s8.bf16 %v2359_v34  ;;  %v2462_v26 = vld [vmem:[%s7590_s24 + $0x750] sm:$0xff] }
 0x45d   : > { %3229 = vmatprep.subr.bf16.mxu1 %v2687_v27  ;;  %v2879_v27 = vunpack.c.h.s8.bf16 %v2423_v32 }
 0x45f   : > { %3189 = vmatpush2.bf16.msra.mxu0 %v2558_v18  ;;  %v2750_v18 = vunpack.c.h.s8.bf16 %v2358_v35 }
 0x460   : > { %3230 = vmatpush2.bf16.msra.mxu1 %v2686_v33  ;;  %3190 = vmatprep.subr.bf16.mxu0 %v2551_v21  ;;  %v2878_v33 = vunpack.c.h.s8.bf16 %v2422_v11  ;;  %v2743_v21 = vunpack.c.l.s8.bf16 %v2359_v34  ;;  %v2391_v34 = vld [vmem:[%s7590_s24 + $0x518] sm:$0xff] }
 0x461   : > { %3231 = vmatprep.subr.bf16.mxu1 %v2679_v38  ;;  %v2871_v38 = vunpack.c.l.s8.bf16 %v2423_v32  ;;  %v2455_v32 = vld [vmem:[%s7590_s24 + $0x718] sm:$0xff] }
 0x463   : > { %3191 = vmatpush2.bf16.msra.mxu0 %v2550_v31  ;;  %v2742_v31 = vunpack.c.l.s8.bf16 %v2358_v35  ;;  %v2390_v35 = vld [vmem:[%s7590_s24 + $0x510] sm:$0xff] }
 0x464   : > { %3232 = vmatpush2.bf16.msra.mxu1 %v2678_v46  ;;  %3242 = vmatprep.subr.bf16.mxu0 %v2799_v47  ;;  %v2870_v46 = vunpack.c.l.s8.bf16 %v2422_v11  ;;  %v2863_v47 = vunpack.c.h.s8.bf16 %v2415_v24  ;;  %v2454_v11 = vld [vmem:[%s7590_s24 + $0x710] sm:$0xff] }
 0x465   : > { %3283 = vmatprep.subr.bf16.mxu1 %v2927_v51  ;;  %v2991_v51 = vunpack.c.h.s8.bf16 %v2479_v0  ;;  %v2321_v0 = vld [vmem:[%s7590_s24 + $0x2e8] sm:$0xff] }
 0x466   : > { %3193 = vmatmul.mubr.bf16.vlgmr.msra.gmra.mxu0 %v7974_v3 }
 0x467   : > { %3234 = vmatmul.mubr.bf16.vlgmr.msra.gmra.mxu1 %v7979_v13  ;;  %3243 = vmatpush1.bf16.msra.mxu0 %v2798_v40  ;;  %v2862_v40 = vunpack.c.h.s8.bf16 %v2414_v49 }
 0x468   : > { %3274 = vmatprep.mubr.bf16.mxu0 %v8050_v53  ;;  %3284 = vmatpush1.bf16.msra.mxu1 %v2926_v56  ;;  %v2990_v56 = vunpack.c.h.s8.bf16 %v2478_v39 }
 0x469   : > { %3315 = vmatprep.mubr.bf16.mxu1 %v8054_v55  ;;  %3244 = vmatprep.subr.bf16.mxu0 %v2791_v58  ;;  %v2855_v58 = vunpack.c.l.s8.bf16 %v2415_v24  ;;  %v2257_v24 = vld [vmem:[%s7590_s24 + $0xe8] sm:$0xff] }
 0x46a   : > { %3285 = vmatprep.subr.bf16.mxu1 %v2919_v60  ;;  %v2407_v60 = vld [vmem:[%s7590_s24 + $0x598] sm:$0xff] }
 0x46b   : > { %3245 = vmatpush1.bf16.msra.mxu0 %v2790_v41  ;;  %v2854_v41 = vunpack.c.l.s8.bf16 %v2414_v49  ;;  %v2256_v49 = vld [vmem:[%s7590_s24 + $0xe0] sm:$0xff] }
 0x46c   : > { %3286 = vmatpush1.bf16.msra.mxu1 %v2918_v54  ;;  %3246 = vmatprep.subr.bf16.mxu0 %v2783_v61  ;;  %v2982_v54 = vunpack.c.l.s8.bf16 %v2478_v39  ;;  %v2847_v61 = vunpack.c.h.s8.bf16 %v2407_v60  ;;  %v2320_v39 = vld [vmem:[%s7590_s24 + $0x2e0] sm:$0xff] }
 0x46d   : > { %3287 = vmatprep.subr.bf16.mxu1 %v2911_v14  ;;  %v2975_v14 = vunpack.c.h.s8.bf16 %v2471_v36 }
 0x46f   : > { %3247 = vmatpush1.bf16.msra.mxu0 %v2782_v37  ;;  %v2846_v37 = vunpack.c.h.s8.bf16 %v2406_v62 }
 0x470   : > { %3288 = vmatpush1.bf16.msra.mxu1 %v2910_v4  ;;  %3248 = vmatprep.subr.bf16.mxu0 %v2775_v5  ;;  %v2974_v4 = vunpack.c.h.s8.bf16 %v2470_v2  ;;  %v2839_v5 = vunpack.c.l.s8.bf16 %v2407_v60 }
 0x471   : > { %3289 = vmatprep.subr.bf16.mxu1 %v2903_v30  ;;  %v2967_v30 = vunpack.c.l.s8.bf16 %v2471_v36  ;;  %v2665_v36 = vunpack.c.l.s8.bf16 %v2321_v0 }
 0x473   : > { %3249 = vmatpush1.bf16.msra.mxu0 %v2774_v12  ;;  %v2838_v12 = vunpack.c.l.s8.bf16 %v2406_v62 }
 0x474   : > { %3290 = vmatpush1.bf16.msra.mxu1 %v2902_v16  ;;  %3250 = vmatprep.subr.bf16.mxu0 %v2767_v10  ;;  %v2966_v16 = vunpack.c.l.s8.bf16 %v2470_v2  ;;  %v2831_v10 = vunpack.c.h.s8.bf16 %v2399_v7  ;;  %v2664_v2 = vunpack.c.l.s8.bf16 %v2320_v39 }
 0x475   : > { %3291 = vmatprep.subr.bf16.mxu1 %v2895_v25  ;;  %v2959_v25 = vunpack.c.h.s8.bf16 %v2463_v9 }
 0x477   : > { %3251 = vmatpush1.bf16.msra.mxu0 %v2766_v17  ;;  %v2830_v17 = vunpack.c.h.s8.bf16 %v2398_v20 }
 0x478   : > { %3292 = vmatpush1.bf16.msra.mxu1 %v2894_v15  ;;  %3252 = vmatprep.subr.bf16.mxu0 %v2759_v19  ;;  %v2958_v15 = vunpack.c.h.s8.bf16 %v2462_v26  ;;  %v2823_v19 = vunpack.c.l.s8.bf16 %v2399_v7  ;;  %v2312_v7 = vld [vmem:[%s7590_s24 + $0x2a0] sm:$0xff] }
 0x479   : > { %3293 = vmatprep.subr.bf16.mxu1 %v2887_v28  ;;  %v2951_v28 = vunpack.c.l.s8.bf16 %v2463_v9 }
 0x47b   : > { %3253 = vmatpush1.bf16.msra.mxu0 %v2758_v22  ;;  %v2822_v22 = vunpack.c.l.s8.bf16 %v2398_v20 }
 0x47c   : > { %3294 = vmatpush1.bf16.msra.mxu1 %v2886_v29  ;;  %3254 = vmatprep.subr.bf16.mxu0 %v2751_v63  ;;  %v2950_v29 = vunpack.c.l.s8.bf16 %v2462_v26  ;;  %v2815_v63 = vunpack.c.h.s8.bf16 %v2391_v34 }
 0x47d   : > { %3295 = vmatprep.subr.bf16.mxu1 %v2879_v27  ;;  %v2943_v27 = vunpack.c.h.s8.bf16 %v2455_v32 }
 0x47f   : > { %3255 = vmatpush1.bf16.msra.mxu0 %v2750_v18  ;;  %v2814_v18 = vunpack.c.h.s8.bf16 %v2390_v35 }
 0x480   : > { %3296 = vmatpush1.bf16.msra.mxu1 %v2878_v33  ;;  %3256 = vmatprep.subr.bf16.mxu0 %v2743_v21  ;;  %v2942_v33 = vunpack.c.h.s8.bf16 %v2454_v11  ;;  %v2807_v21 = vunpack.c.l.s8.bf16 %v2391_v34 }
 0x481   : > { %3297 = vmatprep.subr.bf16.mxu1 %v2871_v38  ;;  %v2935_v38 = vunpack.c.l.s8.bf16 %v2455_v32  ;;  %v2648_v32 = vunpack.c.l.s8.bf16 %v2312_v7 }
 0x483   : > { %3257 = vmatpush1.bf16.msra.mxu0 %v2742_v31  ;;  %v2806_v31 = vunpack.c.l.s8.bf16 %v2390_v35  ;;  %v2304_v35 = vld [vmem:[%s7590_s24 + $0x260] sm:$0xff] }
 0x484   : > { %3298 = vmatpush1.bf16.msra.mxu1 %v2870_v46  ;;  %3258 = vmatprep.subr.bf16.mxu0 %v2863_v47  ;;  %v2934_v46 = vunpack.c.l.s8.bf16 %v2454_v11  ;;  %v2545_v47 = vunpack.c.h.s8.bf16 %v2257_v24  ;;  %v2640_v11 = vunpack.c.h.s8.bf16 %v2304_v35 }
 0x485   : > { %3299 = vmatprep.subr.bf16.mxu1 %v2991_v51  ;;  %v2673_v51 = vunpack.c.h.s8.bf16 %v2321_v0  ;;  %v2632_v0 = vunpack.c.l.s8.bf16 %v2304_v35  ;;  %v2272_v35 = vld [vmem:[%s7590_s24 + $0x160] sm:$0xff] }
 0x487   : > { %3259 = vmatpush2.bf16.msra.mxu0 %v2862_v40  ;;  %v2544_v40 = vunpack.c.h.s8.bf16 %v2256_v49 }
 0x488   : > { %3300 = vmatpush2.bf16.msra.mxu1 %v2990_v56  ;;  %3260 = vmatprep.subr.bf16.mxu0 %v2855_v58  ;;  %v2672_v56 = vunpack.c.h.s8.bf16 %v2320_v39  ;;  %v2537_v58 = vunpack.c.l.s8.bf16 %v2257_v24 }
 0x489   : > { %3301 = vmatprep.subr.bf16.mxu1 %v2983_v59  ;;  %v2249_v59 = vld [vmem:[%s7590_s24 + $0xa8] sm:$0xff] }
 0x48a   : > { %v2521_v26 = vunpack.c.l.s8.bf16 %v2249_v59 }
 0x48b   : > { %3261 = vmatpush2.bf16.msra.mxu0 %v2854_v41  ;;  %v2313_v41 = vld [vmem:[%s7590_s24 + $0x2a8] sm:$0xff] }
 0x48c   : > { %3302 = vmatpush2.bf16.msra.mxu1 %v2982_v54  ;;  %3262 = vmatprep.subr.bf16.mxu0 %v2847_v61  ;;  %v2536_v61 = vunpack.c.l.s8.bf16 %v2256_v49  ;;  %v2296_v49 = vld [vmem:[%s7590_s24 + $0x220] sm:$0xff] }
 0x48d   : > { %3303 = vmatprep.subr.bf16.mxu1 %v2975_v14  ;;  %v2624_v39 = vunpack.c.h.s8.bf16 %v2296_v49 }
 0x48f   : > { %3263 = vmatpush2.bf16.msra.mxu0 %v2846_v37  ;;  %v2529_v37 = vunpack.c.h.s8.bf16 %v2249_v59  ;;  %v2353_v59 = vld [vmem:[%s7590_s24 + $0x3e8] sm:$0xff] }
 0x490   : > { %3304 = vmatpush2.bf16.msra.mxu1 %v2974_v4  ;;  %3264 = vmatprep.subr.bf16.mxu0 %v2839_v5  ;;  %v2248_v4 = vld [vmem:[%s7590_s24 + $0xa0] sm:$0xff] }
 0x491   : > { %3305 = vmatprep.subr.bf16.mxu1 %v2967_v30  ;;  %v2657_v30 = vunpack.c.h.s8.bf16 %v2313_v41  ;;  %v2520_v34 = vunpack.c.l.s8.bf16 %v2248_v4 }
 0x493   : > { %3265 = vmatpush2.bf16.msra.mxu0 %v2838_v12 }
 0x494   : > { %3306 = vmatpush2.bf16.msra.mxu1 %v2966_v16  ;;  %3266 = vmatprep.subr.bf16.mxu0 %v2831_v10  ;;  %v2528_v10 = vunpack.c.h.s8.bf16 %v2248_v4 }
 0x495   : > { %3307 = vmatprep.subr.bf16.mxu1 %v2959_v25  ;;  %v2656_v25 = vunpack.c.h.s8.bf16 %v2312_v7  ;;  %v2345_v7 = vld [vmem:[%s7590_s24 + $0x3a8] sm:$0xff] }
 0x497   : > { %3267 = vmatpush2.bf16.msra.mxu0 %v2830_v17 }
 0x498   : > { %3308 = vmatpush2.bf16.msra.mxu1 %v2958_v15  ;;  %3268 = vmatprep.subr.bf16.mxu0 %v2823_v19  ;;  %v2649_v15 = vunpack.c.l.s8.bf16 %v2313_v41  ;;  %v2241_v19 = vld [vmem:[%s7590_s24 + $0x68] sm:$0xff] }
 0x499   : > { %3309 = vmatprep.subr.bf16.mxu1 %v2951_v28  ;;  %v2305_v28 = vld [vmem:[%s7590_s24 + $0x268] sm:$0xff] }
 0x49b   : > { %3269 = vmatpush2.bf16.msra.mxu0 %v2822_v22  ;;  %v2513_v22 = vunpack.c.h.s8.bf16 %v2241_v19 }
 0x49c   : > { %3310 = vmatpush2.bf16.msra.mxu1 %v2950_v29  ;;  %3270 = vmatprep.subr.bf16.mxu0 %v2815_v63  ;;  %v2240_v29 = vld [vmem:[%s7590_s24 + $0x60] sm:$0xff]  ;;  %v2641_v63 = vunpack.c.h.s8.bf16 %v2305_v28 }
 0x49d   : > { %3311 = vmatprep.subr.bf16.mxu1 %v2943_v27  ;;  %v2512_v27 = vunpack.c.h.s8.bf16 %v2240_v29  ;;  %v2504_v24 = vunpack.c.l.s8.bf16 %v2240_v29 }
 0x49f   : > { %3271 = vmatpush2.bf16.msra.mxu0 %v2814_v18  ;;  %v2505_v18 = vunpack.c.l.s8.bf16 %v2241_v19 }
 0x4a0   : > { %3312 = vmatpush2.bf16.msra.mxu1 %v2942_v33  ;;  %3272 = vmatprep.subr.bf16.mxu0 %v2807_v21  ;;  %v2633_v33 = vunpack.c.l.s8.bf16 %v2305_v28  ;;  %v2233_v21 = vld [vmem:[%s7590_s24 + $0x28] sm:$0xff]  ;;  %v2713_v28 = vunpack.c.l.s8.bf16 %v2345_v7 }
 0x4a1   : > { %3313 = vmatprep.subr.bf16.mxu1 %v2935_v38  ;;  %v2297_v38 = vld [vmem:[%s7590_s24 + $0x228] sm:$0xff] }
 0x4a3   : > { %3273 = vmatpush2.bf16.msra.mxu0 %v2806_v31  ;;  %v2497_v31 = vunpack.c.h.s8.bf16 %v2233_v21 }
 0x4a4   : > { %3314 = vmatpush2.bf16.msra.mxu1 %v2934_v46  ;;  %3324 = vmatprep.subr.bf16.mxu0 %v2545_v47  ;;  %v2232_v46 = vld [vmem:[%s7590_s24 + $0x20] sm:$0xff]  ;;  %v2625_v47 = vunpack.c.h.s8.bf16 %v2297_v38 }
 0x4a5   : > { %3365 = vmatprep.subr.bf16.mxu1 %v2673_v51  ;;  %v2496_v51 = vunpack.c.h.s8.bf16 %v2232_v46 }
 0x4a6   : > { %3275 = vmatmul.mubr.bf16.vlgmr.msra.gmra.mxu0 %v8052_v23  ;;  %v3030_v60 = vpop.f32.mrf.mxu0 }
 0x4a7   : > { %3316 = vmatmul.mubr.bf16.vlgmr.msra.gmra.mxu1 %v8056_v57  ;;  %v3071_v54 = vpop.f32.mrf.mxu1  ;;  %3325 = vmatpush1.bf16.msra.mxu0 %v2544_v40  ;;  %v2489_v40 = vunpack.c.l.s8.bf16 %v2233_v21 }
 0x4a8   : > { %v8136_v62 = vadd.f32 %v3071_v54, %v3030_v60  ;;  %3356 = vmatprep.mubr.bf16.mxu0 %v7972_v6  ;;  %3366 = vmatpush1.bf16.msra.mxu1 %v2672_v56  ;;  %v3032_v14 = vpop.f32.mrf.mxu0  ;;  %v2617_v56 = vunpack.c.l.s8.bf16 %v2297_v38  ;;  %v2488_v60 = vunpack.c.l.s8.bf16 %v2232_v46  ;;  %v2288_v54 = vld [vmem:[%s7590_s24 + $0x1e0] sm:$0xff] }
 0x4a9   : > { %3397 = vmatprep.mubr.bf16.mxu1 %v7976_v8  ;;  %v3073_v5 = vpop.f32.mrf.mxu1  ;;  %3326 = vmatprep.subr.bf16.mxu0 %v2537_v58  ;;  %v2289_v58 = vld [vmem:[%s7590_s24 + $0x1e8] sm:$0xff] }
 0x4aa   : > { %v8142_v9 = vadd.f32 %v3073_v5, %v3032_v14  ;;  %3367 = vmatprep.subr.bf16.mxu1 %v2665_v36  ;;  %v3034_v12 = vpop.f32.mrf.mxu0  ;;  %v2616_v36 = vunpack.c.l.s8.bf16 %v2296_v49  ;;  %v2609_v41 = vunpack.c.h.s8.bf16 %v2289_v58  ;;  %v2352_v14 = vld [vmem:[%s7590_s24 + $0x3e0] sm:$0xff]  ;;  %v2601_v4 = vunpack.c.l.s8.bf16 %v2289_v58 }
 0x4ab   : > { %v3075_v16 = vpop.f32.mrf.mxu1  ;;  %3327 = vmatpush1.bf16.msra.mxu0 %v2536_v61  ;;  %v2737_v61 = vunpack.c.h.s8.bf16 %v2353_v59  ;;  %v2729_v5 = vunpack.c.l.s8.bf16 %v2353_v59  ;;  %v2600_v12 = vunpack.c.l.s8.bf16 %v2288_v54  ;;  %v2264_v49 = vld [vmem:[%s7590_s24 + $0x120] sm:$0xff] }
 0x4ac   : > { %3368 = vmatpush1.bf16.msra.mxu1 %v2664_v2  ;;  %v3035_v20 = vpop.f32.mrf.mxu0  ;;  %3328 = vmatprep.subr.bf16.mxu0 %v2529_v37  ;;  %v2608_v2 = vunpack.c.h.s8.bf16 %v2288_v54  ;;  %v2736_v37 = vunpack.c.h.s8.bf16 %v2352_v14  ;;  %v2728_v16 = vunpack.c.l.s8.bf16 %v2352_v14  ;;  %v2384_v14 = vld [vmem:[%s7590_s24 + $0x4e0] sm:$0xff] }
 0x4ad   : > { %v3076_v17 = vpop.f32.mrf.mxu1  ;;  %3369 = vmatprep.subr.bf16.mxu1 %v2657_v30  ;;  %v2281_v30 = vld [vmem:[%s7590_s24 + $0x1a8] sm:$0xff]  ;;  %v2280_v20 = vld [vmem:[%s7590_s24 + $0x1a0] sm:$0xff] }
 0x4ae   : > { %v2592_v17 = vunpack.c.h.s8.bf16 %v2280_v20  ;;  %v2585_v19 = vunpack.c.l.s8.bf16 %v2281_v30 }
 0x4af   : > { %3329 = vmatpush1.bf16.msra.mxu0 %v2528_v10  ;;  %v2593_v10 = vunpack.c.h.s8.bf16 %v2281_v30 }
 0x4b0   : > { %3370 = vmatpush1.bf16.msra.mxu1 %v2656_v25  ;;  %3330 = vmatprep.subr.bf16.mxu0 %v2521_v26  ;;  %v2721_v25 = vunpack.c.h.s8.bf16 %v2345_v7  ;;  %v2344_v26 = vld [vmem:[%s7590_s24 + $0x3a0] sm:$0xff]  ;;  %v2377_v7 = vld [vmem:[%s7590_s24 + $0x4a8] sm:$0xff] }
 0x4b1   : > { %3371 = vmatprep.subr.bf16.mxu1 %v2649_v15  ;;  %v2720_v15 = vunpack.c.h.s8.bf16 %v2344_v26  ;;  %v2712_v29 = vunpack.c.l.s8.bf16 %v2344_v26  ;;  %v2792_v26 = vunpack.c.l.s8.bf16 %v2384_v14 }
 0x4b3   : > { %3331 = vmatpush1.bf16.msra.mxu0 %v2520_v34  ;;  %v2273_v34 = vld [vmem:[%s7590_s24 + $0x168] sm:$0xff] }
 0x4b4   : > { %3372 = vmatpush1.bf16.msra.mxu1 %v2648_v32  ;;  %3332 = vmatprep.subr.bf16.mxu0 %v2513_v22  ;;  %v2337_v32 = vld [vmem:[%s7590_s24 + $0x368] sm:$0xff]  ;;  %v2584_v22 = vunpack.c.l.s8.bf16 %v2280_v20  ;;  %v2569_v21 = vunpack.c.l.s8.bf16 %v2273_v34 }
 0x4b5   : > { %3373 = vmatprep.subr.bf16.mxu1 %v2641_v63  ;;  %v2577_v63 = vunpack.c.h.s8.bf16 %v2273_v34  ;;  %v2697_v38 = vunpack.c.l.s8.bf16 %v2337_v32 }
 0x4b7   : > { %3333 = vmatpush1.bf16.msra.mxu0 %v2512_v27  ;;  %v2705_v27 = vunpack.c.h.s8.bf16 %v2337_v32 }
 0x4b8   : > { %3374 = vmatpush1.bf16.msra.mxu1 %v2640_v11  ;;  %3334 = vmatprep.subr.bf16.mxu0 %v2505_v18  ;;  %v2336_v11 = vld [vmem:[%s7590_s24 + $0x360] sm:$0xff]  ;;  %v2576_v18 = vunpack.c.h.s8.bf16 %v2272_v35 }
 0x4b9   : > { %3375 = vmatprep.subr.bf16.mxu1 %v2633_v33  ;;  %v2704_v33 = vunpack.c.h.s8.bf16 %v2336_v11  ;;  %v2696_v46 = vunpack.c.l.s8.bf16 %v2336_v11 }
 0x4bb   : > { %3335 = vmatpush1.bf16.msra.mxu0 %v2504_v24  ;;  %v2265_v24 = vld [vmem:[%s7590_s24 + $0x128] sm:$0xff] }
 0x4bc   : > { %3376 = vmatpush1.bf16.msra.mxu1 %v2632_v0  ;;  %3336 = vmatprep.subr.bf16.mxu0 %v2497_v31  ;;  %v2329_v0 = vld [vmem:[%s7590_s24 + $0x328] sm:$0xff]  ;;  %v2568_v31 = vunpack.c.l.s8.bf16 %v2272_v35  ;;  %v2553_v58 = vunpack.c.l.s8.bf16 %v2265_v24 }
 0x4bd   : > { %3377 = vmatprep.subr.bf16.mxu1 %v2625_v47  ;;  %v2561_v47 = vunpack.c.h.s8.bf16 %v2265_v24  ;;  %v2681_v59 = vunpack.c.l.s8.bf16 %v2329_v0  ;;  %v2369_v24 = vld [vmem:[%s7590_s24 + $0x468] sm:$0xff] }
 0x4bf   : > { %3337 = vmatpush1.bf16.msra.mxu0 %v2496_v51  ;;  %v2689_v51 = vunpack.c.h.s8.bf16 %v2329_v0  ;;  %v2433_v0 = vld [vmem:[%s7590_s24 + $0x668] sm:$0xff] }
 0x4c0   : > { %3378 = vmatpush1.bf16.msra.mxu1 %v2624_v39  ;;  %3338 = vmatprep.subr.bf16.mxu0 %v2489_v40  ;;  %v2328_v39 = vld [vmem:[%s7590_s24 + $0x320] sm:$0xff]  ;;  %v2560_v40 = vunpack.c.h.s8.bf16 %v2264_v49 }
 0x4c1   : > { %3379 = vmatprep.subr.bf16.mxu1 %v2617_v56  ;;  %v2688_v56 = vunpack.c.h.s8.bf16 %v2328_v39  ;;  %v2680_v54 = vunpack.c.l.s8.bf16 %v2328_v39  ;;  %v2432_v39 = vld [vmem:[%s7590_s24 + $0x660] sm:$0xff] }
 0x4c3   : > { %3339 = vmatpush1.bf16.msra.mxu0 %v2488_v60  ;;  %v2385_v60 = vld [vmem:[%s7590_s24 + $0x4e8] sm:$0xff] }
 0x4c4   : > { %3380 = vmatpush1.bf16.msra.mxu1 %v2616_v36  ;;  %3340 = vmatprep.subr.bf16.mxu0 %v2609_v41  ;;  %v2449_v36 = vld [vmem:[%s7590_s24 + $0x6e8] sm:$0xff]  ;;  %v2552_v41 = vunpack.c.l.s8.bf16 %v2264_v49  ;;  %v2793_v30 = vunpack.c.l.s8.bf16 %v2385_v60  ;;  %v2368_v49 = vld [vmem:[%s7590_s24 + $0x460] sm:$0xff] }
 0x4c5   : > { %3381 = vmatprep.subr.bf16.mxu1 %v2737_v61  ;;  %v2801_v61 = vunpack.c.h.s8.bf16 %v2385_v60  ;;  %v2361_v60 = vld [vmem:[%s7590_s24 + $0x428] sm:$0xff] }
 0x4c7   : > { %3341 = vmatpush2.bf16.msra.mxu0 %v2608_v2  ;;  %v2929_v2 = vunpack.c.h.s8.bf16 %v2449_v36 }
 0x4c8   : > { %3382 = vmatpush2.bf16.msra.mxu1 %v2736_v37  ;;  %3342 = vmatprep.subr.bf16.mxu0 %v2601_v4  ;;  %v2448_v37 = vld [vmem:[%s7590_s24 + $0x6e0] sm:$0xff]  ;;  %v2800_v4 = vunpack.c.h.s8.bf16 %v2384_v14 }
 0x4c9   : > { %3383 = vmatprep.subr.bf16.mxu1 %v2729_v5  ;;  %v2928_v5 = vunpack.c.h.s8.bf16 %v2448_v37  ;;  %v2360_v14 = vld [vmem:[%s7590_s24 + $0x420] sm:$0xff] }
 0x4cb   : > { %3343 = vmatpush2.bf16.msra.mxu0 %v2600_v12 }
 0x4cc   : > { %3384 = vmatpush2.bf16.msra.mxu1 %v2728_v16  ;;  %3344 = vmatprep.subr.bf16.mxu0 %v2593_v10  ;;  %v2921_v16 = vunpack.c.l.s8.bf16 %v2449_v36  ;;  %v2441_v10 = vld [vmem:[%s7590_s24 + $0x6a8] sm:$0xff] }
 0x4cd   : > { %3385 = vmatprep.subr.bf16.mxu1 %v2721_v25  ;;  %v2425_v36 = vld [vmem:[%s7590_s24 + $0x628] sm:$0xff] }
 0x4cf   : > { %3345 = vmatpush2.bf16.msra.mxu0 %v2592_v17 }
 0x4d0   : > { %3386 = vmatpush2.bf16.msra.mxu1 %v2720_v15  ;;  %3346 = vmatprep.subr.bf16.mxu0 %v2585_v19  ;;  %v2920_v15 = vunpack.c.l.s8.bf16 %v2448_v37  ;;  %v2785_v19 = vunpack.c.h.s8.bf16 %v2377_v7  ;;  %v2424_v37 = vld [vmem:[%s7590_s24 + $0x620] sm:$0xff] }
 0x4d1   : > { %3387 = vmatprep.subr.bf16.mxu1 %v2713_v28  ;;  %v2376_v28 = vld [vmem:[%s7590_s24 + $0x4a0] sm:$0xff] }
 0x4d2   : > { %v2784_v11 = vunpack.c.h.s8.bf16 %v2376_v28 }
 0x4d3   : > { %3347 = vmatpush2.bf16.msra.mxu0 %v2584_v22 }
 0x4d4   : > { %3388 = vmatpush2.bf16.msra.mxu1 %v2712_v29  ;;  %3348 = vmatprep.subr.bf16.mxu0 %v2577_v63  ;;  %v2440_v29 = vld [vmem:[%s7590_s24 + $0x6a0] sm:$0xff] }
 0x4d5   : > { %3389 = vmatprep.subr.bf16.mxu1 %v2705_v27 }
 0x4d7   : > { %3349 = vmatpush2.bf16.msra.mxu0 %v2576_v18 }
 0x4d8   : > { %3390 = vmatpush2.bf16.msra.mxu1 %v2704_v33  ;;  %3350 = vmatprep.subr.bf16.mxu0 %v2569_v21  ;;  %v2912_v33 = vunpack.c.h.s8.bf16 %v2440_v29 }
 0x4d9   : > { %3391 = vmatprep.subr.bf16.mxu1 %v2697_v38  ;;  %v2905_v38 = vunpack.c.l.s8.bf16 %v2441_v10 }
 0x4db   : > { %3351 = vmatpush2.bf16.msra.mxu0 %v2568_v31  ;;  %v2776_v31 = vunpack.c.l.s8.bf16 %v2376_v28 }
 0x4dc   : > { %3392 = vmatpush2.bf16.msra.mxu1 %v2696_v46  ;;  %3352 = vmatprep.subr.bf16.mxu0 %v2561_v47  ;;  %v2904_v46 = vunpack.c.l.s8.bf16 %v2440_v29  ;;  %v2769_v47 = vunpack.c.h.s8.bf16 %v2369_v24  ;;  %v2473_v29 = vld [vmem:[%s7590_s24 + $0x7a8] sm:$0xff] }
 0x4dd   : > { %3393 = vmatprep.subr.bf16.mxu1 %v2689_v51  ;;  %v2897_v51 = vunpack.c.h.s8.bf16 %v2433_v0 }
 0x4df   : > { %3353 = vmatpush2.bf16.msra.mxu0 %v2560_v40  ;;  %v2768_v40 = vunpack.c.h.s8.bf16 %v2368_v49 }
 0x4e0   : > { %3394 = vmatpush2.bf16.msra.mxu1 %v2688_v56  ;;  %3354 = vmatprep.subr.bf16.mxu0 %v2553_v58  ;;  %v2896_v56 = vunpack.c.h.s8.bf16 %v2432_v39  ;;  %v2761_v58 = vunpack.c.l.s8.bf16 %v2369_v24 }
 0x4e1   : > { %3395 = vmatprep.subr.bf16.mxu1 %v2681_v59  ;;  %v2889_v59 = vunpack.c.l.s8.bf16 %v2433_v0  ;;  %v2969_v0 = vunpack.c.l.s8.bf16 %v2473_v29 }
 0x4e3   : > { %3355 = vmatpush2.bf16.msra.mxu0 %v2552_v41  ;;  %v2760_v41 = vunpack.c.l.s8.bf16 %v2368_v49 }
 0x4e4   : > { %3396 = vmatpush2.bf16.msra.mxu1 %v2680_v54  ;;  %3406 = vmatprep.subr.bf16.mxu0 %v2801_v61  ;;  %v2888_v54 = vunpack.c.l.s8.bf16 %v2432_v39  ;;  %v2753_v61 = vunpack.c.h.s8.bf16 %v2361_v60  ;;  %v2400_v39 = vld [vmem:[%s7590_s24 + $0x560] sm:$0xff] }
 0x4e5   : > { %3447 = vmatprep.subr.bf16.mxu1 %v2929_v2  ;;  %v2881_v2 = vunpack.c.h.s8.bf16 %v2425_v36 }
 0x4e6   : > { %3357 = vmatmul.mubr.bf16.vlgmr.msra.gmra.mxu0 %v7974_v3  ;;  %v3112_v12 = vpop.f32.mrf.mxu0 }
 0x4e7   : > { %3398 = vmatmul.mubr.bf16.vlgmr.msra.gmra.mxu1 %v7979_v13  ;;  %v3113_v20 = vadd.f32 %v3112_v12, %v8136_v62  ;;  %v3153_v25 = vpop.f32.mrf.mxu1  ;;  %3407 = vmatpush1.bf16.msra.mxu0 %v2800_v4  ;;  %v2913_v62 = vunpack.c.h.s8.bf16 %v2441_v10  ;;  %v2752_v4 = vunpack.c.h.s8.bf16 %v2360_v14  ;;  %v2417_v12 = vld [vmem:[%s7590_s24 + $0x5e8] sm:$0xff]  ;;  %v2744_v10 = vunpack.c.l.s8.bf16 %v2360_v14 }
 0x4e8   : > { %3438 = vmatprep.mubr.bf16.mxu0 %v8050_v53  ;;  %3448 = vmatpush1.bf16.msra.mxu1 %v2928_v5  ;;  %v3114_v17 = vpop.f32.mrf.mxu0  ;;  %v2880_v5 = vunpack.c.h.s8.bf16 %v2424_v37 }
 0x4e9   : > { %v8179_v34 = vadd.f32 %v3153_v25, %v3113_v20  ;;  %3479 = vmatprep.mubr.bf16.mxu1 %v8054_v55  ;;  %v3115_v32 = vadd.f32 %v3114_v17, %v8142_v9  ;;  %v3155_v22 = vpop.f32.mrf.mxu1  ;;  %3408 = vmatprep.subr.bf16.mxu0 %v2793_v30  ;;  %v2777_v9 = vunpack.c.l.s8.bf16 %v2377_v7  ;;  %v2745_v30 = vunpack.c.l.s8.bf16 %v2361_v60 }
 0x4ea   : > { %3449 = vmatprep.subr.bf16.mxu1 %v2921_v16  ;;  %v3116_v63 = vpop.f32.mrf.mxu0  ;;  %v2873_v7 = vunpack.c.l.s8.bf16 %v2425_v36  ;;  %v2481_v16 = vld [vmem:[%s7590_s24 + $0x7e8] sm:$0xff]  ;;  %v2872_v20 = vunpack.c.l.s8.bf16 %v2424_v37  ;;  %v2865_v25 = vunpack.c.h.s8.bf16 %v2417_v12  ;;  %v2392_v37 = vld [vmem:[%s7590_s24 + $0x520] sm:$0xff] }
 0x4eb   : > { %v8184_v35 = vadd.f32 %v3155_v22, %v3115_v32  ;;  %v3157_v27 = vpop.f32.mrf.mxu1  ;;  %3409 = vmatpush1.bf16.msra.mxu0 %v2792_v26  ;;  %v2416_v26 = vld [vmem:[%s7590_s24 + $0x5e0] sm:$0xff]  ;;  %v2993_v17 = vunpack.c.h.s8.bf16 %v2481_v16  ;;  %v2857_v32 = vunpack.c.l.s8.bf16 %v2417_v12  ;;  %v2985_v22 = vunpack.c.l.s8.bf16 %v2481_v16 }
 0x4ec   : > { %3450 = vmatpush1.bf16.msra.mxu1 %v2920_v15  ;;  %v3117_v18 = vpop.f32.mrf.mxu0  ;;  %3410 = vmatprep.subr.bf16.mxu0 %v2785_v19  ;;  %v2480_v15 = vld [vmem:[%s7590_s24 + $0x7e0] sm:$0xff]  ;;  %v2864_v19 = vunpack.c.h.s8.bf16 %v2416_v26  ;;  %v2856_v63 = vunpack.c.l.s8.bf16 %v2416_v26 }
 0x4ed   : > { %v3158_v21 = vpop.f32.mrf.mxu1  ;;  %3451 = vmatprep.subr.bf16.mxu1 %v2913_v62  ;;  %v2992_v28 = vunpack.c.h.s8.bf16 %v2480_v15  ;;  %v2409_v62 = vld [vmem:[%s7590_s24 + $0x5a8] sm:$0xff]  ;;  %v2984_v27 = vunpack.c.l.s8.bf16 %v2480_v15  ;;  %v2408_v18 = vld [vmem:[%s7590_s24 + $0x5a0] sm:$0xff]  ;;  %v2258_v15 = vld [vmem:[%s7590_s24 + $0xf0] sm:$0xff] }
 0x4ee   : > { %v2848_v21 = vunpack.c.h.s8.bf16 %v2408_v18  ;;  %v2841_v24 = vunpack.c.l.s8.bf16 %v2409_v62 }
 0x4ef   : > { %3411 = vmatpush1.bf16.msra.mxu0 %v2784_v11  ;;  %v2849_v11 = vunpack.c.h.s8.bf16 %v2409_v62 }
 0x4f0   : > { %3452 = vmatpush1.bf16.msra.mxu1 %v2912_v33  ;;  %3412 = vmatprep.subr.bf16.mxu0 %v2777_v9  ;;  %v2977_v33 = vunpack.c.h.s8.bf16 %v2473_v29  ;;  %v2472_v9 = vld [vmem:[%s7590_s24 + $0x7a0] sm:$0xff]  ;;  %v2251_v29 = vld [vmem:[%s7590_s24 + $0xb8] sm:$0xff] }
 0x4f1   : > { %3453 = vmatprep.subr.bf16.mxu1 %v2905_v38  ;;  %v2976_v38 = vunpack.c.h.s8.bf16 %v2472_v9  ;;  %v2968_v49 = vunpack.c.l.s8.bf16 %v2472_v9 }
 0x4f3   : > { %3413 = vmatpush1.bf16.msra.mxu0 %v2776_v31  ;;  %v2401_v31 = vld [vmem:[%s7590_s24 + $0x568] sm:$0xff] }
 0x4f4   : > { %3454 = vmatpush1.bf16.msra.mxu1 %v2904_v46  ;;  %3414 = vmatprep.subr.bf16.mxu0 %v2769_v47  ;;  %v2465_v46 = vld [vmem:[%s7590_s24 + $0x768] sm:$0xff]  ;;  %v2840_v47 = vunpack.c.l.s8.bf16 %v2408_v18  ;;  %v2825_v60 = vunpack.c.l.s8.bf16 %v2401_v31 }
 0x4f5   : > { %3455 = vmatprep.subr.bf16.mxu1 %v2897_v51  ;;  %v2833_v51 = vunpack.c.h.s8.bf16 %v2401_v31  ;;  %v2953_v36 = vunpack.c.l.s8.bf16 %v2465_v46 }
 0x4f7   : > { %3415 = vmatpush1.bf16.msra.mxu0 %v2768_v40  ;;  %v2961_v40 = vunpack.c.h.s8.bf16 %v2465_v46 }
 0x4f8   : > { %3456 = vmatpush1.bf16.msra.mxu1 %v2896_v56  ;;  %3416 = vmatprep.subr.bf16.mxu0 %v2761_v58  ;;  %v2464_v56 = vld [vmem:[%s7590_s24 + $0x760] sm:$0xff]  ;;  %v2832_v58 = vunpack.c.h.s8.bf16 %v2400_v39 }
 0x4f9   : > { %3457 = vmatprep.subr.bf16.mxu1 %v2889_v59  ;;  %v2960_v59 = vunpack.c.h.s8.bf16 %v2464_v56  ;;  %v2952_v14 = vunpack.c.l.s8.bf16 %v2464_v56 }
 0x4fb   : > { %3417 = vmatpush1.bf16.msra.mxu0 %v2760_v41  ;;  %v2393_v41 = vld [vmem:[%s7590_s24 + $0x528] sm:$0xff] }
 0x4fc   : > { %3458 = vmatpush1.bf16.msra.mxu1 %v2888_v54  ;;  %3418 = vmatprep.subr.bf16.mxu0 %v2753_v61  ;;  %v2457_v54 = vld [vmem:[%s7590_s24 + $0x728] sm:$0xff]  ;;  %v2824_v61 = vunpack.c.l.s8.bf16 %v2400_v39  ;;  %v2809_v12 = vunpack.c.l.s8.bf16 %v2393_v41 }
 0x4fd   : > { %3459 = vmatprep.subr.bf16.mxu1 %v2881_v2  ;;  %v2817_v2 = vunpack.c.h.s8.bf16 %v2393_v41  ;;  %v2937_v16 = vunpack.c.l.s8.bf16 %v2457_v54 }
 0x4ff   : > { %3419 = vmatpush1.bf16.msra.mxu0 %v2752_v4  ;;  %v2945_v4 = vunpack.c.h.s8.bf16 %v2457_v54 }
 0x500   : > { %3460 = vmatpush1.bf16.msra.mxu1 %v2880_v5  ;;  %3420 = vmatprep.subr.bf16.mxu0 %v2745_v30  ;;  %v2456_v5 = vld [vmem:[%s7590_s24 + $0x720] sm:$0xff]  ;;  %v2816_v30 = vunpack.c.h.s8.bf16 %v2392_v37 }
 0x501   : > { %3461 = vmatprep.subr.bf16.mxu1 %v2873_v7  ;;  %v2944_v7 = vunpack.c.h.s8.bf16 %v2456_v5  ;;  %v2936_v26 = vunpack.c.l.s8.bf16 %v2456_v5 }
 0x503   : > { %3421 = vmatpush1.bf16.msra.mxu0 %v2744_v10  ;;  %v2259_v10 = vld [vmem:[%s7590_s24 + $0xf8] sm:$0xff] }
 0x504   : > { %3462 = vmatpush1.bf16.msra.mxu1 %v2872_v20  ;;  %3422 = vmatprep.subr.bf16.mxu0 %v2865_v25  ;;  %v2323_v20 = vld [vmem:[%s7590_s24 + $0x2f8] sm:$0xff]  ;;  %v2808_v25 = vunpack.c.l.s8.bf16 %v2392_v37  ;;  %v2539_v62 = vunpack.c.l.s8.bf16 %v2259_v10  ;;  %v2306_v37 = vld [vmem:[%s7590_s24 + $0x270] sm:$0xff] }
 0x505   : > { %3463 = vmatprep.subr.bf16.mxu1 %v2993_v17  ;;  %v2547_v17 = vunpack.c.h.s8.bf16 %v2259_v10  ;;  %v2642_v5 = vunpack.c.h.s8.bf16 %v2306_v37 }
 0x507   : > { %3423 = vmatpush2.bf16.msra.mxu0 %v2864_v19  ;;  %v2675_v19 = vunpack.c.h.s8.bf16 %v2323_v20 }
 0x508   : > { %3464 = vmatpush2.bf16.msra.mxu1 %v2992_v28  ;;  %3424 = vmatprep.subr.bf16.mxu0 %v2857_v32  ;;  %v2322_v28 = vld [vmem:[%s7590_s24 + $0x2f0] sm:$0xff]  ;;  %v2546_v32 = vunpack.c.h.s8.bf16 %v2258_v15 }
 0x509   : > { %3465 = vmatprep.subr.bf16.mxu1 %v2985_v22  ;;  %v2674_v22 = vunpack.c.h.s8.bf16 %v2322_v28 }
 0x50b   : > { %3425 = vmatpush2.bf16.msra.mxu0 %v2856_v63 }
 0x50c   : > { %3466 = vmatpush2.bf16.msra.mxu1 %v2984_v27  ;;  %3426 = vmatprep.subr.bf16.mxu0 %v2849_v11  ;;  %v2667_v27 = vunpack.c.l.s8.bf16 %v2323_v20  ;;  %v2315_v11 = vld [vmem:[%s7590_s24 + $0x2b8] sm:$0xff]  ;;  %v2634_v20 = vunpack.c.l.s8.bf16 %v2306_v37  ;;  %v2274_v37 = vld [vmem:[%s7590_s24 + $0x170] sm:$0xff] }
 0x50d   : > { %3467 = vmatprep.subr.bf16.mxu1 %v2977_v33  ;;  %v2538_v33 = vunpack.c.l.s8.bf16 %v2258_v15  ;;  %v2659_v46 = vunpack.c.h.s8.bf16 %v2315_v11  ;;  %v2298_v15 = vld [vmem:[%s7590_s24 + $0x230] sm:$0xff] }
 0x50f   : > { %3427 = vmatpush2.bf16.msra.mxu0 %v2848_v21 }
 0x510   : > { %3468 = vmatpush2.bf16.msra.mxu1 %v2976_v38  ;;  %3428 = vmatprep.subr.bf16.mxu0 %v2841_v24  ;;  %v2666_v38 = vunpack.c.l.s8.bf16 %v2322_v28  ;;  %v2531_v24 = vunpack.c.h.s8.bf16 %v2251_v29  ;;  %v2626_v28 = vunpack.c.h.s8.bf16 %v2298_v15 }
 0x511   : > { %3469 = vmatprep.subr.bf16.mxu1 %v2969_v0  ;;  %v2250_v0 = vld [vmem:[%s7590_s24 + $0xb0] sm:$0xff] }
 0x512   : > { %v2522_v41 = vunpack.c.l.s8.bf16 %v2250_v0 }
 0x513   : > { %3429 = vmatpush2.bf16.msra.mxu0 %v2840_v47  ;;  %v2314_v47 = vld [vmem:[%s7590_s24 + $0x2b0] sm:$0xff] }
 0x514   : > { %3470 = vmatpush2.bf16.msra.mxu1 %v2968_v49  ;;  %3430 = vmatprep.subr.bf16.mxu0 %v2833_v51  ;;  %v2658_v56 = vunpack.c.h.s8.bf16 %v2314_v47  ;;  %v2650_v54 = vunpack.c.l.s8.bf16 %v2314_v47  ;;  %v2347_v47 = vld [vmem:[%s7590_s24 + $0x3b8] sm:$0xff] }
 0x515   : > { %3471 = vmatprep.subr.bf16.mxu1 %v2961_v40 }
 0x517   : > { %3431 = vmatpush2.bf16.msra.mxu0 %v2832_v58 }
 0x518   : > { %3472 = vmatpush2.bf16.msra.mxu1 %v2960_v59  ;;  %3432 = vmatprep.subr.bf16.mxu0 %v2825_v60  ;;  %v2651_v59 = vunpack.c.l.s8.bf16 %v2315_v11  ;;  %v2243_v60 = vld [vmem:[%s7590_s24 + $0x78] sm:$0xff] }
 0x519   : > { %3473 = vmatprep.subr.bf16.mxu1 %v2953_v36  ;;  %v2307_v36 = vld [vmem:[%s7590_s24 + $0x278] sm:$0xff] }
 0x51b   : > { %3433 = vmatpush2.bf16.msra.mxu0 %v2824_v61  ;;  %v2515_v61 = vunpack.c.h.s8.bf16 %v2243_v60 }
 0x51c   : > { %3474 = vmatpush2.bf16.msra.mxu1 %v2952_v14  ;;  %3434 = vmatprep.subr.bf16.mxu0 %v2817_v2  ;;  %v2242_v14 = vld [vmem:[%s7590_s24 + $0x70] sm:$0xff]  ;;  %v2643_v2 = vunpack.c.h.s8.bf16 %v2307_v36 }
 0x51d   : > { %3475 = vmatprep.subr.bf16.mxu1 %v2945_v4  ;;  %v2514_v4 = vunpack.c.h.s8.bf16 %v2242_v14  ;;  %v2506_v10 = vunpack.c.l.s8.bf16 %v2242_v14 }
 0x51f   : > { %3435 = vmatpush2.bf16.msra.mxu0 %v2816_v30  ;;  %v2507_v30 = vunpack.c.l.s8.bf16 %v2243_v60 }
 0x520   : > { %3476 = vmatpush2.bf16.msra.mxu1 %v2944_v7  ;;  %3436 = vmatprep.subr.bf16.mxu0 %v2809_v12  ;;  %v2635_v7 = vunpack.c.l.s8.bf16 %v2307_v36  ;;  %v2235_v12 = vld [vmem:[%s7590_s24 + $0x38] sm:$0xff]  ;;  %v2715_v36 = vunpack.c.l.s8.bf16 %v2347_v47 }
 0x521   : > { %3477 = vmatprep.subr.bf16.mxu1 %v2937_v16  ;;  %v2299_v16 = vld [vmem:[%s7590_s24 + $0x238] sm:$0xff] }
 0x523   : > { %3437 = vmatpush2.bf16.msra.mxu0 %v2808_v25  ;;  %v2499_v25 = vunpack.c.h.s8.bf16 %v2235_v12 }
 0x524   : > { %3478 = vmatpush2.bf16.msra.mxu1 %v2936_v26  ;;  %3488 = vmatprep.subr.bf16.mxu0 %v2547_v17  ;;  %v2234_v26 = vld [vmem:[%s7590_s24 + $0x30] sm:$0xff]  ;;  %v2627_v17 = vunpack.c.h.s8.bf16 %v2299_v16 }
 0x525   : > { %3529 = vmatprep.subr.bf16.mxu1 %v2675_v19  ;;  %v2498_v19 = vunpack.c.h.s8.bf16 %v2234_v26 }
 0x526   : > { %v3194_v63 = vpop.f32.mrf.mxu0  ;;  %3439 = vmatmul.mubr.bf16.vlgmr.msra.gmra.mxu0 %v8052_v23 }
 0x527   : > { %v3235_v18 = vpop.f32.mrf.mxu1  ;;  %3480 = vmatmul.mubr.bf16.vlgmr.msra.gmra.mxu1 %v8056_v57  ;;  %3489 = vmatpush1.bf16.msra.mxu0 %v2546_v32  ;;  %v2491_v32 = vunpack.c.l.s8.bf16 %v2235_v12 }
 0x528   : > { %v8218_v9 = vadd.f32 %v3235_v18, %v3194_v63  ;;  %3520 = vmatprep.mubr.bf16.mxu0 %v7972_v6  ;;  %3530 = vmatpush1.bf16.msra.mxu1 %v2674_v22  ;;  %v3196_v21 = vpop.f32.mrf.mxu0  ;;  %v2530_v6 = vunpack.c.h.s8.bf16 %v2250_v0  ;;  %v2619_v22 = vunpack.c.l.s8.bf16 %v2299_v16  ;;  %v2490_v63 = vunpack.c.l.s8.bf16 %v2234_v26  ;;  %v2290_v18 = vld [vmem:[%s7590_s24 + $0x1f0] sm:$0xff] }
 0x529   : > { %3561 = vmatprep.mubr.bf16.mxu1 %v7976_v8  ;;  %v3237_v31 = vpop.f32.mrf.mxu1  ;;  %3490 = vmatprep.subr.bf16.mxu0 %v2539_v62  ;;  %v2523_v8 = vunpack.c.l.s8.bf16 %v2251_v29  ;;  %v2291_v62 = vld [vmem:[%s7590_s24 + $0x1f8] sm:$0xff] }
 0x52a   : > { %v8224_v49 = vadd.f32 %v3237_v31, %v3196_v21  ;;  %v3198_v51 = vpop.f32.mrf.mxu0  ;;  %3531 = vmatprep.subr.bf16.mxu1 %v2667_v27  ;;  %v2355_v29 = vld [vmem:[%s7590_s24 + $0x3f8] sm:$0xff]  ;;  %v2618_v27 = vunpack.c.l.s8.bf16 %v2298_v15  ;;  %v2611_v11 = vunpack.c.h.s8.bf16 %v2291_v62  ;;  %v2354_v21 = vld [vmem:[%s7590_s24 + $0x3f0] sm:$0xff]  ;;  %v2603_v0 = vunpack.c.l.s8.bf16 %v2291_v62 }
 0x52b   : > { %v3239_v39 = vpop.f32.mrf.mxu1  ;;  %3491 = vmatpush1.bf16.msra.mxu0 %v2538_v33  ;;  %v2739_v33 = vunpack.c.h.s8.bf16 %v2355_v29  ;;  %v2731_v31 = vunpack.c.l.s8.bf16 %v2355_v29  ;;  %v2602_v51 = vunpack.c.l.s8.bf16 %v2290_v18  ;;  %v2266_v15 = vld [vmem:[%s7590_s24 + $0x130] sm:$0xff] }
 0x52c   : > { %3532 = vmatpush1.bf16.msra.mxu1 %v2666_v38  ;;  %v3199_v40 = vpop.f32.mrf.mxu0  ;;  %3492 = vmatprep.subr.bf16.mxu0 %v2531_v24  ;;  %v2610_v38 = vunpack.c.h.s8.bf16 %v2290_v18  ;;  %v2738_v24 = vunpack.c.h.s8.bf16 %v2354_v21  ;;  %v2730_v39 = vunpack.c.l.s8.bf16 %v2354_v21  ;;  %v2386_v21 = vld [vmem:[%s7590_s24 + $0x4f0] sm:$0xff] }
 0x52d   : > { %v3240_v58 = vpop.f32.mrf.mxu1  ;;  %3533 = vmatprep.subr.bf16.mxu1 %v2659_v46  ;;  %v2283_v46 = vld [vmem:[%s7590_s24 + $0x1b8] sm:$0xff]  ;;  %v2282_v40 = vld [vmem:[%s7590_s24 + $0x1b0] sm:$0xff] }
 0x52e   : > { %v2594_v58 = vunpack.c.h.s8.bf16 %v2282_v40  ;;  %v2587_v60 = vunpack.c.l.s8.bf16 %v2283_v46 }
 0x52f   : > { %3493 = vmatpush1.bf16.msra.mxu0 %v2530_v6  ;;  %v2595_v6 = vunpack.c.h.s8.bf16 %v2283_v46 }
 0x530   : > { %3534 = vmatpush1.bf16.msra.mxu1 %v2658_v56  ;;  %3494 = vmatprep.subr.bf16.mxu0 %v2523_v8  ;;  %v2723_v56 = vunpack.c.h.s8.bf16 %v2347_v47  ;;  %v2346_v8 = vld [vmem:[%s7590_s24 + $0x3b0] sm:$0xff]  ;;  %v2379_v47 = vld [vmem:[%s7590_s24 + $0x4b8] sm:$0xff] }
 0x531   : > { %3535 = vmatprep.subr.bf16.mxu1 %v2651_v59  ;;  %v2722_v59 = vunpack.c.h.s8.bf16 %v2346_v8  ;;  %v2714_v14 = vunpack.c.l.s8.bf16 %v2346_v8  ;;  %v2794_v8 = vunpack.c.l.s8.bf16 %v2386_v21 }
 0x533   : > { %3495 = vmatpush1.bf16.msra.mxu0 %v2522_v41  ;;  %v2275_v41 = vld [vmem:[%s7590_s24 + $0x178] sm:$0xff] }
 0x534   : > { %3536 = vmatpush1.bf16.msra.mxu1 %v2650_v54  ;;  %3496 = vmatprep.subr.bf16.mxu0 %v2515_v61  ;;  %v2339_v54 = vld [vmem:[%s7590_s24 + $0x378] sm:$0xff]  ;;  %v2586_v61 = vunpack.c.l.s8.bf16 %v2282_v40  ;;  %v2571_v12 = vunpack.c.l.s8.bf16 %v2275_v41 }
 0x535   : > { %3537 = vmatprep.subr.bf16.mxu1 %v2643_v2  ;;  %v2579_v2 = vunpack.c.h.s8.bf16 %v2275_v41  ;;  %v2699_v16 = vunpack.c.l.s8.bf16 %v2339_v54 }
 0x537   : > { %3497 = vmatpush1.bf16.msra.mxu0 %v2514_v4  ;;  %v2707_v4 = vunpack.c.h.s8.bf16 %v2339_v54 }
 0x538   : > { %3538 = vmatpush1.bf16.msra.mxu1 %v2642_v5  ;;  %3498 = vmatprep.subr.bf16.mxu0 %v2507_v30  ;;  %v2338_v5 = vld [vmem:[%s7590_s24 + $0x370] sm:$0xff]  ;;  %v2578_v30 = vunpack.c.h.s8.bf16 %v2274_v37 }
 0x539   : > { %3539 = vmatprep.subr.bf16.mxu1 %v2635_v7  ;;  %v2706_v7 = vunpack.c.h.s8.bf16 %v2338_v5  ;;  %v2698_v26 = vunpack.c.l.s8.bf16 %v2338_v5  ;;  %v2371_v5 = vld [vmem:[%s7590_s24 + $0x478] sm:$0xff] }
 0x53b   : > { %3499 = vmatpush1.bf16.msra.mxu0 %v2506_v10  ;;  %v2267_v10 = vld [vmem:[%s7590_s24 + $0x138] sm:$0xff] }
 0x53c   : > { %3540 = vmatpush1.bf16.msra.mxu1 %v2634_v20  ;;  %3500 = vmatprep.subr.bf16.mxu0 %v2499_v25  ;;  %v2331_v20 = vld [vmem:[%s7590_s24 + $0x338] sm:$0xff]  ;;  %v2570_v25 = vunpack.c.l.s8.bf16 %v2274_v37  ;;  %v2555_v62 = vunpack.c.l.s8.bf16 %v2267_v10  ;;  %v2779_v37 = vunpack.c.l.s8.bf16 %v2379_v47 }
 0x53d   : > { %3541 = vmatprep.subr.bf16.mxu1 %v2627_v17  ;;  %v2563_v17 = vunpack.c.h.s8.bf16 %v2267_v10  ;;  %v2683_v29 = vunpack.c.l.s8.bf16 %v2331_v20  ;;  %v2370_v10 = vld [vmem:[%s7590_s24 + $0x470] sm:$0xff] }
 0x53f   : > { %3501 = vmatpush1.bf16.msra.mxu0 %v2498_v19  ;;  %v2691_v19 = vunpack.c.h.s8.bf16 %v2331_v20 }
 0x540   : > { %3542 = vmatpush1.bf16.msra.mxu1 %v2626_v28  ;;  %3502 = vmatprep.subr.bf16.mxu0 %v2491_v32  ;;  %v2330_v28 = vld [vmem:[%s7590_s24 + $0x330] sm:$0xff]  ;;  %v2562_v32 = vunpack.c.h.s8.bf16 %v2266_v15 }
 0x541   : > { %3543 = vmatprep.subr.bf16.mxu1 %v2619_v22  ;;  %v2690_v22 = vunpack.c.h.s8.bf16 %v2330_v28  ;;  %v2682_v18 = vunpack.c.l.s8.bf16 %v2330_v28  ;;  %v2363_v28 = vld [vmem:[%s7590_s24 + $0x438] sm:$0xff] }
 0x543   : > { %3503 = vmatpush1.bf16.msra.mxu0 %v2490_v63  ;;  %v2387_v63 = vld [vmem:[%s7590_s24 + $0x4f8] sm:$0xff] }
 0x544   : > { %3544 = vmatpush1.bf16.msra.mxu1 %v2618_v27  ;;  %3504 = vmatprep.subr.bf16.mxu0 %v2611_v11  ;;  %v2451_v27 = vld [vmem:[%s7590_s24 + $0x6f8] sm:$0xff]  ;;  %v2554_v11 = vunpack.c.l.s8.bf16 %v2266_v15  ;;  %v2795_v46 = vunpack.c.l.s8.bf16 %v2387_v63  ;;  %v2763_v15 = vunpack.c.l.s8.bf16 %v2371_v5 }
 0x545   : > { %3545 = vmatprep.subr.bf16.mxu1 %v2739_v33  ;;  %v2803_v33 = vunpack.c.h.s8.bf16 %v2387_v63  ;;  %v2362_v63 = vld [vmem:[%s7590_s24 + $0x430] sm:$0xff] }
 0x547   : > { %3505 = vmatpush2.bf16.msra.mxu0 %v2610_v38  ;;  %v2931_v38 = vunpack.c.h.s8.bf16 %v2451_v27 }
 0x548   : > { %3546 = vmatpush2.bf16.msra.mxu1 %v2738_v24  ;;  %3506 = vmatprep.subr.bf16.mxu0 %v2603_v0  ;;  %v2450_v24 = vld [vmem:[%s7590_s24 + $0x6f0] sm:$0xff]  ;;  %v2802_v0 = vunpack.c.h.s8.bf16 %v2386_v21  ;;  %v2747_v21 = vunpack.c.l.s8.bf16 %v2363_v28 }
 0x549   : > { %3547 = vmatprep.subr.bf16.mxu1 %v2731_v31  ;;  %v2930_v31 = vunpack.c.h.s8.bf16 %v2450_v24 }
 0x54b   : > { %3507 = vmatpush2.bf16.msra.mxu0 %v2602_v51 }
 0x54c   : > { %3548 = vmatpush2.bf16.msra.mxu1 %v2730_v39  ;;  %3508 = vmatprep.subr.bf16.mxu0 %v2595_v6  ;;  %v2923_v39 = vunpack.c.l.s8.bf16 %v2451_v27  ;;  %v2443_v6 = vld [vmem:[%s7590_s24 + $0x6b8] sm:$0xff] }
 0x54d   : > { %3549 = vmatprep.subr.bf16.mxu1 %v2723_v56 }
 0x54f   : > { %3509 = vmatpush2.bf16.msra.mxu0 %v2594_v58 }
 0x550   : > { %3550 = vmatpush2.bf16.msra.mxu1 %v2722_v59  ;;  %3510 = vmatprep.subr.bf16.mxu0 %v2587_v60  ;;  %v2922_v59 = vunpack.c.l.s8.bf16 %v2450_v24  ;;  %v2787_v60 = vunpack.c.h.s8.bf16 %v2379_v47  ;;  %v2419_v24 = vld [vmem:[%s7590_s24 + $0x5f8] sm:$0xff] }
 0x551   : > { %3551 = vmatprep.subr.bf16.mxu1 %v2715_v36  ;;  %v2378_v36 = vld [vmem:[%s7590_s24 + $0x4b0] sm:$0xff]  ;;  %v2867_v47 = vunpack.c.h.s8.bf16 %v2419_v24 }
 0x553   : > { %3511 = vmatpush2.bf16.msra.mxu0 %v2586_v61  ;;  %v2786_v61 = vunpack.c.h.s8.bf16 %v2378_v36 }
 0x554   : > { %3552 = vmatpush2.bf16.msra.mxu1 %v2714_v14  ;;  %3512 = vmatprep.subr.bf16.mxu0 %v2579_v2 }
 0x555   : > { %3553 = vmatprep.subr.bf16.mxu1 %v2707_v4  ;;  %v2907_v4 = vunpack.c.l.s8.bf16 %v2443_v6 }
 0x557   : > { %3513 = vmatpush2.bf16.msra.mxu0 %v2578_v30  ;;  %v2435_v30 = vld [vmem:[%s7590_s24 + $0x678] sm:$0xff] }
 0x558   : > { %3554 = vmatpush2.bf16.msra.mxu1 %v2706_v7  ;;  %3514 = vmatprep.subr.bf16.mxu0 %v2571_v12  ;;  %v2778_v7 = vunpack.c.l.s8.bf16 %v2378_v36  ;;  %v2899_v20 = vunpack.c.h.s8.bf16 %v2435_v30  ;;  %v2475_v36 = vld [vmem:[%s7590_s24 + $0x7b8] sm:$0xff] }
 0x559   : > { %3555 = vmatprep.subr.bf16.mxu1 %v2699_v16  ;;  %v2771_v16 = vunpack.c.h.s8.bf16 %v2371_v5  ;;  %v2403_v5 = vld [vmem:[%s7590_s24 + $0x578] sm:$0xff] }
 0x55b   : > { %3515 = vmatpush2.bf16.msra.mxu0 %v2570_v25  ;;  %v2434_v25 = vld [vmem:[%s7590_s24 + $0x670] sm:$0xff] }
 0x55c   : > { %3556 = vmatpush2.bf16.msra.mxu1 %v2698_v26  ;;  %3516 = vmatprep.subr.bf16.mxu0 %v2563_v17  ;;  %v2770_v26 = vunpack.c.h.s8.bf16 %v2370_v10  ;;  %v2898_v17 = vunpack.c.h.s8.bf16 %v2434_v25 }
 0x55d   : > { %3557 = vmatprep.subr.bf16.mxu1 %v2691_v19  ;;  %v2891_v19 = vunpack.c.l.s8.bf16 %v2435_v30  ;;  %v2467_v30 = vld [vmem:[%s7590_s24 + $0x778] sm:$0xff] }
 0x55f   : > { %3517 = vmatpush2.bf16.msra.mxu0 %v2562_v32  ;;  %v2427_v32 = vld [vmem:[%s7590_s24 + $0x638] sm:$0xff] }
 0x560   : > { %3558 = vmatpush2.bf16.msra.mxu1 %v2690_v22  ;;  %3518 = vmatprep.subr.bf16.mxu0 %v2555_v62  ;;  %v2762_v22 = vunpack.c.l.s8.bf16 %v2370_v10  ;;  %v2890_v62 = vunpack.c.l.s8.bf16 %v2434_v25  ;;  %v2883_v27 = vunpack.c.h.s8.bf16 %v2427_v32  ;;  %v2402_v10 = vld [vmem:[%s7590_s24 + $0x570] sm:$0xff] }
 0x561   : > { %3559 = vmatprep.subr.bf16.mxu1 %v2683_v29  ;;  %v2755_v29 = vunpack.c.h.s8.bf16 %v2363_v28  ;;  %v2466_v25 = vld [vmem:[%s7590_s24 + $0x770] sm:$0xff]  ;;  %v8293_v28 = vld [vmem:[%s755_s13] sm:$0xff] }
 0x563   : > { %3519 = vmatpush2.bf16.msra.mxu0 %v2554_v11  ;;  %v2426_v11 = vld [vmem:[%s7590_s24 + $0x630] sm:$0xff] }
 0x564   : > { %3560 = vmatpush2.bf16.msra.mxu1 %v2682_v18  ;;  %3570 = vmatprep.subr.bf16.mxu0 %v2803_v33  ;;  %v2754_v18 = vunpack.c.h.s8.bf16 %v2362_v63  ;;  %v2882_v33 = vunpack.c.h.s8.bf16 %v2426_v11 }
 0x565   : > { %3611 = vmatprep.subr.bf16.mxu1 %v2931_v38  ;;  %v2875_v38 = vunpack.c.l.s8.bf16 %v2427_v32  ;;  %v2955_v32 = vunpack.c.l.s8.bf16 %v2467_v30 }
 0x566   : > { %v3276_v51 = vpop.f32.mrf.mxu0  ;;  %3521 = vmatmul.mubr.bf16.vlgmr.msra.gmra.mxu0 %v7974_v3 }
 0x567   : > { %v3277_v40 = vadd.f32 %v3276_v51, %v8218_v9  ;;  %v3317_v56 = vpop.f32.mrf.mxu1  ;;  %3562 = vmatmul.mubr.bf16.vlgmr.msra.gmra.mxu1 %v7979_v13  ;;  %3571 = vmatpush1.bf16.msra.mxu0 %v2802_v0  ;;  %v2915_v9 = vunpack.c.h.s8.bf16 %v2443_v6  ;;  %v2442_v13 = vld [vmem:[%s7590_s24 + $0x6b0] sm:$0xff]  ;;  %v2483_v0 = vld [vmem:[%s7590_s24 + $0x7f8] sm:$0xff] }
 0x568   : > { %3602 = vmatprep.mubr.bf16.mxu0 %v8050_v53  ;;  %3612 = vmatpush1.bf16.msra.mxu1 %v2930_v31  ;;  %v8260_v58 = vpop.f32.mrf.mxu0  ;;  %v2914_v2 = vunpack.c.h.s8.bf16 %v2442_v13  ;;  %v2906_v12 = vunpack.c.l.s8.bf16 %v2442_v13  ;;  %v2746_v31 = vunpack.c.l.s8.bf16 %v2362_v63  ;;  %v2418_v51 = vld [vmem:[%s7590_s24 + $0x5f0] sm:$0xff]  ;;  %v2826_v63 = vunpack.c.l.s8.bf16 %v2402_v10 }
 0x569   : > { %v8263_v41 = vadd.f32 %v3317_v56, %v3277_v40  ;;  %3643 = vmatprep.mubr.bf16.mxu1 %v8054_v55  ;;  %v8266_v3 = vpop.f32.mrf.mxu1  ;;  %3572 = vmatprep.subr.bf16.mxu0 %v2795_v46  ;;  %v2874_v46 = vunpack.c.l.s8.bf16 %v2426_v11  ;;  %v2482_v6 = vld [vmem:[%s7590_s24 + $0x7f0] sm:$0xff]  ;;  %v2866_v40 = vunpack.c.h.s8.bf16 %v2418_v51 }
 0x56a   : > { %v3280_v54 = vpop.f32.mrf.mxu0  ;;  %3613 = vmatprep.subr.bf16.mxu1 %v2923_v39  ;;  %v2995_v39 = vunpack.c.h.s8.bf16 %v2483_v0  ;;  %v2994_v56 = vunpack.c.h.s8.bf16 %v2482_v6  ;;  %v2986_v13 = vunpack.c.l.s8.bf16 %v2482_v6  ;;  %v3793_v6 = vld [vmem:[%s7600_s8 + $0xc8] sm:$0xff] }
 0x56b   : > { %v3321_v53 = vpop.f32.mrf.mxu1  ;;  %3573 = vmatpush1.bf16.msra.mxu0 %v2794_v8  ;;  %v2859_v8 = vunpack.c.l.s8.bf16 %v2419_v24 }
 0x56c   : > { %3614 = vmatpush1.bf16.msra.mxu1 %v2922_v59  ;;  %v3281_v14 = vpop.f32.mrf.mxu0  ;;  %3574 = vmatprep.subr.bf16.mxu0 %v2787_v60  ;;  %v2987_v59 = vunpack.c.l.s8.bf16 %v2483_v0  ;;  %v2411_v60 = vld [vmem:[%s7590_s24 + $0x5b8] sm:$0xff]  ;;  %v2410_v53 = vld [vmem:[%s7590_s24 + $0x5b0] sm:$0xff] }
 0x56d   : > { %v3322_v55 = vpop.f32.mrf.mxu1  ;;  %3615 = vmatprep.subr.bf16.mxu1 %v2915_v9  ;;  %v2858_v9 = vunpack.c.l.s8.bf16 %v2418_v51  ;;  %v2851_v54 = vunpack.c.h.s8.bf16 %v2411_v60  ;;  %v2474_v14 = vld [vmem:[%s7590_s24 + $0x7b0] sm:$0xff] }
 0x56e   : > { %v2843_v55 = vunpack.c.l.s8.bf16 %v2411_v60  ;;  %v4081_v60 = vunpack.c.h.s8.bf16 %v3793_v6 }
 0x56f   : > { %3575 = vmatpush1.bf16.msra.mxu0 %v2786_v61  ;;  %v2979_v61 = vunpack.c.h.s8.bf16 %v2475_v36 }
 0x570   : > { %3616 = vmatpush1.bf16.msra.mxu1 %v2914_v2  ;;  %3576 = vmatprep.subr.bf16.mxu0 %v2779_v37  ;;  %v2850_v2 = vunpack.c.h.s8.bf16 %v2410_v53  ;;  %v2978_v37 = vunpack.c.h.s8.bf16 %v2474_v14 }
 0x571   : > { %3617 = vmatprep.subr.bf16.mxu1 %v2907_v4  ;;  %v2971_v4 = vunpack.c.l.s8.bf16 %v2475_v36  ;;  %v3792_v36 = vld [vmem:[%s7600_s8 + $0xc0] sm:$0xff] }
 0x573   : > { %3577 = vmatpush1.bf16.msra.mxu0 %v2778_v7  ;;  %v2842_v7 = vunpack.c.l.s8.bf16 %v2410_v53 }
 0x574   : > { %3618 = vmatpush1.bf16.msra.mxu1 %v2906_v12  ;;  %3578 = vmatprep.subr.bf16.mxu0 %v2771_v16  ;;  %v2970_v12 = vunpack.c.l.s8.bf16 %v2474_v14  ;;  %v2835_v16 = vunpack.c.h.s8.bf16 %v2403_v5 }
 0x575   : > { %3619 = vmatprep.subr.bf16.mxu1 %v2899_v20  ;;  %v2963_v20 = vunpack.c.h.s8.bf16 %v2467_v30  ;;  %v3849_v30 = vld [vmem:[%s7600_s8 + $0x288] sm:$0xff] }
 0x577   : > { %3579 = vmatpush1.bf16.msra.mxu0 %v2770_v26  ;;  %v3279_v26 = vadd.f32 %v8260_v58, %v8224_v49  ;;  %v3669_v58 = vrot.slane %v8293_v28, %v7678_v45 }
 0x578   : > { %3620 = vmatpush1.bf16.msra.mxu1 %v2898_v17  ;;  %3580 = vmatprep.subr.bf16.mxu0 %v2763_v15  ;;  %v2834_v17 = vunpack.c.h.s8.bf16 %v2402_v10  ;;  %v2962_v15 = vunpack.c.h.s8.bf16 %v2466_v25 }
 0x579   : > { %3621 = vmatprep.subr.bf16.mxu1 %v2891_v19  ;;  %v2827_v19 = vunpack.c.l.s8.bf16 %v2403_v5  ;;  %v3320_v49 = vadd.f32 %v8266_v3, %v3279_v26 }
 0x57b   : > { %3581 = vmatpush1.bf16.msra.mxu0 %v2762_v22  ;;  %v2395_v22 = vld [vmem:[%s7590_s24 + $0x538] sm:$0xff]  ;;  %v3697_v0 = vmul.f32 %v3669_v58, %v3320_v49 }
 0x57c   : > { %3622 = vmatpush1.bf16.msra.mxu1 %v2890_v62  ;;  %3582 = vmatprep.subr.bf16.mxu0 %v2755_v29  ;;  %v3661_v62 = vrot.slane %v8293_v28, %v7675_v44  ;;  %v2459_v29 = vld [vmem:[%s7590_s24 + $0x738] sm:$0xff]  ;;  %v2819_v11 = vunpack.c.h.s8.bf16 %v2395_v22  ;;  %v2811_v51 = vunpack.c.l.s8.bf16 %v2395_v22 }
 0x57d   : > { %3623 = vmatprep.subr.bf16.mxu1 %v2883_v27  ;;  %v2954_v27 = vunpack.c.l.s8.bf16 %v2466_v25 }
 0x57e   : > { %v3695_v3 = vmul.f32 %v3661_v62, %v8184_v35  ;;  %v3857_v35 = vld [vmem:[%s7600_s8 + $0x2c8] sm:$0xff] }
 0x57f   : > { %3583 = vmatpush1.bf16.msra.mxu0 %v2754_v18  ;;  %v2394_v18 = vld [vmem:[%s7590_s24 + $0x530] sm:$0xff]  ;;  %v4201_v5 = vunpack.c.l.s8.bf16 %v3857_v35 }
 0x580   : > { %3624 = vmatpush1.bf16.msra.mxu1 %v2882_v33  ;;  %3584 = vmatprep.subr.bf16.mxu0 %v2747_v21  ;;  %v8305_v33 = vld [vmem:[%s764_s2] sm:$0xff]  ;;  %v2947_v21 = vunpack.c.h.s8.bf16 %v2459_v29 }
 0x581   : > { %3625 = vmatprep.subr.bf16.mxu1 %v2875_v38  ;;  %v2458_v38 = vld [vmem:[%s7590_s24 + $0x730] sm:$0xff]  ;;  %v3711_v24 = vrot.slane %v8305_v33, %v7675_v44 }
 0x583   : > { %3585 = vmatpush1.bf16.msra.mxu0 %v2746_v31  ;;  %v3719_v31 = vrot.slane %v8305_v33, %v7678_v45 }
 0x584   : > { %3626 = vmatpush1.bf16.msra.mxu1 %v2874_v46  ;;  %3586 = vmatprep.subr.bf16.mxu0 %v2867_v47  ;;  %v2818_v46 = vunpack.c.h.s8.bf16 %v2394_v18  ;;  %v2946_v47 = vunpack.c.h.s8.bf16 %v2458_v38 }
 0x585   : > { %3627 = vmatprep.subr.bf16.mxu1 %v2995_v39  ;;  %v2939_v39 = vunpack.c.l.s8.bf16 %v2459_v29 }
 0x587   : > { %3587 = vmatpush2.bf16.msra.mxu0 %v2866_v40  ;;  %v3745_v40 = vadd.f32 %v3711_v24, %v3695_v3  ;;  %v3776_v3 = vld [vmem:[%s7600_s8 + $0x40] sm:$0xff] }
 0x588   : > { %3628 = vmatpush2.bf16.msra.mxu1 %v2994_v56  ;;  %3588 = vmatprep.subr.bf16.mxu0 %v2859_v8  ;;  %v3747_v56 = vadd.f32 %v3719_v31, %v3697_v0  ;;  %v2810_v8 = vunpack.c.l.s8.bf16 %v2394_v18  ;;  %v3840_v0 = vld [vmem:[%s7600_s8 + $0x240] sm:$0xff]  ;;  %v4048_v31 = vunpack.c.h.s8.bf16 %v3776_v3 }
 0x589   : > { %3629 = vmatprep.subr.bf16.mxu1 %v2987_v59  ;;  %v2938_v59 = vunpack.c.l.s8.bf16 %v2458_v38 }
 0x58a   : > { %v3755_v53 = vmax.f32 %v3747_v56, 0.0 }
 0x58b   : > { %3589 = vmatpush2.bf16.msra.mxu0 %v2858_v9  ;;  %v4209_v9 = vunpack.c.h.s8.bf16 %v3857_v35  ;;  %v4168_v35 = vunpack.c.l.s8.bf16 %v3840_v0 }
 0x58c   : > { %3630 = vmatpush2.bf16.msra.mxu1 %v2986_v13  ;;  %3590 = vmatprep.subr.bf16.mxu0 %v2851_v54  ;;  %v3856_v13 = vld [vmem:[%s7600_s8 + $0x2c0] sm:$0xff]  ;;  %v3753_v54 = vmax.f32 %v3745_v40, 0.0  ;;  %v4040_v40 = vunpack.c.l.s8.bf16 %v3776_v3 }
 0x58d   : > { %3631 = vmatprep.subr.bf16.mxu1 %v2979_v61  ;;  %v4080_v61 = vunpack.c.h.s8.bf16 %v3792_v36  ;;  %v4208_v14 = vunpack.c.h.s8.bf16 %v3856_v13  ;;  %v4200_v25 = vunpack.c.l.s8.bf16 %v3856_v13 }
 0x58f   : > { %3591 = vmatpush2.bf16.msra.mxu0 %v2850_v2  ;;  %v4073_v2 = vunpack.c.l.s8.bf16 %v3793_v6  ;;  %v3833_v6 = vld [vmem:[%s7600_s8 + $0x208] sm:$0xff] }
 0x590   : > { %3632 = vmatpush2.bf16.msra.mxu1 %v2978_v37  ;;  %3592 = vmatprep.subr.bf16.mxu0 %v2843_v55  ;;  %v3785_v37 = vld [vmem:[%s7600_s8 + $0x88] sm:$0xff]  ;;  %v8318_v55 = vpack.c.bf16 %v3753_v54, %v3753_v54  ;;  %v4153_v54 = vunpack.c.l.s8.bf16 %v3833_v6 }
 0x591   : > { %3633 = vmatprep.subr.bf16.mxu1 %v2971_v4  ;;  %v4065_v26 = vunpack.c.h.s8.bf16 %v3785_v37  ;;  %v4057_v49 = vunpack.c.l.s8.bf16 %v3785_v37 }
 0x593   : > { %3593 = vmatpush2.bf16.msra.mxu0 %v2842_v7  ;;  %v8322_v7 = vpack.c.bf16 %v3755_v53, %v3755_v53  ;;  %v3825_v53 = vld [vmem:[%s7600_s8 + $0x1c8] sm:$0xff] }
 0x594   : > { %3634 = vmatpush2.bf16.msra.mxu1 %v2970_v12  ;;  %3594 = vmatprep.subr.bf16.mxu0 %v2835_v16  ;;  %v4072_v16 = vunpack.c.l.s8.bf16 %v3792_v36  ;;  %v4145_v37 = vunpack.c.h.s8.bf16 %v3825_v53 }
 0x595   : > { %3635 = vmatprep.subr.bf16.mxu1 %v2963_v20 }
 0x597   : > { %3595 = vmatpush2.bf16.msra.mxu0 %v2834_v17 }
 0x598   : > { %3636 = vmatpush2.bf16.msra.mxu1 %v2962_v15  ;;  %3596 = vmatprep.subr.bf16.mxu0 %v2827_v19  ;;  %v4193_v15 = vunpack.c.h.s8.bf16 %v3849_v30 }
 0x599   : > { %3637 = vmatprep.subr.bf16.mxu1 %v2955_v32 }
 0x59b   : > { %3597 = vmatpush2.bf16.msra.mxu0 %v2826_v63  ;;  %v4185_v63 = vunpack.c.l.s8.bf16 %v3849_v30  ;;  %v3888_v30 = vld [vmem:[%s7600_s8 + $0x3c0] sm:$0xff] }
 0x59c   : > { %3638 = vmatpush2.bf16.msra.mxu1 %v2954_v27  ;;  %3598 = vmatprep.subr.bf16.mxu0 %v2819_v11  ;;  %v3777_v27 = vld [vmem:[%s7600_s8 + $0x48] sm:$0xff] }
 0x59d   : > { %3639 = vmatprep.subr.bf16.mxu1 %v2947_v21  ;;  %v3841_v11 = vld [vmem:[%s7600_s8 + $0x248] sm:$0xff]  ;;  %v4049_v38 = vunpack.c.h.s8.bf16 %v3777_v27 }
 0x59e   : > { %v4177_v24 = vunpack.c.h.s8.bf16 %v3841_v11 }
 0x59f   : > { %3599 = vmatpush2.bf16.msra.mxu0 %v2818_v46  ;;  %v4176_v46 = vunpack.c.h.s8.bf16 %v3840_v0 }
 0x5a0   : > { %3640 = vmatpush2.bf16.msra.mxu1 %v2946_v47  ;;  %3600 = vmatprep.subr.bf16.mxu0 %v2811_v51  ;;  %v4041_v47 = vunpack.c.l.s8.bf16 %v3777_v27  ;;  %v4169_v51 = vunpack.c.l.s8.bf16 %v3841_v11  ;;  %v3809_v11 = vld [vmem:[%s7600_s8 + $0x148] sm:$0xff] }
 0x5a1   : > { %3641 = vmatprep.subr.bf16.mxu1 %v2939_v39  ;;  %v3769_v39 = vld [vmem:[%s7600_s8 + $0x8] sm:$0xff]  ;;  %v4113_v3 = vunpack.c.h.s8.bf16 %v3809_v11 }
 0x5a2   : > { %v4033_v56 = vunpack.c.h.s8.bf16 %v3769_v39  ;;  %v4025_v13 = vunpack.c.l.s8.bf16 %v3769_v39  ;;  %v4105_v39 = vunpack.c.l.s8.bf16 %v3809_v11 }
 0x5a3   : > { %3601 = vmatpush2.bf16.msra.mxu0 %v2810_v8  ;;  %v3768_v8 = vld [vmem:[%s7600_s8] sm:$0xff] }
 0x5a4   : > { %3642 = vmatpush2.bf16.msra.mxu1 %v2938_v59  ;;  %4536 = vmatprep.subr.bf16.mxu0 %v4081_v60  ;;  %v4161_v59 = vunpack.c.h.s8.bf16 %v3833_v6  ;;  %v3832_v60 = vld [vmem:[%s7600_s8 + $0x200] sm:$0xff]  ;;  %v4032_v36 = vunpack.c.h.s8.bf16 %v3768_v8  ;;  %v3665_v6 = vrot.slane %v8293_v28, %v7672_v43 }
 0x5a5   : > { %4577 = vmatprep.subr.bf16.mxu1 %v4209_v9  ;;  %v4160_v9 = vunpack.c.h.s8.bf16 %v3832_v60 }
 0x5a6   : > { %v3358_v4 = vpop.f32.mrf.mxu0  ;;  %3603 = vmatmul.mubr.bf16.vlgmr.msra.gmra.mxu0 %v8052_v23  ;;  %v3784_v23 = vld [vmem:[%s7600_s8 + $0x80] sm:$0xff] }
 0x5a7   : > { %v3399_v12 = vpop.f32.mrf.mxu1  ;;  %3644 = vmatmul.mubr.bf16.vlgmr.msra.gmra.mxu1 %v8056_v57  ;;  %4537 = vmatpush1.bf16.msra.mxu0 %v4080_v61  ;;  %v3848_v57 = vld [vmem:[%s7600_s8 + $0x280] sm:$0xff]  ;;  %v4064_v22 = vunpack.c.h.s8.bf16 %v3784_v23  ;;  %v4056_v18 = vunpack.c.l.s8.bf16 %v3784_v23  ;;  %v3889_v61 = vld [vmem:[%s7600_s8 + $0x3c8] sm:$0xff] }
 0x5a8   : > { %v8325_v10 = vadd.f32 %v3399_v12, %v3358_v4  ;;  %4568 = vmatprep.mubr.bf16.mxu0 %v8318_v55  ;;  %4578 = vmatpush1.bf16.msra.mxu1 %v4208_v14  ;;  %v8328_v20 = vpop.f32.mrf.mxu0  ;;  %v4192_v29 = vunpack.c.h.s8.bf16 %v3848_v57  ;;  %v4184_v21 = vunpack.c.l.s8.bf16 %v3848_v57  ;;  %v4024_v14 = vunpack.c.l.s8.bf16 %v3768_v8  ;;  %v3824_v4 = vld [vmem:[%s7600_s8 + $0x1c0] sm:$0xff]  ;;  %v3817_v23 = vld [vmem:[%s7600_s8 + $0x188] sm:$0xff] }
 0x5a9   : > { %4609 = vmatprep.mubr.bf16.mxu1 %v8322_v7  ;;  %v8332_v17 = vpop.f32.mrf.mxu1  ;;  %4538 = vmatprep.subr.bf16.mxu0 %v4073_v2  ;;  %v4152_v2 = vunpack.c.l.s8.bf16 %v3832_v60  ;;  %v4144_v12 = vunpack.c.h.s8.bf16 %v3824_v4  ;;  %v4136_v57 = vunpack.c.l.s8.bf16 %v3824_v4  ;;  %v3707_v60 = vrot.slane %v8305_v33, %v7669_v42 }
 0x5aa   : > { %v3362_v19 = vpop.f32.mrf.mxu0  ;;  %4579 = vmatprep.subr.bf16.mxu1 %v4201_v5  ;;  %v4273_v5 = vunpack.c.h.s8.bf16 %v3889_v61 }
 0x5ab   : > { %v3403_v32 = vpop.f32.mrf.mxu1  ;;  %4539 = vmatpush1.bf16.msra.mxu0 %v4072_v16  ;;  %v4272_v16 = vunpack.c.h.s8.bf16 %v3888_v30  ;;  %v4264_v19 = vunpack.c.l.s8.bf16 %v3888_v30 }
 0x5ac   : > { %4580 = vmatpush1.bf16.msra.mxu1 %v4200_v25  ;;  %v3363_v62 = vpop.f32.mrf.mxu0  ;;  %4540 = vmatprep.subr.bf16.mxu0 %v4065_v26  ;;  %v4137_v25 = vunpack.c.l.s8.bf16 %v3825_v53  ;;  %v4265_v26 = vunpack.c.l.s8.bf16 %v3889_v61  ;;  %v4129_v32 = vunpack.c.h.s8.bf16 %v3817_v23  ;;  %v3715_v53 = vrot.slane %v8305_v33, %v7672_v43 }
 0x5ad   : > { %v3404_v58 = vpop.f32.mrf.mxu1  ;;  %4581 = vmatprep.subr.bf16.mxu1 %v4193_v15  ;;  %v3881_v15 = vld [vmem:[%s7600_s8 + $0x388] sm:$0xff] }
 0x5ae   : > { %v4257_v62 = vunpack.c.h.s8.bf16 %v3881_v15  ;;  %v4249_v27 = vunpack.c.l.s8.bf16 %v3881_v15  ;;  %v3920_v15 = vld [vmem:[%s7600_s8 + $0x4c0] sm:$0xff] }
 0x5af   : > { %4541 = vmatpush1.bf16.msra.mxu0 %v4064_v22  ;;  %v3816_v22 = vld [vmem:[%s7600_s8 + $0x180] sm:$0xff] }
 0x5b0   : > { %4582 = vmatpush1.bf16.msra.mxu1 %v4192_v29  ;;  %4542 = vmatprep.subr.bf16.mxu0 %v4057_v49  ;;  %v3880_v29 = vld [vmem:[%s7600_s8 + $0x380] sm:$0xff]  ;;  %v4128_v49 = vunpack.c.h.s8.bf16 %v3816_v22 }
 0x5b1   : > { %4583 = vmatprep.subr.bf16.mxu1 %v4185_v63  ;;  %v4256_v58 = vunpack.c.h.s8.bf16 %v3880_v29  ;;  %v4121_v63 = vunpack.c.l.s8.bf16 %v3817_v23 }
 0x5b3   : > { %4543 = vmatpush1.bf16.msra.mxu0 %v4056_v18  ;;  %v3873_v18 = vld [vmem:[%s7600_s8 + $0x348] sm:$0xff] }
 0x5b4   : > { %4584 = vmatpush1.bf16.msra.mxu1 %v4184_v21  ;;  %4544 = vmatprep.subr.bf16.mxu0 %v4049_v38  ;;  %v4120_v21 = vunpack.c.l.s8.bf16 %v3816_v22  ;;  %v4248_v38 = vunpack.c.l.s8.bf16 %v3880_v29  ;;  %v4241_v0 = vunpack.c.h.s8.bf16 %v3873_v18  ;;  %v4336_v22 = vunpack.c.h.s8.bf16 %v3920_v15 }
 0x5b5   : > { %4585 = vmatprep.subr.bf16.mxu1 %v4177_v24  ;;  %v3808_v24 = vld [vmem:[%s7600_s8 + $0x140] sm:$0xff] }
 0x5b6   : > { %v4104_v8 = vunpack.c.l.s8.bf16 %v3808_v24 }
 0x5b7   : > { %4545 = vmatpush1.bf16.msra.mxu0 %v4048_v31  ;;  %v3872_v31 = vld [vmem:[%s7600_s8 + $0x340] sm:$0xff] }
 0x5b8   : > { %4586 = vmatpush1.bf16.msra.mxu1 %v4176_v46  ;;  %4546 = vmatprep.subr.bf16.mxu0 %v4041_v47  ;;  %v4112_v46 = vunpack.c.h.s8.bf16 %v3808_v24  ;;  %v3657_v47 = vrot.slane %v8293_v28, %v7669_v42 }
 0x5b9   : > { %4587 = vmatprep.subr.bf16.mxu1 %v4169_v51  ;;  %v4240_v51 = vunpack.c.h.s8.bf16 %v3872_v31 }
 0x5bb   : > { %4547 = vmatpush1.bf16.msra.mxu0 %v4040_v40  ;;  %v4233_v40 = vunpack.c.l.s8.bf16 %v3873_v18  ;;  %v3977_v18 = vld [vmem:[%s7600_s8 + $0x688] sm:$0xff] }
 0x5bc   : > { %4588 = vmatpush1.bf16.msra.mxu1 %v4168_v35  ;;  %4548 = vmatprep.subr.bf16.mxu0 %v4033_v56  ;;  %v3801_v35 = vld [vmem:[%s7600_s8 + $0x108] sm:$0xff] }
 0x5bd   : > { %4589 = vmatprep.subr.bf16.mxu1 %v4161_v59  ;;  %v3865_v56 = vld [vmem:[%s7600_s8 + $0x308] sm:$0xff]  ;;  %v3694_v59 = vmul.f32 %v3657_v47, %v8179_v34  ;;  %v4089_v4 = vunpack.c.l.s8.bf16 %v3801_v35 }
 0x5be   : > { %v4225_v61 = vunpack.c.h.s8.bf16 %v3865_v56  ;;  %v4217_v30 = vunpack.c.l.s8.bf16 %v3865_v56 }
 0x5bf   : > { %4549 = vmatpush1.bf16.msra.mxu0 %v4032_v36  ;;  %v4232_v36 = vunpack.c.l.s8.bf16 %v3872_v31  ;;  %v3912_v31 = vld [vmem:[%s7600_s8 + $0x480] sm:$0xff] }
 0x5c0   : > { %4590 = vmatpush1.bf16.msra.mxu1 %v4160_v9  ;;  %4550 = vmatprep.subr.bf16.mxu0 %v4025_v13  ;;  %v4097_v9 = vunpack.c.h.s8.bf16 %v3801_v35  ;;  %v3800_v13 = vld [vmem:[%s7600_s8 + $0x100] sm:$0xff]  ;;  %v3727_v35 = vrot.slane %v8305_v33, %v8017_v52 }
 0x5c1   : > { %4591 = vmatprep.subr.bf16.mxu1 %v4153_v54  ;;  %v3696_v54 = vmul.f32 %v3665_v6, %v8263_v41  ;;  %v4096_v34 = vunpack.c.h.s8.bf16 %v3800_v13  ;;  %v3921_v41 = vld [vmem:[%s7600_s8 + $0x4c8] sm:$0xff] }
 0x5c2   : > { %v4337_v23 = vunpack.c.h.s8.bf16 %v3921_v41  ;;  %v4329_v29 = vunpack.c.l.s8.bf16 %v3921_v41  ;;  %v3968_v41 = vld [vmem:[%s7600_s8 + $0x640] sm:$0xff] }
 0x5c3   : > { %4551 = vmatpush1.bf16.msra.mxu0 %v4024_v14  ;;  %v3864_v14 = vld [vmem:[%s7600_s8 + $0x300] sm:$0xff] }
 0x5c4   : > { %4592 = vmatpush1.bf16.msra.mxu1 %v4152_v2  ;;  %4552 = vmatprep.subr.bf16.mxu0 %v4145_v37  ;;  %v3744_v2 = vadd.f32 %v3707_v60, %v3694_v59  ;;  %v4224_v37 = vunpack.c.h.s8.bf16 %v3864_v14 }
 0x5c5   : > { %4593 = vmatprep.subr.bf16.mxu1 %v4273_v5  ;;  %v3746_v5 = vadd.f32 %v3715_v53, %v3696_v54  ;;  %v3905_v54 = vld [vmem:[%s7600_s8 + $0x448] sm:$0xff]  ;;  %v4441_v53 = vunpack.c.l.s8.bf16 %v3977_v18 }
 0x5c7   : > { %4553 = vmatpush2.bf16.msra.mxu0 %v4144_v12  ;;  %v3985_v12 = vld [vmem:[%s7600_s8 + $0x6c8] sm:$0xff] }
 0x5c8   : > { %4594 = vmatpush2.bf16.msra.mxu1 %v4272_v16  ;;  %4554 = vmatprep.subr.bf16.mxu0 %v4137_v25  ;;  %v4088_v16 = vunpack.c.l.s8.bf16 %v3800_v13  ;;  %v3752_v25 = vmax.f32 %v3744_v2, 0.0  ;;  %v4305_v2 = vunpack.c.h.s8.bf16 %v3905_v54 }
 0x5c9   : > { %4595 = vmatprep.subr.bf16.mxu1 %v4265_v26  ;;  %v4216_v26 = vunpack.c.l.s8.bf16 %v3864_v14 }
 0x5cb   : > { %4555 = vmatpush2.bf16.msra.mxu0 %v4136_v57  ;;  %v3754_v57 = vmax.f32 %v3746_v5, 0.0 }
 0x5cc   : > { %4596 = vmatpush2.bf16.msra.mxu1 %v4264_v19  ;;  %4556 = vmatprep.subr.bf16.mxu0 %v4129_v32  ;;  %v4465_v19 = vunpack.c.h.s8.bf16 %v3985_v12  ;;  %v3984_v32 = vld [vmem:[%s7600_s8 + $0x6c0] sm:$0xff] }
 0x5cd   : > { %4597 = vmatprep.subr.bf16.mxu1 %v4257_v62  ;;  %v8373_v62 = vpack.c.bf16 %v3752_v25, %v3752_v25  ;;  %v4297_v25 = vunpack.c.l.s8.bf16 %v3905_v54  ;;  %v4008_v54 = vld [vmem:[%s7600_s8 + $0x780] sm:$0xff] }
 0x5cf   : > { %4557 = vmatpush2.bf16.msra.mxu0 %v4128_v49  ;;  %v4464_v49 = vunpack.c.h.s8.bf16 %v3984_v32 }
 0x5d0   : > { %4598 = vmatpush2.bf16.msra.mxu1 %v4256_v58  ;;  %4558 = vmatprep.subr.bf16.mxu0 %v4121_v63  ;;  %v8375_v58 = vpack.c.bf16 %v3754_v57, %v3754_v57  ;;  %v3913_v63 = vld [vmem:[%s7600_s8 + $0x488] sm:$0xff] }
 0x5d1   : > { %4599 = vmatprep.subr.bf16.mxu1 %v4249_v27  ;;  %v4457_v27 = vunpack.c.l.s8.bf16 %v3985_v12  ;;  %v4313_v60 = vunpack.c.l.s8.bf16 %v3913_v63  ;;  %v3961_v57 = vld [vmem:[%s7600_s8 + $0x608] sm:$0xff] }
 0x5d3   : > { %4559 = vmatpush2.bf16.msra.mxu0 %v4120_v21  ;;  %v3402_v21 = vadd.f32 %v8332_v17, %v8328_v20  ;;  %v4449_v20 = vunpack.c.h.s8.bf16 %v3977_v18  ;;  %v3976_v17 = vld [vmem:[%s7600_s8 + $0x680] sm:$0xff] }
 0x5d4   : > { %4600 = vmatpush2.bf16.msra.mxu1 %v4248_v38  ;;  %4560 = vmatprep.subr.bf16.mxu0 %v4113_v3  ;;  %v4328_v3 = vunpack.c.l.s8.bf16 %v3920_v15 }
 0x5d5   : > { %4601 = vmatprep.subr.bf16.mxu1 %v4241_v0  ;;  %v4321_v0 = vunpack.c.h.s8.bf16 %v3913_v63  ;;  %v3960_v63 = vld [vmem:[%s7600_s8 + $0x600] sm:$0xff] }
 0x5d7   : > { %4561 = vmatpush2.bf16.msra.mxu0 %v4112_v46  ;;  %v4456_v46 = vunpack.c.l.s8.bf16 %v3984_v32 }
 0x5d8   : > { %4602 = vmatpush2.bf16.msra.mxu1 %v4240_v51  ;;  %4562 = vmatprep.subr.bf16.mxu0 %v4105_v39  ;;  %v3677_v39 = vrot.slane %v8293_v28, %v8017_v52 }
 0x5d9   : > { %4603 = vmatprep.subr.bf16.mxu1 %v4233_v40 }
 0x5db   : > { %4563 = vmatpush2.bf16.msra.mxu0 %v4104_v8  ;;  %v4320_v8 = vunpack.c.h.s8.bf16 %v3912_v31 }
 0x5dc   : > { %4604 = vmatpush2.bf16.msra.mxu1 %v4232_v36  ;;  %4564 = vmatprep.subr.bf16.mxu0 %v4097_v9  ;;  %v4448_v36 = vunpack.c.h.s8.bf16 %v3976_v17 }
 0x5dd   : > { %4605 = vmatprep.subr.bf16.mxu1 %v4225_v61  ;;  %v3969_v61 = vld [vmem:[%s7600_s8 + $0x648] sm:$0xff] }
 0x5de   : > { %v4425_v15 = vunpack.c.l.s8.bf16 %v3969_v61 }
 0x5df   : > { %4565 = vmatpush2.bf16.msra.mxu0 %v4096_v34  ;;  %v4312_v34 = vunpack.c.l.s8.bf16 %v3912_v31 }
 0x5e0   : > { %4606 = vmatpush2.bf16.msra.mxu1 %v4224_v37  ;;  %4566 = vmatprep.subr.bf16.mxu0 %v4089_v4  ;;  %v3904_v37 = vld [vmem:[%s7600_s8 + $0x440] sm:$0xff]  ;;  %v4440_v4 = vunpack.c.l.s8.bf16 %v3976_v17 }
 0x5e1   : > { %4607 = vmatprep.subr.bf16.mxu1 %v4217_v30  ;;  %v4433_v30 = vunpack.c.h.s8.bf16 %v3969_v61 }
 0x5e3   : > { %4567 = vmatpush2.bf16.msra.mxu0 %v4088_v16  ;;  %v4304_v16 = vunpack.c.h.s8.bf16 %v3904_v37 }
 0x5e4   : > { %4608 = vmatpush2.bf16.msra.mxu1 %v4216_v26  ;;  %4618 = vmatprep.subr.bf16.mxu0 %v4337_v23  ;;  %v4432_v26 = vunpack.c.h.s8.bf16 %v3968_v41  ;;  %v3897_v23 = vld [vmem:[%s7600_s8 + $0x408] sm:$0xff] }
 0x5e5   : > { %4659 = vmatprep.subr.bf16.mxu1 %v4465_v19  ;;  %v4296_v19 = vunpack.c.l.s8.bf16 %v3904_v37  ;;  %v4289_v32 = vunpack.c.h.s8.bf16 %v3897_v23  ;;  %v4281_v18 = vunpack.c.l.s8.bf16 %v3897_v23  ;;  %v4001_v37 = vld [vmem:[%s7600_s8 + $0x748] sm:$0xff] }
 0x5e6   : > { %v8378_v11 = vpop.f32.mrf.mxu0  ;;  %4569 = vmatmul.mubr.bf16.vlgmr.msra.gmra.mxu0 %v8373_v62 }
 0x5e7   : > { %v8384_v38 = vpop.f32.mrf.mxu1  ;;  %4610 = vmatmul.mubr.bf16.vlgmr.msra.gmra.mxu1 %v8375_v58  ;;  %4619 = vmatpush1.bf16.msra.mxu0 %v4336_v22  ;;  %v3896_v22 = vld [vmem:[%s7600_s8 + $0x400] sm:$0xff] }
 0x5e8   : > { %v3442_v24 = vpop.f32.mrf.mxu0  ;;  %4620 = vmatprep.subr.bf16.mxu0 %v4329_v29  ;;  %4660 = vmatpush1.bf16.msra.mxu1 %v4464_v49  ;;  %v4424_v29 = vunpack.c.l.s8.bf16 %v3968_v41  ;;  %v4417_v49 = vunpack.c.h.s8.bf16 %v3961_v57  ;;  %v4280_v31 = vunpack.c.l.s8.bf16 %v3896_v22  ;;  %v3936_v41 = vld [vmem:[%s7600_s8 + $0x540] sm:$0xff] }
 0x5e9   : > { %v3443_v47 = vadd.f32 %v3442_v24, %v3402_v21  ;;  %v3483_v51 = vpop.f32.mrf.mxu1  ;;  %4661 = vmatprep.subr.bf16.mxu1 %v4457_v27  ;;  %v4288_v27 = vunpack.c.h.s8.bf16 %v3896_v22  ;;  %v4416_v21 = vunpack.c.h.s8.bf16 %v3960_v63  ;;  %v4409_v24 = vunpack.c.l.s8.bf16 %v3961_v57  ;;  %v3993_v22 = vld [vmem:[%s7600_s8 + $0x708] sm:$0xff] }
 0x5ea   : > { %v3444_v6 = vpop.f32.mrf.mxu0  ;;  %v4368_v23 = vunpack.c.h.s8.bf16 %v3936_v41  ;;  %v3673_v57 = vrot.slane %v8293_v28, %v8011_v48 }
 0x5eb   : > { %v3484_v40 = vadd.f32 %v3483_v51, %v3443_v47  ;;  %v3485_v56 = vpop.f32.mrf.mxu1  ;;  %4621 = vmatpush1.bf16.msra.mxu0 %v4328_v3  ;;  %v3953_v3 = vld [vmem:[%s7600_s8 + $0x5c8] sm:$0xff]  ;;  %v3952_v47 = vld [vmem:[%s7600_s8 + $0x5c0] sm:$0xff]  ;;  %v4408_v51 = vunpack.c.l.s8.bf16 %v3960_v63  ;;  %v3723_v63 = vrot.slane %v8305_v33, %v8011_v48  ;;  %v4473_v33 = vunpack.c.l.s8.bf16 %v3993_v22 }
 0x5ec   : > { %v3445_v59 = vpop.f32.mrf.mxu0  ;;  %4622 = vmatprep.subr.bf16.mxu0 %v4321_v0  ;;  %4662 = vmatpush1.bf16.msra.mxu1 %v4456_v46  ;;  %v4017_v0 = vld [vmem:[%s7600_s8 + $0x7c8] sm:$0xff]  ;;  %v4401_v46 = vunpack.c.h.s8.bf16 %v3953_v3  ;;  %v4400_v17 = vunpack.c.h.s8.bf16 %v3952_v47  ;;  %v4393_v6 = vunpack.c.l.s8.bf16 %v3953_v3 }
 0x5ed   : > { %v3699_v9 = vmul.f32 %v3677_v39, %v3484_v40  ;;  %v3486_v13 = vpop.f32.mrf.mxu1  ;;  %4663 = vmatprep.subr.bf16.mxu1 %v4449_v20  ;;  %v4529_v39 = vunpack.c.h.s8.bf16 %v4017_v0  ;;  %v4016_v20 = vld [vmem:[%s7600_s8 + $0x7c0] sm:$0xff]  ;;  %v4521_v56 = vunpack.c.l.s8.bf16 %v4017_v0  ;;  %v4392_v59 = vunpack.c.l.s8.bf16 %v3952_v47  ;;  %v8429_v47 = vld [vmem:[%s7600_s8 + $0x2d8] sm:$0xff] }
 0x5ee   : > { %v4528_v40 = vunpack.c.h.s8.bf16 %v4016_v20 }
 0x5ef   : > { %v3749_v14 = vadd.f32 %v3727_v35, %v3699_v9  ;;  %4623 = vmatpush1.bf16.msra.mxu0 %v4320_v8  ;;  %v3945_v35 = vld [vmem:[%s7600_s8 + $0x588] sm:$0xff]  ;;  %v4520_v9 = vunpack.c.l.s8.bf16 %v4016_v20 }
 0x5f0   : > { %4624 = vmatprep.subr.bf16.mxu0 %v4313_v60  ;;  %4664 = vmatpush1.bf16.msra.mxu1 %v4448_v36  ;;  %v4009_v8 = vld [vmem:[%s7600_s8 + $0x788] sm:$0xff]  ;;  %v4385_v60 = vunpack.c.h.s8.bf16 %v3945_v35  ;;  %v3944_v36 = vld [vmem:[%s7600_s8 + $0x580] sm:$0xff]  ;;  %v4377_v61 = vunpack.c.l.s8.bf16 %v3945_v35 }
 0x5f1   : > { %v3757_v5 = vmax.f32 %v3749_v14, 0.0  ;;  %4665 = vmatprep.subr.bf16.mxu1 %v4441_v53  ;;  %v4513_v13 = vunpack.c.h.s8.bf16 %v4009_v8  ;;  %v4384_v53 = vunpack.c.h.s8.bf16 %v3944_v36  ;;  %v4512_v14 = vunpack.c.h.s8.bf16 %v4008_v54 }
 0x5f3   : > { %v8397_v12 = vpack.c.bf16 %v3757_v5, %v3757_v5  ;;  %4625 = vmatpush1.bf16.msra.mxu0 %v4312_v34  ;;  %v3937_v34 = vld [vmem:[%s7600_s8 + $0x548] sm:$0xff]  ;;  %v3441_v5 = vadd.f32 %v8378_v11, %v8325_v10 }
 0x5f4   : > { %4626 = vmatprep.subr.bf16.mxu0 %v4305_v2  ;;  %4666 = vmatpush1.bf16.msra.mxu1 %v4440_v4  ;;  %v4505_v2 = vunpack.c.l.s8.bf16 %v4009_v8  ;;  %v4376_v4 = vunpack.c.l.s8.bf16 %v3944_v36  ;;  %v4361_v10 = vunpack.c.l.s8.bf16 %v3937_v34 }
 0x5f5   : > { %4650 = vmatprep.mubr.bf16.mxu0 %v8397_v12  ;;  %4667 = vmatprep.subr.bf16.mxu1 %v4433_v30  ;;  %v4369_v30 = vunpack.c.h.s8.bf16 %v3937_v34 }
 0x5f7   : > { %4627 = vmatpush1.bf16.msra.mxu0 %v4304_v16  ;;  %v4504_v16 = vunpack.c.l.s8.bf16 %v4008_v54 }
 0x5f8   : > { %4628 = vmatprep.subr.bf16.mxu0 %v4297_v25  ;;  %4668 = vmatpush1.bf16.msra.mxu1 %v4432_v26  ;;  %v4497_v25 = vunpack.c.h.s8.bf16 %v4001_v37  ;;  %v4000_v26 = vld [vmem:[%s7600_s8 + $0x740] sm:$0xff] }
 0x5f9   : > { %4669 = vmatprep.subr.bf16.mxu1 %v4425_v15  ;;  %v3482_v15 = vadd.f32 %v8384_v38, %v3441_v5  ;;  %v4496_v11 = vunpack.c.h.s8.bf16 %v4000_v26  ;;  %v4488_v28 = vunpack.c.l.s8.bf16 %v4000_v26  ;;  %v3778_v26 = vld [vmem:[%s7600_s8 + $0x50] sm:$0xff] }
 0x5fb   : > { %4629 = vmatpush1.bf16.msra.mxu0 %v4296_v19  ;;  %v3929_v19 = vld [vmem:[%s7600_s8 + $0x508] sm:$0xff] }
 0x5fc   : > { %4630 = vmatprep.subr.bf16.mxu0 %v4289_v32  ;;  %4670 = vmatpush1.bf16.msra.mxu1 %v4424_v29  ;;  %v4489_v32 = vunpack.c.l.s8.bf16 %v4001_v37  ;;  %v4360_v29 = vunpack.c.l.s8.bf16 %v3936_v41  ;;  %v4353_v38 = vunpack.c.h.s8.bf16 %v3929_v19  ;;  %v4345_v0 = vunpack.c.l.s8.bf16 %v3929_v19  ;;  %v3779_v41 = vld [vmem:[%s7600_s8 + $0x58] sm:$0xff]  ;;  %v3770_v19 = vld [vmem:[%s7600_s8 + $0x10] sm:$0xff] }
 0x5fd   : > { %4671 = vmatprep.subr.bf16.mxu1 %v4417_v49  ;;  %v3698_v49 = vmul.f32 %v3673_v57, %v3482_v15  ;;  %v4043_v15 = vunpack.c.l.s8.bf16 %v3779_v41  ;;  %v3771_v57 = vld [vmem:[%s7600_s8 + $0x18] sm:$0xff] }
 0x5ff   : > { %4631 = vmatpush1.bf16.msra.mxu0 %v4288_v27  ;;  %v3928_v27 = vld [vmem:[%s7600_s8 + $0x500] sm:$0xff] }
 0x600   : > { %4632 = vmatprep.subr.bf16.mxu0 %v4281_v18  ;;  %4672 = vmatpush1.bf16.msra.mxu1 %v4416_v21  ;;  %v4481_v18 = vunpack.c.h.s8.bf16 %v3993_v22  ;;  %v3992_v21 = vld [vmem:[%s7600_s8 + $0x700] sm:$0xff]  ;;  %v4352_v3 = vunpack.c.h.s8.bf16 %v3928_v27  ;;  %v4027_v22 = vunpack.c.l.s8.bf16 %v3771_v57 }
 0x601   : > { %4673 = vmatprep.subr.bf16.mxu1 %v4409_v24  ;;  %v3748_v24 = vadd.f32 %v3723_v63, %v3698_v49  ;;  %v4026_v49 = vunpack.c.l.s8.bf16 %v3770_v19 }
 0x603   : > { %4633 = vmatpush1.bf16.msra.mxu0 %v4280_v31  ;;  %v4480_v31 = vunpack.c.h.s8.bf16 %v3992_v21 }
 0x604   : > { %4634 = vmatprep.subr.bf16.mxu0 %v4401_v46  ;;  %4674 = vmatpush1.bf16.msra.mxu1 %v4408_v51  ;;  %v3795_v46 = vld [vmem:[%s7600_s8 + $0xd8] sm:$0xff]  ;;  %v4344_v51 = vunpack.c.l.s8.bf16 %v3928_v27 }
 0x605   : > { %4675 = vmatprep.subr.bf16.mxu1 %v4529_v39  ;;  %v3756_v39 = vmax.f32 %v3748_v24, 0.0  ;;  %v4083_v20 = vunpack.c.h.s8.bf16 %v3795_v46  ;;  %v4075_v8 = vunpack.c.l.s8.bf16 %v3795_v46  ;;  %v3818_v24 = vld [vmem:[%s7600_s8 + $0x190] sm:$0xff]  ;;  %v3811_v46 = vld [vmem:[%s7600_s8 + $0x158] sm:$0xff] }
 0x607   : > { %4635 = vmatpush2.bf16.msra.mxu0 %v4400_v17  ;;  %v3794_v17 = vld [vmem:[%s7600_s8 + $0xd0] sm:$0xff] }
 0x608   : > { %4636 = vmatprep.subr.bf16.mxu0 %v4393_v6  ;;  %4676 = vmatpush2.bf16.msra.mxu1 %v4528_v40  ;;  %v4472_v6 = vunpack.c.l.s8.bf16 %v3992_v21  ;;  %v4211_v40 = vunpack.c.h.s8.bf16 %v8429_v47  ;;  %v4082_v35 = vunpack.c.h.s8.bf16 %v3794_v17 }
 0x609   : > { %4677 = vmatprep.subr.bf16.mxu1 %v4521_v56  ;;  %v8433_v56 = vpack.c.bf16 %v3756_v39, %v3756_v39  ;;  %v3810_v39 = vld [vmem:[%s7600_s8 + $0x150] sm:$0xff] }
 0x60b   : > { %4637 = vmatpush2.bf16.msra.mxu0 %v4392_v59  ;;  %v3787_v59 = vld [vmem:[%s7600_s8 + $0x98] sm:$0xff] }
 0x60c   : > { %4638 = vmatprep.subr.bf16.mxu0 %v4385_v60  ;;  %4678 = vmatpush2.bf16.msra.mxu1 %v4520_v9  ;;  %v4074_v9 = vunpack.c.l.s8.bf16 %v3794_v17  ;;  %v4059_v5 = vunpack.c.l.s8.bf16 %v3787_v59  ;;  %v4107_v17 = vunpack.c.l.s8.bf16 %v3811_v46 }
 0x60d   : > { %4679 = vmatprep.subr.bf16.mxu1 %v4513_v13 }
 0x60f   : > { %4639 = vmatpush2.bf16.msra.mxu0 %v4384_v53  ;;  %v4067_v53 = vunpack.c.h.s8.bf16 %v3787_v59 }
 0x610   : > { %4640 = vmatprep.subr.bf16.mxu0 %v4377_v61  ;;  %4680 = vmatpush2.bf16.msra.mxu1 %v4512_v14  ;;  %v3786_v61 = vld [vmem:[%s7600_s8 + $0x90] sm:$0xff] }
 0x611   : > { %4681 = vmatprep.subr.bf16.mxu1 %v4505_v2  ;;  %v4066_v37 = vunpack.c.h.s8.bf16 %v3786_v61 }
 0x613   : > { %4641 = vmatpush2.bf16.msra.mxu0 %v4376_v4 }
 0x614   : > { %4642 = vmatprep.subr.bf16.mxu0 %v4369_v30  ;;  %4682 = vmatpush2.bf16.msra.mxu1 %v4504_v16  ;;  %v4058_v16 = vunpack.c.l.s8.bf16 %v3786_v61  ;;  %v3922_v61 = vld [vmem:[%s7600_s8 + $0x4d0] sm:$0xff] }
 0x615   : > { %4683 = vmatprep.subr.bf16.mxu1 %v4497_v25  ;;  %v4051_v25 = vunpack.c.h.s8.bf16 %v3779_v41 }
 0x617   : > { %4643 = vmatpush2.bf16.msra.mxu0 %v4368_v23  ;;  %v4050_v23 = vunpack.c.h.s8.bf16 %v3778_v26 }
 0x618   : > { %4644 = vmatprep.subr.bf16.mxu0 %v4361_v10  ;;  %4684 = vmatpush2.bf16.msra.mxu1 %v4496_v11  ;;  %v4042_v10 = vunpack.c.l.s8.bf16 %v3778_v26  ;;  %v4035_v11 = vunpack.c.h.s8.bf16 %v3771_v57  ;;  %v4330_v26 = vunpack.c.l.s8.bf16 %v3922_v61  ;;  %v3914_v57 = vld [vmem:[%s7600_s8 + $0x490] sm:$0xff] }
 0x619   : > { %4685 = vmatprep.subr.bf16.mxu1 %v4489_v32  ;;  %v4034_v32 = vunpack.c.h.s8.bf16 %v3770_v19 }
 0x61b   : > { %4645 = vmatpush2.bf16.msra.mxu0 %v4360_v29  ;;  %v3827_v29 = vld [vmem:[%s7600_s8 + $0x1d8] sm:$0xff] }
 0x61c   : > { %4646 = vmatprep.subr.bf16.mxu0 %v4353_v38  ;;  %4686 = vmatpush2.bf16.msra.mxu1 %v4488_v28  ;;  %v4147_v63 = vunpack.c.h.s8.bf16 %v3827_v29  ;;  %v3826_v38 = vld [vmem:[%s7600_s8 + $0x1d0] sm:$0xff]  ;;  %v4139_v28 = vunpack.c.l.s8.bf16 %v3827_v29 }
 0x61d   : > { %4687 = vmatprep.subr.bf16.mxu1 %v4481_v18  ;;  %v4146_v27 = vunpack.c.h.s8.bf16 %v3826_v38  ;;  %v3819_v18 = vld [vmem:[%s7600_s8 + $0x198] sm:$0xff]  ;;  %v4138_v21 = vunpack.c.l.s8.bf16 %v3826_v38  ;;  %v4322_v38 = vunpack.c.h.s8.bf16 %v3914_v57 }
 0x61f   : > { %4647 = vmatpush2.bf16.msra.mxu0 %v4352_v3  ;;  %v4131_v3 = vunpack.c.h.s8.bf16 %v3819_v18 }
 0x620   : > { %4648 = vmatprep.subr.bf16.mxu0 %v4345_v0  ;;  %4688 = vmatpush2.bf16.msra.mxu1 %v4480_v31  ;;  %v4130_v0 = vunpack.c.h.s8.bf16 %v3818_v24  ;;  %v4123_v31 = vunpack.c.l.s8.bf16 %v3819_v18 }
 0x621   : > { %4689 = vmatprep.subr.bf16.mxu1 %v4473_v33  ;;  %v4122_v33 = vunpack.c.l.s8.bf16 %v3818_v24  ;;  %v3907_v24 = vld [vmem:[%s7600_s8 + $0x458] sm:$0xff] }
 0x623   : > { %4649 = vmatpush2.bf16.msra.mxu0 %v4344_v51  ;;  %v4115_v51 = vunpack.c.h.s8.bf16 %v3811_v46 }
 0x624   : > { %4700 = vmatprep.subr.bf16.mxu0 %v4083_v20  ;;  %4690 = vmatpush2.bf16.msra.mxu1 %v4472_v6  ;;  %v4114_v20 = vunpack.c.h.s8.bf16 %v3810_v39  ;;  %v3803_v6 = vld [vmem:[%s7600_s8 + $0x118] sm:$0xff] }
 0x625   : > { %4741 = vmatprep.subr.bf16.mxu1 %v4211_v40  ;;  %v4106_v40 = vunpack.c.l.s8.bf16 %v3810_v39 }
 0x626   : > { %v3522_v60 = vpop.f32.mrf.mxu0  ;;  %4651 = vmatmul.mubr.bf16.vlgmr.msra.gmra.mxu0 %v8433_v56 }
 0x627   : > { %v3563_v36 = vpop.f32.mrf.mxu1  ;;  %4701 = vmatpush1.bf16.msra.mxu0 %v4082_v35  ;;  %4732 = vmatprep.mubr.bf16.mxu0 %v8318_v55  ;;  %v4099_v35 = vunpack.c.h.s8.bf16 %v3803_v6 }
 0x628   : > { %v8438_v13 = vadd.f32 %v3563_v36, %v3522_v60  ;;  %v8440_v54 = vpop.f32.mrf.mxu0  ;;  %4702 = vmatprep.subr.bf16.mxu0 %v4075_v8  ;;  %v3802_v8 = vld [vmem:[%s7600_s8 + $0x110] sm:$0xff]  ;;  %v4091_v60 = vunpack.c.l.s8.bf16 %v3803_v6  ;;  %v3923_v36 = vld [vmem:[%s7600_s8 + $0x4d8] sm:$0xff] }
 0x629   : > { %v8443_v14 = vpop.f32.mrf.mxu1  ;;  %v4098_v59 = vunpack.c.h.s8.bf16 %v3802_v8 }
 0x62a   : > { %v3526_v34 = vpop.f32.mrf.mxu0 }
 0x62b   : > { %v3567_v2 = vpop.f32.mrf.mxu1  ;;  %4703 = vmatpush1.bf16.msra.mxu0 %v4074_v9  ;;  %v4090_v9 = vunpack.c.l.s8.bf16 %v3802_v8  ;;  %v4338_v34 = vunpack.c.h.s8.bf16 %v3922_v61  ;;  %v4203_v8 = vunpack.c.l.s8.bf16 %v8429_v47 }
 0x62c   : > { %v3527_v4 = vpop.f32.mrf.mxu0  ;;  %4704 = vmatprep.subr.bf16.mxu0 %v4067_v53  ;;  %v4339_v53 = vunpack.c.h.s8.bf16 %v3923_v36  ;;  %v4331_v2 = vunpack.c.l.s8.bf16 %v3923_v36  ;;  %v3899_v36 = vld [vmem:[%s7600_s8 + $0x418] sm:$0xff] }
 0x62d   : > { %v3568_v30 = vpop.f32.mrf.mxu1  ;;  %v4291_v47 = vunpack.c.h.s8.bf16 %v3899_v36 }
 0x62f   : > { %4705 = vmatpush1.bf16.msra.mxu0 %v4066_v37  ;;  %v3915_v37 = vld [vmem:[%s7600_s8 + $0x498] sm:$0xff] }
 0x630   : > { %4706 = vmatprep.subr.bf16.mxu0 %v4059_v5  ;;  %v3566_v5 = vadd.f32 %v8443_v14, %v8440_v54 }
 0x633   : > { %4707 = vmatpush1.bf16.msra.mxu0 %v4058_v16  ;;  %v6585_v16 = vld [vmem:[%s755_s13] sm:$0xff] }
 0x634   : > { %4708 = vmatprep.subr.bf16.mxu0 %v4051_v25  ;;  %v3681_v25 = vrot.slane %v6585_v16, %v8014_v50  ;;  %v3685_v19 = vrot.slane %v6585_v16, %v8021_v1  ;;  %v3955_v16 = vld [vmem:[%s7600_s8 + $0x5d8] sm:$0xff] }
 0x637   : > { %4709 = vmatpush1.bf16.msra.mxu0 %v4050_v23 }
 0x638   : > { %4710 = vmatprep.subr.bf16.mxu0 %v4043_v15  ;;  %v4323_v15 = vunpack.c.h.s8.bf16 %v3915_v37 }
 0x63b   : > { %4711 = vmatpush1.bf16.msra.mxu0 %v4042_v10 }
 0x63c   : > { %4712 = vmatprep.subr.bf16.mxu0 %v4035_v11  ;;  %v6586_v11 = vld [vmem:[%s764_s2] sm:$0xff] }
 0x63d   : > { %v3731_v54 = vrot.slane %v6586_v11, %v8014_v50 }
 0x63f   : > { %4713 = vmatpush1.bf16.msra.mxu0 %v4034_v32 }
 0x640   : > { %4714 = vmatprep.subr.bf16.mxu0 %v4027_v22 }
 0x643   : > { %4715 = vmatpush1.bf16.msra.mxu0 %v4026_v49  ;;  %v3735_v49 = vrot.slane %v6586_v11, %v8021_v1 }
 0x644   : > { %4716 = vmatprep.subr.bf16.mxu0 %v4147_v63 }
 0x647   : > { %4717 = vmatpush2.bf16.msra.mxu0 %v4146_v27 }
 0x648   : > { %4718 = vmatprep.subr.bf16.mxu0 %v4139_v28  ;;  %v4315_v28 = vunpack.c.l.s8.bf16 %v3915_v37 }
 0x64b   : > { %4719 = vmatpush2.bf16.msra.mxu0 %v4138_v21 }
 0x64c   : > { %4720 = vmatprep.subr.bf16.mxu0 %v4131_v3 }
 0x64f   : > { %4721 = vmatpush2.bf16.msra.mxu0 %v4130_v0 }
 0x650   : > { %4722 = vmatprep.subr.bf16.mxu0 %v4123_v31  ;;  %v4314_v31 = vunpack.c.l.s8.bf16 %v3914_v57  ;;  %v4403_v57 = vunpack.c.h.s8.bf16 %v3955_v16 }
 0x653   : > { %4723 = vmatpush2.bf16.msra.mxu0 %v4122_v33  ;;  %v3858_v33 = vld [vmem:[%s7600_s8 + $0x2d0] sm:$0xff] }
 0x654   : > { %4724 = vmatprep.subr.bf16.mxu0 %v4115_v51  ;;  %v4307_v51 = vunpack.c.h.s8.bf16 %v3907_v24  ;;  %v4210_v6 = vunpack.c.h.s8.bf16 %v3858_v33 }
 0x657   : > { %4725 = vmatpush2.bf16.msra.mxu0 %v4114_v20  ;;  %v3906_v20 = vld [vmem:[%s7600_s8 + $0x450] sm:$0xff] }
 0x658   : > { %4726 = vmatprep.subr.bf16.mxu0 %v4107_v17 }
 0x65b   : > { %4727 = vmatpush2.bf16.msra.mxu0 %v4106_v40 }
 0x65c   : > { %4728 = vmatprep.subr.bf16.mxu0 %v4099_v35  ;;  %v4306_v35 = vunpack.c.h.s8.bf16 %v3906_v20 }
 0x65f   : > { %4729 = vmatpush2.bf16.msra.mxu0 %v4098_v59  ;;  %v4299_v59 = vunpack.c.l.s8.bf16 %v3907_v24  ;;  %v3891_v24 = vld [vmem:[%s7600_s8 + $0x3d8] sm:$0xff] }
 0x660   : > { %4730 = vmatprep.subr.bf16.mxu0 %v4091_v60  ;;  %v3851_v60 = vld [vmem:[%s7600_s8 + $0x298] sm:$0xff] }
 0x661   : > { %v4195_v61 = vunpack.c.h.s8.bf16 %v3851_v60 }
 0x663   : > { %4731 = vmatpush2.bf16.msra.mxu0 %v4090_v9  ;;  %v4202_v9 = vunpack.c.l.s8.bf16 %v3858_v33  ;;  %v4275_v33 = vunpack.c.h.s8.bf16 %v3891_v24 }
 0x664   : > { %4782 = vmatprep.subr.bf16.mxu0 %v4339_v53  ;;  %v4298_v53 = vunpack.c.l.s8.bf16 %v3906_v20  ;;  %v3938_v20 = vld [vmem:[%s7600_s8 + $0x550] sm:$0xff] }
 0x666   : > { %v3604_v4 = vpop.f32.mrf.mxu0  ;;  %4733 = vmatmul.mubr.bf16.vlgmr.msra.gmra.mxu0 %v8373_v62 }
 0x667   : > { %v3605_v30 = vadd.f32 %v3604_v4, %v8438_v13  ;;  %v3645_v41 = vpop.f32.mrf.mxu1  ;;  %4783 = vmatpush1.bf16.msra.mxu0 %v4338_v34  ;;  %4814 = vmatprep.mubr.bf16.mxu0 %v8397_v12  ;;  %v3850_v34 = vld [vmem:[%s7600_s8 + $0x290] sm:$0xff] }
 0x668   : > { %v3606_v23 = vpop.f32.mrf.mxu0  ;;  %4784 = vmatprep.subr.bf16.mxu0 %v4331_v2  ;;  %v3898_v2 = vld [vmem:[%s7600_s8 + $0x410] sm:$0xff]  ;;  %v4194_v37 = vunpack.c.h.s8.bf16 %v3850_v34 }
 0x669   : > { %v3646_v10 = vadd.f32 %v3645_v41, %v3605_v30  ;;  %v3607_v14 = vadd.f32 %v3606_v23, %v3566_v5  ;;  %v3647_v13 = vpop.f32.mrf.mxu1  ;;  %v4290_v4 = vunpack.c.h.s8.bf16 %v3898_v2  ;;  %v4187_v5 = vunpack.c.l.s8.bf16 %v3851_v60  ;;  %v3843_v41 = vld [vmem:[%s7600_s8 + $0x258] sm:$0xff] }
 0x66a   : > { %v3608_v32 = vpop.f32.mrf.mxu0  ;;  %v4283_v30 = vunpack.c.l.s8.bf16 %v3899_v36  ;;  %v4179_v23 = vunpack.c.h.s8.bf16 %v3843_v41  ;;  %v3883_v60 = vld [vmem:[%s7600_s8 + $0x398] sm:$0xff] }
 0x66b   : > { %v3700_v22 = vmul.f32 %v3681_v25, %v3646_v10  ;;  %v3648_v29 = vadd.f32 %v3647_v13, %v3607_v14  ;;  %v3649_v63 = vpop.f32.mrf.mxu1  ;;  %4785 = vmatpush1.bf16.msra.mxu0 %v4330_v26  ;;  %v4186_v25 = vunpack.c.l.s8.bf16 %v3850_v34  ;;  %v4282_v26 = vunpack.c.l.s8.bf16 %v3898_v2  ;;  %v3954_v10 = vld [vmem:[%s7600_s8 + $0x5d0] sm:$0xff]  ;;  %v3947_v32 = vld [vmem:[%s7600_s8 + $0x598] sm:$0xff] }
 0x66c   : > { %v3609_v27 = vpop.f32.mrf.mxu0  ;;  %4786 = vmatprep.subr.bf16.mxu0 %v4323_v15  ;;  %v3842_v15 = vld [vmem:[%s7600_s8 + $0x250] sm:$0xff]  ;;  %v4171_v14 = vunpack.c.l.s8.bf16 %v3843_v41  ;;  %v4395_v13 = vunpack.c.l.s8.bf16 %v3955_v16  ;;  %v3931_v36 = vld [vmem:[%s7600_s8 + $0x518] sm:$0xff]  ;;  %v3797_v16 = vld [vmem:[%s7600_s8 + $0xe8] sm:$0xff] }
 0x66d   : > { %v3750_v18 = vadd.f32 %v3731_v54, %v3700_v22  ;;  %v3701_v21 = vmul.f32 %v3685_v19, %v3648_v29  ;;  %v3650_v3 = vpop.f32.mrf.mxu1  ;;  %v4178_v11 = vunpack.c.h.s8.bf16 %v3842_v15  ;;  %v4402_v54 = vunpack.c.h.s8.bf16 %v3954_v10  ;;  %v3835_v19 = vld [vmem:[%s7600_s8 + $0x218] sm:$0xff]  ;;  %v3834_v63 = vld [vmem:[%s7600_s8 + $0x210] sm:$0xff] }
 0x66e   : > { %v4170_v22 = vunpack.c.l.s8.bf16 %v3842_v15  ;;  %v4394_v29 = vunpack.c.l.s8.bf16 %v3954_v10  ;;  %v3946_v27 = vld [vmem:[%s7600_s8 + $0x590] sm:$0xff]  ;;  %v4379_v3 = vunpack.c.l.s8.bf16 %v3947_v32  ;;  %v3875_v41 = vld [vmem:[%s7600_s8 + $0x358] sm:$0xff]  ;;  %v3796_v10 = vld [vmem:[%s7600_s8 + $0xe0] sm:$0xff] }
 0x66f   : > { %v3751_v0 = vadd.f32 %v3735_v49, %v3701_v21  ;;  %4787 = vmatpush1.bf16.msra.mxu0 %v4322_v38  ;;  %v3758_v46 = vmax.f32 %v3750_v18, 0.0  ;;  %v4163_v49 = vunpack.c.h.s8.bf16 %v3835_v19  ;;  %v4387_v38 = vunpack.c.h.s8.bf16 %v3947_v32  ;;  %v3882_v34 = vld [vmem:[%s7600_s8 + $0x390] sm:$0xff] }
 0x670   : > { %4788 = vmatprep.subr.bf16.mxu0 %v4315_v28  ;;  %v4162_v28 = vunpack.c.h.s8.bf16 %v3834_v63  ;;  %v4386_v18 = vunpack.c.h.s8.bf16 %v3946_v27  ;;  %v4155_v21 = vunpack.c.l.s8.bf16 %v3835_v19  ;;  %v3930_v2 = vld [vmem:[%s7600_s8 + $0x510] sm:$0xff]  ;;  %v3867_v19 = vld [vmem:[%s7600_s8 + $0x318] sm:$0xff] }
 0x671   : > { %v3759_v39 = vmax.f32 %v3751_v0, 0.0  ;;  %v8479_v40 = vpack.c.bf16 %v3758_v46, %v3758_v46  ;;  %v3939_v0 = vld [vmem:[%s7600_s8 + $0x558] sm:$0xff]  ;;  %v4378_v46 = vunpack.c.l.s8.bf16 %v3946_v27  ;;  %v3874_v15 = vld [vmem:[%s7600_s8 + $0x350] sm:$0xff]  ;;  %v4076_v27 = vunpack.c.l.s8.bf16 %v3796_v10 }
 0x673   : > { %v8477_v17 = vpack.c.bf16 %v3759_v39, %v3759_v39  ;;  %4789 = vmatpush1.bf16.msra.mxu0 %v4314_v31  ;;  %v4154_v31 = vunpack.c.l.s8.bf16 %v3834_v63  ;;  %v4371_v39 = vunpack.c.h.s8.bf16 %v3939_v0 }
 0x674   : > { %4790 = vmatprep.subr.bf16.mxu0 %v4307_v51  ;;  %v3890_v51 = vld [vmem:[%s7600_s8 + $0x3d0] sm:$0xff] }
 0x675   : > { %4691 = vmatprep.mubr.bf16.mxu1 %v8477_v17 }
 0x676   : > { %4692 = vmatmul.mubr.bf16.vlgmr.msra.gmra.mxu1 %v8479_v40 }
 0x677   : > { %4742 = vmatpush1.bf16.msra.mxu1 %v4210_v6  ;;  %4773 = vmatprep.mubr.bf16.mxu1 %v8322_v7  ;;  %v4274_v6 = vunpack.c.h.s8.bf16 %v3890_v51 }
 0x678   : > { %4791 = vmatpush1.bf16.msra.mxu0 %v4306_v35  ;;  %4743 = vmatprep.subr.bf16.mxu1 %v4203_v8  ;;  %v4370_v35 = vunpack.c.h.s8.bf16 %v3938_v20  ;;  %v4267_v8 = vunpack.c.l.s8.bf16 %v3891_v24  ;;  %v3788_v24 = vld [vmem:[%s7600_s8 + $0xa0] sm:$0xff] }
 0x679   : > { %4792 = vmatprep.subr.bf16.mxu0 %v4299_v59  ;;  %v4363_v59 = vunpack.c.l.s8.bf16 %v3939_v0 }
 0x67b   : > { %4744 = vmatpush1.bf16.msra.mxu1 %v4202_v9  ;;  %v4266_v9 = vunpack.c.l.s8.bf16 %v3890_v51 }
 0x67c   : > { %4793 = vmatpush1.bf16.msra.mxu0 %v4298_v53  ;;  %4745 = vmatprep.subr.bf16.mxu1 %v4195_v61  ;;  %v4362_v53 = vunpack.c.l.s8.bf16 %v3938_v20  ;;  %v4259_v61 = vunpack.c.h.s8.bf16 %v3883_v60  ;;  %v4219_v20 = vunpack.c.l.s8.bf16 %v3867_v19 }
 0x67d   : > { %4794 = vmatprep.subr.bf16.mxu0 %v4291_v47  ;;  %v4355_v47 = vunpack.c.h.s8.bf16 %v3931_v36 }
 0x67f   : > { %4746 = vmatpush1.bf16.msra.mxu1 %v4194_v37  ;;  %v4258_v37 = vunpack.c.h.s8.bf16 %v3882_v34 }
 0x680   : > { %4795 = vmatpush1.bf16.msra.mxu0 %v4290_v4  ;;  %4747 = vmatprep.subr.bf16.mxu1 %v4187_v5  ;;  %v4354_v4 = vunpack.c.h.s8.bf16 %v3930_v2  ;;  %v4251_v5 = vunpack.c.l.s8.bf16 %v3883_v60 }
 0x681   : > { %4796 = vmatprep.subr.bf16.mxu0 %v4283_v30  ;;  %v4347_v30 = vunpack.c.l.s8.bf16 %v3931_v36  ;;  %v4060_v36 = vunpack.c.l.s8.bf16 %v3788_v24 }
 0x683   : > { %4748 = vmatpush1.bf16.msra.mxu1 %v4186_v25  ;;  %v4250_v25 = vunpack.c.l.s8.bf16 %v3882_v34  ;;  %v3780_v34 = vld [vmem:[%s7600_s8 + $0x60] sm:$0xff] }
 0x684   : > { %4797 = vmatpush1.bf16.msra.mxu0 %v4282_v26  ;;  %4749 = vmatprep.subr.bf16.mxu1 %v4179_v23  ;;  %v4346_v26 = vunpack.c.l.s8.bf16 %v3930_v2  ;;  %v4243_v23 = vunpack.c.h.s8.bf16 %v3875_v41  ;;  %v4052_v2 = vunpack.c.h.s8.bf16 %v3780_v34 }
 0x685   : > { %4798 = vmatprep.subr.bf16.mxu0 %v4403_v57  ;;  %v4085_v57 = vunpack.c.h.s8.bf16 %v3797_v16 }
 0x687   : > { %4750 = vmatpush1.bf16.msra.mxu1 %v4178_v11  ;;  %v4242_v11 = vunpack.c.h.s8.bf16 %v3874_v15 }
 0x688   : > { %4799 = vmatpush2.bf16.msra.mxu0 %v4402_v54  ;;  %4751 = vmatprep.subr.bf16.mxu1 %v4171_v14  ;;  %v4084_v54 = vunpack.c.h.s8.bf16 %v3796_v10  ;;  %v4235_v14 = vunpack.c.l.s8.bf16 %v3875_v41 }
 0x689   : > { %4800 = vmatprep.subr.bf16.mxu0 %v4395_v13  ;;  %v4077_v13 = vunpack.c.l.s8.bf16 %v3797_v16  ;;  %v4044_v16 = vunpack.c.l.s8.bf16 %v3780_v34  ;;  %v4018_v34 = vld [vmem:[%s7600_s8 + $0x7d0] sm:$0xff] }
 0x68b   : > { %4752 = vmatpush1.bf16.msra.mxu1 %v4170_v22  ;;  %v3789_v22 = vld [vmem:[%s7600_s8 + $0xa8] sm:$0xff] }
 0x68c   : > { %4801 = vmatpush2.bf16.msra.mxu0 %v4394_v29  ;;  %4753 = vmatprep.subr.bf16.mxu1 %v4163_v49  ;;  %v4234_v49 = vunpack.c.l.s8.bf16 %v3874_v15  ;;  %v3772_v15 = vld [vmem:[%s7600_s8 + $0x20] sm:$0xff] }
 0x68d   : > { %4802 = vmatprep.subr.bf16.mxu0 %v4387_v38  ;;  %v4036_v10 = vunpack.c.h.s8.bf16 %v3772_v15 }
 0x68f   : > { %4754 = vmatpush1.bf16.msra.mxu1 %v4162_v28  ;;  %v4227_v28 = vunpack.c.h.s8.bf16 %v3867_v19 }
 0x690   : > { %4803 = vmatpush2.bf16.msra.mxu0 %v4386_v18  ;;  %4755 = vmatprep.subr.bf16.mxu1 %v4155_v21  ;;  %v3866_v18 = vld [vmem:[%s7600_s8 + $0x310] sm:$0xff] }
 0x691   : > { %4804 = vmatprep.subr.bf16.mxu0 %v4379_v3  ;;  %v4069_v3 = vunpack.c.h.s8.bf16 %v3789_v22  ;;  %v4218_v60 = vunpack.c.l.s8.bf16 %v3866_v18 }
 0x693   : > { %4756 = vmatpush1.bf16.msra.mxu1 %v4154_v31 }
 0x694   : > { %4805 = vmatpush2.bf16.msra.mxu0 %v4378_v46  ;;  %4757 = vmatprep.subr.bf16.mxu1 %v4275_v33  ;;  %v4226_v33 = vunpack.c.h.s8.bf16 %v3866_v18 }
 0x695   : > { %4806 = vmatprep.subr.bf16.mxu0 %v4371_v39  ;;  %v4068_v39 = vunpack.c.h.s8.bf16 %v3788_v24  ;;  %v3821_v24 = vld [vmem:[%s7600_s8 + $0x1a8] sm:$0xff] }
 0x697   : > { %4758 = vmatpush2.bf16.msra.mxu1 %v4274_v6 }
 0x698   : > { %4807 = vmatpush2.bf16.msra.mxu0 %v4370_v35  ;;  %4759 = vmatprep.subr.bf16.mxu1 %v4267_v8  ;;  %v4061_v35 = vunpack.c.l.s8.bf16 %v3789_v22  ;;  %v3987_v8 = vld [vmem:[%s7600_s8 + $0x6d8] sm:$0xff] }
 0x699   : > { %4808 = vmatprep.subr.bf16.mxu0 %v4363_v59  ;;  %v3781_v59 = vld [vmem:[%s7600_s8 + $0x68] sm:$0xff] }
 0x69b   : > { %4760 = vmatpush2.bf16.msra.mxu1 %v4266_v9  ;;  %v4467_v9 = vunpack.c.h.s8.bf16 %v3987_v8 }
 0x69c   : > { %4809 = vmatpush2.bf16.msra.mxu0 %v4362_v53  ;;  %4761 = vmatprep.subr.bf16.mxu1 %v4259_v61  ;;  %v3986_v53 = vld [vmem:[%s7600_s8 + $0x6d0] sm:$0xff]  ;;  %v4053_v61 = vunpack.c.h.s8.bf16 %v3781_v59 }
 0x69d   : > { %4810 = vmatprep.subr.bf16.mxu0 %v4355_v47  ;;  %v4466_v47 = vunpack.c.h.s8.bf16 %v3986_v53  ;;  %v4458_v41 = vunpack.c.l.s8.bf16 %v3986_v53 }
 0x69f   : > { %4762 = vmatpush2.bf16.msra.mxu1 %v4258_v37  ;;  %v4459_v37 = vunpack.c.l.s8.bf16 %v3987_v8 }
 0x6a0   : > { %4811 = vmatpush2.bf16.msra.mxu0 %v4354_v4  ;;  %4763 = vmatprep.subr.bf16.mxu1 %v4251_v5  ;;  %v4045_v4 = vunpack.c.l.s8.bf16 %v3781_v59  ;;  %v3979_v5 = vld [vmem:[%s7600_s8 + $0x698] sm:$0xff]  ;;  %v4125_v59 = vunpack.c.l.s8.bf16 %v3821_v24 }
 0x6a1   : > { %4812 = vmatprep.subr.bf16.mxu0 %v4347_v30  ;;  %v3773_v30 = vld [vmem:[%s7600_s8 + $0x28] sm:$0xff] }
 0x6a3   : > { %4764 = vmatpush2.bf16.msra.mxu1 %v4250_v25  ;;  %v4451_v25 = vunpack.c.h.s8.bf16 %v3979_v5 }
 0x6a4   : > { %4813 = vmatpush2.bf16.msra.mxu0 %v4346_v26  ;;  %4765 = vmatprep.subr.bf16.mxu1 %v4243_v23  ;;  %v3978_v26 = vld [vmem:[%s7600_s8 + $0x690] sm:$0xff]  ;;  %v4037_v23 = vunpack.c.h.s8.bf16 %v3773_v30 }
 0x6a5   : > { %4864 = vmatprep.subr.bf16.mxu0 %v4085_v57  ;;  %v4450_v57 = vunpack.c.h.s8.bf16 %v3978_v26  ;;  %v4442_v19 = vunpack.c.l.s8.bf16 %v3978_v26 }
 0x6a6   : > { %v4570_v32 = vpop.f32.mrf.mxu0 }
 0x6a7   : > { %v4611_v29 = vpop.f32.mrf.mxu1  ;;  %4766 = vmatpush2.bf16.msra.mxu1 %v4242_v11  ;;  %4815 = vmatmul.mubr.bf16.vlgmr.msra.gmra.mxu0 %v8433_v56  ;;  %v4443_v11 = vunpack.c.l.s8.bf16 %v3979_v5 }
 0x6a8   : > { %v8512_v63 = vadd.f32 %v4611_v29, %v4570_v32  ;;  %4865 = vmatpush1.bf16.msra.mxu0 %v4084_v54  ;;  %4896 = vmatprep.mubr.bf16.mxu0 %v8318_v55  ;;  %v4572_v38 = vpop.f32.mrf.mxu0  ;;  %v4029_v54 = vunpack.c.l.s8.bf16 %v3773_v30  ;;  %v4028_v32 = vunpack.c.l.s8.bf16 %v3772_v15  ;;  %v3970_v29 = vld [vmem:[%s7600_s8 + $0x650] sm:$0xff] }
 0x6a9   : > { %v4613_v21 = vpop.f32.mrf.mxu1  ;;  %4767 = vmatprep.subr.bf16.mxu1 %v4235_v14  ;;  %4866 = vmatprep.subr.bf16.mxu0 %v4077_v13  ;;  %v3971_v14 = vld [vmem:[%s7600_s8 + $0x658] sm:$0xff]  ;;  %v3829_v13 = vld [vmem:[%s7600_s8 + $0x1e8] sm:$0xff]  ;;  %v4010_v15 = vld [vmem:[%s7600_s8 + $0x790] sm:$0xff] }
 0x6aa   : > { %v8517_v0 = vadd.f32 %v4613_v21, %v4572_v38  ;;  %v4574_v31 = vpop.f32.mrf.mxu0  ;;  %v4435_v22 = vunpack.c.h.s8.bf16 %v3971_v14  ;;  %v3828_v38 = vld [vmem:[%s7600_s8 + $0x1e0] sm:$0xff]  ;;  %v4427_v18 = vunpack.c.l.s8.bf16 %v3971_v14  ;;  %v4141_v21 = vunpack.c.l.s8.bf16 %v3829_v13 }
 0x6ab   : > { %v4615_v46 = vpop.f32.mrf.mxu1  ;;  %4768 = vmatpush2.bf16.msra.mxu1 %v4234_v49  ;;  %v4149_v49 = vunpack.c.h.s8.bf16 %v3829_v13  ;;  %v4426_v31 = vunpack.c.l.s8.bf16 %v3970_v29 }
 0x6ac   : > { %4867 = vmatpush1.bf16.msra.mxu0 %v4076_v27  ;;  %v4575_v51 = vpop.f32.mrf.mxu0  ;;  %4769 = vmatprep.subr.bf16.mxu1 %v4227_v28  ;;  %v4434_v27 = vunpack.c.h.s8.bf16 %v3970_v29  ;;  %v4148_v28 = vunpack.c.h.s8.bf16 %v3828_v38  ;;  %v4140_v46 = vunpack.c.l.s8.bf16 %v3828_v38  ;;  %v4002_v38 = vld [vmem:[%s7600_s8 + $0x750] sm:$0xff] }
 0x6ad   : > { %v4616_v6 = vpop.f32.mrf.mxu1  ;;  %4868 = vmatprep.subr.bf16.mxu0 %v4069_v3  ;;  %v3963_v3 = vld [vmem:[%s7600_s8 + $0x618] sm:$0xff]  ;;  %v3962_v51 = vld [vmem:[%s7600_s8 + $0x610] sm:$0xff] }
 0x6ae   : > { %v4418_v6 = vunpack.c.h.s8.bf16 %v3962_v51  ;;  %v4411_v8 = vunpack.c.l.s8.bf16 %v3963_v3 }
 0x6af   : > { %4770 = vmatpush2.bf16.msra.mxu1 %v4226_v33  ;;  %v4419_v33 = vunpack.c.h.s8.bf16 %v3963_v3 }
 0x6b0   : > { %4869 = vmatpush1.bf16.msra.mxu0 %v4068_v39  ;;  %4771 = vmatprep.subr.bf16.mxu1 %v4219_v20  ;;  %v4133_v39 = vunpack.c.h.s8.bf16 %v3821_v24  ;;  %v3820_v20 = vld [vmem:[%s7600_s8 + $0x1a0] sm:$0xff] }
 0x6b1   : > { %4870 = vmatprep.subr.bf16.mxu0 %v4061_v35  ;;  %v4132_v35 = vunpack.c.h.s8.bf16 %v3820_v20  ;;  %v4124_v53 = vunpack.c.l.s8.bf16 %v3820_v20 }
 0x6b3   : > { %4772 = vmatpush2.bf16.msra.mxu1 %v4218_v60  ;;  %v4019_v60 = vld [vmem:[%s7600_s8 + $0x7d8] sm:$0xff] }
 0x6b4   : > { %4871 = vmatpush1.bf16.msra.mxu0 %v4060_v36  ;;  %4823 = vmatprep.subr.bf16.mxu1 %v4467_v9  ;;  %v3813_v36 = vld [vmem:[%s7600_s8 + $0x168] sm:$0xff]  ;;  %v4410_v9 = vunpack.c.l.s8.bf16 %v3962_v51  ;;  %v4523_v5 = vunpack.c.l.s8.bf16 %v4019_v60 }
 0x6b5   : > { %4872 = vmatprep.subr.bf16.mxu0 %v4053_v61  ;;  %v4531_v61 = vunpack.c.h.s8.bf16 %v4019_v60  ;;  %v4109_v30 = vunpack.c.l.s8.bf16 %v3813_v36  ;;  %v3916_v60 = vld [vmem:[%s7600_s8 + $0x4a0] sm:$0xff] }
 0x6b6   : > { %4774 = vmatmul.mubr.bf16.vlgmr.msra.gmra.mxu1 %v8375_v58 }
 0x6b7   : > { %4824 = vmatpush1.bf16.msra.mxu1 %v4466_v47  ;;  %4855 = vmatprep.mubr.bf16.mxu1 %v8477_v17  ;;  %v4117_v47 = vunpack.c.h.s8.bf16 %v3813_v36 }
 0x6b8   : > { %4873 = vmatpush1.bf16.msra.mxu0 %v4052_v2  ;;  %4825 = vmatprep.subr.bf16.mxu1 %v4459_v37  ;;  %v3812_v2 = vld [vmem:[%s7600_s8 + $0x160] sm:$0xff]  ;;  %v4530_v37 = vunpack.c.h.s8.bf16 %v4018_v34 }
 0x6b9   : > { %4874 = vmatprep.subr.bf16.mxu0 %v4045_v4  ;;  %v4116_v4 = vunpack.c.h.s8.bf16 %v3812_v2  ;;  %v4108_v26 = vunpack.c.l.s8.bf16 %v3812_v2  ;;  %v3861_v2 = vld [vmem:[%s7600_s8 + $0x2e8] sm:$0xff] }
 0x6bb   : > { %4826 = vmatpush1.bf16.msra.mxu1 %v4458_v41  ;;  %v4011_v41 = vld [vmem:[%s7600_s8 + $0x798] sm:$0xff] }
 0x6bc   : > { %4875 = vmatpush1.bf16.msra.mxu0 %v4044_v16  ;;  %4827 = vmatprep.subr.bf16.mxu1 %v4451_v25  ;;  %v3805_v16 = vld [vmem:[%s7600_s8 + $0x128] sm:$0xff]  ;;  %v4522_v25 = vunpack.c.l.s8.bf16 %v4018_v34  ;;  %v4507_v14 = vunpack.c.l.s8.bf16 %v4011_v41 }
 0x6bd   : > { %4876 = vmatprep.subr.bf16.mxu0 %v4037_v23  ;;  %v4515_v23 = vunpack.c.h.s8.bf16 %v4011_v41  ;;  %v4093_v13 = vunpack.c.l.s8.bf16 %v3805_v16 }
 0x6bf   : > { %4828 = vmatpush1.bf16.msra.mxu1 %v4450_v57  ;;  %v4101_v57 = vunpack.c.h.s8.bf16 %v3805_v16  ;;  %v3908_v16 = vld [vmem:[%s7600_s8 + $0x460] sm:$0xff] }
 0x6c0   : > { %4877 = vmatpush1.bf16.msra.mxu0 %v4036_v10  ;;  %4829 = vmatprep.subr.bf16.mxu1 %v4443_v11  ;;  %v3804_v10 = vld [vmem:[%s7600_s8 + $0x120] sm:$0xff]  ;;  %v4514_v11 = vunpack.c.h.s8.bf16 %v4010_v15 }
 0x6c1   : > { %4878 = vmatprep.subr.bf16.mxu0 %v4029_v54  ;;  %v4100_v54 = vunpack.c.h.s8.bf16 %v3804_v10  ;;  %v4092_v29 = vunpack.c.l.s8.bf16 %v3804_v10  ;;  %v3901_v10 = vld [vmem:[%s7600_s8 + $0x428] sm:$0xff] }
 0x6c3   : > { %4830 = vmatpush1.bf16.msra.mxu1 %v4442_v19  ;;  %v4003_v19 = vld [vmem:[%s7600_s8 + $0x758] sm:$0xff] }
 0x6c4   : > { %4879 = vmatpush1.bf16.msra.mxu0 %v4028_v32  ;;  %4831 = vmatprep.subr.bf16.mxu1 %v4435_v22  ;;  %v3925_v32 = vld [vmem:[%s7600_s8 + $0x4e8] sm:$0xff]  ;;  %v4506_v22 = vunpack.c.l.s8.bf16 %v4010_v15  ;;  %v4491_v3 = vunpack.c.l.s8.bf16 %v4003_v19 }
 0x6c5   : > { %4880 = vmatprep.subr.bf16.mxu0 %v4149_v49  ;;  %v4499_v49 = vunpack.c.h.s8.bf16 %v4003_v19  ;;  %v4333_v24 = vunpack.c.l.s8.bf16 %v3925_v32  ;;  %v4293_v19 = vunpack.c.h.s8.bf16 %v3901_v10 }
 0x6c7   : > { %4832 = vmatpush1.bf16.msra.mxu1 %v4434_v27  ;;  %v4341_v27 = vunpack.c.h.s8.bf16 %v3925_v32  ;;  %v3900_v32 = vld [vmem:[%s7600_s8 + $0x420] sm:$0xff] }
 0x6c8   : > { %4881 = vmatpush2.bf16.msra.mxu0 %v4148_v28  ;;  %4833 = vmatprep.subr.bf16.mxu1 %v4427_v18  ;;  %v3924_v28 = vld [vmem:[%s7600_s8 + $0x4e0] sm:$0xff]  ;;  %v4498_v18 = vunpack.c.h.s8.bf16 %v4002_v38 }
 0x6c9   : > { %4882 = vmatprep.subr.bf16.mxu0 %v4141_v21  ;;  %v4340_v21 = vunpack.c.h.s8.bf16 %v3924_v28 }
 0x6cb   : > { %4834 = vmatpush1.bf16.msra.mxu1 %v4426_v31  ;;  %v3995_v31 = vld [vmem:[%s7600_s8 + $0x718] sm:$0xff] }
 0x6cc   : > { %4883 = vmatpush2.bf16.msra.mxu0 %v4140_v46  ;;  %4835 = vmatprep.subr.bf16.mxu1 %v4419_v33  ;;  %v3917_v33 = vld [vmem:[%s7600_s8 + $0x4a8] sm:$0xff]  ;;  %v4475_v34 = vunpack.c.l.s8.bf16 %v3995_v31 }
 0x6cd   : > { %4884 = vmatprep.subr.bf16.mxu0 %v4133_v39  ;;  %v4490_v39 = vunpack.c.l.s8.bf16 %v4002_v38  ;;  %v4285_v38 = vunpack.c.l.s8.bf16 %v3901_v10 }
 0x6cf   : > { %4836 = vmatpush1.bf16.msra.mxu1 %v4418_v6  ;;  %v4332_v6 = vunpack.c.l.s8.bf16 %v3924_v28  ;;  %v3957_v28 = vld [vmem:[%s7600_s8 + $0x5e8] sm:$0xff] }
 0x6d0   : > { %4885 = vmatpush2.bf16.msra.mxu0 %v4132_v35  ;;  %4837 = vmatprep.subr.bf16.mxu1 %v4411_v8  ;;  %v4483_v35 = vunpack.c.h.s8.bf16 %v3995_v31  ;;  %v3994_v8 = vld [vmem:[%s7600_s8 + $0x710] sm:$0xff]  ;;  %v4405_v31 = vunpack.c.h.s8.bf16 %v3957_v28 }
 0x6d1   : > { %4886 = vmatprep.subr.bf16.mxu0 %v4125_v59 }
 0x6d3   : > { %4838 = vmatpush1.bf16.msra.mxu1 %v4410_v9  ;;  %v4482_v9 = vunpack.c.h.s8.bf16 %v3994_v8 }
 0x6d4   : > { %4887 = vmatpush2.bf16.msra.mxu0 %v4124_v53  ;;  %4839 = vmatprep.subr.bf16.mxu1 %v4531_v61  ;;  %v4324_v61 = vunpack.c.h.s8.bf16 %v3916_v60 }
 0x6d5   : > { %4888 = vmatprep.subr.bf16.mxu0 %v4117_v47  ;;  %v4317_v47 = vunpack.c.l.s8.bf16 %v3917_v33 }
 0x6d7   : > { %4840 = vmatpush2.bf16.msra.mxu1 %v4530_v37  ;;  %v4474_v37 = vunpack.c.l.s8.bf16 %v3994_v8  ;;  %v3949_v8 = vld [vmem:[%s7600_s8 + $0x5a8] sm:$0xff] }
 0x6d8   : > { %4889 = vmatpush2.bf16.msra.mxu0 %v4116_v4  ;;  %4841 = vmatprep.subr.bf16.mxu1 %v4523_v5  ;;  %v4316_v4 = vunpack.c.l.s8.bf16 %v3916_v60  ;;  %v4213_v5 = vunpack.c.h.s8.bf16 %v3861_v2 }
 0x6d9   : > { %4890 = vmatprep.subr.bf16.mxu0 %v4109_v30  ;;  %v3860_v30 = vld [vmem:[%s7600_s8 + $0x2e0] sm:$0xff] }
 0x6db   : > { %4842 = vmatpush2.bf16.msra.mxu1 %v4522_v25  ;;  %v4212_v25 = vunpack.c.h.s8.bf16 %v3860_v30 }
 0x6dc   : > { %4891 = vmatpush2.bf16.msra.mxu0 %v4108_v26  ;;  %4843 = vmatprep.subr.bf16.mxu1 %v4515_v23  ;;  %v4308_v26 = vunpack.c.h.s8.bf16 %v3908_v16  ;;  %v4205_v23 = vunpack.c.l.s8.bf16 %v3861_v2 }
 0x6dd   : > { %4892 = vmatprep.subr.bf16.mxu0 %v4101_v57  ;;  %v3853_v57 = vld [vmem:[%s7600_s8 + $0x2a8] sm:$0xff] }
 0x6df   : > { %4844 = vmatpush2.bf16.msra.mxu1 %v4514_v11  ;;  %v4204_v11 = vunpack.c.l.s8.bf16 %v3860_v30 }
 0x6e0   : > { %4893 = vmatpush2.bf16.msra.mxu0 %v4100_v54  ;;  %4845 = vmatprep.subr.bf16.mxu1 %v4507_v14  ;;  %v4300_v54 = vunpack.c.l.s8.bf16 %v3908_v16  ;;  %v4197_v14 = vunpack.c.h.s8.bf16 %v3853_v57  ;;  %v3892_v16 = vld [vmem:[%s7600_s8 + $0x3e0] sm:$0xff] }
 0x6e1   : > { %4894 = vmatprep.subr.bf16.mxu0 %v4093_v13  ;;  %v3852_v13 = vld [vmem:[%s7600_s8 + $0x2a0] sm:$0xff] }
 0x6e3   : > { %4846 = vmatpush2.bf16.msra.mxu1 %v4506_v22  ;;  %v4196_v22 = vunpack.c.h.s8.bf16 %v3852_v13 }
 0x6e4   : > { %4895 = vmatpush2.bf16.msra.mxu0 %v4092_v29  ;;  %4847 = vmatprep.subr.bf16.mxu1 %v4499_v49  ;;  %v4292_v29 = vunpack.c.h.s8.bf16 %v3900_v32  ;;  %v4189_v49 = vunpack.c.l.s8.bf16 %v3853_v57 }
 0x6e5   : > { %4946 = vmatprep.subr.bf16.mxu0 %v4341_v27  ;;  %v3845_v27 = vld [vmem:[%s7600_s8 + $0x268] sm:$0xff] }
 0x6e6   : > { %v4652_v46 = vpop.f32.mrf.mxu0 }
 0x6e7   : > { %v8552_v51 = vadd.f32 %v4652_v46, %v8512_v63  ;;  %4848 = vmatpush2.bf16.msra.mxu1 %v4498_v18  ;;  %4897 = vmatmul.mubr.bf16.vlgmr.msra.gmra.mxu0 %v8373_v62  ;;  %v4325_v63 = vunpack.c.h.s8.bf16 %v3917_v33  ;;  %v4188_v18 = vunpack.c.l.s8.bf16 %v3852_v13  ;;  %v3956_v46 = vld [vmem:[%s7600_s8 + $0x5e0] sm:$0xff] }
 0x6e8   : > { %4947 = vmatpush1.bf16.msra.mxu0 %v4340_v21  ;;  %4978 = vmatprep.mubr.bf16.mxu0 %v8397_v12  ;;  %v4654_v20 = vpop.f32.mrf.mxu0  ;;  %v4284_v21 = vunpack.c.l.s8.bf16 %v3900_v32  ;;  %v4396_v60 = vunpack.c.l.s8.bf16 %v3956_v46  ;;  %v3884_v32 = vld [vmem:[%s7600_s8 + $0x3a0] sm:$0xff] }
 0x6e9   : > { %v8558_v59 = vadd.f32 %v4654_v20, %v8517_v0  ;;  %4849 = vmatprep.subr.bf16.mxu1 %v4491_v3  ;;  %4948 = vmatprep.subr.bf16.mxu0 %v4333_v24  ;;  %v3909_v0 = vld [vmem:[%s7600_s8 + $0x468] sm:$0xff]  ;;  %v4181_v3 = vunpack.c.h.s8.bf16 %v3845_v27  ;;  %v3844_v24 = vld [vmem:[%s7600_s8 + $0x260] sm:$0xff]  ;;  %v4173_v20 = vunpack.c.l.s8.bf16 %v3845_v27 }
 0x6ea   : > { %v4656_v36 = vpop.f32.mrf.mxu0  ;;  %v4309_v41 = vunpack.c.h.s8.bf16 %v3909_v0  ;;  %v4301_v15 = vunpack.c.l.s8.bf16 %v3909_v0  ;;  %v4180_v33 = vunpack.c.h.s8.bf16 %v3844_v24  ;;  %v4381_v0 = vunpack.c.l.s8.bf16 %v3949_v8 }
 0x6eb   : > { %4850 = vmatpush2.bf16.msra.mxu1 %v4490_v39  ;;  %v4404_v39 = vunpack.c.h.s8.bf16 %v3956_v46  ;;  %v3876_v46 = vld [vmem:[%s7600_s8 + $0x360] sm:$0xff] }
 0x6ec   : > { %4949 = vmatpush1.bf16.msra.mxu0 %v4332_v6  ;;  %v4657_v53 = vpop.f32.mrf.mxu0  ;;  %4851 = vmatprep.subr.bf16.mxu1 %v4483_v35  ;;  %v4397_v6 = vunpack.c.l.s8.bf16 %v3957_v28  ;;  %v3837_v35 = vld [vmem:[%s7600_s8 + $0x228] sm:$0xff] }
 0x6ed   : > { %4950 = vmatprep.subr.bf16.mxu0 %v4325_v63  ;;  %v4172_v63 = vunpack.c.l.s8.bf16 %v3844_v24  ;;  %v4165_v36 = vunpack.c.h.s8.bf16 %v3837_v35  ;;  %v4389_v53 = vunpack.c.h.s8.bf16 %v3949_v8  ;;  %v4157_v2 = vunpack.c.l.s8.bf16 %v3837_v35 }
 0x6ef   : > { %4852 = vmatpush2.bf16.msra.mxu1 %v4482_v9  ;;  %v3836_v9 = vld [vmem:[%s7600_s8 + $0x220] sm:$0xff] }
 0x6f0   : > { %4951 = vmatpush1.bf16.msra.mxu0 %v4324_v61  ;;  %4853 = vmatprep.subr.bf16.mxu1 %v4475_v34  ;;  %v3948_v61 = vld [vmem:[%s7600_s8 + $0x5a0] sm:$0xff]  ;;  %v4164_v34 = vunpack.c.h.s8.bf16 %v3836_v9 }
 0x6f1   : > { %4952 = vmatprep.subr.bf16.mxu0 %v4317_v47  ;;  %v4388_v47 = vunpack.c.h.s8.bf16 %v3948_v61  ;;  %v4380_v30 = vunpack.c.l.s8.bf16 %v3948_v61 }
 0x6f3   : > { %4854 = vmatpush2.bf16.msra.mxu1 %v4474_v37  ;;  %v3893_v37 = vld [vmem:[%s7600_s8 + $0x3e8] sm:$0xff] }
 0x6f4   : > { %4953 = vmatpush1.bf16.msra.mxu0 %v4316_v4  ;;  %4905 = vmatprep.subr.bf16.mxu1 %v4213_v5  ;;  %v3941_v4 = vld [vmem:[%s7600_s8 + $0x568] sm:$0xff]  ;;  %v4156_v5 = vunpack.c.l.s8.bf16 %v3836_v9  ;;  %v4269_v57 = vunpack.c.l.s8.bf16 %v3893_v37  ;;  %v4236_v9 = vunpack.c.l.s8.bf16 %v3876_v46 }
 0x6f5   : > { %4954 = vmatprep.subr.bf16.mxu0 %v4309_v41  ;;  %v4277_v41 = vunpack.c.h.s8.bf16 %v3893_v37  ;;  %v4365_v10 = vunpack.c.l.s8.bf16 %v3941_v4 }
 0x6f6   : > { %4856 = vmatmul.mubr.bf16.vlgmr.msra.gmra.mxu1 %v8479_v40 }
 0x6f7   : > { %4906 = vmatpush1.bf16.msra.mxu1 %v4212_v25  ;;  %4937 = vmatprep.mubr.bf16.mxu1 %v8322_v7  ;;  %v4373_v25 = vunpack.c.h.s8.bf16 %v3941_v4 }
 0x6f8   : > { %4955 = vmatpush1.bf16.msra.mxu0 %v4308_v26  ;;  %4907 = vmatprep.subr.bf16.mxu1 %v4205_v23  ;;  %v3940_v26 = vld [vmem:[%s7600_s8 + $0x560] sm:$0xff]  ;;  %v4276_v23 = vunpack.c.h.s8.bf16 %v3892_v16 }
 0x6f9   : > { %4956 = vmatprep.subr.bf16.mxu0 %v4301_v15  ;;  %v4372_v15 = vunpack.c.h.s8.bf16 %v3940_v26  ;;  %v4364_v13 = vunpack.c.l.s8.bf16 %v3940_v26 }
 0x6fb   : > { %4908 = vmatpush1.bf16.msra.mxu1 %v4204_v11  ;;  %v3885_v11 = vld [vmem:[%s7600_s8 + $0x3a8] sm:$0xff] }
 0x6fc   : > { %4957 = vmatpush1.bf16.msra.mxu0 %v4300_v54  ;;  %4909 = vmatprep.subr.bf16.mxu1 %v4197_v14  ;;  %v3933_v54 = vld [vmem:[%s7600_s8 + $0x528] sm:$0xff]  ;;  %v4268_v14 = vunpack.c.l.s8.bf16 %v3892_v16  ;;  %v4253_v27 = vunpack.c.l.s8.bf16 %v3885_v11 }
 0x6fd   : > { %4958 = vmatprep.subr.bf16.mxu0 %v4293_v19  ;;  %v4261_v19 = vunpack.c.h.s8.bf16 %v3885_v11  ;;  %v4349_v28 = vunpack.c.l.s8.bf16 %v3933_v54  ;;  %v3989_v16 = vld [vmem:[%s7600_s8 + $0x6e8] sm:$0xff]  ;;  %v3782_v11 = vld [vmem:[%s7600_s8 + $0x70] sm:$0xff] }
 0x6ff   : > { %4910 = vmatpush1.bf16.msra.mxu1 %v4196_v22  ;;  %v4357_v22 = vunpack.c.h.s8.bf16 %v3933_v54 }
 0x700   : > { %4959 = vmatpush1.bf16.msra.mxu0 %v4292_v29  ;;  %4911 = vmatprep.subr.bf16.mxu1 %v4189_v49  ;;  %v3932_v29 = vld [vmem:[%s7600_s8 + $0x520] sm:$0xff]  ;;  %v4260_v49 = vunpack.c.h.s8.bf16 %v3884_v32 }
 0x701   : > { %4960 = vmatprep.subr.bf16.mxu0 %v4285_v38  ;;  %v4356_v38 = vunpack.c.h.s8.bf16 %v3932_v29  ;;  %v4348_v24 = vunpack.c.l.s8.bf16 %v3932_v29  ;;  %v3775_v29 = vld [vmem:[%s7600_s8 + $0x38] sm:$0xff] }
 0x703   : > { %4912 = vmatpush1.bf16.msra.mxu1 %v4188_v18  ;;  %v3877_v18 = vld [vmem:[%s7600_s8 + $0x368] sm:$0xff] }
 0x704   : > { %4961 = vmatpush1.bf16.msra.mxu0 %v4284_v21  ;;  %4913 = vmatprep.subr.bf16.mxu1 %v4181_v3  ;;  %v3799_v21 = vld [vmem:[%s7600_s8 + $0xf8] sm:$0xff]  ;;  %v4252_v3 = vunpack.c.l.s8.bf16 %v3884_v32  ;;  %v4237_v35 = vunpack.c.l.s8.bf16 %v3877_v18  ;;  %v3981_v32 = vld [vmem:[%s7600_s8 + $0x6a8] sm:$0xff] }
 0x705   : > { %4962 = vmatprep.subr.bf16.mxu0 %v4405_v31  ;;  %v4245_v31 = vunpack.c.h.s8.bf16 %v3877_v18  ;;  %v4079_v8 = vunpack.c.l.s8.bf16 %v3799_v21  ;;  %v4453_v18 = vunpack.c.h.s8.bf16 %v3981_v32 }
 0x707   : > { %4914 = vmatpush1.bf16.msra.mxu1 %v4180_v33  ;;  %v4087_v33 = vunpack.c.h.s8.bf16 %v3799_v21  ;;  %v3980_v21 = vld [vmem:[%s7600_s8 + $0x6a0] sm:$0xff] }
 0x708   : > { %4963 = vmatpush2.bf16.msra.mxu0 %v4404_v39  ;;  %4915 = vmatprep.subr.bf16.mxu1 %v4173_v20  ;;  %v3798_v39 = vld [vmem:[%s7600_s8 + $0xf0] sm:$0xff]  ;;  %v4244_v20 = vunpack.c.h.s8.bf16 %v3876_v46  ;;  %v4452_v46 = vunpack.c.h.s8.bf16 %v3980_v21 }
 0x709   : > { %4964 = vmatprep.subr.bf16.mxu0 %v4397_v6  ;;  %v4086_v6 = vunpack.c.h.s8.bf16 %v3798_v39  ;;  %v4078_v61 = vunpack.c.l.s8.bf16 %v3798_v39 }
 0x70b   : > { %4916 = vmatpush1.bf16.msra.mxu1 %v4172_v63  ;;  %v3869_v63 = vld [vmem:[%s7600_s8 + $0x328] sm:$0xff] }
 0x70c   : > { %4965 = vmatpush2.bf16.msra.mxu0 %v4396_v60  ;;  %4917 = vmatprep.subr.bf16.mxu1 %v4165_v36  ;;  %v3791_v36 = vld [vmem:[%s7600_s8 + $0xb8] sm:$0xff] }
 0x70d   : > { %4966 = vmatprep.subr.bf16.mxu0 %v4389_v53 }
 0x70f   : > { %4918 = vmatpush1.bf16.msra.mxu1 %v4164_v34  ;;  %v4229_v34 = vunpack.c.h.s8.bf16 %v3869_v63 }
 0x710   : > { %4967 = vmatpush2.bf16.msra.mxu0 %v4388_v47  ;;  %4919 = vmatprep.subr.bf16.mxu1 %v4157_v2  ;;  %v3868_v47 = vld [vmem:[%s7600_s8 + $0x320] sm:$0xff]  ;;  %v4071_v2 = vunpack.c.h.s8.bf16 %v3791_v36 }
 0x711   : > { %4968 = vmatprep.subr.bf16.mxu0 %v4381_v0  ;;  %v3790_v0 = vld [vmem:[%s7600_s8 + $0xb0] sm:$0xff]  ;;  %v4228_v4 = vunpack.c.h.s8.bf16 %v3868_v47  ;;  %v4220_v26 = vunpack.c.l.s8.bf16 %v3868_v47 }
 0x713   : > { %4920 = vmatpush1.bf16.msra.mxu1 %v4156_v5 }
 0x714   : > { %4969 = vmatpush2.bf16.msra.mxu0 %v4380_v30  ;;  %4921 = vmatprep.subr.bf16.mxu1 %v4277_v41  ;;  %v4221_v30 = vunpack.c.l.s8.bf16 %v3869_v63  ;;  %v4063_v41 = vunpack.c.l.s8.bf16 %v3791_v36 }
 0x715   : > { %4970 = vmatprep.subr.bf16.mxu0 %v4373_v25  ;;  %v3783_v25 = vld [vmem:[%s7600_s8 + $0x78] sm:$0xff] }
 0x717   : > { %4922 = vmatpush2.bf16.msra.mxu1 %v4276_v23  ;;  %v4062_v23 = vunpack.c.l.s8.bf16 %v3790_v0 }
 0x718   : > { %4971 = vmatpush2.bf16.msra.mxu0 %v4372_v15  ;;  %4923 = vmatprep.subr.bf16.mxu1 %v4269_v57  ;;  %v4469_v15 = vunpack.c.h.s8.bf16 %v3989_v16  ;;  %v3988_v57 = vld [vmem:[%s7600_s8 + $0x6e0] sm:$0xff] }
 0x719   : > { %4972 = vmatprep.subr.bf16.mxu0 %v4365_v10  ;;  %v4055_v10 = vunpack.c.h.s8.bf16 %v3783_v25  ;;  %v4468_v54 = vunpack.c.h.s8.bf16 %v3988_v57 }
 0x71b   : > { %4924 = vmatpush2.bf16.msra.mxu1 %v4268_v14  ;;  %v4054_v14 = vunpack.c.h.s8.bf16 %v3782_v11 }
 0x71c   : > { %4973 = vmatpush2.bf16.msra.mxu0 %v4364_v13  ;;  %4925 = vmatprep.subr.bf16.mxu1 %v4261_v19  ;;  %v4461_v13 = vunpack.c.l.s8.bf16 %v3989_v16  ;;  %v4047_v19 = vunpack.c.l.s8.bf16 %v3783_v25  ;;  %v3964_v16 = vld [vmem:[%s7600_s8 + $0x620] sm:$0xff] }
 0x71d   : > { %4974 = vmatprep.subr.bf16.mxu0 %v4357_v22 }
 0x71f   : > { %4926 = vmatpush2.bf16.msra.mxu1 %v4260_v49 }
 0x720   : > { %4975 = vmatpush2.bf16.msra.mxu0 %v4356_v38  ;;  %4927 = vmatprep.subr.bf16.mxu1 %v4253_v27  ;;  %v4460_v38 = vunpack.c.l.s8.bf16 %v3988_v57 }
 0x721   : > { %4976 = vmatprep.subr.bf16.mxu0 %v4349_v28  ;;  %v4046_v28 = vunpack.c.l.s8.bf16 %v3782_v11  ;;  %v4021_v11 = vld [vmem:[%s7600_s8 + $0x7e8] sm:$0xff] }
 0x723   : > { %4928 = vmatpush2.bf16.msra.mxu1 %v4252_v3 }
 0x724   : > { %4977 = vmatpush2.bf16.msra.mxu0 %v4348_v24  ;;  %4929 = vmatprep.subr.bf16.mxu1 %v4245_v31  ;;  %v4039_v24 = vunpack.c.h.s8.bf16 %v3775_v29  ;;  %v3774_v31 = vld [vmem:[%s7600_s8 + $0x30] sm:$0xff] }
 0x725   : > { %5028 = vmatprep.subr.bf16.mxu0 %v4087_v33  ;;  %v4038_v39 = vunpack.c.h.s8.bf16 %v3774_v31  ;;  %v4030_v63 = vunpack.c.l.s8.bf16 %v3774_v31 }
 0x726   : > { %v8592_v60 = vpop.f32.mrf.mxu0 }
 0x727   : > { %4930 = vmatpush2.bf16.msra.mxu1 %v4244_v20  ;;  %4979 = vmatmul.mubr.bf16.vlgmr.msra.gmra.mxu0 %v8433_v56  ;;  %v4445_v20 = vunpack.c.l.s8.bf16 %v3981_v32  ;;  %v4020_v32 = vld [vmem:[%s7600_s8 + $0x7e0] sm:$0xff] }
 0x728   : > { %5029 = vmatpush1.bf16.msra.mxu0 %v4086_v6  ;;  %5060 = vmatprep.mubr.bf16.mxu0 %v8318_v55  ;;  %v8597_v53 = vpop.f32.mrf.mxu0  ;;  %v4070_v55 = vunpack.c.h.s8.bf16 %v3790_v0  ;;  %v4031_v6 = vunpack.c.l.s8.bf16 %v3775_v29  ;;  %v3814_v29 = vld [vmem:[%s7600_s8 + $0x170] sm:$0xff]  ;;  %v4524_v31 = vunpack.c.l.s8.bf16 %v4020_v32 }
 0x729   : > { %4931 = vmatprep.subr.bf16.mxu1 %v4237_v35  ;;  %5030 = vmatprep.subr.bf16.mxu0 %v4079_v8  ;;  %v3973_v35 = vld [vmem:[%s7600_s8 + $0x668] sm:$0xff]  ;;  %v3831_v8 = vld [vmem:[%s7600_s8 + $0x1f8] sm:$0xff] }
 0x72a   : > { %v4738_v37 = vpop.f32.mrf.mxu0  ;;  %v4437_v36 = vunpack.c.h.s8.bf16 %v3973_v35  ;;  %v4429_v0 = vunpack.c.l.s8.bf16 %v3973_v35 }
 0x72b   : > { %4932 = vmatpush2.bf16.msra.mxu1 %v4236_v9  ;;  %v3972_v9 = vld [vmem:[%s7600_s8 + $0x660] sm:$0xff]  ;;  %v4143_v37 = vunpack.c.l.s8.bf16 %v3831_v8 }
 0x72c   : > { %5031 = vmatpush1.bf16.msra.mxu0 %v4078_v61  ;;  %v4739_v5 = vpop.f32.mrf.mxu0  ;;  %4933 = vmatprep.subr.bf16.mxu1 %v4229_v34  ;;  %v4151_v61 = vunpack.c.h.s8.bf16 %v3831_v8  ;;  %v3830_v34 = vld [vmem:[%s7600_s8 + $0x1f0] sm:$0xff]  ;;  %v4436_v47 = vunpack.c.h.s8.bf16 %v3972_v9 }
 0x72d   : > { %5032 = vmatprep.subr.bf16.mxu0 %v4071_v2  ;;  %v4150_v2 = vunpack.c.h.s8.bf16 %v3830_v34  ;;  %v3823_v5 = vld [vmem:[%s7600_s8 + $0x1b8] sm:$0xff] }
 0x72e   : > { %v4135_v25 = vunpack.c.h.s8.bf16 %v3823_v5 }
 0x72f   : > { %4934 = vmatpush2.bf16.msra.mxu1 %v4228_v4  ;;  %v3965_v4 = vld [vmem:[%s7600_s8 + $0x628] sm:$0xff] }
 0x730   : > { %5033 = vmatpush1.bf16.msra.mxu0 %v4070_v55  ;;  %4935 = vmatprep.subr.bf16.mxu1 %v4221_v30  ;;  %v4428_v55 = vunpack.c.l.s8.bf16 %v3972_v9  ;;  %v4142_v30 = vunpack.c.l.s8.bf16 %v3830_v34  ;;  %v4413_v57 = vunpack.c.l.s8.bf16 %v3965_v4 }
 0x731   : > { %5034 = vmatprep.subr.bf16.mxu0 %v4063_v41  ;;  %v4421_v41 = vunpack.c.h.s8.bf16 %v3965_v4 }
 0x733   : > { %4936 = vmatpush2.bf16.msra.mxu1 %v4220_v26  ;;  %v3822_v26 = vld [vmem:[%s7600_s8 + $0x1b0] sm:$0xff] }
 0x734   : > { %5035 = vmatpush1.bf16.msra.mxu0 %v4062_v23  ;;  %4987 = vmatprep.subr.bf16.mxu1 %v4469_v15  ;;  %v4420_v23 = vunpack.c.h.s8.bf16 %v3964_v16  ;;  %v4134_v15 = vunpack.c.h.s8.bf16 %v3822_v26 }
 0x735   : > { %5036 = vmatprep.subr.bf16.mxu0 %v4055_v10  ;;  %v4127_v10 = vunpack.c.l.s8.bf16 %v3823_v5 }
 0x736   : > { %4938 = vmatmul.mubr.bf16.vlgmr.msra.gmra.mxu1 %v8375_v58  ;;  %v4693_v22 = vpop.f32.mrf.mxu1 }
 0x737   : > { %v8609_v49 = vadd.f32 %v4693_v22, %v8552_v51  ;;  %4988 = vmatpush1.bf16.msra.mxu1 %v4468_v54  ;;  %5019 = vmatprep.mubr.bf16.mxu1 %v8477_v17  ;;  %v3815_v54 = vld [vmem:[%s7600_s8 + $0x178] sm:$0xff] }
 0x738   : > { %5037 = vmatpush1.bf16.msra.mxu0 %v4054_v14  ;;  %v4695_v27 = vpop.f32.mrf.mxu1  ;;  %4989 = vmatprep.subr.bf16.mxu1 %v4461_v13  ;;  %v4412_v14 = vunpack.c.l.s8.bf16 %v3964_v16  ;;  %v4126_v13 = vunpack.c.l.s8.bf16 %v3822_v26  ;;  %v4119_v22 = vunpack.c.h.s8.bf16 %v3815_v54 }
 0x739   : > { %v8614_v3 = vadd.f32 %v4695_v27, %v8558_v59  ;;  %5038 = vmatprep.subr.bf16.mxu0 %v4047_v19  ;;  %v4444_v59 = vunpack.c.l.s8.bf16 %v3980_v21  ;;  %v4533_v19 = vunpack.c.h.s8.bf16 %v4021_v11  ;;  %v4118_v27 = vunpack.c.h.s8.bf16 %v3814_v29  ;;  %v4013_v21 = vld [vmem:[%s7600_s8 + $0x7a8] sm:$0xff] }
 0x73a   : > { %v4697_v51 = vpop.f32.mrf.mxu1  ;;  %v4509_v8 = vunpack.c.l.s8.bf16 %v4013_v21 }
 0x73b   : > { %4990 = vmatpush1.bf16.msra.mxu1 %v4460_v38  ;;  %v4532_v38 = vunpack.c.h.s8.bf16 %v4020_v32  ;;  %v4110_v51 = vunpack.c.l.s8.bf16 %v3814_v29  ;;  %v3863_v32 = vld [vmem:[%s7600_s8 + $0x2f8] sm:$0xff] }
 0x73c   : > { %5039 = vmatpush1.bf16.msra.mxu0 %v4046_v28  ;;  %v4698_v33 = vpop.f32.mrf.mxu1  ;;  %4991 = vmatprep.subr.bf16.mxu1 %v4453_v18  ;;  %v4525_v28 = vunpack.c.l.s8.bf16 %v4021_v11  ;;  %v4111_v18 = vunpack.c.l.s8.bf16 %v3815_v54  ;;  %v3918_v11 = vld [vmem:[%s7600_s8 + $0x4b0] sm:$0xff] }
 0x73d   : > { %5040 = vmatprep.subr.bf16.mxu0 %v4039_v24  ;;  %v3807_v24 = vld [vmem:[%s7600_s8 + $0x138] sm:$0xff]  ;;  %v4012_v33 = vld [vmem:[%s7600_s8 + $0x7a0] sm:$0xff] }
 0x73e   : > { %v4508_v9 = vunpack.c.l.s8.bf16 %v4012_v33 }
 0x73f   : > { %4992 = vmatpush1.bf16.msra.mxu1 %v4452_v46  ;;  %v4517_v46 = vunpack.c.h.s8.bf16 %v4013_v21  ;;  %v3910_v21 = vld [vmem:[%s7600_s8 + $0x470] sm:$0xff] }
 0x740   : > { %5041 = vmatpush1.bf16.msra.mxu0 %v4038_v39  ;;  %4993 = vmatprep.subr.bf16.mxu1 %v4445_v20  ;;  %v4103_v39 = vunpack.c.h.s8.bf16 %v3807_v24  ;;  %v3806_v20 = vld [vmem:[%s7600_s8 + $0x130] sm:$0xff] }
 0x741   : > { %5042 = vmatprep.subr.bf16.mxu0 %v4031_v6  ;;  %v4516_v6 = vunpack.c.h.s8.bf16 %v4012_v33  ;;  %v4102_v35 = vunpack.c.h.s8.bf16 %v3806_v20  ;;  %v3855_v33 = vld [vmem:[%s7600_s8 + $0x2b8] sm:$0xff] }
 0x743   : > { %4994 = vmatpush1.bf16.msra.mxu1 %v4444_v59  ;;  %v4095_v59 = vunpack.c.l.s8.bf16 %v3807_v24 }
 0x744   : > { %5043 = vmatpush1.bf16.msra.mxu0 %v4030_v63  ;;  %4995 = vmatprep.subr.bf16.mxu1 %v4437_v36  ;;  %v4005_v63 = vld [vmem:[%s7600_s8 + $0x768] sm:$0xff]  ;;  %v3927_v36 = vld [vmem:[%s7600_s8 + $0x4f8] sm:$0xff] }
 0x745   : > { %5044 = vmatprep.subr.bf16.mxu0 %v4151_v61  ;;  %v4094_v61 = vunpack.c.l.s8.bf16 %v3806_v20  ;;  %v4501_v34 = vunpack.c.h.s8.bf16 %v4005_v63  ;;  %v4493_v5 = vunpack.c.l.s8.bf16 %v4005_v63  ;;  %v3903_v20 = vld [vmem:[%s7600_s8 + $0x438] sm:$0xff]  ;;  %v4199_v63 = vunpack.c.h.s8.bf16 %v3855_v33 }
 0x747   : > { %4996 = vmatpush1.bf16.msra.mxu1 %v4436_v47  ;;  %v4004_v47 = vld [vmem:[%s7600_s8 + $0x760] sm:$0xff] }
 0x748   : > { %5045 = vmatpush2.bf16.msra.mxu0 %v4150_v2  ;;  %4997 = vmatprep.subr.bf16.mxu1 %v4429_v0  ;;  %v4343_v2 = vunpack.c.h.s8.bf16 %v3927_v36  ;;  %v3926_v0 = vld [vmem:[%s7600_s8 + $0x4f0] sm:$0xff] }
 0x749   : > { %5046 = vmatprep.subr.bf16.mxu0 %v4143_v37  ;;  %v4500_v37 = vunpack.c.h.s8.bf16 %v4004_v47  ;;  %v4342_v4 = vunpack.c.h.s8.bf16 %v3926_v0  ;;  %v4334_v26 = vunpack.c.l.s8.bf16 %v3926_v0 }
 0x74b   : > { %4998 = vmatpush1.bf16.msra.mxu1 %v4428_v55  ;;  %v4335_v55 = vunpack.c.l.s8.bf16 %v3927_v36  ;;  %v3854_v36 = vld [vmem:[%s7600_s8 + $0x2b0] sm:$0xff] }
 0x74c   : > { %5047 = vmatpush2.bf16.msra.mxu0 %v4142_v30  ;;  %4999 = vmatprep.subr.bf16.mxu1 %v4421_v41  ;;  %v3997_v30 = vld [vmem:[%s7600_s8 + $0x728] sm:$0xff]  ;;  %v3919_v41 = vld [vmem:[%s7600_s8 + $0x4b8] sm:$0xff] }
 0x74d   : > { %5048 = vmatprep.subr.bf16.mxu0 %v4135_v25  ;;  %v4492_v25 = vunpack.c.l.s8.bf16 %v4004_v47 }
 0x74f   : > { %5000 = vmatpush1.bf16.msra.mxu1 %v4420_v23  ;;  %v4485_v23 = vunpack.c.h.s8.bf16 %v3997_v30 }
 0x750   : > { %5049 = vmatpush2.bf16.msra.mxu0 %v4134_v15  ;;  %5001 = vmatprep.subr.bf16.mxu1 %v4413_v57  ;;  %v3996_v15 = vld [vmem:[%s7600_s8 + $0x720] sm:$0xff] }
 0x751   : > { %5050 = vmatprep.subr.bf16.mxu0 %v4127_v10  ;;  %v4327_v10 = vunpack.c.h.s8.bf16 %v3919_v41  ;;  %v4476_v29 = vunpack.c.l.s8.bf16 %v3996_v15 }
 0x753   : > { %5002 = vmatpush1.bf16.msra.mxu1 %v4412_v14  ;;  %v4484_v14 = vunpack.c.h.s8.bf16 %v3996_v15 }
 0x754   : > { %5051 = vmatpush2.bf16.msra.mxu0 %v4126_v13  ;;  %5003 = vmatprep.subr.bf16.mxu1 %v4533_v19  ;;  %v4477_v13 = vunpack.c.l.s8.bf16 %v3997_v30  ;;  %v4319_v19 = vunpack.c.l.s8.bf16 %v3919_v41  ;;  %v4190_v30 = vunpack.c.l.s8.bf16 %v3854_v36 }
 0x755   : > { %5052 = vmatprep.subr.bf16.mxu0 %v4119_v22  ;;  %v3911_v22 = vld [vmem:[%s7600_s8 + $0x478] sm:$0xff] }
 0x757   : > { %5004 = vmatpush2.bf16.msra.mxu1 %v4532_v38  ;;  %v4318_v38 = vunpack.c.l.s8.bf16 %v3918_v11 }
 0x758   : > { %5053 = vmatpush2.bf16.msra.mxu0 %v4118_v27  ;;  %5005 = vmatprep.subr.bf16.mxu1 %v4525_v28  ;;  %v4215_v27 = vunpack.c.h.s8.bf16 %v3863_v32  ;;  %v3862_v28 = vld [vmem:[%s7600_s8 + $0x2f0] sm:$0xff] }
 0x759   : > { %5054 = vmatprep.subr.bf16.mxu0 %v4111_v18  ;;  %v4311_v18 = vunpack.c.h.s8.bf16 %v3911_v22  ;;  %v4214_v24 = vunpack.c.h.s8.bf16 %v3862_v28 }
 0x75b   : > { %5006 = vmatpush2.bf16.msra.mxu1 %v4524_v31  ;;  %v4310_v31 = vunpack.c.h.s8.bf16 %v3910_v21 }
 0x75c   : > { %5055 = vmatpush2.bf16.msra.mxu0 %v4110_v51  ;;  %5007 = vmatprep.subr.bf16.mxu1 %v4517_v46  ;;  %v4207_v51 = vunpack.c.l.s8.bf16 %v3863_v32  ;;  %v4303_v46 = vunpack.c.l.s8.bf16 %v3911_v22  ;;  %v3950_v22 = vld [vmem:[%s7600_s8 + $0x5b0] sm:$0xff] }
 0x75d   : > { %5056 = vmatprep.subr.bf16.mxu0 %v4103_v39 }
 0x75f   : > { %5008 = vmatpush2.bf16.msra.mxu1 %v4516_v6 }
 0x760   : > { %5057 = vmatpush2.bf16.msra.mxu0 %v4102_v35  ;;  %5009 = vmatprep.subr.bf16.mxu1 %v4509_v8  ;;  %v4206_v35 = vunpack.c.l.s8.bf16 %v3862_v28 }
 0x761   : > { %5058 = vmatprep.subr.bf16.mxu0 %v4095_v59  ;;  %v4302_v59 = vunpack.c.l.s8.bf16 %v3910_v21  ;;  %v3943_v21 = vld [vmem:[%s7600_s8 + $0x578] sm:$0xff] }
 0x763   : > { %5010 = vmatpush2.bf16.msra.mxu1 %v4508_v9 }
 0x764   : > { %5059 = vmatpush2.bf16.msra.mxu0 %v4094_v61  ;;  %5011 = vmatprep.subr.bf16.mxu1 %v4501_v34  ;;  %v4295_v61 = vunpack.c.h.s8.bf16 %v3903_v20  ;;  %v3902_v34 = vld [vmem:[%s7600_s8 + $0x430] sm:$0xff] }
 0x765   : > { %5110 = vmatprep.subr.bf16.mxu0 %v4343_v2  ;;  %v4198_v2 = vunpack.c.h.s8.bf16 %v3854_v36  ;;  %v4286_v41 = vunpack.c.l.s8.bf16 %v3902_v34 }
 0x767   : > { %v4816_v16 = vpop.f32.mrf.mxu0  ;;  %5012 = vmatpush2.bf16.msra.mxu1 %v4500_v37  ;;  %5061 = vmatmul.mubr.bf16.vlgmr.msra.gmra.mxu0 %v8373_v62  ;;  %v4326_v62 = vunpack.c.h.s8.bf16 %v3918_v11  ;;  %v4294_v37 = vunpack.c.h.s8.bf16 %v3902_v34 }
 0x768   : > { %5111 = vmatpush1.bf16.msra.mxu0 %v4342_v4  ;;  %5142 = vmatprep.mubr.bf16.mxu0 %v8397_v12  ;;  %v4191_v4 = vunpack.c.l.s8.bf16 %v3855_v33  ;;  %v4375_v33 = vunpack.c.h.s8.bf16 %v3943_v21 }
 0x769   : > { %v4818_v57 = vpop.f32.mrf.mxu0  ;;  %5013 = vmatprep.subr.bf16.mxu1 %v4493_v5  ;;  %5112 = vmatprep.subr.bf16.mxu0 %v4335_v55  ;;  %v3847_v5 = vld [vmem:[%s7600_s8 + $0x278] sm:$0xff] }
 0x76a   : > { %v3959_v55 = vld [vmem:[%s7600_s8 + $0x5f8] sm:$0xff] }
 0x76b   : > { %v4820_v54 = vpop.f32.mrf.mxu0  ;;  %5014 = vmatpush2.bf16.msra.mxu1 %v4492_v25  ;;  %v3846_v25 = vld [vmem:[%s7600_s8 + $0x270] sm:$0xff]  ;;  %v4399_v11 = vunpack.c.l.s8.bf16 %v3959_v55 }
 0x76c   : > { %5113 = vmatpush1.bf16.msra.mxu0 %v4334_v26  ;;  %5015 = vmatprep.subr.bf16.mxu1 %v4485_v23  ;;  %v4407_v26 = vunpack.c.h.s8.bf16 %v3959_v55  ;;  %v3958_v23 = vld [vmem:[%s7600_s8 + $0x5f0] sm:$0xff]  ;;  %v4182_v15 = vunpack.c.h.s8.bf16 %v3846_v25  ;;  %v3839_v54 = vld [vmem:[%s7600_s8 + $0x238] sm:$0xff] }
 0x76d   : > { %v4821_v12 = vpop.f32.mrf.mxu0  ;;  %5114 = vmatprep.subr.bf16.mxu0 %v4327_v10  ;;  %v4175_v10 = vunpack.c.l.s8.bf16 %v3847_v5 }
 0x76e   : > { %v4167_v12 = vunpack.c.h.s8.bf16 %v3839_v54 }
 0x76f   : > { %5016 = vmatpush2.bf16.msra.mxu1 %v4484_v14  ;;  %v3951_v14 = vld [vmem:[%s7600_s8 + $0x5b8] sm:$0xff] }
 0x770   : > { %5115 = vmatpush1.bf16.msra.mxu0 %v4326_v62  ;;  %5017 = vmatprep.subr.bf16.mxu1 %v4477_v13  ;;  %v4174_v62 = vunpack.c.l.s8.bf16 %v3846_v25  ;;  %v4398_v13 = vunpack.c.l.s8.bf16 %v3958_v23  ;;  %v4391_v32 = vunpack.c.h.s8.bf16 %v3951_v14  ;;  %v4383_v28 = vunpack.c.l.s8.bf16 %v3951_v14  ;;  %v3879_v25 = vld [vmem:[%s7600_s8 + $0x378] sm:$0xff] }
 0x771   : > { %5116 = vmatprep.subr.bf16.mxu0 %v4319_v19  ;;  %v3838_v19 = vld [vmem:[%s7600_s8 + $0x230] sm:$0xff] }
 0x773   : > { %5018 = vmatpush2.bf16.msra.mxu1 %v4476_v29  ;;  %v4166_v29 = vunpack.c.h.s8.bf16 %v3838_v19 }
 0x774   : > { %5117 = vmatpush1.bf16.msra.mxu0 %v4318_v38  ;;  %5069 = vmatprep.subr.bf16.mxu1 %v4215_v27  ;;  %v4390_v38 = vunpack.c.h.s8.bf16 %v3950_v22  ;;  %v4159_v27 = vunpack.c.l.s8.bf16 %v3839_v54  ;;  %v5320_v54 = vld [vmem:[%s7613_s18 + $0x60] sm:$0xff] }
 0x775   : > { %5118 = vmatprep.subr.bf16.mxu0 %v4311_v18  ;;  %v3895_v18 = vld [vmem:[%s7600_s8 + $0x3f8] sm:$0xff] }
 0x776   : > { %v4775_v39 = vpop.f32.mrf.mxu1  ;;  %5020 = vmatmul.mubr.bf16.vlgmr.msra.gmra.mxu1 %v8479_v40 }
 0x777   : > { %v4776_v6 = vadd.f32 %v4775_v39, %v8592_v60  ;;  %5070 = vmatpush1.bf16.msra.mxu1 %v4214_v24  ;;  %5101 = vmatprep.mubr.bf16.mxu1 %v8322_v7  ;;  %v4158_v24 = vunpack.c.l.s8.bf16 %v3838_v19  ;;  %v3942_v39 = vld [vmem:[%s7600_s8 + $0x570] sm:$0xff] }
 0x778   : > { %v4777_v8 = vpop.f32.mrf.mxu1  ;;  %5119 = vmatpush1.bf16.msra.mxu0 %v4310_v31  ;;  %5071 = vmatprep.subr.bf16.mxu1 %v4207_v51  ;;  %v4382_v31 = vunpack.c.l.s8.bf16 %v3950_v22  ;;  %v4279_v51 = vunpack.c.h.s8.bf16 %v3895_v18  ;;  %v4366_v34 = vunpack.c.l.s8.bf16 %v3942_v39 }
 0x779   : > { %v4778_v9 = vadd.f32 %v4777_v8, %v8597_v53  ;;  %5120 = vmatprep.subr.bf16.mxu0 %v4303_v46  ;;  %v8655_v47 = vadd.f32 %v4816_v16, %v4776_v6  ;;  %v4287_v53 = vunpack.c.l.s8.bf16 %v3903_v20  ;;  %v4183_v16 = vunpack.c.h.s8.bf16 %v3847_v5  ;;  %v3894_v46 = vld [vmem:[%s7600_s8 + $0x3f0] sm:$0xff]  ;;  %v8673_v8 = vld [vmem:[%s782_s26] sm:$0xff] }
 0x77a   : > { %v4779_v60 = vpop.f32.mrf.mxu1  ;;  %v4278_v20 = vunpack.c.h.s8.bf16 %v3894_v46  ;;  %v4374_v6 = vunpack.c.h.s8.bf16 %v3942_v39  ;;  %v5201_v36 = vrot.slane %v8673_v8, %v7675_v44 }
 0x77b   : > { %5072 = vmatpush1.bf16.msra.mxu1 %v4206_v35  ;;  %v8657_v7 = vadd.f32 %v4818_v57, %v4778_v9  ;;  %v4406_v57 = vunpack.c.h.s8.bf16 %v3958_v23  ;;  %v4271_v35 = vunpack.c.l.s8.bf16 %v3895_v18  ;;  %v3935_v9 = vld [vmem:[%s7600_s8 + $0x538] sm:$0xff]  ;;  %v5321_v23 = vld [vmem:[%s7613_s18 + $0x68] sm:$0xff] }
 0x77c   : > { %v4780_v0 = vpop.f32.mrf.mxu1  ;;  %5121 = vmatpush1.bf16.msra.mxu0 %v4302_v59  ;;  %5073 = vmatprep.subr.bf16.mxu1 %v4199_v63  ;;  %v4367_v59 = vunpack.c.l.s8.bf16 %v3943_v21  ;;  %v3887_v63 = vld [vmem:[%s7600_s8 + $0x3b8] sm:$0xff]  ;;  %v5461_v19 = vunpack.c.l.s8.bf16 %v5321_v23  ;;  %v3870_v21 = vld [vmem:[%s7600_s8 + $0x330] sm:$0xff] }
 0x77d   : > { %5122 = vmatprep.subr.bf16.mxu0 %v4295_v61  ;;  %v4270_v61 = vunpack.c.l.s8.bf16 %v3894_v46  ;;  %v4263_v60 = vunpack.c.h.s8.bf16 %v3887_v63  ;;  %v8682_v0 = vld [vmem:[%s791_s15] sm:$0xff] }
 0x77e   : > { %v5251_v5 = vrot.slane %v8682_v0, %v7675_v44 }
 0x77f   : > { %5074 = vmatpush1.bf16.msra.mxu1 %v4198_v2  ;;  %v3886_v2 = vld [vmem:[%s7600_s8 + $0x3b0] sm:$0xff] }
 0x780   : > { %5123 = vmatpush1.bf16.msra.mxu0 %v4294_v37  ;;  %5075 = vmatprep.subr.bf16.mxu1 %v4191_v4  ;;  %v4359_v37 = vunpack.c.h.s8.bf16 %v3935_v9  ;;  %v3934_v4 = vld [vmem:[%s7600_s8 + $0x530] sm:$0xff]  ;;  %v4262_v55 = vunpack.c.h.s8.bf16 %v3886_v2 }
 0x781   : > { %5124 = vmatprep.subr.bf16.mxu0 %v4287_v53  ;;  %v5235_v53 = vmul.f32 %v5201_v36, %v8614_v3  ;;  %v4350_v3 = vunpack.c.l.s8.bf16 %v3934_v4 }
 0x783   : > { %5076 = vmatpush1.bf16.msra.mxu1 %v4190_v30  ;;  %v4358_v30 = vunpack.c.h.s8.bf16 %v3934_v4 }
 0x784   : > { %5125 = vmatpush1.bf16.msra.mxu0 %v4286_v41  ;;  %5077 = vmatprep.subr.bf16.mxu1 %v4183_v16  ;;  %v4255_v41 = vunpack.c.l.s8.bf16 %v3887_v63  ;;  %v4351_v16 = vunpack.c.l.s8.bf16 %v3935_v9  ;;  %v4222_v63 = vunpack.c.l.s8.bf16 %v3870_v21 }
 0x785   : > { %5126 = vmatprep.subr.bf16.mxu0 %v4407_v26  ;;  %v5285_v26 = vadd.f32 %v5251_v5, %v5235_v53  ;;  %v3983_v5 = vld [vmem:[%s7600_s8 + $0x6b8] sm:$0xff] }
 0x787   : > { %5078 = vmatpush1.bf16.msra.mxu1 %v4182_v15  ;;  %v4254_v15 = vunpack.c.l.s8.bf16 %v3886_v2  ;;  %v5293_v14 = vmax.f32 %v5285_v26, 0.0 }
 0x788   : > { %5127 = vmatpush2.bf16.msra.mxu0 %v4406_v57  ;;  %5079 = vmatprep.subr.bf16.mxu1 %v4175_v10  ;;  %v4247_v57 = vunpack.c.h.s8.bf16 %v3879_v25  ;;  %v3878_v10 = vld [vmem:[%s7600_s8 + $0x370] sm:$0xff] }
 0x789   : > { %5128 = vmatprep.subr.bf16.mxu0 %v4399_v11  ;;  %v5465_v11 = vunpack.c.h.s8.bf16 %v5321_v23  ;;  %v8693_v22 = vpack.c.bf16 %v5293_v14, %v5293_v14  ;;  %v4455_v23 = vunpack.c.h.s8.bf16 %v3983_v5  ;;  %v3975_v14 = vld [vmem:[%s7600_s8 + $0x678] sm:$0xff] }
 0x78b   : > { %5080 = vmatpush1.bf16.msra.mxu1 %v4174_v62  ;;  %v4246_v62 = vunpack.c.h.s8.bf16 %v3878_v10 }
 0x78c   : > { %5129 = vmatpush2.bf16.msra.mxu0 %v4398_v13  ;;  %5081 = vmatprep.subr.bf16.mxu1 %v4167_v12  ;;  %v5464_v13 = vunpack.c.h.s8.bf16 %v5320_v54  ;;  %v4239_v12 = vunpack.c.l.s8.bf16 %v3879_v25 }
 0x78d   : > { %5130 = vmatprep.subr.bf16.mxu0 %v4391_v32  ;;  %v3871_v32 = vld [vmem:[%s7600_s8 + $0x338] sm:$0xff] }
 0x78e   : > { %v4231_v18 = vunpack.c.h.s8.bf16 %v3871_v32  ;;  %v4223_v39 = vunpack.c.l.s8.bf16 %v3871_v32  ;;  %v3974_v32 = vld [vmem:[%s7600_s8 + $0x670] sm:$0xff] }
 0x78f   : > { %5082 = vmatpush1.bf16.msra.mxu1 %v4166_v29  ;;  %v5317_v29 = vld [vmem:[%s7613_s18 + $0x48] sm:$0xff] }
 0x790   : > { %5131 = vmatpush2.bf16.msra.mxu0 %v4390_v38  ;;  %5083 = vmatprep.subr.bf16.mxu1 %v4159_v27  ;;  %v4238_v27 = vunpack.c.l.s8.bf16 %v3878_v10 }
 0x791   : > { %5132 = vmatprep.subr.bf16.mxu0 %v4383_v28  ;;  %v5460_v28 = vunpack.c.l.s8.bf16 %v5320_v54 }
 0x793   : > { %5084 = vmatpush1.bf16.msra.mxu1 %v4158_v24 }
 0x794   : > { %5133 = vmatpush2.bf16.msra.mxu0 %v4382_v31  ;;  %5085 = vmatprep.subr.bf16.mxu1 %v4279_v51  ;;  %v5457_v31 = vunpack.c.h.s8.bf16 %v5317_v29  ;;  %v5316_v51 = vld [vmem:[%s7613_s18 + $0x40] sm:$0xff] }
 0x795   : > { %5134 = vmatprep.subr.bf16.mxu0 %v4375_v33  ;;  %v4230_v33 = vunpack.c.h.s8.bf16 %v3870_v21  ;;  %v5452_v36 = vunpack.c.l.s8.bf16 %v5316_v51  ;;  %v4431_v21 = vunpack.c.l.s8.bf16 %v3975_v14 }
 0x797   : > { %5086 = vmatpush2.bf16.msra.mxu1 %v4278_v20 }
 0x798   : > { %5135 = vmatpush2.bf16.msra.mxu0 %v4374_v6  ;;  %5087 = vmatprep.subr.bf16.mxu1 %v4271_v35  ;;  %v5453_v6 = vunpack.c.l.s8.bf16 %v5317_v29  ;;  %v3991_v35 = vld [vmem:[%s7600_s8 + $0x6f8] sm:$0xff] }
 0x799   : > { %5136 = vmatprep.subr.bf16.mxu0 %v4367_v59  ;;  %v5313_v59 = vld [vmem:[%s7613_s18 + $0x28] sm:$0xff]  ;;  %v4471_v9 = vunpack.c.h.s8.bf16 %v3991_v35  ;;  %v4463_v4 = vunpack.c.l.s8.bf16 %v3991_v35  ;;  %v5332_v35 = vld [vmem:[%s7613_s18 + $0xc0] sm:$0xff] }
 0x79a   : > { %v5445_v53 = vunpack.c.l.s8.bf16 %v5313_v59 }
 0x79b   : > { %5088 = vmatpush2.bf16.msra.mxu1 %v4270_v61  ;;  %v3990_v61 = vld [vmem:[%s7600_s8 + $0x6f0] sm:$0xff] }
 0x79c   : > { %5137 = vmatpush2.bf16.msra.mxu0 %v4366_v34  ;;  %5089 = vmatprep.subr.bf16.mxu1 %v4263_v60  ;;  %v5449_v34 = vunpack.c.h.s8.bf16 %v5313_v59  ;;  %v5312_v60 = vld [vmem:[%s7613_s18 + $0x20] sm:$0xff]  ;;  %v4470_v2 = vunpack.c.h.s8.bf16 %v3990_v61 }
 0x79d   : > { %5138 = vmatprep.subr.bf16.mxu0 %v4359_v37  ;;  %v5448_v37 = vunpack.c.h.s8.bf16 %v5312_v60  ;;  %v5444_v26 = vunpack.c.l.s8.bf16 %v5312_v60 }
 0x79f   : > { %5090 = vmatpush2.bf16.msra.mxu1 %v4262_v55 }
 0x7a0   : > { %5139 = vmatpush2.bf16.msra.mxu0 %v4358_v30  ;;  %5091 = vmatprep.subr.bf16.mxu1 %v4255_v41  ;;  %v5309_v30 = vld [vmem:[%s7613_s18 + $0x8] sm:$0xff] }
 0x7a1   : > { %5140 = vmatprep.subr.bf16.mxu0 %v4351_v16  ;;  %v4462_v16 = vunpack.c.l.s8.bf16 %v3990_v61  ;;  %v5437_v54 = vunpack.c.l.s8.bf16 %v5309_v30  ;;  %v4023_v61 = vld [vmem:[%s7600_s8 + $0x7f8] sm:$0xff] }
 0x7a3   : > { %5092 = vmatpush2.bf16.msra.mxu1 %v4254_v15  ;;  %v3982_v15 = vld [vmem:[%s7600_s8 + $0x6b0] sm:$0xff] }
 0x7a4   : > { %5141 = vmatpush2.bf16.msra.mxu0 %v4350_v3  ;;  %5093 = vmatprep.subr.bf16.mxu1 %v4247_v57  ;;  %v5441_v3 = vunpack.c.h.s8.bf16 %v5309_v30 }
 0x7a5   : > { %5692 = vmatprep.subr.bf16.mxu0 %v5465_v11  ;;  %v4447_v11 = vunpack.c.l.s8.bf16 %v3983_v5  ;;  %v5328_v5 = vld [vmem:[%s7613_s18 + $0xa0] sm:$0xff] }
 0x7a6   : > { %v5480_v30 = vunpack.c.h.s8.bf16 %v5328_v5 }
 0x7a7   : > { %v8696_v38 = vpop.f32.mrf.mxu0  ;;  %5094 = vmatpush2.bf16.msra.mxu1 %v4246_v62  ;;  %5143 = vmatmul.mubr.bf16.vlgmr.msra.gmra.mxu0 %v8433_v56  ;;  %v5456_v56 = vunpack.c.h.s8.bf16 %v5316_v51  ;;  %v5337_v62 = vld [vmem:[%s7613_s18 + $0xe8] sm:$0xff]  ;;  %v3967_v51 = vld [vmem:[%s7600_s8 + $0x638] sm:$0xff] }
 0x7a8   : > { %5693 = vmatpush1.bf16.msra.mxu0 %v5464_v13  ;;  %5724 = vmatprep.mubr.bf16.mxu0 %v8693_v22  ;;  %v4446_v13 = vunpack.c.l.s8.bf16 %v3982_v15  ;;  %v5497_v29 = vunpack.c.h.s8.bf16 %v5337_v62 }
 0x7a9   : > { %v8701_v24 = vpop.f32.mrf.mxu0  ;;  %5095 = vmatprep.subr.bf16.mxu1 %v4239_v12  ;;  %5694 = vmatprep.subr.bf16.mxu0 %v5461_v19  ;;  %v4439_v19 = vunpack.c.h.s8.bf16 %v3975_v14  ;;  %v5324_v14 = vld [vmem:[%s7613_s18 + $0x80] sm:$0xff] }
 0x7ab   : > { %v4902_v46 = vpop.f32.mrf.mxu0  ;;  %5096 = vmatpush2.bf16.msra.mxu1 %v4238_v27  ;;  %v5336_v27 = vld [vmem:[%s7613_s18 + $0xe0] sm:$0xff] }
 0x7ac   : > { %5695 = vmatpush1.bf16.msra.mxu0 %v5460_v28  ;;  %5097 = vmatprep.subr.bf16.mxu1 %v4231_v18  ;;  %v4438_v28 = vunpack.c.h.s8.bf16 %v3974_v32  ;;  %v5496_v18 = vunpack.c.h.s8.bf16 %v5336_v27  ;;  %v5333_v46 = vld [vmem:[%s7613_s18 + $0xc8] sm:$0xff] }
 0x7ad   : > { %v4903_v20 = vpop.f32.mrf.mxu0  ;;  %5696 = vmatprep.subr.bf16.mxu0 %v5457_v31  ;;  %v5493_v31 = vunpack.c.l.s8.bf16 %v5337_v62 }
 0x7ae   : > { %v3966_v20 = vld [vmem:[%s7600_s8 + $0x630] sm:$0xff] }
 0x7af   : > { %5098 = vmatpush2.bf16.msra.mxu1 %v4230_v33  ;;  %v4430_v33 = vunpack.c.l.s8.bf16 %v3974_v32  ;;  %v4422_v59 = vunpack.c.h.s8.bf16 %v3966_v20  ;;  %v4414_v60 = vunpack.c.l.s8.bf16 %v3966_v20 }
 0x7b0   : > { %5697 = vmatpush1.bf16.msra.mxu0 %v5456_v56  ;;  %5099 = vmatprep.subr.bf16.mxu1 %v4223_v39  ;;  %v5492_v56 = vunpack.c.l.s8.bf16 %v5336_v27  ;;  %v4423_v39 = vunpack.c.h.s8.bf16 %v3967_v51  ;;  %v5385_v27 = vld [vmem:[%s7613_s18 + $0x268] sm:$0xff] }
 0x7b1   : > { %5698 = vmatprep.subr.bf16.mxu0 %v5453_v6  ;;  %v5489_v6 = vunpack.c.h.s8.bf16 %v5333_v46 }
 0x7b3   : > { %5100 = vmatpush2.bf16.msra.mxu1 %v4222_v63  ;;  %v5488_v63 = vunpack.c.h.s8.bf16 %v5332_v35 }
 0x7b4   : > { %5699 = vmatpush1.bf16.msra.mxu0 %v5452_v36  ;;  %5151 = vmatprep.subr.bf16.mxu1 %v4471_v9  ;;  %v4415_v36 = vunpack.c.l.s8.bf16 %v3967_v51  ;;  %v5485_v9 = vunpack.c.l.s8.bf16 %v5333_v46  ;;  %v5593_v51 = vunpack.c.h.s8.bf16 %v5385_v27  ;;  %v5384_v46 = vld [vmem:[%s7613_s18 + $0x260] sm:$0xff] }
 0x7b5   : > { %5700 = vmatprep.subr.bf16.mxu0 %v5449_v34  ;;  %v5329_v34 = vld [vmem:[%s7613_s18 + $0xa8] sm:$0xff] }
 0x7b6   : > { %v4857_v55 = vpop.f32.mrf.mxu1  ;;  %5102 = vmatmul.mubr.bf16.vlgmr.msra.gmra.mxu1 %v8375_v58  ;;  %v5308_v58 = vld [vmem:[%s7613_s18] sm:$0xff] }
 0x7b7   : > { %v8712_v41 = vadd.f32 %v4857_v55, %v8655_v47  ;;  %5152 = vmatpush1.bf16.msra.mxu1 %v4470_v2  ;;  %5183 = vmatprep.mubr.bf16.mxu1 %v8477_v17  ;;  %v4454_v47 = vunpack.c.h.s8.bf16 %v3982_v15  ;;  %v5440_v17 = vunpack.c.h.s8.bf16 %v5308_v58  ;;  %v5436_v12 = vunpack.c.l.s8.bf16 %v5308_v58  ;;  %v4015_v15 = vld [vmem:[%s7600_s8 + $0x7b8] sm:$0xff] }
 0x7b8   : > { %v8715_v25 = vpop.f32.mrf.mxu1  ;;  %5701 = vmatpush1.bf16.msra.mxu0 %v5448_v37  ;;  %5153 = vmatprep.subr.bf16.mxu1 %v4463_v4  ;;  %v5484_v2 = vunpack.c.l.s8.bf16 %v5332_v35  ;;  %v4535_v37 = vunpack.c.h.s8.bf16 %v4023_v61  ;;  %v4022_v4 = vld [vmem:[%s7600_s8 + $0x7f0] sm:$0xff]  ;;  %v5209_v35 = vrot.slane %v8673_v8, %v7678_v45 }
 0x7b9   : > { %5702 = vmatprep.subr.bf16.mxu0 %v5445_v53  ;;  %v5481_v53 = vunpack.c.h.s8.bf16 %v5329_v34  ;;  %v4534_v55 = vunpack.c.h.s8.bf16 %v4022_v4  ;;  %v4526_v58 = vunpack.c.l.s8.bf16 %v4022_v4 }
 0x7ba   : > { %v4861_v57 = vpop.f32.mrf.mxu1 }
 0x7bb   : > { %5154 = vmatpush1.bf16.msra.mxu1 %v4462_v16  ;;  %v4527_v16 = vunpack.c.l.s8.bf16 %v4023_v61  ;;  %v5476_v57 = vunpack.c.l.s8.bf16 %v5328_v5 }
 0x7bc   : > { %v4862_v10 = vpop.f32.mrf.mxu1  ;;  %5703 = vmatpush1.bf16.msra.mxu0 %v5444_v26  ;;  %5155 = vmatprep.subr.bf16.mxu1 %v4455_v23  ;;  %v5197_v26 = vrot.slane %v8673_v8, %v7669_v42  ;;  %v5477_v23 = vunpack.c.l.s8.bf16 %v5329_v34 }
 0x7bd   : > { %5704 = vmatprep.subr.bf16.mxu0 %v5441_v3  ;;  %v5325_v3 = vld [vmem:[%s7613_s18 + $0x88] sm:$0xff]  ;;  %v4014_v10 = vld [vmem:[%s7600_s8 + $0x7b0] sm:$0xff] }
 0x7be   : > { %v4518_v62 = vunpack.c.h.s8.bf16 %v4014_v10  ;;  %v5469_v32 = vunpack.c.l.s8.bf16 %v5325_v3 }
 0x7bf   : > { %5156 = vmatpush1.bf16.msra.mxu1 %v4454_v47  ;;  %v4519_v47 = vunpack.c.h.s8.bf16 %v4015_v15 }
 0x7c0   : > { %5705 = vmatpush1.bf16.msra.mxu0 %v5440_v17  ;;  %5157 = vmatprep.subr.bf16.mxu1 %v4447_v11  ;;  %v5234_v17 = vmul.f32 %v5197_v26, %v8609_v49  ;;  %v5247_v11 = vrot.slane %v8682_v0, %v7669_v42  ;;  %v4510_v49 = vunpack.c.l.s8.bf16 %v4014_v10  ;;  %v5352_v10 = vld [vmem:[%s7613_s18 + $0x160] sm:$0xff] }
 0x7c1   : > { %5706 = vmatprep.subr.bf16.mxu0 %v5437_v54  ;;  %v5473_v54 = vunpack.c.h.s8.bf16 %v5325_v3 }
 0x7c3   : > { %5158 = vmatpush1.bf16.msra.mxu1 %v4446_v13  ;;  %v5472_v13 = vunpack.c.h.s8.bf16 %v5324_v14 }
 0x7c4   : > { %5707 = vmatpush1.bf16.msra.mxu0 %v5436_v12  ;;  %5159 = vmatprep.subr.bf16.mxu1 %v4439_v19  ;;  %v4511_v12 = vunpack.c.l.s8.bf16 %v4015_v15  ;;  %v5284_v19 = vadd.f32 %v5247_v11, %v5234_v17  ;;  %v5353_v15 = vld [vmem:[%s7613_s18 + $0x168] sm:$0xff] }
 0x7c5   : > { %5708 = vmatprep.subr.bf16.mxu0 %v5497_v29  ;;  %v4007_v29 = vld [vmem:[%s7600_s8 + $0x778] sm:$0xff] }
 0x7c7   : > { %5160 = vmatpush1.bf16.msra.mxu1 %v4438_v28  ;;  %v5468_v28 = vunpack.c.l.s8.bf16 %v5324_v14  ;;  %v5376_v14 = vld [vmem:[%s7613_s18 + $0x220] sm:$0xff] }
 0x7c8   : > { %5709 = vmatpush2.bf16.msra.mxu0 %v5496_v18  ;;  %5161 = vmatprep.subr.bf16.mxu1 %v4431_v21  ;;  %v4503_v18 = vunpack.c.h.s8.bf16 %v4007_v29  ;;  %v4006_v21 = vld [vmem:[%s7600_s8 + $0x770] sm:$0xff] }
 0x7c9   : > { %5710 = vmatprep.subr.bf16.mxu0 %v5493_v31  ;;  %v5292_v31 = vmax.f32 %v5284_v19, 0.0  ;;  %v4494_v61 = vunpack.c.l.s8.bf16 %v4006_v21 }
 0x7cb   : > { %5162 = vmatpush1.bf16.msra.mxu1 %v4430_v33  ;;  %v4502_v33 = vunpack.c.h.s8.bf16 %v4006_v21  ;;  %v8744_v20 = vpack.c.bf16 %v5292_v31, %v5292_v31  ;;  %v5348_v31 = vld [vmem:[%s7613_s18 + $0x140] sm:$0xff] }
 0x7cc   : > { %5711 = vmatpush2.bf16.msra.mxu0 %v5492_v56  ;;  %5163 = vmatprep.subr.bf16.mxu1 %v4423_v39  ;;  %v4495_v56 = vunpack.c.l.s8.bf16 %v4007_v29  ;;  %v5592_v39 = vunpack.c.h.s8.bf16 %v5384_v46 }
 0x7cd   : > { %5712 = vmatprep.subr.bf16.mxu0 %v5489_v6  ;;  %v4860_v6 = vadd.f32 %v8715_v25, %v8657_v7  ;;  %v5259_v25 = vrot.slane %v8682_v0, %v7678_v45 }
 0x7cf   : > { %5164 = vmatpush1.bf16.msra.mxu1 %v4422_v59  ;;  %v3999_v59 = vld [vmem:[%s7600_s8 + $0x738] sm:$0xff]  ;;  %v5237_v7 = vmul.f32 %v5209_v35, %v4860_v6 }
 0x7d0   : > { %5713 = vmatpush2.bf16.msra.mxu0 %v5488_v63  ;;  %5165 = vmatprep.subr.bf16.mxu1 %v4415_v36  ;;  %v5589_v63 = vunpack.c.l.s8.bf16 %v5385_v27  ;;  %v5381_v36 = vld [vmem:[%s7613_s18 + $0x248] sm:$0xff]  ;;  %v4487_v34 = vunpack.c.h.s8.bf16 %v3999_v59 }
 0x7d1   : > { %5714 = vmatprep.subr.bf16.mxu0 %v5485_v9  ;;  %v5585_v4 = vunpack.c.h.s8.bf16 %v5381_v36  ;;  %v5287_v26 = vadd.f32 %v5259_v25, %v5237_v7  ;;  %v5581_v3 = vunpack.c.l.s8.bf16 %v5381_v36  ;;  %v5401_v36 = vld [vmem:[%s7613_s18 + $0x2e8] sm:$0xff]  ;;  %v5400_v25 = vld [vmem:[%s7613_s18 + $0x2e0] sm:$0xff] }
 0x7d2   : > { %v5625_v7 = vunpack.c.h.s8.bf16 %v5401_v36 }
 0x7d3   : > { %5166 = vmatpush1.bf16.msra.mxu1 %v4414_v60  ;;  %v3998_v60 = vld [vmem:[%s7600_s8 + $0x730] sm:$0xff]  ;;  %v5295_v11 = vmax.f32 %v5287_v26, 0.0 }
 0x7d4   : > { %5715 = vmatpush2.bf16.msra.mxu0 %v5484_v2  ;;  %5167 = vmatprep.subr.bf16.mxu1 %v4535_v37  ;;  %v5588_v2 = vunpack.c.l.s8.bf16 %v5384_v46 }
 0x7d5   : > { %5716 = vmatprep.subr.bf16.mxu0 %v5481_v53  ;;  %v5380_v53 = vld [vmem:[%s7613_s18 + $0x240] sm:$0xff]  ;;  %v8765_v19 = vpack.c.bf16 %v5295_v11, %v5295_v11  ;;  %v5369_v11 = vld [vmem:[%s7613_s18 + $0x1e8] sm:$0xff] }
 0x7d6   : > { %v5580_v17 = vunpack.c.l.s8.bf16 %v5380_v53 }
 0x7d7   : > { %5168 = vmatpush2.bf16.msra.mxu1 %v4534_v55  ;;  %v4486_v55 = vunpack.c.h.s8.bf16 %v3998_v60 }
 0x7d8   : > { %5717 = vmatpush2.bf16.msra.mxu0 %v5480_v30  ;;  %5169 = vmatprep.subr.bf16.mxu1 %v4527_v16  ;;  %v4479_v30 = vunpack.c.l.s8.bf16 %v3999_v59  ;;  %v5584_v16 = vunpack.c.h.s8.bf16 %v5380_v53  ;;  %v5345_v59 = vld [vmem:[%s7613_s18 + $0x128] sm:$0xff] }
 0x7d9   : > { %5718 = vmatprep.subr.bf16.mxu0 %v5477_v23  ;;  %v5509_v53 = vunpack.c.l.s8.bf16 %v5345_v59 }
 0x7db   : > { %5170 = vmatpush2.bf16.msra.mxu1 %v4526_v58  ;;  %v5377_v58 = vld [vmem:[%s7613_s18 + $0x228] sm:$0xff] }
 0x7dc   : > { %5719 = vmatpush2.bf16.msra.mxu0 %v5476_v57  ;;  %5171 = vmatprep.subr.bf16.mxu1 %v4519_v47  ;;  %v4478_v57 = vunpack.c.l.s8.bf16 %v3998_v60  ;;  %v5529_v47 = vunpack.c.h.s8.bf16 %v5353_v15  ;;  %v5573_v29 = vunpack.c.l.s8.bf16 %v5377_v58  ;;  %v5344_v60 = vld [vmem:[%s7613_s18 + $0x120] sm:$0xff] }
 0x7dd   : > { %5720 = vmatprep.subr.bf16.mxu0 %v5473_v54  ;;  %v5577_v54 = vunpack.c.h.s8.bf16 %v5377_v58  ;;  %v5508_v26 = vunpack.c.l.s8.bf16 %v5344_v60 }
 0x7df   : > { %5172 = vmatpush2.bf16.msra.mxu1 %v4518_v62  ;;  %v5528_v62 = vunpack.c.h.s8.bf16 %v5352_v10 }
 0x7e0   : > { %5721 = vmatpush2.bf16.msra.mxu0 %v5472_v13  ;;  %5173 = vmatprep.subr.bf16.mxu1 %v4511_v12  ;;  %v5525_v13 = vunpack.c.l.s8.bf16 %v5353_v15  ;;  %v5576_v12 = vunpack.c.h.s8.bf16 %v5376_v14  ;;  %v5340_v15 = vld [vmem:[%s7613_s18 + $0x100] sm:$0xff] }
 0x7e1   : > { %5722 = vmatprep.subr.bf16.mxu0 %v5469_v32  ;;  %v5349_v32 = vld [vmem:[%s7613_s18 + $0x148] sm:$0xff] }
 0x7e2   : > { %v5521_v21 = vunpack.c.h.s8.bf16 %v5349_v32  ;;  %v5517_v6 = vunpack.c.l.s8.bf16 %v5349_v32 }
 0x7e3   : > { %5174 = vmatpush2.bf16.msra.mxu1 %v4510_v49  ;;  %v5373_v49 = vld [vmem:[%s7613_s18 + $0x208] sm:$0xff] }
 0x7e4   : > { %5723 = vmatpush2.bf16.msra.mxu0 %v5468_v28  ;;  %5175 = vmatprep.subr.bf16.mxu1 %v4503_v18  ;;  %v5524_v28 = vunpack.c.l.s8.bf16 %v5352_v10  ;;  %v5569_v46 = vunpack.c.h.s8.bf16 %v5373_v49 }
 0x7e5   : > { %5774 = vmatprep.subr.bf16.mxu0 %v5593_v51  ;;  %v5572_v51 = vunpack.c.l.s8.bf16 %v5376_v14  ;;  %v5393_v14 = vld [vmem:[%s7613_s18 + $0x2a8] sm:$0xff] }
 0x7e7   : > { %v8752_v9 = vpop.f32.mrf.mxu0  ;;  %5176 = vmatpush2.bf16.msra.mxu1 %v4502_v33  ;;  %5725 = vmatmul.mubr.bf16.vlgmr.msra.gmra.mxu0 %v8744_v20  ;;  %v5372_v33 = vld [vmem:[%s7613_s18 + $0x200] sm:$0xff] }
 0x7e8   : > { %5177 = vmatprep.subr.bf16.mxu1 %v4495_v56  ;;  %5775 = vmatpush1.bf16.msra.mxu0 %v5592_v39  ;;  %v5568_v35 = vunpack.c.h.s8.bf16 %v5372_v33 }
 0x7e9   : > { %v8758_v37 = vpop.f32.mrf.mxu0  ;;  %5776 = vmatprep.subr.bf16.mxu0 %v5589_v63  ;;  %v5565_v63 = vunpack.c.l.s8.bf16 %v5373_v49  ;;  %v5392_v49 = vld [vmem:[%s7613_s18 + $0x2a0] sm:$0xff] }
 0x7eb   : > { %v4984_v5 = vpop.f32.mrf.mxu0  ;;  %5178 = vmatpush2.bf16.msra.mxu1 %v4494_v61  ;;  %v5516_v61 = vunpack.c.l.s8.bf16 %v5348_v31 }
 0x7ec   : > { %5179 = vmatprep.subr.bf16.mxu1 %v4487_v34  ;;  %5777 = vmatpush1.bf16.msra.mxu0 %v5588_v2  ;;  %v5513_v34 = vunpack.c.h.s8.bf16 %v5345_v59  ;;  %v5564_v2 = vunpack.c.l.s8.bf16 %v5372_v33  ;;  %v5624_v5 = vunpack.c.h.s8.bf16 %v5400_v25  ;;  %v5389_v33 = vld [vmem:[%s7613_s18 + $0x288] sm:$0xff]  ;;  %v5388_v59 = vld [vmem:[%s7613_s18 + $0x280] sm:$0xff] }
 0x7ed   : > { %v4985_v23 = vpop.f32.mrf.mxu0  ;;  %5778 = vmatprep.subr.bf16.mxu0 %v5585_v4  ;;  %v5512_v4 = vunpack.c.h.s8.bf16 %v5344_v60  ;;  %v5597_v60 = vunpack.c.l.s8.bf16 %v5389_v33 }
 0x7ef   : > { %5180 = vmatpush2.bf16.msra.mxu1 %v4486_v55  ;;  %v5341_v55 = vld [vmem:[%s7613_s18 + $0x108] sm:$0xff] }
 0x7f0   : > { %5181 = vmatprep.subr.bf16.mxu1 %v4479_v30  ;;  %5779 = vmatpush1.bf16.msra.mxu0 %v5584_v16  ;;  %v5621_v30 = vunpack.c.l.s8.bf16 %v5401_v36  ;;  %v5397_v16 = vld [vmem:[%s7613_s18 + $0x2c8] sm:$0xff]  ;;  %v5505_v23 = vunpack.c.h.s8.bf16 %v5341_v55  ;;  %v5501_v10 = vunpack.c.l.s8.bf16 %v5341_v55 }
 0x7f1   : > { %5780 = vmatprep.subr.bf16.mxu0 %v5581_v3  ;;  %v5620_v3 = vunpack.c.l.s8.bf16 %v5400_v25  ;;  %v5617_v58 = vunpack.c.h.s8.bf16 %v5397_v16 }
 0x7f3   : > { %5182 = vmatpush2.bf16.msra.mxu1 %v4478_v57  ;;  %v5396_v57 = vld [vmem:[%s7613_s18 + $0x2c0] sm:$0xff] }
 0x7f4   : > { %5733 = vmatprep.subr.bf16.mxu1 %v5529_v47  ;;  %5781 = vmatpush1.bf16.msra.mxu0 %v5580_v17  ;;  %v5504_v47 = vunpack.c.h.s8.bf16 %v5340_v15  ;;  %v5616_v17 = vunpack.c.h.s8.bf16 %v5396_v57  ;;  %v5612_v32 = vunpack.c.l.s8.bf16 %v5396_v57 }
 0x7f5   : > { %5782 = vmatprep.subr.bf16.mxu0 %v5577_v54  ;;  %v5613_v54 = vunpack.c.l.s8.bf16 %v5397_v16 }
 0x7f6   : > { %v8768_v27 = vpop.f32.mrf.mxu1  ;;  %5184 = vmatmul.mubr.bf16.vlgmr.msra.gmra.mxu1 %v8479_v40  ;;  %v5520_v40 = vunpack.c.h.s8.bf16 %v5348_v31  ;;  %v5608_v31 = vunpack.c.h.s8.bf16 %v5392_v49 }
 0x7f7   : > { %5734 = vmatpush1.bf16.msra.mxu1 %v5528_v62  ;;  %5765 = vmatprep.mubr.bf16.mxu1 %v8765_v19  ;;  %v5500_v62 = vunpack.c.l.s8.bf16 %v5340_v15 }
 0x7f8   : > { %v8773_v18 = vpop.f32.mrf.mxu1  ;;  %5735 = vmatprep.subr.bf16.mxu1 %v5525_v13  ;;  %5783 = vmatpush1.bf16.msra.mxu0 %v5576_v12  ;;  %v5561_v13 = vunpack.c.h.s8.bf16 %v5369_v11  ;;  %v5368_v12 = vld [vmem:[%s7613_s18 + $0x1e0] sm:$0xff] }
 0x7f9   : > { %5784 = vmatprep.subr.bf16.mxu0 %v5573_v29  ;;  %v5609_v29 = vunpack.c.h.s8.bf16 %v5393_v14 }
 0x7fa   : > { %v4943_v56 = vpop.f32.mrf.mxu1 }
 0x7fb   : > { %5736 = vmatpush1.bf16.msra.mxu1 %v5524_v28  ;;  %v5560_v28 = vunpack.c.h.s8.bf16 %v5368_v12  ;;  %v5556_v56 = vunpack.c.l.s8.bf16 %v5368_v12 }
 0x7fc   : > { %v4944_v39 = vpop.f32.mrf.mxu1  ;;  %5737 = vmatprep.subr.bf16.mxu1 %v5521_v21  ;;  %5785 = vmatpush1.bf16.msra.mxu0 %v5572_v51  ;;  %v5557_v21 = vunpack.c.l.s8.bf16 %v5369_v11  ;;  %v5365_v51 = vld [vmem:[%s7613_s18 + $0x1c8] sm:$0xff] }
 0x7fd   : > { %5786 = vmatprep.subr.bf16.mxu0 %v5569_v46  ;;  %v5605_v46 = vunpack.c.l.s8.bf16 %v5393_v14  ;;  %v5364_v39 = vld [vmem:[%s7613_s18 + $0x1c0] sm:$0xff]  ;;  %v5549_v36 = vunpack.c.l.s8.bf16 %v5365_v51 }
 0x7ff   : > { %5738 = vmatpush1.bf16.msra.mxu1 %v5520_v40  ;;  %v5553_v40 = vunpack.c.h.s8.bf16 %v5365_v51 }
 0x800   : > { %5739 = vmatprep.subr.bf16.mxu1 %v5517_v6  ;;  %5787 = vmatpush1.bf16.msra.mxu0 %v5568_v35  ;;  %v5604_v6 = vunpack.c.l.s8.bf16 %v5392_v49  ;;  %v5601_v35 = vunpack.c.h.s8.bf16 %v5389_v33  ;;  %v4940_v49 = vadd.f32 %v8768_v27, %v8696_v38  ;;  %v5213_v33 = vrot.slane %v8673_v8, %v8011_v48 }
 0x801   : > { %5788 = vmatprep.subr.bf16.mxu0 %v5565_v63  ;;  %v5552_v63 = vunpack.c.h.s8.bf16 %v5364_v39  ;;  %v5263_v38 = vrot.slane %v8682_v0, %v8011_v48  ;;  %v5267_v48 = vrot.slane %v8682_v0, %v8017_v52 }
 0x803   : > { %5740 = vmatpush1.bf16.msra.mxu1 %v5516_v61  ;;  %v5600_v61 = vunpack.c.h.s8.bf16 %v5388_v59 }
 0x804   : > { %5741 = vmatprep.subr.bf16.mxu1 %v5513_v34  ;;  %5789 = vmatpush1.bf16.msra.mxu0 %v5564_v2  ;;  %v5361_v34 = vld [vmem:[%s7613_s18 + $0x1a8] sm:$0xff]  ;;  %v8795_v2 = vld [vmem:[%s7613_s18 + $0x78] sm:$0xff] }
 0x805   : > { %5790 = vmatprep.subr.bf16.mxu0 %v5625_v7  ;;  %v5548_v7 = vunpack.c.l.s8.bf16 %v5364_v39  ;;  %v5545_v25 = vunpack.c.h.s8.bf16 %v5361_v34  ;;  %v5541_v16 = vunpack.c.l.s8.bf16 %v5361_v34 }
 0x807   : > { %5742 = vmatpush1.bf16.msra.mxu1 %v5512_v4  ;;  %v5360_v4 = vld [vmem:[%s7613_s18 + $0x1a0] sm:$0xff] }
 0x808   : > { %5743 = vmatprep.subr.bf16.mxu1 %v5509_v53  ;;  %5791 = vmatpush2.bf16.msra.mxu0 %v5624_v5  ;;  %v5596_v53 = vunpack.c.l.s8.bf16 %v5388_v59  ;;  %v5467_v5 = vunpack.c.h.s8.bf16 %v8795_v2  ;;  %v5544_v55 = vunpack.c.h.s8.bf16 %v5360_v4  ;;  %v5540_v15 = vunpack.c.l.s8.bf16 %v5360_v4 }
 0x809   : > { %5792 = vmatprep.subr.bf16.mxu0 %v5621_v30  ;;  %v5205_v30 = vrot.slane %v8673_v8, %v7672_v43 }
 0x80b   : > { %5744 = vmatpush1.bf16.msra.mxu1 %v5508_v26  ;;  %v5357_v26 = vld [vmem:[%s7613_s18 + $0x188] sm:$0xff] }
 0x80c   : > { %5745 = vmatprep.subr.bf16.mxu1 %v5505_v23  ;;  %5793 = vmatpush2.bf16.msra.mxu0 %v5620_v3  ;;  %v5236_v3 = vmul.f32 %v5205_v30, %v8712_v41  ;;  %v5537_v57 = vunpack.c.h.s8.bf16 %v5357_v26  ;;  %v5533_v14 = vunpack.c.l.s8.bf16 %v5357_v26 }
 0x80d   : > { %5794 = vmatprep.subr.bf16.mxu0 %v5617_v58  ;;  %v5255_v58 = vrot.slane %v8682_v0, %v7672_v43 }
 0x80f   : > { %5746 = vmatpush1.bf16.msra.mxu1 %v5504_v47  ;;  %v5356_v47 = vld [vmem:[%s7613_s18 + $0x180] sm:$0xff] }
 0x810   : > { %5747 = vmatprep.subr.bf16.mxu1 %v5501_v10  ;;  %5795 = vmatpush2.bf16.msra.mxu0 %v5616_v17  ;;  %v5536_v11 = vunpack.c.h.s8.bf16 %v5356_v47  ;;  %v5532_v41 = vunpack.c.l.s8.bf16 %v5356_v47 }
 0x811   : > { %5796 = vmatprep.subr.bf16.mxu0 %v5613_v54  ;;  %v5286_v54 = vadd.f32 %v5255_v58, %v5236_v3  ;;  %v5319_v3 = vld [vmem:[%s7613_s18 + $0x58] sm:$0xff] }
 0x813   : > { %5748 = vmatpush1.bf16.msra.mxu1 %v5500_v62  ;;  %v5294_v12 = vmax.f32 %v5286_v54, 0.0  ;;  %v5318_v54 = vld [vmem:[%s7613_s18 + $0x50] sm:$0xff] }
 0x814   : > { %5749 = vmatprep.subr.bf16.mxu1 %v5561_v13  ;;  %5797 = vmatpush2.bf16.msra.mxu0 %v5612_v32  ;;  %v5417_v13 = vld [vmem:[%s7613_s18 + $0x368] sm:$0xff] }
 0x815   : > { %5798 = vmatprep.subr.bf16.mxu0 %v5609_v29  ;;  %v5657_v32 = vunpack.c.h.s8.bf16 %v5417_v13  ;;  %v5416_v29 = vld [vmem:[%s7613_s18 + $0x360] sm:$0xff]  ;;  %v5653_v51 = vunpack.c.l.s8.bf16 %v5417_v13  ;;  %v5458_v13 = vunpack.c.h.s8.bf16 %v5318_v54 }
 0x816   : > { %v5652_v39 = vunpack.c.l.s8.bf16 %v5416_v29 }
 0x817   : > { %5750 = vmatpush2.bf16.msra.mxu1 %v5560_v28  ;;  %v4942_v28 = vadd.f32 %v8773_v18, %v8701_v24  ;;  %v5217_v18 = vrot.slane %v8673_v8, %v8017_v52  ;;  %v5408_v52 = vld [vmem:[%s7613_s18 + $0x320] sm:$0xff] }
 0x818   : > { %5751 = vmatprep.subr.bf16.mxu1 %v5557_v21  ;;  %5799 = vmatpush2.bf16.msra.mxu0 %v5608_v31  ;;  %v5656_v21 = vunpack.c.h.s8.bf16 %v5416_v29  ;;  %v8816_v31 = vpack.c.bf16 %v5294_v12, %v5294_v12  ;;  %v5640_v58 = vunpack.c.h.s8.bf16 %v5408_v52  ;;  %v5315_v12 = vld [vmem:[%s7613_s18 + $0x38] sm:$0xff]  ;;  %v5454_v29 = vunpack.c.l.s8.bf16 %v5318_v54 }
 0x819   : > { %5800 = vmatprep.subr.bf16.mxu0 %v5605_v46  ;;  %v4981_v46 = vadd.f32 %v8752_v9, %v4940_v49  ;;  %v4983_v27 = vadd.f32 %v8758_v37, %v4942_v28  ;;  %v5433_v49 = vld [vmem:[%s7613_s18 + $0x3e8] sm:$0xff]  ;;  %v5451_v28 = vunpack.c.h.s8.bf16 %v5315_v12 }
 0x81b   : > { %5752 = vmatpush2.bf16.msra.mxu1 %v5556_v56  ;;  %v5413_v56 = vld [vmem:[%s7613_s18 + $0x348] sm:$0xff] }
 0x81c   : > { %5753 = vmatprep.subr.bf16.mxu1 %v5553_v40  ;;  %5801 = vmatpush2.bf16.msra.mxu0 %v5604_v6  ;;  %v5649_v9 = vunpack.c.h.s8.bf16 %v5413_v56 }
 0x81d   : > { %5802 = vmatprep.subr.bf16.mxu0 %v5601_v35  ;;  %v5412_v35 = vld [vmem:[%s7613_s18 + $0x340] sm:$0xff] }
 0x81e   : > { %v5648_v34 = vunpack.c.h.s8.bf16 %v5412_v35 }
 0x81f   : > { %5754 = vmatpush2.bf16.msra.mxu1 %v5552_v63 }
 0x820   : > { %5755 = vmatprep.subr.bf16.mxu1 %v5549_v36  ;;  %5803 = vmatpush2.bf16.msra.mxu0 %v5600_v61 }
 0x821   : > { %5804 = vmatprep.subr.bf16.mxu0 %v5597_v60  ;;  %v5645_v60 = vunpack.c.l.s8.bf16 %v5413_v56 }
 0x823   : > { %5756 = vmatpush2.bf16.msra.mxu1 %v5548_v7 }
 0x824   : > { %5757 = vmatprep.subr.bf16.mxu1 %v5545_v25  ;;  %5805 = vmatpush2.bf16.msra.mxu0 %v5596_v53  ;;  %v5409_v25 = vld [vmem:[%s7613_s18 + $0x328] sm:$0xff]  ;;  %v5322_v53 = vld [vmem:[%s7613_s18 + $0x70] sm:$0xff] }
 0x825   : > { %5856 = vmatprep.subr.bf16.mxu0 %v5467_v5  ;;  %v5641_v30 = vunpack.c.h.s8.bf16 %v5409_v25  ;;  %v5462_v47 = vunpack.c.l.s8.bf16 %v5322_v53 }
 0x827   : > { %v8802_v23 = vpop.f32.mrf.mxu0  ;;  %5758 = vmatpush2.bf16.msra.mxu1 %v5544_v55  ;;  %v5644_v55 = vunpack.c.l.s8.bf16 %v5412_v35 }
 0x828   : > { %5759 = vmatprep.subr.bf16.mxu1 %v5541_v16  ;;  %v5466_v16 = vunpack.c.h.s8.bf16 %v5322_v53 }
 0x829   : > { %v8808_v10 = vpop.f32.mrf.mxu0 }
 0x82b   : > { %v5066_v17 = vpop.f32.mrf.mxu0  ;;  %5760 = vmatpush2.bf16.msra.mxu1 %v5540_v15  ;;  %v5463_v15 = vunpack.c.l.s8.bf16 %v8795_v2  ;;  %v5636_v2 = vunpack.c.l.s8.bf16 %v5408_v52  ;;  %v5335_v52 = vld [vmem:[%s7613_s18 + $0xd8] sm:$0xff] }
 0x82c   : > { %5761 = vmatprep.subr.bf16.mxu1 %v5537_v57  ;;  %v5637_v57 = vunpack.c.l.s8.bf16 %v5409_v25  ;;  %v5405_v17 = vld [vmem:[%s7613_s18 + $0x308] sm:$0xff]  ;;  %v5338_v25 = vld [vmem:[%s7613_s18 + $0xf0] sm:$0xff] }
 0x82d   : > { %v5067_v62 = vpop.f32.mrf.mxu0 }
 0x82e   : > { %v5404_v62 = vld [vmem:[%s7613_s18 + $0x300] sm:$0xff] }
 0x82f   : > { %5762 = vmatpush2.bf16.msra.mxu1 %v5536_v11  ;;  %v5459_v11 = vunpack.c.h.s8.bf16 %v5319_v3 }
 0x830   : > { %5763 = vmatprep.subr.bf16.mxu1 %v5533_v14  ;;  %v5633_v14 = vunpack.c.h.s8.bf16 %v5405_v17 }
 0x833   : > { %5764 = vmatpush2.bf16.msra.mxu1 %v5532_v41  ;;  %v5455_v41 = vunpack.c.l.s8.bf16 %v5319_v3  ;;  %v5494_v3 = vunpack.c.l.s8.bf16 %v5338_v25 }
 0x834   : > { %5815 = vmatprep.subr.bf16.mxu1 %v5657_v32  ;;  %v5629_v32 = vunpack.c.l.s8.bf16 %v5405_v17 }
 0x836   : > { %v5021_v40 = vpop.f32.mrf.mxu1  ;;  %5766 = vmatmul.mubr.bf16.vlgmr.msra.gmra.mxu1 %v8816_v31 }
 0x837   : > { %v5022_v24 = vadd.f32 %v5021_v40, %v4981_v46  ;;  %5816 = vmatpush1.bf16.msra.mxu1 %v5656_v21  ;;  %v5314_v21 = vld [vmem:[%s7613_s18 + $0x30] sm:$0xff]  ;;  %v5689_v46 = vunpack.c.h.s8.bf16 %v5433_v49  ;;  %v5447_v40 = vunpack.c.l.s8.bf16 %v5315_v12  ;;  %v5331_v12 = vld [vmem:[%s7613_s18 + $0xb8] sm:$0xff] }
 0x838   : > { %v5023_v6 = vpop.f32.mrf.mxu1  ;;  %5817 = vmatprep.subr.bf16.mxu1 %v5653_v51  ;;  %v5628_v51 = vunpack.c.l.s8.bf16 %v5404_v62  ;;  %v5450_v56 = vunpack.c.h.s8.bf16 %v5314_v21 }
 0x839   : > { %v5238_v59 = vmul.f32 %v5213_v33, %v5022_v24  ;;  %v5024_v63 = vadd.f32 %v5023_v6, %v4983_v27  ;;  %v5432_v33 = vld [vmem:[%s7613_s18 + $0x3e0] sm:$0xff]  ;;  %v5685_v27 = vunpack.c.l.s8.bf16 %v5433_v49 }
 0x83a   : > { %v5025_v36 = vpop.f32.mrf.mxu1  ;;  %v5688_v24 = vunpack.c.h.s8.bf16 %v5432_v33  ;;  %v5684_v35 = vunpack.c.l.s8.bf16 %v5432_v33 }
 0x83b   : > { %v5288_v61 = vadd.f32 %v5263_v38, %v5238_v59  ;;  %v5239_v37 = vmul.f32 %v5217_v18, %v5024_v63  ;;  %5818 = vmatpush1.bf16.msra.mxu1 %v5652_v39  ;;  %v5311_v38 = vld [vmem:[%s7613_s18 + $0x18] sm:$0xff]  ;;  %v5446_v18 = vunpack.c.l.s8.bf16 %v5314_v21  ;;  %v5429_v39 = vld [vmem:[%s7613_s18 + $0x3c8] sm:$0xff]  ;;  %v5428_v63 = vld [vmem:[%s7613_s18 + $0x3c0] sm:$0xff]  ;;  %v5483_v21 = vunpack.c.h.s8.bf16 %v5331_v12 }
 0x83c   : > { %v5026_v8 = vpop.f32.mrf.mxu1  ;;  %5819 = vmatprep.subr.bf16.mxu1 %v5649_v9  ;;  %v5443_v6 = vunpack.c.h.s8.bf16 %v5311_v38  ;;  %v5310_v9 = vld [vmem:[%s7613_s18 + $0x10] sm:$0xff]  ;;  %v5681_v59 = vunpack.c.h.s8.bf16 %v5429_v39  ;;  %v5439_v36 = vunpack.c.l.s8.bf16 %v5311_v38  ;;  %v5327_v38 = vld [vmem:[%s7613_s18 + $0x98] sm:$0xff] }
 0x83d   : > { %v5289_v7 = vadd.f32 %v5267_v48, %v5239_v37  ;;  %v5296_v4 = vmax.f32 %v5288_v61, 0.0  ;;  %v5442_v48 = vunpack.c.h.s8.bf16 %v5310_v9  ;;  %v5339_v61 = vld [vmem:[%s7613_s18 + $0xf8] sm:$0xff]  ;;  %v5680_v37 = vunpack.c.h.s8.bf16 %v5428_v63 }
 0x83e   : > { %v5438_v8 = vunpack.c.l.s8.bf16 %v5310_v9 }
 0x83f   : > { %v5297_v5 = vmax.f32 %v5289_v7, 0.0  ;;  %5820 = vmatpush1.bf16.msra.mxu1 %v5648_v34  ;;  %v8836_v26 = vpack.c.bf16 %v5296_v4, %v5296_v4  ;;  %v5677_v34 = vunpack.c.l.s8.bf16 %v5429_v39  ;;  %v5499_v7 = vunpack.c.h.s8.bf16 %v5339_v61  ;;  %v5326_v39 = vld [vmem:[%s7613_s18 + $0x90] sm:$0xff] }
 0x840   : > { %5821 = vmatprep.subr.bf16.mxu1 %v5645_v60  ;;  %v5425_v60 = vld [vmem:[%s7613_s18 + $0x3a8] sm:$0xff]  ;;  %v5676_v4 = vunpack.c.l.s8.bf16 %v5428_v63  ;;  %v5474_v9 = vunpack.c.h.s8.bf16 %v5326_v39  ;;  %v5387_v63 = vld [vmem:[%s7613_s18 + $0x278] sm:$0xff] }
 0x841   : > { %v8834_v0 = vpack.c.bf16 %v5297_v5, %v5297_v5  ;;  %v5673_v53 = vunpack.c.h.s8.bf16 %v5425_v60  ;;  %v5424_v5 = vld [vmem:[%s7613_s18 + $0x3a0] sm:$0xff] }
 0x843   : > { %5806 = vmatprep.mubr.bf16.mxu0 %v8834_v0  ;;  %5822 = vmatpush1.bf16.msra.mxu1 %v5644_v55  ;;  %v5498_v55 = vunpack.c.h.s8.bf16 %v5338_v25 }
 0x844   : > { %5807 = vmatmul.mubr.bf16.vlgmr.msra.gmra.mxu0 %v8836_v26  ;;  %5823 = vmatprep.subr.bf16.mxu1 %v5641_v30  ;;  %v5495_v30 = vunpack.c.l.s8.bf16 %v5339_v61  ;;  %v5595_v61 = vunpack.c.h.s8.bf16 %v5387_v63 }
 0x845   : > { %5857 = vmatpush1.bf16.msra.mxu0 %v5466_v16  ;;  %5888 = vmatprep.mubr.bf16.mxu0 %v8693_v22  ;;  %v5632_v22 = vunpack.c.h.s8.bf16 %v5404_v62  ;;  %v5672_v16 = vunpack.c.h.s8.bf16 %v5424_v5 }
 0x846   : > { %5858 = vmatprep.subr.bf16.mxu0 %v5463_v15  ;;  %v5669_v15 = vunpack.c.l.s8.bf16 %v5425_v60  ;;  %v5383_v60 = vld [vmem:[%s7613_s18 + $0x258] sm:$0xff] }
 0x847   : > { %5824 = vmatpush1.bf16.msra.mxu1 %v5640_v58  ;;  %v5421_v58 = vld [vmem:[%s7613_s18 + $0x388] sm:$0xff]  ;;  %v5587_v25 = vunpack.c.h.s8.bf16 %v5383_v60 }
 0x848   : > { %5825 = vmatprep.subr.bf16.mxu1 %v5637_v57  ;;  %v5491_v57 = vunpack.c.h.s8.bf16 %v5335_v52  ;;  %v5665_v54 = vunpack.c.h.s8.bf16 %v5421_v58 }
 0x849   : > { %5859 = vmatpush1.bf16.msra.mxu0 %v5462_v47  ;;  %v5334_v47 = vld [vmem:[%s7613_s18 + $0xd0] sm:$0xff] }
 0x84a   : > { %5860 = vmatprep.subr.bf16.mxu0 %v5459_v11  ;;  %v5668_v11 = vunpack.c.l.s8.bf16 %v5424_v5  ;;  %v5490_v62 = vunpack.c.h.s8.bf16 %v5334_v47  ;;  %v5486_v49 = vunpack.c.l.s8.bf16 %v5334_v47  ;;  %v5583_v5 = vunpack.c.l.s8.bf16 %v5383_v60 }
 0x84b   : > { %5826 = vmatpush1.bf16.msra.mxu1 %v5636_v2  ;;  %v5420_v2 = vld [vmem:[%s7613_s18 + $0x380] sm:$0xff] }
 0x84c   : > { %5827 = vmatprep.subr.bf16.mxu1 %v5633_v14 }
 0x84d   : > { %5861 = vmatpush1.bf16.msra.mxu0 %v5458_v13  ;;  %v5487_v13 = vunpack.c.l.s8.bf16 %v5335_v52 }
 0x84e   : > { %5862 = vmatprep.subr.bf16.mxu0 %v5455_v41 }
 0x84f   : > { %5828 = vmatpush1.bf16.msra.mxu1 %v5632_v22  ;;  %v5664_v22 = vunpack.c.h.s8.bf16 %v5420_v2 }
 0x850   : > { %5829 = vmatprep.subr.bf16.mxu1 %v5629_v32  ;;  %v5661_v32 = vunpack.c.l.s8.bf16 %v5421_v58 }
 0x851   : > { %5863 = vmatpush1.bf16.msra.mxu0 %v5454_v29 }
 0x852   : > { %5864 = vmatprep.subr.bf16.mxu0 %v5451_v28  ;;  %v8868_v28 = vld [vmem:[%s7613_s18 + $0x178] sm:$0xff] }
 0x853   : > { %5830 = vmatpush1.bf16.msra.mxu1 %v5628_v51  ;;  %v5330_v51 = vld [vmem:[%s7613_s18 + $0xb0] sm:$0xff]  ;;  %v5531_v33 = vunpack.c.h.s8.bf16 %v8868_v28 }
 0x854   : > { %5831 = vmatprep.subr.bf16.mxu1 %v5689_v46  ;;  %v5660_v46 = vunpack.c.l.s8.bf16 %v5420_v2 }
 0x855   : > { %5865 = vmatpush1.bf16.msra.mxu0 %v5450_v56  ;;  %v5482_v56 = vunpack.c.h.s8.bf16 %v5330_v51 }
 0x856   : > { %5866 = vmatprep.subr.bf16.mxu0 %v5447_v40  ;;  %v5479_v40 = vunpack.c.l.s8.bf16 %v5331_v12 }
 0x857   : > { %5832 = vmatpush2.bf16.msra.mxu1 %v5688_v24  ;;  %v5478_v24 = vunpack.c.l.s8.bf16 %v5330_v51 }
 0x858   : > { %5833 = vmatprep.subr.bf16.mxu1 %v5685_v27 }
 0x859   : > { %5867 = vmatpush1.bf16.msra.mxu0 %v5446_v18  ;;  %v5475_v18 = vunpack.c.h.s8.bf16 %v5327_v38 }
 0x85a   : > { %5868 = vmatprep.subr.bf16.mxu0 %v5443_v6 }
 0x85b   : > { %5834 = vmatpush2.bf16.msra.mxu1 %v5684_v35 }
 0x85c   : > { %5835 = vmatprep.subr.bf16.mxu1 %v5681_v59  ;;  %v5471_v59 = vunpack.c.l.s8.bf16 %v5327_v38 }
 0x85d   : > { %5869 = vmatpush1.bf16.msra.mxu0 %v5442_v48 }
 0x85e   : > { %5870 = vmatprep.subr.bf16.mxu0 %v5439_v36  ;;  %v5470_v36 = vunpack.c.l.s8.bf16 %v5326_v39  ;;  %v5394_v39 = vld [vmem:[%s7613_s18 + $0x2b0] sm:$0xff] }
 0x85f   : > { %5836 = vmatpush2.bf16.msra.mxu1 %v5680_v37  ;;  %v5386_v37 = vld [vmem:[%s7613_s18 + $0x270] sm:$0xff] }
 0x860   : > { %5837 = vmatprep.subr.bf16.mxu1 %v5677_v34  ;;  %v5594_v34 = vunpack.c.h.s8.bf16 %v5386_v37 }
 0x861   : > { %5871 = vmatpush1.bf16.msra.mxu0 %v5438_v8  ;;  %v5591_v8 = vunpack.c.l.s8.bf16 %v5387_v63 }
 0x862   : > { %5872 = vmatprep.subr.bf16.mxu0 %v5499_v7  ;;  %v5590_v7 = vunpack.c.l.s8.bf16 %v5386_v37 }
 0x863   : > { %5838 = vmatpush2.bf16.msra.mxu1 %v5676_v4  ;;  %v5382_v4 = vld [vmem:[%s7613_s18 + $0x250] sm:$0xff] }
 0x864   : > { %5839 = vmatprep.subr.bf16.mxu1 %v5673_v53  ;;  %v5586_v53 = vunpack.c.h.s8.bf16 %v5382_v4 }
 0x865   : > { %5873 = vmatpush2.bf16.msra.mxu0 %v5498_v55  ;;  %v5379_v55 = vld [vmem:[%s7613_s18 + $0x238] sm:$0xff] }
 0x866   : > { %5874 = vmatprep.subr.bf16.mxu0 %v5495_v30  ;;  %v5582_v30 = vunpack.c.l.s8.bf16 %v5382_v4  ;;  %v5579_v52 = vunpack.c.h.s8.bf16 %v5379_v55 }
 0x867   : > { %v8861_v17 = vpop.f32.mrf.mxu0  ;;  %5840 = vmatpush2.bf16.msra.mxu1 %v5672_v16 }
 0x868   : > { %5841 = vmatprep.subr.bf16.mxu1 %v5669_v15  ;;  %v5375_v15 = vld [vmem:[%s7613_s18 + $0x218] sm:$0xff] }
 0x869   : > { %5875 = vmatpush2.bf16.msra.mxu0 %v5494_v3  ;;  %v8864_v14 = vpop.f32.mrf.mxu0  ;;  %v5571_v58 = vunpack.c.h.s8.bf16 %v5375_v15 }
 0x86a   : > { %5876 = vmatprep.subr.bf16.mxu0 %v5491_v57  ;;  %v5374_v57 = vld [vmem:[%s7613_s18 + $0x210] sm:$0xff] }
 0x86b   : > { %v5148_v41 = vpop.f32.mrf.mxu0  ;;  %5842 = vmatpush2.bf16.msra.mxu1 %v5668_v11  ;;  %v5570_v47 = vunpack.c.h.s8.bf16 %v5374_v57  ;;  %v5567_v11 = vunpack.c.l.s8.bf16 %v5375_v15  ;;  %v5566_v2 = vunpack.c.l.s8.bf16 %v5374_v57 }
 0x86c   : > { %5843 = vmatprep.subr.bf16.mxu1 %v5665_v54  ;;  %v5403_v54 = vld [vmem:[%s7613_s18 + $0x2f8] sm:$0xff] }
 0x86d   : > { %5877 = vmatpush2.bf16.msra.mxu0 %v5490_v62  ;;  %v5149_v29 = vpop.f32.mrf.mxu0  ;;  %v5627_v62 = vunpack.c.h.s8.bf16 %v5403_v54  ;;  %v5623_v12 = vunpack.c.l.s8.bf16 %v5403_v54  ;;  %v5351_v54 = vld [vmem:[%s7613_s18 + $0x158] sm:$0xff] }
 0x86e   : > { %5878 = vmatprep.subr.bf16.mxu0 %v5487_v13  ;;  %v5402_v13 = vld [vmem:[%s7613_s18 + $0x2f0] sm:$0xff] }
 0x86f   : > { %5844 = vmatpush2.bf16.msra.mxu1 %v5664_v22  ;;  %v5626_v41 = vunpack.c.h.s8.bf16 %v5402_v13  ;;  %v5399_v22 = vld [vmem:[%s7613_s18 + $0x2d8] sm:$0xff] }
 0x870   : > { %5845 = vmatprep.subr.bf16.mxu1 %v5661_v32  ;;  %v5622_v32 = vunpack.c.l.s8.bf16 %v5402_v13  ;;  %v5619_v29 = vunpack.c.h.s8.bf16 %v5399_v22  ;;  %v5350_v13 = vld [vmem:[%s7613_s18 + $0x150] sm:$0xff] }
 0x871   : > { %5879 = vmatpush2.bf16.msra.mxu0 %v5486_v49  ;;  %v5398_v49 = vld [vmem:[%s7613_s18 + $0x2d0] sm:$0xff] }
 0x872   : > { %5880 = vmatprep.subr.bf16.mxu0 %v5483_v21 }
 0x873   : > { %5846 = vmatpush2.bf16.msra.mxu1 %v5660_v46  ;;  %v5618_v46 = vunpack.c.h.s8.bf16 %v5398_v49 }
 0x874   : > { %5897 = vmatprep.subr.bf16.mxu1 %v5531_v33  ;;  %v5615_v33 = vunpack.c.l.s8.bf16 %v5399_v22  ;;  %v5518_v22 = vunpack.c.l.s8.bf16 %v5350_v13 }
 0x875   : > { %5881 = vmatpush2.bf16.msra.mxu0 %v5482_v56 }
 0x876   : > { %v8873_v27 = vpop.f32.mrf.mxu1  ;;  %5882 = vmatprep.subr.bf16.mxu0 %v5479_v40  ;;  %v5395_v40 = vld [vmem:[%s7613_s18 + $0x2b8] sm:$0xff] }
 0x878   : > { %v8876_v6 = vpop.f32.mrf.mxu1 }
 0x879   : > { %5883 = vmatpush2.bf16.msra.mxu0 %v5478_v24  ;;  %v5614_v24 = vunpack.c.l.s8.bf16 %v5398_v49  ;;  %v5106_v63 = vadd.f32 %v8876_v6, %v8808_v10  ;;  %v5343_v49 = vld [vmem:[%s7613_s18 + $0x118] sm:$0xff] }
 0x87a   : > { %v5107_v35 = vpop.f32.mrf.mxu1  ;;  %5884 = vmatprep.subr.bf16.mxu0 %v5475_v18  ;;  %v5611_v18 = vunpack.c.h.s8.bf16 %v5395_v40 }
 0x87b   : > { %v5610_v35 = vunpack.c.h.s8.bf16 %v5394_v39  ;;  %v5147_v10 = vadd.f32 %v8864_v14, %v5106_v63  ;;  %v5367_v63 = vld [vmem:[%s7613_s18 + $0x1d8] sm:$0xff] }
 0x87c   : > { %v5108_v48 = vpop.f32.mrf.mxu1 }
 0x87d   : > { %5885 = vmatpush2.bf16.msra.mxu0 %v5474_v9  ;;  %v5104_v9 = vadd.f32 %v8873_v27, %v8802_v23  ;;  %v5391_v48 = vld [vmem:[%s7613_s18 + $0x298] sm:$0xff]  ;;  %v5390_v27 = vld [vmem:[%s7613_s18 + $0x290] sm:$0xff] }
 0x87e   : > { %5886 = vmatprep.subr.bf16.mxu0 %v5471_v59  ;;  %v5607_v59 = vunpack.c.l.s8.bf16 %v5395_v40  ;;  %v5603_v23 = vunpack.c.h.s8.bf16 %v5391_v48  ;;  %v5598_v14 = vunpack.c.l.s8.bf16 %v5390_v27 }
 0x881   : > { %5887 = vmatpush2.bf16.msra.mxu0 %v5470_v36  ;;  %v5145_v36 = vadd.f32 %v8861_v17, %v5104_v9  ;;  %v5370_v9 = vld [vmem:[%s7613_s18 + $0x1f0] sm:$0xff] }
 0x882   : > { %5938 = vmatprep.subr.bf16.mxu0 %v5595_v61  ;;  %v6587_v61 = vld [vmem:[%s782_s26] sm:$0xff] }
 0x883   : > { %v5221_v37 = vrot.slane %v6587_v61, %v8014_v50  ;;  %v5225_v6 = vrot.slane %v6587_v61, %v8021_v1  ;;  %v5366_v61 = vld [vmem:[%s7613_s18 + $0x1d0] sm:$0xff] }
 0x884   : > { %5889 = vmatmul.mubr.bf16.vlgmr.msra.gmra.mxu0 %v8744_v20  ;;  %v5378_v20 = vld [vmem:[%s7613_s18 + $0x230] sm:$0xff] }
 0x885   : > { %5939 = vmatpush1.bf16.msra.mxu0 %v5594_v34  ;;  %5970 = vmatprep.mubr.bf16.mxu0 %v8834_v0  ;;  %v5578_v16 = vunpack.c.h.s8.bf16 %v5378_v20  ;;  %v5575_v0 = vunpack.c.l.s8.bf16 %v5379_v55  ;;  %v5574_v3 = vunpack.c.l.s8.bf16 %v5378_v20  ;;  %v5606_v34 = vunpack.c.l.s8.bf16 %v5394_v39 }
 0x886   : > { %5940 = vmatprep.subr.bf16.mxu0 %v5591_v8  ;;  %v5602_v55 = vunpack.c.h.s8.bf16 %v5390_v27 }
 0x889   : > { %5941 = vmatpush1.bf16.msra.mxu0 %v5590_v7  ;;  %v6588_v7 = vld [vmem:[%s791_s15] sm:$0xff] }
 0x88a   : > { %5942 = vmatprep.subr.bf16.mxu0 %v5587_v25  ;;  %v5271_v25 = vrot.slane %v6588_v7, %v8014_v50 }
 0x88d   : > { %5943 = vmatpush1.bf16.msra.mxu0 %v5586_v53 }
 0x88e   : > { %5944 = vmatprep.subr.bf16.mxu0 %v5583_v5  ;;  %v5275_v5 = vrot.slane %v6588_v7, %v8021_v1 }
 0x891   : > { %5945 = vmatpush1.bf16.msra.mxu0 %v5582_v30 }
 0x892   : > { %5946 = vmatprep.subr.bf16.mxu0 %v5579_v52  ;;  %v5599_v52 = vunpack.c.l.s8.bf16 %v5391_v48  ;;  %v5558_v48 = vunpack.c.l.s8.bf16 %v5370_v9 }
 0x895   : > { %5947 = vmatpush1.bf16.msra.mxu0 %v5578_v16 }
 0x896   : > { %5948 = vmatprep.subr.bf16.mxu0 %v5575_v0 }
 0x899   : > { %5949 = vmatpush1.bf16.msra.mxu0 %v5574_v3  ;;  %v5354_v3 = vld [vmem:[%s7613_s18 + $0x170] sm:$0xff] }
 0x89a   : > { %5950 = vmatprep.subr.bf16.mxu0 %v5571_v58  ;;  %v5530_v1 = vunpack.c.h.s8.bf16 %v5354_v3 }
 0x89d   : > { %5951 = vmatpush1.bf16.msra.mxu0 %v5570_v47 }
 0x89e   : > { %5952 = vmatprep.subr.bf16.mxu0 %v5567_v11  ;;  %v5527_v11 = vunpack.c.l.s8.bf16 %v8868_v28  ;;  %v5519_v28 = vunpack.c.l.s8.bf16 %v5351_v54 }
 0x8a1   : > { %5953 = vmatpush1.bf16.msra.mxu0 %v5566_v2  ;;  %v5526_v2 = vunpack.c.l.s8.bf16 %v5354_v3 }
 0x8a2   : > { %5954 = vmatprep.subr.bf16.mxu0 %v5627_v62  ;;  %v5523_v62 = vunpack.c.h.s8.bf16 %v5351_v54 }
 0x8a5   : > { %5955 = vmatpush2.bf16.msra.mxu0 %v5626_v41  ;;  %v5522_v41 = vunpack.c.h.s8.bf16 %v5350_v13 }
 0x8a6   : > { %5956 = vmatprep.subr.bf16.mxu0 %v5623_v12  ;;  %v5347_v12 = vld [vmem:[%s7613_s18 + $0x138] sm:$0xff] }
 0x8a7   : > { %v8892_v21 = vpop.f32.mrf.mxu0 }
 0x8a9   : > { %5957 = vmatpush2.bf16.msra.mxu0 %v5622_v32  ;;  %v8894_v51 = vpop.f32.mrf.mxu0  ;;  %v5346_v32 = vld [vmem:[%s7613_s18 + $0x130] sm:$0xff] }
 0x8aa   : > { %5958 = vmatprep.subr.bf16.mxu0 %v5619_v29  ;;  %v5514_v29 = vunpack.c.h.s8.bf16 %v5346_v32 }
 0x8ab   : > { %v5730_v56 = vpop.f32.mrf.mxu0 }
 0x8ac   : > { %v5342_v56 = vld [vmem:[%s7613_s18 + $0x110] sm:$0xff] }
 0x8ad   : > { %5959 = vmatpush2.bf16.msra.mxu0 %v5618_v46  ;;  %v5731_v38 = vpop.f32.mrf.mxu0  ;;  %v5510_v46 = vunpack.c.l.s8.bf16 %v5346_v32  ;;  %v5506_v40 = vunpack.c.h.s8.bf16 %v5342_v56 }
 0x8ae   : > { %5960 = vmatprep.subr.bf16.mxu0 %v5615_v33  ;;  %v5507_v33 = vunpack.c.h.s8.bf16 %v5343_v49  ;;  %v5503_v38 = vunpack.c.l.s8.bf16 %v5343_v49 }
 0x8b1   : > { %5961 = vmatpush2.bf16.msra.mxu0 %v5614_v24  ;;  %v5371_v24 = vld [vmem:[%s7613_s18 + $0x1f8] sm:$0xff] }
 0x8b2   : > { %5962 = vmatprep.subr.bf16.mxu0 %v5611_v18  ;;  %v5502_v18 = vunpack.c.l.s8.bf16 %v5342_v56  ;;  %v5563_v39 = vunpack.c.h.s8.bf16 %v5371_v24 }
 0x8b5   : > { %5963 = vmatpush2.bf16.msra.mxu0 %v5610_v35  ;;  %v5562_v35 = vunpack.c.h.s8.bf16 %v5370_v9 }
 0x8b6   : > { %v5185_v8 = vpop.f32.mrf.mxu1  ;;  %5964 = vmatprep.subr.bf16.mxu0 %v5607_v59  ;;  %v5559_v59 = vunpack.c.l.s8.bf16 %v5371_v24 }
 0x8b7   : > { %v5186_v60 = vadd.f32 %v5185_v8, %v5145_v36  ;;  %v5555_v36 = vunpack.c.h.s8.bf16 %v5367_v63  ;;  %v5363_v8 = vld [vmem:[%s7613_s18 + $0x1b8] sm:$0xff] }
 0x8b8   : > { %v5187_v4 = vpop.f32.mrf.mxu1  ;;  %v5547_v27 = vunpack.c.h.s8.bf16 %v5363_v8 }
 0x8b9   : > { %v5240_v17 = vmul.f32 %v5221_v37, %v5186_v60  ;;  %v5188_v53 = vadd.f32 %v5187_v4, %v5147_v10  ;;  %5965 = vmatpush2.bf16.msra.mxu0 %v5606_v34  ;;  %v5554_v37 = vunpack.c.h.s8.bf16 %v5366_v61  ;;  %v5551_v34 = vunpack.c.l.s8.bf16 %v5367_v63  ;;  %v5362_v60 = vld [vmem:[%s7613_s18 + $0x1b0] sm:$0xff]  ;;  %v5359_v10 = vld [vmem:[%s7613_s18 + $0x198] sm:$0xff] }
 0x8ba   : > { %v5189_v30 = vpop.f32.mrf.mxu1  ;;  %5966 = vmatprep.subr.bf16.mxu0 %v5603_v23  ;;  %v5550_v23 = vunpack.c.l.s8.bf16 %v5366_v61  ;;  %v5546_v7 = vunpack.c.h.s8.bf16 %v5362_v60 }
 0x8bb   : > { %v5290_v20 = vadd.f32 %v5271_v25, %v5240_v17  ;;  %v5241_v16 = vmul.f32 %v5225_v6, %v5188_v53  ;;  %v5543_v25 = vunpack.c.l.s8.bf16 %v5363_v8  ;;  %v5542_v6 = vunpack.c.l.s8.bf16 %v5362_v60  ;;  %v5358_v53 = vld [vmem:[%s7613_s18 + $0x190] sm:$0xff] }
 0x8bc   : > { %v5190_v0 = vpop.f32.mrf.mxu1  ;;  %v5539_v17 = vunpack.c.h.s8.bf16 %v5359_v10 }
 0x8bd   : > { %v5291_v50 = vadd.f32 %v5275_v5, %v5241_v16  ;;  %5967 = vmatpush2.bf16.msra.mxu0 %v5602_v55  ;;  %v5298_v15 = vmax.f32 %v5290_v20, 0.0  ;;  %v5538_v55 = vunpack.c.h.s8.bf16 %v5358_v53  ;;  %v5419_v20 = vld [vmem:[%s7613_s18 + $0x378] sm:$0xff]  ;;  %v5534_v0 = vunpack.c.l.s8.bf16 %v5358_v53  ;;  %v5422_v53 = vld [vmem:[%s7613_s18 + $0x390] sm:$0xff] }
 0x8be   : > { %5968 = vmatprep.subr.bf16.mxu0 %v5599_v52  ;;  %v5535_v52 = vunpack.c.l.s8.bf16 %v5359_v10  ;;  %v5655_v3 = vunpack.c.l.s8.bf16 %v5419_v20 }
 0x8bf   : > { %v5299_v58 = vmax.f32 %v5291_v50, 0.0  ;;  %v8917_v47 = vpack.c.bf16 %v5298_v15, %v5298_v15  ;;  %v5659_v50 = vunpack.c.h.s8.bf16 %v5419_v20 }
 0x8c1   : > { %5969 = vmatpush2.bf16.msra.mxu0 %v5598_v14  ;;  %v8915_v57 = vpack.c.bf16 %v5299_v58, %v5299_v58  ;;  %v5418_v14 = vld [vmem:[%s7613_s18 + $0x370] sm:$0xff] }
 0x8c2   : > { %v5658_v15 = vunpack.c.h.s8.bf16 %v5418_v14 }
 0x8c3   : > { %5847 = vmatprep.mubr.bf16.mxu1 %v8915_v57 }
 0x8c4   : > { %5971 = vmatmul.mubr.bf16.vlgmr.msra.gmra.mxu0 %v8836_v26  ;;  %5848 = vmatmul.mubr.bf16.vlgmr.msra.gmra.mxu1 %v8917_v47  ;;  %v5515_v26 = vunpack.c.h.s8.bf16 %v5347_v12 }
 0x8c5   : > { %5898 = vmatpush1.bf16.msra.mxu1 %v5530_v1  ;;  %5929 = vmatprep.mubr.bf16.mxu1 %v8765_v19  ;;  %v5511_v19 = vunpack.c.l.s8.bf16 %v5347_v12  ;;  %v5415_v1 = vld [vmem:[%s7613_s18 + $0x358] sm:$0xff] }
 0x8c6   : > { %5899 = vmatprep.subr.bf16.mxu1 %v5527_v11 }
 0x8c9   : > { %5900 = vmatpush1.bf16.msra.mxu1 %v5526_v2 }
 0x8ca   : > { %5901 = vmatprep.subr.bf16.mxu1 %v5523_v62  ;;  %v5654_v62 = vunpack.c.l.s8.bf16 %v5418_v14  ;;  %v6050_v14 = vld [vmem:[%s818_s0] sm:$0xf] }
 0x8cd   : > { %5902 = vmatpush1.bf16.msra.mxu1 %v5522_v41  ;;  %v5651_v41 = vunpack.c.h.s8.bf16 %v5415_v1 }
 0x8ce   : > { %5903 = vmatprep.subr.bf16.mxu1 %v5519_v28  ;;  %v5414_v28 = vld [vmem:[%s7613_s18 + $0x350] sm:$0xff] }
 0x8cf   : > { %v5646_v32 = vunpack.c.l.s8.bf16 %v5414_v28 }
 0x8d1   : > { %5904 = vmatpush1.bf16.msra.mxu1 %v5518_v22 }
 0x8d2   : > { %5905 = vmatprep.subr.bf16.mxu1 %v5515_v26  ;;  %v5411_v26 = vld [vmem:[%s7613_s18 + $0x338] sm:$0xff] }
 0x8d3   : > { %v5639_v49 = vunpack.c.l.s8.bf16 %v5411_v26 }
 0x8d5   : > { %5906 = vmatpush1.bf16.msra.mxu1 %v5514_v29  ;;  %v5410_v29 = vld [vmem:[%s7613_s18 + $0x330] sm:$0xff] }
 0x8d6   : > { %5907 = vmatprep.subr.bf16.mxu1 %v5511_v19  ;;  %v5642_v19 = vunpack.c.h.s8.bf16 %v5410_v29 }
 0x8d9   : > { %5908 = vmatpush1.bf16.msra.mxu1 %v5510_v46  ;;  %v5407_v46 = vld [vmem:[%s7613_s18 + $0x318] sm:$0xff] }
 0x8da   : > { %5909 = vmatprep.subr.bf16.mxu1 %v5507_v33  ;;  %v5638_v33 = vunpack.c.l.s8.bf16 %v5410_v29  ;;  %v5635_v56 = vunpack.c.h.s8.bf16 %v5407_v46  ;;  %v5631_v24 = vunpack.c.l.s8.bf16 %v5407_v46 }
 0x8dd   : > { %5910 = vmatpush1.bf16.msra.mxu1 %v5506_v40  ;;  %v5406_v40 = vld [vmem:[%s7613_s18 + $0x310] sm:$0xff] }
 0x8de   : > { %5911 = vmatprep.subr.bf16.mxu1 %v5503_v38  ;;  %v5634_v38 = vunpack.c.h.s8.bf16 %v5406_v40 }
 0x8e1   : > { %5912 = vmatpush1.bf16.msra.mxu1 %v5502_v18  ;;  %v5435_v18 = vld [vmem:[%s7613_s18 + $0x3f8] sm:$0xff] }
 0x8e2   : > { %5913 = vmatprep.subr.bf16.mxu1 %v5563_v39  ;;  %v5630_v39 = vunpack.c.l.s8.bf16 %v5406_v40  ;;  %v5691_v9 = vunpack.c.h.s8.bf16 %v5435_v18  ;;  %v5687_v63 = vunpack.c.l.s8.bf16 %v5435_v18 }
 0x8e5   : > { %5914 = vmatpush2.bf16.msra.mxu1 %v5562_v35  ;;  %v5434_v35 = vld [vmem:[%s7613_s18 + $0x3f0] sm:$0xff] }
 0x8e6   : > { %5915 = vmatprep.subr.bf16.mxu1 %v5559_v59  ;;  %v5690_v59 = vunpack.c.h.s8.bf16 %v5434_v35 }
 0x8e9   : > { %5916 = vmatpush2.bf16.msra.mxu1 %v5558_v48  ;;  %v5431_v48 = vld [vmem:[%s7613_s18 + $0x3d8] sm:$0xff] }
 0x8ea   : > { %5917 = vmatprep.subr.bf16.mxu1 %v5555_v36  ;;  %v5686_v36 = vunpack.c.l.s8.bf16 %v5434_v35  ;;  %v5683_v61 = vunpack.c.h.s8.bf16 %v5431_v48  ;;  %v5679_v8 = vunpack.c.l.s8.bf16 %v5431_v48 }
 0x8ed   : > { %5918 = vmatpush2.bf16.msra.mxu1 %v5554_v37  ;;  %v5430_v37 = vld [vmem:[%s7613_s18 + $0x3d0] sm:$0xff] }
 0x8ee   : > { %5919 = vmatprep.subr.bf16.mxu1 %v5551_v34  ;;  %v5682_v34 = vunpack.c.h.s8.bf16 %v5430_v37 }
 0x8f1   : > { %5920 = vmatpush2.bf16.msra.mxu1 %v5550_v23  ;;  %v5427_v23 = vld [vmem:[%s7613_s18 + $0x3b8] sm:$0xff] }
 0x8f2   : > { %5921 = vmatprep.subr.bf16.mxu1 %v5547_v27  ;;  %v5678_v27 = vunpack.c.l.s8.bf16 %v5430_v37  ;;  %v5675_v60 = vunpack.c.h.s8.bf16 %v5427_v23  ;;  %v5671_v10 = vunpack.c.l.s8.bf16 %v5427_v23  ;;  %v6023_v23 = vld [vmem:[#allocation23 + $0x18] sm:$0xff] }
 0x8f5   : > { %5922 = vmatpush2.bf16.msra.mxu1 %v5546_v7  ;;  %v5426_v7 = vld [vmem:[%s7613_s18 + $0x3b0] sm:$0xff] }
 0x8f6   : > { %v5767_v4 = vpop.f32.mrf.mxu1  ;;  %5923 = vmatprep.subr.bf16.mxu1 %v5543_v25  ;;  %v5674_v25 = vunpack.c.h.s8.bf16 %v5426_v7 }
 0x8f7   : > { %v5768_v58 = vadd.f32 %v5767_v4, %v8892_v21  ;;  %v5670_v4 = vunpack.c.l.s8.bf16 %v5426_v7 }
 0x8f8   : > { %v5769_v5 = vpop.f32.mrf.mxu1 }
 0x8f9   : > { %5924 = vmatpush2.bf16.msra.mxu1 %v5542_v6  ;;  %v5770_v54 = vadd.f32 %v5769_v5, %v8894_v51  ;;  %v5647_v51 = vunpack.c.l.s8.bf16 %v5415_v1  ;;  %v5423_v6 = vld [vmem:[%s7613_s18 + $0x398] sm:$0xff]  ;;  %v5666_v5 = vunpack.c.h.s8.bf16 %v5422_v53 }
 0x8fa   : > { %v5771_v30 = vpop.f32.mrf.mxu1  ;;  %5925 = vmatprep.subr.bf16.mxu1 %v5539_v17  ;;  %v5667_v17 = vunpack.c.h.s8.bf16 %v5423_v6 }
 0x8fb   : > { %v5662_v30 = vunpack.c.l.s8.bf16 %v5422_v53 }
 0x8fc   : > { %v5772_v16 = vpop.f32.mrf.mxu1 }
 0x8fd   : > { %5926 = vmatpush2.bf16.msra.mxu1 %v5538_v55  ;;  %v5663_v55 = vunpack.c.l.s8.bf16 %v5423_v6 }
 0x8fe   : > { %5927 = vmatprep.subr.bf16.mxu1 %v5535_v52 }
 0x901   : > { %5928 = vmatpush2.bf16.msra.mxu1 %v5534_v0 }
 0x902   : > { %5979 = vmatprep.subr.bf16.mxu1 %v5659_v50  ;;  %v6024_v50 = vld [vmem:[%s809_s6] sm:$0xf] }
 0x903   : > { %v6041_v35 = vrot.slane %v6024_v50, %v7678_v45 }
 0x904   : > { %5930 = vmatmul.mubr.bf16.vlgmr.msra.gmra.mxu1 %v8816_v31  ;;  %v5808_v11 = vpop.f32.mrf.mxu0  ;;  %v5650_v31 = vunpack.c.h.s8.bf16 %v5414_v28  ;;  %v6059_v28 = vrot.slane %v6050_v14, %v7675_v44 }
 0x905   : > { %v8944_v2 = vadd.f32 %v5808_v11, %v5768_v58  ;;  %5980 = vmatpush1.bf16.msra.mxu1 %v5658_v15  ;;  %6011 = vmatprep.mubr.bf16.mxu1 %v8915_v57  ;;  %v5643_v57 = vunpack.c.h.s8.bf16 %v5411_v26  ;;  %v6029_v15 = vrot.slane %v6024_v50, %v7669_v42  ;;  %v6055_v11 = vrot.slane %v6050_v14, %v7669_v42 }
 0x906   : > { %v5810_v13 = vpop.f32.mrf.mxu0  ;;  %5981 = vmatprep.subr.bf16.mxu1 %v5655_v3 }
 0x907   : > { %v8948_v12 = vadd.f32 %v5810_v13, %v5770_v54  ;;  %v6033_v54 = vrot.slane %v6024_v50, %v7675_v44 }
 0x908   : > { %v5812_v21 = vpop.f32.mrf.mxu0 }
 0x909   : > { %5982 = vmatpush1.bf16.msra.mxu1 %v5654_v62  ;;  %v6020_v21 = vld [vmem:[#allocation23] sm:$0xff] }
 0x90a   : > { %v5813_v22 = vpop.f32.mrf.mxu0  ;;  %5983 = vmatprep.subr.bf16.mxu1 %v5651_v41 }
 0x90d   : > { %5984 = vmatpush1.bf16.msra.mxu1 %v5650_v31 }
 0x90e   : > { %5985 = vmatprep.subr.bf16.mxu1 %v5647_v51 }
 0x911   : > { %5986 = vmatpush1.bf16.msra.mxu1 %v5646_v32  ;;  %v6021_v32 = vld [vmem:[#allocation23 + $0x8] sm:$0xff] }
 0x912   : > { %5987 = vmatprep.subr.bf16.mxu1 %v5643_v57 }
 0x915   : > { %5988 = vmatpush1.bf16.msra.mxu1 %v5642_v19 }
 0x916   : > { %5989 = vmatprep.subr.bf16.mxu1 %v5639_v49 }
 0x919   : > { %5990 = vmatpush1.bf16.msra.mxu1 %v5638_v33 }
 0x91a   : > { %5991 = vmatprep.subr.bf16.mxu1 %v5635_v56 }
 0x91d   : > { %5992 = vmatpush1.bf16.msra.mxu1 %v5634_v38  ;;  %v6037_v38 = vrot.slane %v6024_v50, %v7672_v43 }
 0x91e   : > { %5993 = vmatprep.subr.bf16.mxu1 %v5631_v24 }
 0x921   : > { %5994 = vmatpush1.bf16.msra.mxu1 %v5630_v39  ;;  %v6063_v39 = vrot.slane %v6050_v14, %v7672_v43 }
 0x922   : > { %5995 = vmatprep.subr.bf16.mxu1 %v5691_v9 }
 0x925   : > { %5996 = vmatpush2.bf16.msra.mxu1 %v5690_v59 }
 0x926   : > { %5997 = vmatprep.subr.bf16.mxu1 %v5687_v63 }
 0x929   : > { %5998 = vmatpush2.bf16.msra.mxu1 %v5686_v36  ;;  %v6067_v36 = vrot.slane %v6050_v14, %v7678_v45 }
 0x92a   : > { %5999 = vmatprep.subr.bf16.mxu1 %v5683_v61  ;;  %v6022_v61 = vld [vmem:[#allocation23 + $0x10] sm:$0xff] }
 0x92d   : > { %6000 = vmatpush2.bf16.msra.mxu1 %v5682_v34 }
 0x92e   : > { %6001 = vmatprep.subr.bf16.mxu1 %v5679_v8 }
 0x931   : > { %6002 = vmatpush2.bf16.msra.mxu1 %v5678_v27 }
 0x932   : > { %6003 = vmatprep.subr.bf16.mxu1 %v5675_v60 }
 0x935   : > { %6004 = vmatpush2.bf16.msra.mxu1 %v5674_v25 }
 0x936   : > { %6005 = vmatprep.subr.bf16.mxu1 %v5671_v10 }
 0x939   : > { %6006 = vmatpush2.bf16.msra.mxu1 %v5670_v4 }
 0x93a   : > { %6007 = vmatprep.subr.bf16.mxu1 %v5667_v17 }
 0x93d   : > { %6008 = vmatpush2.bf16.msra.mxu1 %v5666_v5 }
 0x93e   : > { %6009 = vmatprep.subr.bf16.mxu1 %v5663_v55 }
 0x941   : > { %6010 = vmatpush2.bf16.msra.mxu1 %v5662_v30 }
 0x944   : > { %v5890_v52 = vpop.f32.mrf.mxu0  ;;  %6012 = vmatmul.mubr.bf16.vlgmr.msra.gmra.mxu1 %v8917_v47 }
 0x946   : > { %v5892_v20 = vpop.f32.mrf.mxu0 }
 0x948   : > { %v5894_v16 = vpop.f32.mrf.mxu0 }
 0x94a   : > { %v5895_v0 = vpop.f32.mrf.mxu0 }
 0x984   : > { %v5972_v3 = vpop.f32.mrf.mxu0  ;;  %v5849_v58 = vpop.f32.mrf.mxu1 }
 0x985   : > { %v5850_v1 = vadd.f32 %v5849_v58, %v8944_v2 }
 0x986   : > { %v5974_v62 = vpop.f32.mrf.mxu0  ;;  %v5851_v13 = vpop.f32.mrf.mxu1 }
 0x987   : > { %v6046_v47 = vmul.f32 %v6029_v15, %v5850_v1  ;;  %v5852_v41 = vadd.f32 %v5851_v13, %v8948_v12 }
 0x988   : > { %v5976_v31 = vpop.f32.mrf.mxu0  ;;  %v5853_v22 = vpop.f32.mrf.mxu1 }
 0x989   : > { %v6072_v51 = vadd.f32 %v6055_v11, %v6046_v47  ;;  %v6047_v26 = vmul.f32 %v6033_v54, %v5852_v41 }
 0x98a   : > { %v5977_v57 = vpop.f32.mrf.mxu0  ;;  %v5854_v29 = vpop.f32.mrf.mxu1 }
 0x98b   : > { %v6076_v2 = vadd.f32 %v6072_v51, %v6020_v21  ;;  %v6073_v19 = vadd.f32 %v6059_v28, %v6047_v26 }
 0x98d   : > { %6080 = vst [vmem:[#allocation23] sm:$0xff] %v6076_v2  ;;  %v6077_v42 = vadd.f32 %v6073_v19, %v6021_v32 }
 0x98f   : > { %6081 = vst [vmem:[#allocation23 + $0x8] sm:$0xff] %v6077_v42 }
 0x9c4   : > { %v5931_v49 = vpop.f32.mrf.mxu1 }
 0x9c5   : > { %v5932_v12 = vadd.f32 %v5931_v49, %v5890_v52 }
 0x9c6   : > { %v5933_v46 = vpop.f32.mrf.mxu1 }
 0x9c7   : > { %v5934_v40 = vadd.f32 %v5933_v46, %v5892_v20  ;;  %v5973_v44 = vadd.f32 %v5972_v3, %v5932_v12 }
 0x9c8   : > { %v5935_v33 = vpop.f32.mrf.mxu1 }
 0x9c9   : > { %v5975_v9 = vadd.f32 %v5974_v62, %v5934_v40 }
 0x9ca   : > { %v5936_v56 = vpop.f32.mrf.mxu1 }
 0xa04   : > { %v6013_v24 = vpop.f32.mrf.mxu1 }
 0xa05   : > { %v6014_v18 = vadd.f32 %v6013_v24, %v5973_v44 }
 0xa06   : > { %v6015_v59 = vpop.f32.mrf.mxu1 }
 0xa07   : > { %v6048_v63 = vmul.f32 %v6037_v38, %v6014_v18  ;;  %v6016_v48 = vadd.f32 %v6015_v59, %v5975_v9 }
 0xa08   : > { %v6017_v37 = vpop.f32.mrf.mxu1 }
 0xa09   : > { %v6074_v34 = vadd.f32 %v6063_v39, %v6048_v63  ;;  %v6049_v8 = vmul.f32 %v6041_v35, %v6016_v48 }
 0xa0a   : > { %v6018_v27 = vpop.f32.mrf.mxu1 }
 0xa0b   : > { %v6078_v60 = vadd.f32 %v6074_v34, %v6022_v61  ;;  %v6075_v43 = vadd.f32 %v6067_v36, %v6049_v8 }
 0xa0d   : > { %6082 = vst [vmem:[#allocation23 + $0x10] sm:$0xff] %v6078_v60  ;;  %v6079_v7 = vadd.f32 %v6075_v43, %v6023_v23 }
 0xa0f   : > { %6083 = vst [vmem:[#allocation23 + $0x18] sm:$0xff] %v6079_v7 }
 0xa10   : > { %6940 = shalt.err (!%p6937_p7)
}
 0xa11   : > { %s9089_s10 = sld [smem:[#allocation47_spill]] }
 0xa17   : > { %6524 = dma.vmem_to_hbm [thread:$0]  (%p6527_p6), %s6092_s17, 512, %s9089_s10, [#allocation4]  }
 0xa18   : > { %6996 = dma.done.wait (%p6527_p6), [#allocation4], 512  }
 0xa19   : > { %6998 = vsyncadd (%p6527_p6), [#allocation4], 4294966784 }
 0xa1a PF: > { %s9090_s16 = sld [smem:[#allocation35_spill]] }
 0xa1b   : > { %s9091_s29 = sld [smem:[#allocation32_spill]] }
 0xa1c   : > { %s9092_s30 = sld [smem:[#allocation33_spill]] }
 0xa1d   : > { %s9093_s15 = sld [smem:[#allocation36_spill]] }
 0xa20   : > { %p43_p8 = scmp.ge.s32.totalorder %s9090_s16, 5  }
 0xa22   :  { %45 = sbr.rel (!%p43_p8) target bundleno = 26 (0x1a), region = 261 }
 0xa27   :  { %6104 = vsyncpa [#allocation3], 1 }
 0xa28   :  { %6106 = vsyncpa [#allocation3 + $0x1], 1 }
 0xa29   :  { %6107 = vsyncpa [#allocation6], 1 }
 0xa2a   :  { %6109 = vsyncpa [#allocation6 + $0x1], 1 }
 0xa2b   :  { %6110 = vsyncpa [#allocation9], 1 }
 0xa2c   :  { %6112 = vsyncpa [#allocation9 + $0x1], 1 }
 0xa2d   :  { %6113 = vsyncpa [#allocation12], 1 }
 0xa2e   :  { %6115 = vsyncpa [#allocation12 + $0x1], 1 }
 0xa2f   :  { %6116 = vsyncpa [#allocation15], 1 }
 0xa30   :  { %6118 = vsyncpa [#allocation15 + $0x1], 1 }
 0xa31   :  { %6119 = vsyncpa [#allocation18], 1 }
 0xa32   :  { %6121 = vsyncpa [#allocation18 + $0x1], 1 }
 0xa33   :  { %6122 = vsyncpa [#allocation21], 1 }
 0xa34   :  { %6124 = vsyncpa [#allocation21 + $0x1], 1 }
 0xa35   :  { %6125 = vsyncpa [#allocation4], 1 }
 0xa36   :  { %6127 = vsyncpa [#allocation4 + $0x1], 1 }

</bundles_post_ra>
